<compile_context>
chip_gen: v6e
topology: v6e:2x2x1
jax: 0.10.0
libtpu: 0.0.40
codegen_flags: <defaults>
</compile_context>

<pallas_src>
import numpy as np

import jax
import jax.numpy as jnp
from jax import lax
from jax.experimental import pallas as pl
from jax.experimental.pallas import tpu as pltpu


# Per conv layer: (Hp, Wp, Cin, Ho, Wo, Cout)  -- input is already padded for
# the pad=1 layers (L1 input padded in the wrapper, L2 input padded in-kernel).
_LAYERS = (
    (30, 30, 1, 28, 28, 8),    # block1 conv (pad=1)
    (30, 30, 8, 28, 28, 8),    # block2 conv (pad=1)   -> 2x2 maxpool after
    (14, 14, 8, 12, 12, 12),   # block3 conv a
    (12, 12, 12, 10, 10, 12),  # block3 conv b
    (10, 10, 12, 8, 8, 12),    # block4 conv a
    (8, 8, 12, 6, 6, 16),      # block4 conv b
    (6, 6, 16, 4, 4, 16),      # block5 conv
)
_EPS = 1e-5
_NUM_SPLITS = 4


# --------------------------------------------------------------------------
# In-kernel 0/1 constant builders (2-D iota + f32 floor-div + compare only;
# exact for the small integer ranges used here).
# --------------------------------------------------------------------------
def _iota_f32(shape, dim):
    return lax.broadcasted_iota(jnp.int32, shape, dim).astype(jnp.float32)


def _floor_div(x, d):
    return jnp.floor(x * (1.0 / d))


def _chan_reduce_mat(wc, c):
    # (wc, c): 1 where row % c == col  -> per-channel reduction of interleaved lanes
    r = _iota_f32((wc, c), 0)
    k = _iota_f32((wc, c), 1)
    return ((r - c * _floor_div(r, c)) == k).astype(jnp.float32)


def _chan_expand_mat(c, wc):
    # (c, wc): 1 where col % c == row  -> broadcast per-channel values back
    r = _iota_f32((c, wc), 0)
    k = _iota_f32((c, wc), 1)
    return ((k - c * _floor_div(k, c)) == r).astype(jnp.float32)


def _pad_row_mat(ho):
    # (ho+2, ho): embed rows with one zero row on each side
    i = _iota_f32((ho + 2, ho), 0)
    j = _iota_f32((ho + 2, ho), 1)
    return (j == i - 1.0).astype(jnp.float32)


def _pad_col_mat(wc, c):
    # (wc, wc+2c): embed interleaved W*C lanes with one zero pixel each side
    i = _iota_f32((wc, wc + 2 * c), 0)
    j = _iota_f32((wc, wc + 2 * c), 1)
    return (i == j - float(c)).astype(jnp.float32)


def _pool_col_mats(wc, c):
    # even/odd pixel selectors along the interleaved lane axis: (wc, wc//2)
    i = _iota_f32((wc, wc // 2), 0)
    j = _iota_f32((wc, wc // 2), 1)
    base = j + c * _floor_div(j, c)
    return ((i == base).astype(jnp.float32),
            (i == base + float(c)).astype(jnp.float32))


def _pool_row_mats(h):
    # even/odd row selectors: (h//2, h)
    r = _iota_f32((h // 2, h), 0)
    i = _iota_f32((h // 2, h), 1)
    return ((i == 2.0 * r).astype(jnp.float32),
            (i == 2.0 * r + 1.0).astype(jnp.float32))


def _mm(a, b):
    return jnp.dot(a, b, preferred_element_type=jnp.float32)


# --------------------------------------------------------------------------
# Fused whole-net kernel: one grid step = one ghost-batch group.
# --------------------------------------------------------------------------
def _net_kernel(x_ref, w1, w2, w3, w4, w5, w6, w7,
                gam_ref, bet_ref, whead_ref, o_ref,
                a2, a3, a4, a5, a6, a7):
    w_refs = (w1, w2, w3, w4, w5, w6, w7)
    act_refs = (x_ref, a2, a3, a4, a5, a6, a7)   # per-layer input slabs (VMEM)
    nb = x_ref.shape[0]                          # samples in this ghost group

    ys = None
    for l, (hp, wp, cin, ho, wo, cout) in enumerate(_LAYERS):
        wc = wo * cout
        src = act_refs[l]
        wl = [w_refs[l][dy] for dy in range(3)]          # (wp*cin, wc) bf16

        # ---- conv: 3 shifted-row matmuls per sample (in-VMEM im2col) ----
        ys = []
        for i in range(nb):
            acc = None
            for dy in range(3):
                lhs = src[i, dy:dy + ho, :].astype(jnp.bfloat16)   # (ho, wp*cin)
                p = _mm(lhs, wl[dy])                               # (ho, wc) f32
                acc = p if acc is None else acc + p
            ys.append(acc)

        # ---- GhostBatchNorm (training: this group's batch stats) + ReLU ----
        s_red = _chan_reduce_mat(wc, cout)        # (wc, cout)
        s_exp = _chan_expand_mat(cout, wc)        # (cout, wc)
        tot = None
        tot2 = None
        for y in ys:
            s1 = jnp.sum(y, axis=0, keepdims=True)                 # (1, wc)
            s2 = jnp.sum(y * y, axis=0, keepdims=True)
            tot = s1 if tot is None else tot + s1
            tot2 = s2 if tot2 is None else tot2 + s2
        cnt = float(nb * ho * wo)
        mean = _mm(tot, s_red) * (1.0 / cnt)                       # (1, cout)
        ex2 = _mm(tot2, s_red) * (1.0 / cnt)
        var = ex2 - mean * mean                                    # biased var
        inv_std = lax.rsqrt(var + _EPS)
        gamma = gam_ref[l:l + 1, 0:cout]
        beta = bet_ref[l:l + 1, 0:cout]
        scale = gamma * inv_std
        shift = beta - mean * scale
        scale_row = _mm(scale, s_exp)                              # (1, wc)
        shift_row = _mm(shift, s_exp)
        ys = [jnp.maximum(y * scale_row + shift_row, 0.0) for y in ys]

        # ---- inter-layer plumbing (stays in VMEM) ----
        if l == 0:
            # pad=1 for conv2: embed (28, 28*8) into zeroed (30, 30*8)
            ph = _pad_row_mat(ho)                 # (30, 28)
            pw = _pad_col_mat(wc, cout)           # (224, 240)
            for i in range(nb):
                act_refs[l + 1][i] = _mm(_mm(ph, ys[i]), pw)
        elif l == 1:
            # fused 2x2 max-pool: (28, 28*8) -> (14, 14*8)
            pe, po = _pool_col_mats(wc, cout)     # (224, 112) each
            re, ro = _pool_row_mats(ho)           # (14, 28) each
            for i in range(nb):
                m = jnp.maximum(_mm(ys[i], pe), _mm(ys[i], po))
                act_refs[l + 1][i] = jnp.maximum(_mm(re, m), _mm(ro, m))
        elif l + 1 < len(_LAYERS):
            for i in range(nb):
                act_refs[l + 1][i] = ys[i]

    # ---- head: GAP(4x4) + 1x1 conv (16 -> 10) + log_softmax ----
    s_gap = _chan_reduce_mat(4 * 16, 16)          # (64, 16)
    whead = whead_ref[...].astype(jnp.float32)    # (16, 10)
    for i in range(nb):
        y = ys[i]                                  # (4, 64)
        gap = _mm(jnp.sum(y, axis=0, keepdims=True), s_gap) * (1.0 / 16.0)  # (1, 16)
        logits = _mm(gap, whead)                   # (1, 10)
        zmax = jnp.max(logits, axis=-1, keepdims=True)
        z = logits - zmax
        lse = jnp.log(jnp.sum(jnp.exp(z), axis=-1, keepdims=True))
        o_ref[i:i + 1, :] = (z - lse).astype(o_ref.dtype)


# --------------------------------------------------------------------------
# Wrapper glue: structured conv matrices, sample->group ordering, pallas_call.
# --------------------------------------------------------------------------
def _build_conv_mats(w_hwio, wp, wo):
    """W_dy[(wo+dx)*Cin + ci, wo*Cout + co] = w[dy, dx, ci, co]  (bf16, (3,K,N))."""
    mats = []
    for dy in range(3):
        m = None
        for dx in range(3):
            sel = jnp.zeros((wp, wo), jnp.float32).at[
                jnp.arange(wo) + dx, jnp.arange(wo)].set(1.0)
            term = jnp.kron(sel, w_hwio[dy, dx])
            m = term if m is None else m + term
        mats.append(m)
    return jnp.stack(mats).astype(jnp.bfloat16)


def _pad_to_16(v):
    return jnp.pad(v, (0, 16 - v.shape[0]))


def net_forward(x_nchw, params, gbn=True):
    """Forward pass of Net (GhostBatchNorm in its default training mode)."""
    # TODO(synk): BatchNorm running_mean/running_var buffer updates are a training
    # side effect that does not affect this forward's outputs; not modeled.
    n = x_nchw.shape[0]
    num_groups = _NUM_SPLITS if gbn else 1
    if n % num_groups != 0:
        raise ValueError(f"batch {n} must be divisible by num_splits={num_groups}")
    nb = n // num_groups

    # NCHW (Cin=1) -> (N, 30, 30): zero-pad by 1 for the first pad=1 conv.
    x = jnp.pad(x_nchw[:, 0, :, :], ((0, 0), (1, 1), (1, 1)))

    # View-based GhostBatchNorm groups sample n into ghost group n % num_splits.
    # Reorder so each group's samples are contiguous -> one grid step per group.
    order = np.argsort(np.arange(n) % num_groups, kind="stable")
    inv_order = np.argsort(order)
    x = x[order]

    conv_mats = [
        _build_conv_mats(params[f"w{l + 1}"], wp, wo)
        for l, (_, wp, _, _, wo, _) in enumerate(_LAYERS)
    ]
    gammas = jnp.stack([_pad_to_16(params[f"g{l + 1}"]) for l in range(7)])  # (7,16)
    betas = jnp.stack([_pad_to_16(params[f"b{l + 1}"]) for l in range(7)])   # (7,16)

    in_specs = [pl.BlockSpec((nb, 30, 30), lambda g: (g, 0, 0))]
    in_specs += [pl.BlockSpec(m.shape, lambda g: (0, 0, 0)) for m in conv_mats]
    in_specs += [pl.BlockSpec((7, 16), lambda g: (0, 0)),
                 pl.BlockSpec((7, 16), lambda g: (0, 0)),
                 pl.BlockSpec((16, 10), lambda g: (0, 0))]

    out = pl.pallas_call(
        _net_kernel,
        out_shape=jax.ShapeDtypeStruct((num_groups, nb, 10), jnp.float32),
        grid=(num_groups,),
        in_specs=in_specs,
        out_specs=pl.BlockSpec((None, nb, 10), lambda g: (g, 0, 0)),
        scratch_shapes=[pltpu.VMEM((nb, hp, wp * cin), jnp.float32)
                        for (hp, wp, cin, _, _, _) in _LAYERS[1:]],
        compiler_params=pltpu.CompilerParams(
            dimension_semantics=("parallel",)),
    )(x, *conv_mats, gammas, betas, params["w_head"])

    return out.reshape(n, 10)[inv_order]


def init_params(key):
    conv_shapes = [(3, 3, 1, 8), (3, 3, 8, 8), (3, 3, 8, 12), (3, 3, 12, 12),
                   (3, 3, 12, 12), (3, 3, 12, 16), (3, 3, 16, 16)]
    ks = jax.random.split(key, len(conv_shapes) + 1)
    p = {}
    for i, s in enumerate(conv_shapes):
        fan_in = s[0] * s[1] * s[2]
        p[f"w{i + 1}"] = jax.random.normal(ks[i], s, jnp.float32) * (2.0 / fan_in) ** 0.5
        c = s[-1]
        p[f"g{i + 1}"] = jnp.ones((c,), jnp.float32)   # BN weight init 1.0
        p[f"b{i + 1}"] = jnp.zeros((c,), jnp.float32)  # BN bias init 0.0
    p["w_head"] = jax.random.normal(ks[-1], (16, 10), jnp.float32) * 0.25
    return p


if __name__ == "__main__":
    key = jax.random.PRNGKey(0)
    k_x, k_p = jax.random.split(key)

    # MNIST-like input; batch must be a multiple of num_splits=4 for GhostBN.
    x = jax.random.normal(k_x, (4, 1, 28, 28), dtype=jnp.float32)
    params = init_params(k_p)

    fwd = jax.jit(lambda inp: net_forward(inp, params, gbn=True))
    out = jax.block_until_ready(fwd(x))

    assert out.shape == (4, 10), out.shape
    # log_softmax sanity: exp(out) rows sum to 1
    row_sums = jnp.sum(jnp.exp(out), axis=-1)
    assert bool(jnp.all(jnp.abs(row_sums - 1.0) < 1e-3)), row_sums

    print("KERNEL_OK")
</pallas_src>

<mosaic_0001>
module attributes {stable_mosaic.version = 11 : i64} {
  func.func @_net_kernel(%arg0: i32, %arg1: memref<1x30x30xf32, #tpu.memory_space<vmem>>, %arg2: memref<3x30x224xbf16, #tpu.memory_space<vmem>>, %arg3: memref<3x240x224xbf16, #tpu.memory_space<vmem>>, %arg4: memref<3x112x144xbf16, #tpu.memory_space<vmem>>, %arg5: memref<3x144x120xbf16, #tpu.memory_space<vmem>>, %arg6: memref<3x120x96xbf16, #tpu.memory_space<vmem>>, %arg7: memref<3x96x96xbf16, #tpu.memory_space<vmem>>, %arg8: memref<3x96x64xbf16, #tpu.memory_space<vmem>>, %arg9: memref<7x16xf32, #tpu.memory_space<vmem>>, %arg10: memref<7x16xf32, #tpu.memory_space<vmem>>, %arg11: memref<16x10xf32, #tpu.memory_space<vmem>>, %arg12: memref<1x1x10xf32, #tpu.memory_space<vmem>>, %arg13: memref<1x30x240xf32, #tpu.memory_space<vmem>>, %arg14: memref<1x14x112xf32, #tpu.memory_space<vmem>>, %arg15: memref<1x12x144xf32, #tpu.memory_space<vmem>>, %arg16: memref<1x10x120xf32, #tpu.memory_space<vmem>>, %arg17: memref<1x8x96xf32, #tpu.memory_space<vmem>>, %arg18: memref<1x6x96xf32, #tpu.memory_space<vmem>>) attributes {dimension_semantics = [#tpu.dimension_semantics<parallel>], iteration_bounds = array<i64: 4>, scalar_prefetch = 0 : i64, scratch_operands = 6 : i64, tpu.core_type = #tpu.core_type<tc>, window_params = [{transform_indices = @transform_0, window_bounds = array<i64: 1, 30, 30>}, {pipeline_mode = #tpu.pipeline_mode<synchronous>, transform_indices = @transform_1, window_bounds = array<i64: 3, 30, 224>}, {pipeline_mode = #tpu.pipeline_mode<synchronous>, transform_indices = @transform_2, window_bounds = array<i64: 3, 240, 224>}, {pipeline_mode = #tpu.pipeline_mode<synchronous>, transform_indices = @transform_3, window_bounds = array<i64: 3, 112, 144>}, {pipeline_mode = #tpu.pipeline_mode<synchronous>, transform_indices = @transform_4, window_bounds = array<i64: 3, 144, 120>}, {pipeline_mode = #tpu.pipeline_mode<synchronous>, transform_indices = @transform_5, window_bounds = array<i64: 3, 120, 96>}, {pipeline_mode = #tpu.pipeline_mode<synchronous>, transform_indices = @transform_6, window_bounds = array<i64: 3, 96, 96>}, {pipeline_mode = #tpu.pipeline_mode<synchronous>, transform_indices = @transform_7, window_bounds = array<i64: 3, 96, 64>}, {pipeline_mode = #tpu.pipeline_mode<synchronous>, transform_indices = @transform_8, window_bounds = array<i64: 7, 16>}, {pipeline_mode = #tpu.pipeline_mode<synchronous>, transform_indices = @transform_9, window_bounds = array<i64: 7, 16>}, {pipeline_mode = #tpu.pipeline_mode<synchronous>, transform_indices = @transform_10, window_bounds = array<i64: 16, 10>}, {transform_indices = @transform_11, window_bounds = array<i64: 1, 1, 10>}]} {
    %c0 = arith.constant 0 : index
    %c0_0 = arith.constant 0 : index
    %c0_1 = arith.constant 0 : index
    %0 = vector.load %arg2[%c0, %c0_0, %c0_1] : memref<3x30x224xbf16, #tpu.memory_space<vmem>>, vector<1x30x224xbf16>
    %1 = vector.shape_cast %0 : vector<1x30x224xbf16> to vector<30x224xbf16>
    %c1 = arith.constant 1 : index
    %c0_2 = arith.constant 0 : index
    %c0_3 = arith.constant 0 : index
    %2 = vector.load %arg2[%c1, %c0_2, %c0_3] : memref<3x30x224xbf16, #tpu.memory_space<vmem>>, vector<1x30x224xbf16>
    %3 = vector.shape_cast %2 : vector<1x30x224xbf16> to vector<30x224xbf16>
    %c2 = arith.constant 2 : index
    %c0_4 = arith.constant 0 : index
    %c0_5 = arith.constant 0 : index
    %4 = vector.load %arg2[%c2, %c0_4, %c0_5] : memref<3x30x224xbf16, #tpu.memory_space<vmem>>, vector<1x30x224xbf16>
    %5 = vector.shape_cast %4 : vector<1x30x224xbf16> to vector<30x224xbf16>
    %c0_6 = arith.constant 0 : index
    %c0_7 = arith.constant 0 : index
    %c0_8 = arith.constant 0 : index
    %6 = vector.load %arg1[%c0_6, %c0_7, %c0_8] : memref<1x30x30xf32, #tpu.memory_space<vmem>>, vector<1x28x30xf32>
    %7 = vector.shape_cast %6 : vector<1x28x30xf32> to vector<28x30xf32>
    %8 = arith.truncf %7 : vector<28x30xf32> to vector<28x30xbf16>
    %cst = arith.constant dense<0.000000e+00> : vector<28x224xf32>
    %9 = tpu.matmul %8, %1, %cst {dimension_numbers = #tpu.dot_dimension_numbers<[1], [0], [0], [1], [0, 0, 1, 1], [], []>} : vector<28x30xbf16>, vector<30x224xbf16>, vector<28x224xf32> -> vector<28x224xf32>
    %c0_9 = arith.constant 0 : index
    %c1_10 = arith.constant 1 : index
    %c0_11 = arith.constant 0 : index
    %10 = vector.load %arg1[%c0_9, %c1_10, %c0_11] : memref<1x30x30xf32, #tpu.memory_space<vmem>>, vector<1x28x30xf32>
    %11 = vector.shape_cast %10 : vector<1x28x30xf32> to vector<28x30xf32>
    %12 = arith.truncf %11 : vector<28x30xf32> to vector<28x30xbf16>
    %cst_12 = arith.constant dense<0.000000e+00> : vector<28x224xf32>
    %13 = tpu.matmul %12, %3, %cst_12 {dimension_numbers = #tpu.dot_dimension_numbers<[1], [0], [0], [1], [0, 0, 1, 1], [], []>} : vector<28x30xbf16>, vector<30x224xbf16>, vector<28x224xf32> -> vector<28x224xf32>
    %14 = arith.addf %9, %13 : vector<28x224xf32>
    %c0_13 = arith.constant 0 : index
    %c2_14 = arith.constant 2 : index
    %c0_15 = arith.constant 0 : index
    %15 = vector.load %arg1[%c0_13, %c2_14, %c0_15] : memref<1x30x30xf32, #tpu.memory_space<vmem>>, vector<1x28x30xf32>
    %16 = vector.shape_cast %15 : vector<1x28x30xf32> to vector<28x30xf32>
    %17 = arith.truncf %16 : vector<28x30xf32> to vector<28x30xbf16>
    %cst_16 = arith.constant dense<0.000000e+00> : vector<28x224xf32>
    %18 = tpu.matmul %17, %5, %cst_16 {dimension_numbers = #tpu.dot_dimension_numbers<[1], [0], [0], [1], [0, 0, 1, 1], [], []>} : vector<28x30xbf16>, vector<30x224xbf16>, vector<28x224xf32> -> vector<28x224xf32>
    %19 = arith.addf %14, %18 : vector<28x224xf32>
    %20 = tpu.iota {dimensions = array<i32: 0>} : vector<224x8xi32>
    %21 = arith.sitofp %20 : vector<224x8xi32> to vector<224x8xf32>
    %22 = tpu.iota {dimensions = array<i32: 1>} : vector<224x8xi32>
    %23 = arith.sitofp %22 : vector<224x8xi32> to vector<224x8xf32>
    %cst_17 = arith.constant 1.250000e-01 : f32
    %24 = vector.broadcast %cst_17 : f32 to vector<224x8xf32>
    %25 = arith.mulf %21, %24 : vector<224x8xf32>
    %26 = math.floor %25 : vector<224x8xf32>
    %cst_18 = arith.constant 8.000000e+00 : f32
    %27 = vector.broadcast %cst_18 : f32 to vector<224x8xf32>
    %28 = arith.mulf %27, %26 : vector<224x8xf32>
    %29 = arith.subf %21, %28 : vector<224x8xf32>
    %30 = arith.cmpf oeq, %29, %23 : vector<224x8xf32>
    %31 = arith.extui %30 : vector<224x8xi1> to vector<224x8xi32>
    %32 = arith.sitofp %31 : vector<224x8xi32> to vector<224x8xf32>
    %33 = tpu.iota {dimensions = array<i32: 0>} : vector<8x224xi32>
    %34 = arith.sitofp %33 : vector<8x224xi32> to vector<8x224xf32>
    %35 = tpu.iota {dimensions = array<i32: 1>} : vector<8x224xi32>
    %36 = arith.sitofp %35 : vector<8x224xi32> to vector<8x224xf32>
    %cst_19 = arith.constant 1.250000e-01 : f32
    %37 = vector.broadcast %cst_19 : f32 to vector<8x224xf32>
    %38 = arith.mulf %36, %37 : vector<8x224xf32>
    %39 = math.floor %38 : vector<8x224xf32>
    %cst_20 = arith.constant 8.000000e+00 : f32
    %40 = vector.broadcast %cst_20 : f32 to vector<8x224xf32>
    %41 = arith.mulf %40, %39 : vector<8x224xf32>
    %42 = arith.subf %36, %41 : vector<8x224xf32>
    %43 = arith.cmpf oeq, %42, %34 : vector<8x224xf32>
    %44 = arith.extui %43 : vector<8x224xi1> to vector<8x224xi32>
    %45 = arith.sitofp %44 : vector<8x224xi32> to vector<8x224xf32>
    %cst_21 = arith.constant dense<0.000000e+00> : vector<224xf32>
    %46 = vector.multi_reduction <add>, %19, %cst_21 [0] : vector<28x224xf32> to vector<224xf32>
    %47 = vector.shape_cast %46 : vector<224xf32> to vector<1x224xf32>
    %48 = arith.mulf %19, %19 : vector<28x224xf32>
    %cst_22 = arith.constant dense<0.000000e+00> : vector<224xf32>
    %49 = vector.multi_reduction <add>, %48, %cst_22 [0] : vector<28x224xf32> to vector<224xf32>
    %50 = vector.shape_cast %49 : vector<224xf32> to vector<1x224xf32>
    %cst_23 = arith.constant dense<0.000000e+00> : vector<1x8xf32>
    %51 = tpu.matmul %47, %32, %cst_23 {dimension_numbers = #tpu.dot_dimension_numbers<[1], [0], [0], [1], [0, 0, 1, 1], [], []>} : vector<1x224xf32>, vector<224x8xf32>, vector<1x8xf32> -> vector<1x8xf32>
    %cst_24 = arith.constant 0.00127551018 : f32
    %52 = vector.broadcast %cst_24 : f32 to vector<1x8xf32>
    %53 = arith.mulf %51, %52 : vector<1x8xf32>
    %cst_25 = arith.constant dense<0.000000e+00> : vector<1x8xf32>
    %54 = tpu.matmul %50, %32, %cst_25 {dimension_numbers = #tpu.dot_dimension_numbers<[1], [0], [0], [1], [0, 0, 1, 1], [], []>} : vector<1x224xf32>, vector<224x8xf32>, vector<1x8xf32> -> vector<1x8xf32>
    %cst_26 = arith.constant 0.00127551018 : f32
    %55 = vector.broadcast %cst_26 : f32 to vector<1x8xf32>
    %56 = arith.mulf %54, %55 : vector<1x8xf32>
    %57 = arith.mulf %53, %53 : vector<1x8xf32>
    %58 = arith.subf %56, %57 : vector<1x8xf32>
    %cst_27 = arith.constant 9.99999974E-6 : f32
    %59 = vector.broadcast %cst_27 : f32 to vector<1x8xf32>
    %60 = arith.addf %58, %59 : vector<1x8xf32>
    %61 = math.rsqrt %60 : vector<1x8xf32>
    %c0_28 = arith.constant 0 : index
    %c0_29 = arith.constant 0 : index
    %62 = vector.load %arg9[%c0_28, %c0_29] : memref<7x16xf32, #tpu.memory_space<vmem>>, vector<1x8xf32>
    %c0_30 = arith.constant 0 : index
    %c0_31 = arith.constant 0 : index
    %63 = vector.load %arg10[%c0_30, %c0_31] : memref<7x16xf32, #tpu.memory_space<vmem>>, vector<1x8xf32>
    %64 = arith.mulf %62, %61 : vector<1x8xf32>
    %65 = arith.mulf %53, %64 : vector<1x8xf32>
    %66 = arith.subf %63, %65 : vector<1x8xf32>
    %cst_32 = arith.constant dense<0.000000e+00> : vector<1x224xf32>
    %67 = tpu.matmul %64, %45, %cst_32 {dimension_numbers = #tpu.dot_dimension_numbers<[1], [0], [0], [1], [0, 0, 1, 1], [], []>} : vector<1x8xf32>, vector<8x224xf32>, vector<1x224xf32> -> vector<1x224xf32>
    %cst_33 = arith.constant dense<0.000000e+00> : vector<1x224xf32>
    %68 = tpu.matmul %66, %45, %cst_33 {dimension_numbers = #tpu.dot_dimension_numbers<[1], [0], [0], [1], [0, 0, 1, 1], [], []>} : vector<1x8xf32>, vector<8x224xf32>, vector<1x224xf32> -> vector<1x224xf32>
    %69 = vector.broadcast %67 : vector<1x224xf32> to vector<28x224xf32>
    %70 = arith.mulf %19, %69 : vector<28x224xf32>
    %71 = vector.broadcast %68 : vector<1x224xf32> to vector<28x224xf32>
    %72 = arith.addf %70, %71 : vector<28x224xf32>
    %cst_34 = arith.constant 0.000000e+00 : f32
    %73 = vector.broadcast %cst_34 : f32 to vector<28x224xf32>
    %74 = arith.maximumf %72, %73 : vector<28x224xf32>
    %75 = tpu.iota {dimensions = array<i32: 0>} : vector<30x28xi32>
    %76 = arith.sitofp %75 : vector<30x28xi32> to vector<30x28xf32>
    %77 = tpu.iota {dimensions = array<i32: 1>} : vector<30x28xi32>
    %78 = arith.sitofp %77 : vector<30x28xi32> to vector<30x28xf32>
    %cst_35 = arith.constant 1.000000e+00 : f32
    %79 = vector.broadcast %cst_35 : f32 to vector<30x28xf32>
    %80 = arith.subf %76, %79 : vector<30x28xf32>
    %81 = arith.cmpf oeq, %78, %80 : vector<30x28xf32>
    %82 = arith.extui %81 : vector<30x28xi1> to vector<30x28xi32>
    %83 = arith.sitofp %82 : vector<30x28xi32> to vector<30x28xf32>
    %84 = tpu.iota {dimensions = array<i32: 0>} : vector<224x240xi32>
    %85 = arith.sitofp %84 : vector<224x240xi32> to vector<224x240xf32>
    %86 = tpu.iota {dimensions = array<i32: 1>} : vector<224x240xi32>
    %87 = arith.sitofp %86 : vector<224x240xi32> to vector<224x240xf32>
    %cst_36 = arith.constant 8.000000e+00 : f32
    %88 = vector.broadcast %cst_36 : f32 to vector<224x240xf32>
    %89 = arith.subf %87, %88 : vector<224x240xf32>
    %90 = arith.cmpf oeq, %85, %89 : vector<224x240xf32>
    %91 = arith.extui %90 : vector<224x240xi1> to vector<224x240xi32>
    %92 = arith.sitofp %91 : vector<224x240xi32> to vector<224x240xf32>
    %cst_37 = arith.constant dense<0.000000e+00> : vector<30x224xf32>
    %93 = tpu.matmul %83, %74, %cst_37 {dimension_numbers = #tpu.dot_dimension_numbers<[1], [0], [0], [1], [0, 0, 1, 1], [], []>} : vector<30x28xf32>, vector<28x224xf32>, vector<30x224xf32> -> vector<30x224xf32>
    %cst_38 = arith.constant dense<0.000000e+00> : vector<30x240xf32>
    %94 = tpu.matmul %93, %92, %cst_38 {dimension_numbers = #tpu.dot_dimension_numbers<[1], [0], [0], [1], [0, 0, 1, 1], [], []>} : vector<30x224xf32>, vector<224x240xf32>, vector<30x240xf32> -> vector<30x240xf32>
    %c0_39 = arith.constant 0 : index
    %c0_40 = arith.constant 0 : index
    %c0_41 = arith.constant 0 : index
    %95 = vector.load %arg13[%c0_39, %c0_40, %c0_41] : memref<1x30x240xf32, #tpu.memory_space<vmem>>, vector<1x30x240xf32>
    %96 = vector.shape_cast %95 : vector<1x30x240xf32> to vector<30x240xf32>
    %97 = vector.shape_cast %94 : vector<30x240xf32> to vector<1x30x240xf32>
    tpu.vector_store %arg13[%c0_39, %c0_40, %c0_41], %97 {strides = array<i32>} : memref<1x30x240xf32, #tpu.memory_space<vmem>>, vector<1x30x240xf32>,
    %c0_42 = arith.constant 0 : index
    %c0_43 = arith.constant 0 : index
    %c0_44 = arith.constant 0 : index
    %98 = vector.load %arg3[%c0_42, %c0_43, %c0_44] : memref<3x240x224xbf16, #tpu.memory_space<vmem>>, vector<1x240x224xbf16>
    %99 = vector.shape_cast %98 : vector<1x240x224xbf16> to vector<240x224xbf16>
    %c1_45 = arith.constant 1 : index
    %c0_46 = arith.constant 0 : index
    %c0_47 = arith.constant 0 : index
    %100 = vector.load %arg3[%c1_45, %c0_46, %c0_47] : memref<3x240x224xbf16, #tpu.memory_space<vmem>>, vector<1x240x224xbf16>
    %101 = vector.shape_cast %100 : vector<1x240x224xbf16> to vector<240x224xbf16>
    %c2_48 = arith.constant 2 : index
    %c0_49 = arith.constant 0 : index
    %c0_50 = arith.constant 0 : index
    %102 = vector.load %arg3[%c2_48, %c0_49, %c0_50] : memref<3x240x224xbf16, #tpu.memory_space<vmem>>, vector<1x240x224xbf16>
    %103 = vector.shape_cast %102 : vector<1x240x224xbf16> to vector<240x224xbf16>
    %c0_51 = arith.constant 0 : index
    %c0_52 = arith.constant 0 : index
    %c0_53 = arith.constant 0 : index
    %104 = vector.load %arg13[%c0_51, %c0_52, %c0_53] : memref<1x30x240xf32, #tpu.memory_space<vmem>>, vector<1x28x240xf32>
    %105 = vector.shape_cast %104 : vector<1x28x240xf32> to vector<28x240xf32>
    %106 = arith.truncf %105 : vector<28x240xf32> to vector<28x240xbf16>
    %cst_54 = arith.constant dense<0.000000e+00> : vector<28x224xf32>
    %107 = tpu.matmul %106, %99, %cst_54 {dimension_numbers = #tpu.dot_dimension_numbers<[1], [0], [0], [1], [0, 0, 1, 1], [], []>} : vector<28x240xbf16>, vector<240x224xbf16>, vector<28x224xf32> -> vector<28x224xf32>
    %c0_55 = arith.constant 0 : index
    %c1_56 = arith.constant 1 : index
    %c0_57 = arith.constant 0 : index
    %108 = vector.load %arg13[%c0_55, %c1_56, %c0_57] : memref<1x30x240xf32, #tpu.memory_space<vmem>>, vector<1x28x240xf32>
    %109 = vector.shape_cast %108 : vector<1x28x240xf32> to vector<28x240xf32>
    %110 = arith.truncf %109 : vector<28x240xf32> to vector<28x240xbf16>
    %cst_58 = arith.constant dense<0.000000e+00> : vector<28x224xf32>
    %111 = tpu.matmul %110, %101, %cst_58 {dimension_numbers = #tpu.dot_dimension_numbers<[1], [0], [0], [1], [0, 0, 1, 1], [], []>} : vector<28x240xbf16>, vector<240x224xbf16>, vector<28x224xf32> -> vector<28x224xf32>
    %112 = arith.addf %107, %111 : vector<28x224xf32>
    %c0_59 = arith.constant 0 : index
    %c2_60 = arith.constant 2 : index
    %c0_61 = arith.constant 0 : index
    %113 = vector.load %arg13[%c0_59, %c2_60, %c0_61] : memref<1x30x240xf32, #tpu.memory_space<vmem>>, vector<1x28x240xf32>
    %114 = vector.shape_cast %113 : vector<1x28x240xf32> to vector<28x240xf32>
    %115 = arith.truncf %114 : vector<28x240xf32> to vector<28x240xbf16>
    %cst_62 = arith.constant dense<0.000000e+00> : vector<28x224xf32>
    %116 = tpu.matmul %115, %103, %cst_62 {dimension_numbers = #tpu.dot_dimension_numbers<[1], [0], [0], [1], [0, 0, 1, 1], [], []>} : vector<28x240xbf16>, vector<240x224xbf16>, vector<28x224xf32> -> vector<28x224xf32>
    %117 = arith.addf %112, %116 : vector<28x224xf32>
    %118 = tpu.iota {dimensions = array<i32: 0>} : vector<224x8xi32>
    %119 = arith.sitofp %118 : vector<224x8xi32> to vector<224x8xf32>
    %120 = tpu.iota {dimensions = array<i32: 1>} : vector<224x8xi32>
    %121 = arith.sitofp %120 : vector<224x8xi32> to vector<224x8xf32>
    %cst_63 = arith.constant 1.250000e-01 : f32
    %122 = vector.broadcast %cst_63 : f32 to vector<224x8xf32>
    %123 = arith.mulf %119, %122 : vector<224x8xf32>
    %124 = math.floor %123 : vector<224x8xf32>
    %cst_64 = arith.constant 8.000000e+00 : f32
    %125 = vector.broadcast %cst_64 : f32 to vector<224x8xf32>
    %126 = arith.mulf %125, %124 : vector<224x8xf32>
    %127 = arith.subf %119, %126 : vector<224x8xf32>
    %128 = arith.cmpf oeq, %127, %121 : vector<224x8xf32>
    %129 = arith.extui %128 : vector<224x8xi1> to vector<224x8xi32>
    %130 = arith.sitofp %129 : vector<224x8xi32> to vector<224x8xf32>
    %131 = tpu.iota {dimensions = array<i32: 0>} : vector<8x224xi32>
    %132 = arith.sitofp %131 : vector<8x224xi32> to vector<8x224xf32>
    %133 = tpu.iota {dimensions = array<i32: 1>} : vector<8x224xi32>
    %134 = arith.sitofp %133 : vector<8x224xi32> to vector<8x224xf32>
    %cst_65 = arith.constant 1.250000e-01 : f32
    %135 = vector.broadcast %cst_65 : f32 to vector<8x224xf32>
    %136 = arith.mulf %134, %135 : vector<8x224xf32>
    %137 = math.floor %136 : vector<8x224xf32>
    %cst_66 = arith.constant 8.000000e+00 : f32
    %138 = vector.broadcast %cst_66 : f32 to vector<8x224xf32>
    %139 = arith.mulf %138, %137 : vector<8x224xf32>
    %140 = arith.subf %134, %139 : vector<8x224xf32>
    %141 = arith.cmpf oeq, %140, %132 : vector<8x224xf32>
    %142 = arith.extui %141 : vector<8x224xi1> to vector<8x224xi32>
    %143 = arith.sitofp %142 : vector<8x224xi32> to vector<8x224xf32>
    %cst_67 = arith.constant dense<0.000000e+00> : vector<224xf32>
    %144 = vector.multi_reduction <add>, %117, %cst_67 [0] : vector<28x224xf32> to vector<224xf32>
    %145 = vector.shape_cast %144 : vector<224xf32> to vector<1x224xf32>
    %146 = arith.mulf %117, %117 : vector<28x224xf32>
    %cst_68 = arith.constant dense<0.000000e+00> : vector<224xf32>
    %147 = vector.multi_reduction <add>, %146, %cst_68 [0] : vector<28x224xf32> to vector<224xf32>
    %148 = vector.shape_cast %147 : vector<224xf32> to vector<1x224xf32>
    %cst_69 = arith.constant dense<0.000000e+00> : vector<1x8xf32>
    %149 = tpu.matmul %145, %130, %cst_69 {dimension_numbers = #tpu.dot_dimension_numbers<[1], [0], [0], [1], [0, 0, 1, 1], [], []>} : vector<1x224xf32>, vector<224x8xf32>, vector<1x8xf32> -> vector<1x8xf32>
    %cst_70 = arith.constant 0.00127551018 : f32
    %150 = vector.broadcast %cst_70 : f32 to vector<1x8xf32>
    %151 = arith.mulf %149, %150 : vector<1x8xf32>
    %cst_71 = arith.constant dense<0.000000e+00> : vector<1x8xf32>
    %152 = tpu.matmul %148, %130, %cst_71 {dimension_numbers = #tpu.dot_dimension_numbers<[1], [0], [0], [1], [0, 0, 1, 1], [], []>} : vector<1x224xf32>, vector<224x8xf32>, vector<1x8xf32> -> vector<1x8xf32>
    %cst_72 = arith.constant 0.00127551018 : f32
    %153 = vector.broadcast %cst_72 : f32 to vector<1x8xf32>
    %154 = arith.mulf %152, %153 : vector<1x8xf32>
    %155 = arith.mulf %151, %151 : vector<1x8xf32>
    %156 = arith.subf %154, %155 : vector<1x8xf32>
    %cst_73 = arith.constant 9.99999974E-6 : f32
    %157 = vector.broadcast %cst_73 : f32 to vector<1x8xf32>
    %158 = arith.addf %156, %157 : vector<1x8xf32>
    %159 = math.rsqrt %158 : vector<1x8xf32>
    %c1_74 = arith.constant 1 : index
    %c0_75 = arith.constant 0 : index
    %160 = vector.load %arg9[%c1_74, %c0_75] : memref<7x16xf32, #tpu.memory_space<vmem>>, vector<1x8xf32>
    %c1_76 = arith.constant 1 : index
    %c0_77 = arith.constant 0 : index
    %161 = vector.load %arg10[%c1_76, %c0_77] : memref<7x16xf32, #tpu.memory_space<vmem>>, vector<1x8xf32>
    %162 = arith.mulf %160, %159 : vector<1x8xf32>
    %163 = arith.mulf %151, %162 : vector<1x8xf32>
    %164 = arith.subf %161, %163 : vector<1x8xf32>
    %cst_78 = arith.constant dense<0.000000e+00> : vector<1x224xf32>
    %165 = tpu.matmul %162, %143, %cst_78 {dimension_numbers = #tpu.dot_dimension_numbers<[1], [0], [0], [1], [0, 0, 1, 1], [], []>} : vector<1x8xf32>, vector<8x224xf32>, vector<1x224xf32> -> vector<1x224xf32>
    %cst_79 = arith.constant dense<0.000000e+00> : vector<1x224xf32>
    %166 = tpu.matmul %164, %143, %cst_79 {dimension_numbers = #tpu.dot_dimension_numbers<[1], [0], [0], [1], [0, 0, 1, 1], [], []>} : vector<1x8xf32>, vector<8x224xf32>, vector<1x224xf32> -> vector<1x224xf32>
    %167 = vector.broadcast %165 : vector<1x224xf32> to vector<28x224xf32>
    %168 = arith.mulf %117, %167 : vector<28x224xf32>
    %169 = vector.broadcast %166 : vector<1x224xf32> to vector<28x224xf32>
    %170 = arith.addf %168, %169 : vector<28x224xf32>
    %cst_80 = arith.constant 0.000000e+00 : f32
    %171 = vector.broadcast %cst_80 : f32 to vector<28x224xf32>
    %172 = arith.maximumf %170, %171 : vector<28x224xf32>
    %173 = tpu.iota {dimensions = array<i32: 0>} : vector<224x112xi32>
    %174 = arith.sitofp %173 : vector<224x112xi32> to vector<224x112xf32>
    %175 = tpu.iota {dimensions = array<i32: 1>} : vector<224x112xi32>
    %176 = arith.sitofp %175 : vector<224x112xi32> to vector<224x112xf32>
    %cst_81 = arith.constant 1.250000e-01 : f32
    %177 = vector.broadcast %cst_81 : f32 to vector<224x112xf32>
    %178 = arith.mulf %176, %177 : vector<224x112xf32>
    %179 = math.floor %178 : vector<224x112xf32>
    %cst_82 = arith.constant 8.000000e+00 : f32
    %180 = vector.broadcast %cst_82 : f32 to vector<224x112xf32>
    %181 = arith.mulf %180, %179 : vector<224x112xf32>
    %182 = arith.addf %176, %181 : vector<224x112xf32>
    %183 = arith.cmpf oeq, %174, %182 : vector<224x112xf32>
    %184 = arith.extui %183 : vector<224x112xi1> to vector<224x112xi32>
    %185 = arith.sitofp %184 : vector<224x112xi32> to vector<224x112xf32>
    %cst_83 = arith.constant 8.000000e+00 : f32
    %186 = vector.broadcast %cst_83 : f32 to vector<224x112xf32>
    %187 = arith.addf %182, %186 : vector<224x112xf32>
    %188 = arith.cmpf oeq, %174, %187 : vector<224x112xf32>
    %189 = arith.extui %188 : vector<224x112xi1> to vector<224x112xi32>
    %190 = arith.sitofp %189 : vector<224x112xi32> to vector<224x112xf32>
    %191 = tpu.iota {dimensions = array<i32: 0>} : vector<14x28xi32>
    %192 = arith.sitofp %191 : vector<14x28xi32> to vector<14x28xf32>
    %193 = tpu.iota {dimensions = array<i32: 1>} : vector<14x28xi32>
    %194 = arith.sitofp %193 : vector<14x28xi32> to vector<14x28xf32>
    %cst_84 = arith.constant 2.000000e+00 : f32
    %195 = vector.broadcast %cst_84 : f32 to vector<14x28xf32>
    %196 = arith.mulf %195, %192 : vector<14x28xf32>
    %197 = arith.cmpf oeq, %194, %196 : vector<14x28xf32>
    %198 = arith.extui %197 : vector<14x28xi1> to vector<14x28xi32>
    %199 = arith.sitofp %198 : vector<14x28xi32> to vector<14x28xf32>
    %cst_85 = arith.constant 2.000000e+00 : f32
    %200 = vector.broadcast %cst_85 : f32 to vector<14x28xf32>
    %201 = arith.mulf %200, %192 : vector<14x28xf32>
    %cst_86 = arith.constant 1.000000e+00 : f32
    %202 = vector.broadcast %cst_86 : f32 to vector<14x28xf32>
    %203 = arith.addf %201, %202 : vector<14x28xf32>
    %204 = arith.cmpf oeq, %194, %203 : vector<14x28xf32>
    %205 = arith.extui %204 : vector<14x28xi1> to vector<14x28xi32>
    %206 = arith.sitofp %205 : vector<14x28xi32> to vector<14x28xf32>
    %cst_87 = arith.constant dense<0.000000e+00> : vector<28x112xf32>
    %207 = tpu.matmul %172, %185, %cst_87 {dimension_numbers = #tpu.dot_dimension_numbers<[1], [0], [0], [1], [0, 0, 1, 1], [], []>} : vector<28x224xf32>, vector<224x112xf32>, vector<28x112xf32> -> vector<28x112xf32>
    %cst_88 = arith.constant dense<0.000000e+00> : vector<28x112xf32>
    %208 = tpu.matmul %172, %190, %cst_88 {dimension_numbers = #tpu.dot_dimension_numbers<[1], [0], [0], [1], [0, 0, 1, 1], [], []>} : vector<28x224xf32>, vector<224x112xf32>, vector<28x112xf32> -> vector<28x112xf32>
    %209 = arith.maximumf %207, %208 : vector<28x112xf32>
    %cst_89 = arith.constant dense<0.000000e+00> : vector<14x112xf32>
    %210 = tpu.matmul %199, %209, %cst_89 {dimension_numbers = #tpu.dot_dimension_numbers<[1], [0], [0], [1], [0, 0, 1, 1], [], []>} : vector<14x28xf32>, vector<28x112xf32>, vector<14x112xf32> -> vector<14x112xf32>
    %cst_90 = arith.constant dense<0.000000e+00> : vector<14x112xf32>
    %211 = tpu.matmul %206, %209, %cst_90 {dimension_numbers = #tpu.dot_dimension_numbers<[1], [0], [0], [1], [0, 0, 1, 1], [], []>} : vector<14x28xf32>, vector<28x112xf32>, vector<14x112xf32> -> vector<14x112xf32>
    %212 = arith.maximumf %210, %211 : vector<14x112xf32>
    %c0_91 = arith.constant 0 : index
    %c0_92 = arith.constant 0 : index
    %c0_93 = arith.constant 0 : index
    %213 = vector.load %arg14[%c0_91, %c0_92, %c0_93] : memref<1x14x112xf32, #tpu.memory_space<vmem>>, vector<1x14x112xf32>
    %214 = vector.shape_cast %213 : vector<1x14x112xf32> to vector<14x112xf32>
    %215 = vector.shape_cast %212 : vector<14x112xf32> to vector<1x14x112xf32>
    tpu.vector_store %arg14[%c0_91, %c0_92, %c0_93], %215 {strides = array<i32>} : memref<1x14x112xf32, #tpu.memory_space<vmem>>, vector<1x14x112xf32>,
    %c0_94 = arith.constant 0 : index
    %c0_95 = arith.constant 0 : index
    %c0_96 = arith.constant 0 : index
    %216 = vector.load %arg4[%c0_94, %c0_95, %c0_96] : memref<3x112x144xbf16, #tpu.memory_space<vmem>>, vector<1x112x144xbf16>
    %217 = vector.shape_cast %216 : vector<1x112x144xbf16> to vector<112x144xbf16>
    %c1_97 = arith.constant 1 : index
    %c0_98 = arith.constant 0 : index
    %c0_99 = arith.constant 0 : index
    %218 = vector.load %arg4[%c1_97, %c0_98, %c0_99] : memref<3x112x144xbf16, #tpu.memory_space<vmem>>, vector<1x112x144xbf16>
    %219 = vector.shape_cast %218 : vector<1x112x144xbf16> to vector<112x144xbf16>
    %c2_100 = arith.constant 2 : index
    %c0_101 = arith.constant 0 : index
    %c0_102 = arith.constant 0 : index
    %220 = vector.load %arg4[%c2_100, %c0_101, %c0_102] : memref<3x112x144xbf16, #tpu.memory_space<vmem>>, vector<1x112x144xbf16>
    %221 = vector.shape_cast %220 : vector<1x112x144xbf16> to vector<112x144xbf16>
    %c0_103 = arith.constant 0 : index
    %c0_104 = arith.constant 0 : index
    %c0_105 = arith.constant 0 : index
    %222 = vector.load %arg14[%c0_103, %c0_104, %c0_105] : memref<1x14x112xf32, #tpu.memory_space<vmem>>, vector<1x12x112xf32>
    %223 = vector.shape_cast %222 : vector<1x12x112xf32> to vector<12x112xf32>
    %224 = arith.truncf %223 : vector<12x112xf32> to vector<12x112xbf16>
    %cst_106 = arith.constant dense<0.000000e+00> : vector<12x144xf32>
    %225 = tpu.matmul %224, %217, %cst_106 {dimension_numbers = #tpu.dot_dimension_numbers<[1], [0], [0], [1], [0, 0, 1, 1], [], []>} : vector<12x112xbf16>, vector<112x144xbf16>, vector<12x144xf32> -> vector<12x144xf32>
    %c0_107 = arith.constant 0 : index
    %c1_108 = arith.constant 1 : index
    %c0_109 = arith.constant 0 : index
    %226 = vector.load %arg14[%c0_107, %c1_108, %c0_109] : memref<1x14x112xf32, #tpu.memory_space<vmem>>, vector<1x12x112xf32>
    %227 = vector.shape_cast %226 : vector<1x12x112xf32> to vector<12x112xf32>
    %228 = arith.truncf %227 : vector<12x112xf32> to vector<12x112xbf16>
    %cst_110 = arith.constant dense<0.000000e+00> : vector<12x144xf32>
    %229 = tpu.matmul %228, %219, %cst_110 {dimension_numbers = #tpu.dot_dimension_numbers<[1], [0], [0], [1], [0, 0, 1, 1], [], []>} : vector<12x112xbf16>, vector<112x144xbf16>, vector<12x144xf32> -> vector<12x144xf32>
    %230 = arith.addf %225, %229 : vector<12x144xf32>
    %c0_111 = arith.constant 0 : index
    %c2_112 = arith.constant 2 : index
    %c0_113 = arith.constant 0 : index
    %231 = vector.load %arg14[%c0_111, %c2_112, %c0_113] : memref<1x14x112xf32, #tpu.memory_space<vmem>>, vector<1x12x112xf32>
    %232 = vector.shape_cast %231 : vector<1x12x112xf32> to vector<12x112xf32>
    %233 = arith.truncf %232 : vector<12x112xf32> to vector<12x112xbf16>
    %cst_114 = arith.constant dense<0.000000e+00> : vector<12x144xf32>
    %234 = tpu.matmul %233, %221, %cst_114 {dimension_numbers = #tpu.dot_dimension_numbers<[1], [0], [0], [1], [0, 0, 1, 1], [], []>} : vector<12x112xbf16>, vector<112x144xbf16>, vector<12x144xf32> -> vector<12x144xf32>
    %235 = arith.addf %230, %234 : vector<12x144xf32>
    %236 = tpu.iota {dimensions = array<i32: 0>} : vector<144x12xi32>
    %237 = arith.sitofp %236 : vector<144x12xi32> to vector<144x12xf32>
    %238 = tpu.iota {dimensions = array<i32: 1>} : vector<144x12xi32>
    %239 = arith.sitofp %238 : vector<144x12xi32> to vector<144x12xf32>
    %cst_115 = arith.constant 0.0833333358 : f32
    %240 = vector.broadcast %cst_115 : f32 to vector<144x12xf32>
    %241 = arith.mulf %237, %240 : vector<144x12xf32>
    %242 = math.floor %241 : vector<144x12xf32>
    %cst_116 = arith.constant 1.200000e+01 : f32
    %243 = vector.broadcast %cst_116 : f32 to vector<144x12xf32>
    %244 = arith.mulf %243, %242 : vector<144x12xf32>
    %245 = arith.subf %237, %244 : vector<144x12xf32>
    %246 = arith.cmpf oeq, %245, %239 : vector<144x12xf32>
    %247 = arith.extui %246 : vector<144x12xi1> to vector<144x12xi32>
    %248 = arith.sitofp %247 : vector<144x12xi32> to vector<144x12xf32>
    %249 = tpu.iota {dimensions = array<i32: 0>} : vector<12x144xi32>
    %250 = arith.sitofp %249 : vector<12x144xi32> to vector<12x144xf32>
    %251 = tpu.iota {dimensions = array<i32: 1>} : vector<12x144xi32>
    %252 = arith.sitofp %251 : vector<12x144xi32> to vector<12x144xf32>
    %cst_117 = arith.constant 0.0833333358 : f32
    %253 = vector.broadcast %cst_117 : f32 to vector<12x144xf32>
    %254 = arith.mulf %252, %253 : vector<12x144xf32>
    %255 = math.floor %254 : vector<12x144xf32>
    %cst_118 = arith.constant 1.200000e+01 : f32
    %256 = vector.broadcast %cst_118 : f32 to vector<12x144xf32>
    %257 = arith.mulf %256, %255 : vector<12x144xf32>
    %258 = arith.subf %252, %257 : vector<12x144xf32>
    %259 = arith.cmpf oeq, %258, %250 : vector<12x144xf32>
    %260 = arith.extui %259 : vector<12x144xi1> to vector<12x144xi32>
    %261 = arith.sitofp %260 : vector<12x144xi32> to vector<12x144xf32>
    %cst_119 = arith.constant dense<0.000000e+00> : vector<144xf32>
    %262 = vector.multi_reduction <add>, %235, %cst_119 [0] : vector<12x144xf32> to vector<144xf32>
    %263 = vector.shape_cast %262 : vector<144xf32> to vector<1x144xf32>
    %264 = arith.mulf %235, %235 : vector<12x144xf32>
    %cst_120 = arith.constant dense<0.000000e+00> : vector<144xf32>
    %265 = vector.multi_reduction <add>, %264, %cst_120 [0] : vector<12x144xf32> to vector<144xf32>
    %266 = vector.shape_cast %265 : vector<144xf32> to vector<1x144xf32>
    %cst_121 = arith.constant dense<0.000000e+00> : vector<1x12xf32>
    %267 = tpu.matmul %263, %248, %cst_121 {dimension_numbers = #tpu.dot_dimension_numbers<[1], [0], [0], [1], [0, 0, 1, 1], [], []>} : vector<1x144xf32>, vector<144x12xf32>, vector<1x12xf32> -> vector<1x12xf32>
    %cst_122 = arith.constant 0.0069444445 : f32
    %268 = vector.broadcast %cst_122 : f32 to vector<1x12xf32>
    %269 = arith.mulf %267, %268 : vector<1x12xf32>
    %cst_123 = arith.constant dense<0.000000e+00> : vector<1x12xf32>
    %270 = tpu.matmul %266, %248, %cst_123 {dimension_numbers = #tpu.dot_dimension_numbers<[1], [0], [0], [1], [0, 0, 1, 1], [], []>} : vector<1x144xf32>, vector<144x12xf32>, vector<1x12xf32> -> vector<1x12xf32>
    %cst_124 = arith.constant 0.0069444445 : f32
    %271 = vector.broadcast %cst_124 : f32 to vector<1x12xf32>
    %272 = arith.mulf %270, %271 : vector<1x12xf32>
    %273 = arith.mulf %269, %269 : vector<1x12xf32>
    %274 = arith.subf %272, %273 : vector<1x12xf32>
    %cst_125 = arith.constant 9.99999974E-6 : f32
    %275 = vector.broadcast %cst_125 : f32 to vector<1x12xf32>
    %276 = arith.addf %274, %275 : vector<1x12xf32>
    %277 = math.rsqrt %276 : vector<1x12xf32>
    %c2_126 = arith.constant 2 : index
    %c0_127 = arith.constant 0 : index
    %278 = vector.load %arg9[%c2_126, %c0_127] : memref<7x16xf32, #tpu.memory_space<vmem>>, vector<1x12xf32>
    %c2_128 = arith.constant 2 : index
    %c0_129 = arith.constant 0 : index
    %279 = vector.load %arg10[%c2_128, %c0_129] : memref<7x16xf32, #tpu.memory_space<vmem>>, vector<1x12xf32>
    %280 = arith.mulf %278, %277 : vector<1x12xf32>
    %281 = arith.mulf %269, %280 : vector<1x12xf32>
    %282 = arith.subf %279, %281 : vector<1x12xf32>
    %cst_130 = arith.constant dense<0.000000e+00> : vector<1x144xf32>
    %283 = tpu.matmul %280, %261, %cst_130 {dimension_numbers = #tpu.dot_dimension_numbers<[1], [0], [0], [1], [0, 0, 1, 1], [], []>} : vector<1x12xf32>, vector<12x144xf32>, vector<1x144xf32> -> vector<1x144xf32>
    %cst_131 = arith.constant dense<0.000000e+00> : vector<1x144xf32>
    %284 = tpu.matmul %282, %261, %cst_131 {dimension_numbers = #tpu.dot_dimension_numbers<[1], [0], [0], [1], [0, 0, 1, 1], [], []>} : vector<1x12xf32>, vector<12x144xf32>, vector<1x144xf32> -> vector<1x144xf32>
    %285 = vector.broadcast %283 : vector<1x144xf32> to vector<12x144xf32>
    %286 = arith.mulf %235, %285 : vector<12x144xf32>
    %287 = vector.broadcast %284 : vector<1x144xf32> to vector<12x144xf32>
    %288 = arith.addf %286, %287 : vector<12x144xf32>
    %cst_132 = arith.constant 0.000000e+00 : f32
    %289 = vector.broadcast %cst_132 : f32 to vector<12x144xf32>
    %290 = arith.maximumf %288, %289 : vector<12x144xf32>
    %c0_133 = arith.constant 0 : index
    %c0_134 = arith.constant 0 : index
    %c0_135 = arith.constant 0 : index
    %291 = vector.load %arg15[%c0_133, %c0_134, %c0_135] : memref<1x12x144xf32, #tpu.memory_space<vmem>>, vector<1x12x144xf32>
    %292 = vector.shape_cast %291 : vector<1x12x144xf32> to vector<12x144xf32>
    %293 = vector.shape_cast %290 : vector<12x144xf32> to vector<1x12x144xf32>
    tpu.vector_store %arg15[%c0_133, %c0_134, %c0_135], %293 {strides = array<i32>} : memref<1x12x144xf32, #tpu.memory_space<vmem>>, vector<1x12x144xf32>,
    %c0_136 = arith.constant 0 : index
    %c0_137 = arith.constant 0 : index
    %c0_138 = arith.constant 0 : index
    %294 = vector.load %arg5[%c0_136, %c0_137, %c0_138] : memref<3x144x120xbf16, #tpu.memory_space<vmem>>, vector<1x144x120xbf16>
    %295 = vector.shape_cast %294 : vector<1x144x120xbf16> to vector<144x120xbf16>
    %c1_139 = arith.constant 1 : index
    %c0_140 = arith.constant 0 : index
    %c0_141 = arith.constant 0 : index
    %296 = vector.load %arg5[%c1_139, %c0_140, %c0_141] : memref<3x144x120xbf16, #tpu.memory_space<vmem>>, vector<1x144x120xbf16>
    %297 = vector.shape_cast %296 : vector<1x144x120xbf16> to vector<144x120xbf16>
    %c2_142 = arith.constant 2 : index
    %c0_143 = arith.constant 0 : index
    %c0_144 = arith.constant 0 : index
    %298 = vector.load %arg5[%c2_142, %c0_143, %c0_144] : memref<3x144x120xbf16, #tpu.memory_space<vmem>>, vector<1x144x120xbf16>
    %299 = vector.shape_cast %298 : vector<1x144x120xbf16> to vector<144x120xbf16>
    %c0_145 = arith.constant 0 : index
    %c0_146 = arith.constant 0 : index
    %c0_147 = arith.constant 0 : index
    %300 = vector.load %arg15[%c0_145, %c0_146, %c0_147] : memref<1x12x144xf32, #tpu.memory_space<vmem>>, vector<1x10x144xf32>
    %301 = vector.shape_cast %300 : vector<1x10x144xf32> to vector<10x144xf32>
    %302 = arith.truncf %301 : vector<10x144xf32> to vector<10x144xbf16>
    %cst_148 = arith.constant dense<0.000000e+00> : vector<10x120xf32>
    %303 = tpu.matmul %302, %295, %cst_148 {dimension_numbers = #tpu.dot_dimension_numbers<[1], [0], [0], [1], [0, 0, 1, 1], [], []>} : vector<10x144xbf16>, vector<144x120xbf16>, vector<10x120xf32> -> vector<10x120xf32>
    %c0_149 = arith.constant 0 : index
    %c1_150 = arith.constant 1 : index
    %c0_151 = arith.constant 0 : index
    %304 = vector.load %arg15[%c0_149, %c1_150, %c0_151] : memref<1x12x144xf32, #tpu.memory_space<vmem>>, vector<1x10x144xf32>
    %305 = vector.shape_cast %304 : vector<1x10x144xf32> to vector<10x144xf32>
    %306 = arith.truncf %305 : vector<10x144xf32> to vector<10x144xbf16>
    %cst_152 = arith.constant dense<0.000000e+00> : vector<10x120xf32>
    %307 = tpu.matmul %306, %297, %cst_152 {dimension_numbers = #tpu.dot_dimension_numbers<[1], [0], [0], [1], [0, 0, 1, 1], [], []>} : vector<10x144xbf16>, vector<144x120xbf16>, vector<10x120xf32> -> vector<10x120xf32>
    %308 = arith.addf %303, %307 : vector<10x120xf32>
    %c0_153 = arith.constant 0 : index
    %c2_154 = arith.constant 2 : index
    %c0_155 = arith.constant 0 : index
    %309 = vector.load %arg15[%c0_153, %c2_154, %c0_155] : memref<1x12x144xf32, #tpu.memory_space<vmem>>, vector<1x10x144xf32>
    %310 = vector.shape_cast %309 : vector<1x10x144xf32> to vector<10x144xf32>
    %311 = arith.truncf %310 : vector<10x144xf32> to vector<10x144xbf16>
    %cst_156 = arith.constant dense<0.000000e+00> : vector<10x120xf32>
    %312 = tpu.matmul %311, %299, %cst_156 {dimension_numbers = #tpu.dot_dimension_numbers<[1], [0], [0], [1], [0, 0, 1, 1], [], []>} : vector<10x144xbf16>, vector<144x120xbf16>, vector<10x120xf32> -> vector<10x120xf32>
    %313 = arith.addf %308, %312 : vector<10x120xf32>
    %314 = tpu.iota {dimensions = array<i32: 0>} : vector<120x12xi32>
    %315 = arith.sitofp %314 : vector<120x12xi32> to vector<120x12xf32>
    %316 = tpu.iota {dimensions = array<i32: 1>} : vector<120x12xi32>
    %317 = arith.sitofp %316 : vector<120x12xi32> to vector<120x12xf32>
    %cst_157 = arith.constant 0.0833333358 : f32
    %318 = vector.broadcast %cst_157 : f32 to vector<120x12xf32>
    %319 = arith.mulf %315, %318 : vector<120x12xf32>
    %320 = math.floor %319 : vector<120x12xf32>
    %cst_158 = arith.constant 1.200000e+01 : f32
    %321 = vector.broadcast %cst_158 : f32 to vector<120x12xf32>
    %322 = arith.mulf %321, %320 : vector<120x12xf32>
    %323 = arith.subf %315, %322 : vector<120x12xf32>
    %324 = arith.cmpf oeq, %323, %317 : vector<120x12xf32>
    %325 = arith.extui %324 : vector<120x12xi1> to vector<120x12xi32>
    %326 = arith.sitofp %325 : vector<120x12xi32> to vector<120x12xf32>
    %327 = tpu.iota {dimensions = array<i32: 0>} : vector<12x120xi32>
    %328 = arith.sitofp %327 : vector<12x120xi32> to vector<12x120xf32>
    %329 = tpu.iota {dimensions = array<i32: 1>} : vector<12x120xi32>
    %330 = arith.sitofp %329 : vector<12x120xi32> to vector<12x120xf32>
    %cst_159 = arith.constant 0.0833333358 : f32
    %331 = vector.broadcast %cst_159 : f32 to vector<12x120xf32>
    %332 = arith.mulf %330, %331 : vector<12x120xf32>
    %333 = math.floor %332 : vector<12x120xf32>
    %cst_160 = arith.constant 1.200000e+01 : f32
    %334 = vector.broadcast %cst_160 : f32 to vector<12x120xf32>
    %335 = arith.mulf %334, %333 : vector<12x120xf32>
    %336 = arith.subf %330, %335 : vector<12x120xf32>
    %337 = arith.cmpf oeq, %336, %328 : vector<12x120xf32>
    %338 = arith.extui %337 : vector<12x120xi1> to vector<12x120xi32>
    %339 = arith.sitofp %338 : vector<12x120xi32> to vector<12x120xf32>
    %cst_161 = arith.constant dense<0.000000e+00> : vector<120xf32>
    %340 = vector.multi_reduction <add>, %313, %cst_161 [0] : vector<10x120xf32> to vector<120xf32>
    %341 = vector.shape_cast %340 : vector<120xf32> to vector<1x120xf32>
    %342 = arith.mulf %313, %313 : vector<10x120xf32>
    %cst_162 = arith.constant dense<0.000000e+00> : vector<120xf32>
    %343 = vector.multi_reduction <add>, %342, %cst_162 [0] : vector<10x120xf32> to vector<120xf32>
    %344 = vector.shape_cast %343 : vector<120xf32> to vector<1x120xf32>
    %cst_163 = arith.constant dense<0.000000e+00> : vector<1x12xf32>
    %345 = tpu.matmul %341, %326, %cst_163 {dimension_numbers = #tpu.dot_dimension_numbers<[1], [0], [0], [1], [0, 0, 1, 1], [], []>} : vector<1x120xf32>, vector<120x12xf32>, vector<1x12xf32> -> vector<1x12xf32>
    %cst_164 = arith.constant 0.00999999977 : f32
    %346 = vector.broadcast %cst_164 : f32 to vector<1x12xf32>
    %347 = arith.mulf %345, %346 : vector<1x12xf32>
    %cst_165 = arith.constant dense<0.000000e+00> : vector<1x12xf32>
    %348 = tpu.matmul %344, %326, %cst_165 {dimension_numbers = #tpu.dot_dimension_numbers<[1], [0], [0], [1], [0, 0, 1, 1], [], []>} : vector<1x120xf32>, vector<120x12xf32>, vector<1x12xf32> -> vector<1x12xf32>
    %cst_166 = arith.constant 0.00999999977 : f32
    %349 = vector.broadcast %cst_166 : f32 to vector<1x12xf32>
    %350 = arith.mulf %348, %349 : vector<1x12xf32>
    %351 = arith.mulf %347, %347 : vector<1x12xf32>
    %352 = arith.subf %350, %351 : vector<1x12xf32>
    %cst_167 = arith.constant 9.99999974E-6 : f32
    %353 = vector.broadcast %cst_167 : f32 to vector<1x12xf32>
    %354 = arith.addf %352, %353 : vector<1x12xf32>
    %355 = math.rsqrt %354 : vector<1x12xf32>
    %c3 = arith.constant 3 : index
    %c0_168 = arith.constant 0 : index
    %356 = vector.load %arg9[%c3, %c0_168] : memref<7x16xf32, #tpu.memory_space<vmem>>, vector<1x12xf32>
    %c3_169 = arith.constant 3 : index
    %c0_170 = arith.constant 0 : index
    %357 = vector.load %arg10[%c3_169, %c0_170] : memref<7x16xf32, #tpu.memory_space<vmem>>, vector<1x12xf32>
    %358 = arith.mulf %356, %355 : vector<1x12xf32>
    %359 = arith.mulf %347, %358 : vector<1x12xf32>
    %360 = arith.subf %357, %359 : vector<1x12xf32>
    %cst_171 = arith.constant dense<0.000000e+00> : vector<1x120xf32>
    %361 = tpu.matmul %358, %339, %cst_171 {dimension_numbers = #tpu.dot_dimension_numbers<[1], [0], [0], [1], [0, 0, 1, 1], [], []>} : vector<1x12xf32>, vector<12x120xf32>, vector<1x120xf32> -> vector<1x120xf32>
    %cst_172 = arith.constant dense<0.000000e+00> : vector<1x120xf32>
    %362 = tpu.matmul %360, %339, %cst_172 {dimension_numbers = #tpu.dot_dimension_numbers<[1], [0], [0], [1], [0, 0, 1, 1], [], []>} : vector<1x12xf32>, vector<12x120xf32>, vector<1x120xf32> -> vector<1x120xf32>
    %363 = vector.broadcast %361 : vector<1x120xf32> to vector<10x120xf32>
    %364 = arith.mulf %313, %363 : vector<10x120xf32>
    %365 = vector.broadcast %362 : vector<1x120xf32> to vector<10x120xf32>
    %366 = arith.addf %364, %365 : vector<10x120xf32>
    %cst_173 = arith.constant 0.000000e+00 : f32
    %367 = vector.broadcast %cst_173 : f32 to vector<10x120xf32>
    %368 = arith.maximumf %366, %367 : vector<10x120xf32>
    %c0_174 = arith.constant 0 : index
    %c0_175 = arith.constant 0 : index
    %c0_176 = arith.constant 0 : index
    %369 = vector.load %arg16[%c0_174, %c0_175, %c0_176] : memref<1x10x120xf32, #tpu.memory_space<vmem>>, vector<1x10x120xf32>
    %370 = vector.shape_cast %369 : vector<1x10x120xf32> to vector<10x120xf32>
    %371 = vector.shape_cast %368 : vector<10x120xf32> to vector<1x10x120xf32>
    tpu.vector_store %arg16[%c0_174, %c0_175, %c0_176], %371 {strides = array<i32>} : memref<1x10x120xf32, #tpu.memory_space<vmem>>, vector<1x10x120xf32>,
    %c0_177 = arith.constant 0 : index
    %c0_178 = arith.constant 0 : index
    %c0_179 = arith.constant 0 : index
    %372 = vector.load %arg6[%c0_177, %c0_178, %c0_179] : memref<3x120x96xbf16, #tpu.memory_space<vmem>>, vector<1x120x96xbf16>
    %373 = vector.shape_cast %372 : vector<1x120x96xbf16> to vector<120x96xbf16>
    %c1_180 = arith.constant 1 : index
    %c0_181 = arith.constant 0 : index
    %c0_182 = arith.constant 0 : index
    %374 = vector.load %arg6[%c1_180, %c0_181, %c0_182] : memref<3x120x96xbf16, #tpu.memory_space<vmem>>, vector<1x120x96xbf16>
    %375 = vector.shape_cast %374 : vector<1x120x96xbf16> to vector<120x96xbf16>
    %c2_183 = arith.constant 2 : index
    %c0_184 = arith.constant 0 : index
    %c0_185 = arith.constant 0 : index
    %376 = vector.load %arg6[%c2_183, %c0_184, %c0_185] : memref<3x120x96xbf16, #tpu.memory_space<vmem>>, vector<1x120x96xbf16>
    %377 = vector.shape_cast %376 : vector<1x120x96xbf16> to vector<120x96xbf16>
    %c0_186 = arith.constant 0 : index
    %c0_187 = arith.constant 0 : index
    %c0_188 = arith.constant 0 : index
    %378 = vector.load %arg16[%c0_186, %c0_187, %c0_188] : memref<1x10x120xf32, #tpu.memory_space<vmem>>, vector<1x8x120xf32>
    %379 = vector.shape_cast %378 : vector<1x8x120xf32> to vector<8x120xf32>
    %380 = arith.truncf %379 : vector<8x120xf32> to vector<8x120xbf16>
    %cst_189 = arith.constant dense<0.000000e+00> : vector<8x96xf32>
    %381 = tpu.matmul %380, %373, %cst_189 {dimension_numbers = #tpu.dot_dimension_numbers<[1], [0], [0], [1], [0, 0, 1, 1], [], []>} : vector<8x120xbf16>, vector<120x96xbf16>, vector<8x96xf32> -> vector<8x96xf32>
    %c0_190 = arith.constant 0 : index
    %c1_191 = arith.constant 1 : index
    %c0_192 = arith.constant 0 : index
    %382 = vector.load %arg16[%c0_190, %c1_191, %c0_192] : memref<1x10x120xf32, #tpu.memory_space<vmem>>, vector<1x8x120xf32>
    %383 = vector.shape_cast %382 : vector<1x8x120xf32> to vector<8x120xf32>
    %384 = arith.truncf %383 : vector<8x120xf32> to vector<8x120xbf16>
    %cst_193 = arith.constant dense<0.000000e+00> : vector<8x96xf32>
    %385 = tpu.matmul %384, %375, %cst_193 {dimension_numbers = #tpu.dot_dimension_numbers<[1], [0], [0], [1], [0, 0, 1, 1], [], []>} : vector<8x120xbf16>, vector<120x96xbf16>, vector<8x96xf32> -> vector<8x96xf32>
    %386 = arith.addf %381, %385 : vector<8x96xf32>
    %c0_194 = arith.constant 0 : index
    %c2_195 = arith.constant 2 : index
    %c0_196 = arith.constant 0 : index
    %387 = vector.load %arg16[%c0_194, %c2_195, %c0_196] : memref<1x10x120xf32, #tpu.memory_space<vmem>>, vector<1x8x120xf32>
    %388 = vector.shape_cast %387 : vector<1x8x120xf32> to vector<8x120xf32>
    %389 = arith.truncf %388 : vector<8x120xf32> to vector<8x120xbf16>
    %cst_197 = arith.constant dense<0.000000e+00> : vector<8x96xf32>
    %390 = tpu.matmul %389, %377, %cst_197 {dimension_numbers = #tpu.dot_dimension_numbers<[1], [0], [0], [1], [0, 0, 1, 1], [], []>} : vector<8x120xbf16>, vector<120x96xbf16>, vector<8x96xf32> -> vector<8x96xf32>
    %391 = arith.addf %386, %390 : vector<8x96xf32>
    %392 = tpu.iota {dimensions = array<i32: 0>} : vector<96x12xi32>
    %393 = arith.sitofp %392 : vector<96x12xi32> to vector<96x12xf32>
    %394 = tpu.iota {dimensions = array<i32: 1>} : vector<96x12xi32>
    %395 = arith.sitofp %394 : vector<96x12xi32> to vector<96x12xf32>
    %cst_198 = arith.constant 0.0833333358 : f32
    %396 = vector.broadcast %cst_198 : f32 to vector<96x12xf32>
    %397 = arith.mulf %393, %396 : vector<96x12xf32>
    %398 = math.floor %397 : vector<96x12xf32>
    %cst_199 = arith.constant 1.200000e+01 : f32
    %399 = vector.broadcast %cst_199 : f32 to vector<96x12xf32>
    %400 = arith.mulf %399, %398 : vector<96x12xf32>
    %401 = arith.subf %393, %400 : vector<96x12xf32>
    %402 = arith.cmpf oeq, %401, %395 : vector<96x12xf32>
    %403 = arith.extui %402 : vector<96x12xi1> to vector<96x12xi32>
    %404 = arith.sitofp %403 : vector<96x12xi32> to vector<96x12xf32>
    %405 = tpu.iota {dimensions = array<i32: 0>} : vector<12x96xi32>
    %406 = arith.sitofp %405 : vector<12x96xi32> to vector<12x96xf32>
    %407 = tpu.iota {dimensions = array<i32: 1>} : vector<12x96xi32>
    %408 = arith.sitofp %407 : vector<12x96xi32> to vector<12x96xf32>
    %cst_200 = arith.constant 0.0833333358 : f32
    %409 = vector.broadcast %cst_200 : f32 to vector<12x96xf32>
    %410 = arith.mulf %408, %409 : vector<12x96xf32>
    %411 = math.floor %410 : vector<12x96xf32>
    %cst_201 = arith.constant 1.200000e+01 : f32
    %412 = vector.broadcast %cst_201 : f32 to vector<12x96xf32>
    %413 = arith.mulf %412, %411 : vector<12x96xf32>
    %414 = arith.subf %408, %413 : vector<12x96xf32>
    %415 = arith.cmpf oeq, %414, %406 : vector<12x96xf32>
    %416 = arith.extui %415 : vector<12x96xi1> to vector<12x96xi32>
    %417 = arith.sitofp %416 : vector<12x96xi32> to vector<12x96xf32>
    %cst_202 = arith.constant dense<0.000000e+00> : vector<96xf32>
    %418 = vector.multi_reduction <add>, %391, %cst_202 [0] : vector<8x96xf32> to vector<96xf32>
    %419 = vector.shape_cast %418 : vector<96xf32> to vector<1x96xf32>
    %420 = arith.mulf %391, %391 : vector<8x96xf32>
    %cst_203 = arith.constant dense<0.000000e+00> : vector<96xf32>
    %421 = vector.multi_reduction <add>, %420, %cst_203 [0] : vector<8x96xf32> to vector<96xf32>
    %422 = vector.shape_cast %421 : vector<96xf32> to vector<1x96xf32>
    %cst_204 = arith.constant dense<0.000000e+00> : vector<1x12xf32>
    %423 = tpu.matmul %419, %404, %cst_204 {dimension_numbers = #tpu.dot_dimension_numbers<[1], [0], [0], [1], [0, 0, 1, 1], [], []>} : vector<1x96xf32>, vector<96x12xf32>, vector<1x12xf32> -> vector<1x12xf32>
    %cst_205 = arith.constant 1.562500e-02 : f32
    %424 = vector.broadcast %cst_205 : f32 to vector<1x12xf32>
    %425 = arith.mulf %423, %424 : vector<1x12xf32>
    %cst_206 = arith.constant dense<0.000000e+00> : vector<1x12xf32>
    %426 = tpu.matmul %422, %404, %cst_206 {dimension_numbers = #tpu.dot_dimension_numbers<[1], [0], [0], [1], [0, 0, 1, 1], [], []>} : vector<1x96xf32>, vector<96x12xf32>, vector<1x12xf32> -> vector<1x12xf32>
    %cst_207 = arith.constant 1.562500e-02 : f32
    %427 = vector.broadcast %cst_207 : f32 to vector<1x12xf32>
    %428 = arith.mulf %426, %427 : vector<1x12xf32>
    %429 = arith.mulf %425, %425 : vector<1x12xf32>
    %430 = arith.subf %428, %429 : vector<1x12xf32>
    %cst_208 = arith.constant 9.99999974E-6 : f32
    %431 = vector.broadcast %cst_208 : f32 to vector<1x12xf32>
    %432 = arith.addf %430, %431 : vector<1x12xf32>
    %433 = math.rsqrt %432 : vector<1x12xf32>
    %c4 = arith.constant 4 : index
    %c0_209 = arith.constant 0 : index
    %434 = vector.load %arg9[%c4, %c0_209] : memref<7x16xf32, #tpu.memory_space<vmem>>, vector<1x12xf32>
    %c4_210 = arith.constant 4 : index
    %c0_211 = arith.constant 0 : index
    %435 = vector.load %arg10[%c4_210, %c0_211] : memref<7x16xf32, #tpu.memory_space<vmem>>, vector<1x12xf32>
    %436 = arith.mulf %434, %433 : vector<1x12xf32>
    %437 = arith.mulf %425, %436 : vector<1x12xf32>
    %438 = arith.subf %435, %437 : vector<1x12xf32>
    %cst_212 = arith.constant dense<0.000000e+00> : vector<1x96xf32>
    %439 = tpu.matmul %436, %417, %cst_212 {dimension_numbers = #tpu.dot_dimension_numbers<[1], [0], [0], [1], [0, 0, 1, 1], [], []>} : vector<1x12xf32>, vector<12x96xf32>, vector<1x96xf32> -> vector<1x96xf32>
    %cst_213 = arith.constant dense<0.000000e+00> : vector<1x96xf32>
    %440 = tpu.matmul %438, %417, %cst_213 {dimension_numbers = #tpu.dot_dimension_numbers<[1], [0], [0], [1], [0, 0, 1, 1], [], []>} : vector<1x12xf32>, vector<12x96xf32>, vector<1x96xf32> -> vector<1x96xf32>
    %441 = vector.broadcast %439 : vector<1x96xf32> to vector<8x96xf32>
    %442 = arith.mulf %391, %441 : vector<8x96xf32>
    %443 = vector.broadcast %440 : vector<1x96xf32> to vector<8x96xf32>
    %444 = arith.addf %442, %443 : vector<8x96xf32>
    %cst_214 = arith.constant 0.000000e+00 : f32
    %445 = vector.broadcast %cst_214 : f32 to vector<8x96xf32>
    %446 = arith.maximumf %444, %445 : vector<8x96xf32>
    %c0_215 = arith.constant 0 : index
    %c0_216 = arith.constant 0 : index
    %c0_217 = arith.constant 0 : index
    %447 = vector.load %arg17[%c0_215, %c0_216, %c0_217] : memref<1x8x96xf32, #tpu.memory_space<vmem>>, vector<1x8x96xf32>
    %448 = vector.shape_cast %447 : vector<1x8x96xf32> to vector<8x96xf32>
    %449 = vector.shape_cast %446 : vector<8x96xf32> to vector<1x8x96xf32>
    tpu.vector_store %arg17[%c0_215, %c0_216, %c0_217], %449 {strides = array<i32>} : memref<1x8x96xf32, #tpu.memory_space<vmem>>, vector<1x8x96xf32>,
    %c0_218 = arith.constant 0 : index
    %c0_219 = arith.constant 0 : index
    %c0_220 = arith.constant 0 : index
    %450 = vector.load %arg7[%c0_218, %c0_219, %c0_220] : memref<3x96x96xbf16, #tpu.memory_space<vmem>>, vector<1x96x96xbf16>
    %451 = vector.shape_cast %450 : vector<1x96x96xbf16> to vector<96x96xbf16>
    %c1_221 = arith.constant 1 : index
    %c0_222 = arith.constant 0 : index
    %c0_223 = arith.constant 0 : index
    %452 = vector.load %arg7[%c1_221, %c0_222, %c0_223] : memref<3x96x96xbf16, #tpu.memory_space<vmem>>, vector<1x96x96xbf16>
    %453 = vector.shape_cast %452 : vector<1x96x96xbf16> to vector<96x96xbf16>
    %c2_224 = arith.constant 2 : index
    %c0_225 = arith.constant 0 : index
    %c0_226 = arith.constant 0 : index
    %454 = vector.load %arg7[%c2_224, %c0_225, %c0_226] : memref<3x96x96xbf16, #tpu.memory_space<vmem>>, vector<1x96x96xbf16>
    %455 = vector.shape_cast %454 : vector<1x96x96xbf16> to vector<96x96xbf16>
    %c0_227 = arith.constant 0 : index
    %c0_228 = arith.constant 0 : index
    %c0_229 = arith.constant 0 : index
    %456 = vector.load %arg17[%c0_227, %c0_228, %c0_229] : memref<1x8x96xf32, #tpu.memory_space<vmem>>, vector<1x6x96xf32>
    %457 = vector.shape_cast %456 : vector<1x6x96xf32> to vector<6x96xf32>
    %458 = arith.truncf %457 : vector<6x96xf32> to vector<6x96xbf16>
    %cst_230 = arith.constant dense<0.000000e+00> : vector<6x96xf32>
    %459 = tpu.matmul %458, %451, %cst_230 {dimension_numbers = #tpu.dot_dimension_numbers<[1], [0], [0], [1], [0, 0, 1, 1], [], []>} : vector<6x96xbf16>, vector<96x96xbf16>, vector<6x96xf32> -> vector<6x96xf32>
    %c0_231 = arith.constant 0 : index
    %c1_232 = arith.constant 1 : index
    %c0_233 = arith.constant 0 : index
    %460 = vector.load %arg17[%c0_231, %c1_232, %c0_233] : memref<1x8x96xf32, #tpu.memory_space<vmem>>, vector<1x6x96xf32>
    %461 = vector.shape_cast %460 : vector<1x6x96xf32> to vector<6x96xf32>
    %462 = arith.truncf %461 : vector<6x96xf32> to vector<6x96xbf16>
    %cst_234 = arith.constant dense<0.000000e+00> : vector<6x96xf32>
    %463 = tpu.matmul %462, %453, %cst_234 {dimension_numbers = #tpu.dot_dimension_numbers<[1], [0], [0], [1], [0, 0, 1, 1], [], []>} : vector<6x96xbf16>, vector<96x96xbf16>, vector<6x96xf32> -> vector<6x96xf32>
    %464 = arith.addf %459, %463 : vector<6x96xf32>
    %c0_235 = arith.constant 0 : index
    %c2_236 = arith.constant 2 : index
    %c0_237 = arith.constant 0 : index
    %465 = vector.load %arg17[%c0_235, %c2_236, %c0_237] : memref<1x8x96xf32, #tpu.memory_space<vmem>>, vector<1x6x96xf32>
    %466 = vector.shape_cast %465 : vector<1x6x96xf32> to vector<6x96xf32>
    %467 = arith.truncf %466 : vector<6x96xf32> to vector<6x96xbf16>
    %cst_238 = arith.constant dense<0.000000e+00> : vector<6x96xf32>
    %468 = tpu.matmul %467, %455, %cst_238 {dimension_numbers = #tpu.dot_dimension_numbers<[1], [0], [0], [1], [0, 0, 1, 1], [], []>} : vector<6x96xbf16>, vector<96x96xbf16>, vector<6x96xf32> -> vector<6x96xf32>
    %469 = arith.addf %464, %468 : vector<6x96xf32>
    %470 = tpu.iota {dimensions = array<i32: 0>} : vector<96x16xi32>
    %471 = arith.sitofp %470 : vector<96x16xi32> to vector<96x16xf32>
    %472 = tpu.iota {dimensions = array<i32: 1>} : vector<96x16xi32>
    %473 = arith.sitofp %472 : vector<96x16xi32> to vector<96x16xf32>
    %cst_239 = arith.constant 6.250000e-02 : f32
    %474 = vector.broadcast %cst_239 : f32 to vector<96x16xf32>
    %475 = arith.mulf %471, %474 : vector<96x16xf32>
    %476 = math.floor %475 : vector<96x16xf32>
    %cst_240 = arith.constant 1.600000e+01 : f32
    %477 = vector.broadcast %cst_240 : f32 to vector<96x16xf32>
    %478 = arith.mulf %477, %476 : vector<96x16xf32>
    %479 = arith.subf %471, %478 : vector<96x16xf32>
    %480 = arith.cmpf oeq, %479, %473 : vector<96x16xf32>
    %481 = arith.extui %480 : vector<96x16xi1> to vector<96x16xi32>
    %482 = arith.sitofp %481 : vector<96x16xi32> to vector<96x16xf32>
    %483 = tpu.iota {dimensions = array<i32: 0>} : vector<16x96xi32>
    %484 = arith.sitofp %483 : vector<16x96xi32> to vector<16x96xf32>
    %485 = tpu.iota {dimensions = array<i32: 1>} : vector<16x96xi32>
    %486 = arith.sitofp %485 : vector<16x96xi32> to vector<16x96xf32>
    %cst_241 = arith.constant 6.250000e-02 : f32
    %487 = vector.broadcast %cst_241 : f32 to vector<16x96xf32>
    %488 = arith.mulf %486, %487 : vector<16x96xf32>
    %489 = math.floor %488 : vector<16x96xf32>
    %cst_242 = arith.constant 1.600000e+01 : f32
    %490 = vector.broadcast %cst_242 : f32 to vector<16x96xf32>
    %491 = arith.mulf %490, %489 : vector<16x96xf32>
    %492 = arith.subf %486, %491 : vector<16x96xf32>
    %493 = arith.cmpf oeq, %492, %484 : vector<16x96xf32>
    %494 = arith.extui %493 : vector<16x96xi1> to vector<16x96xi32>
    %495 = arith.sitofp %494 : vector<16x96xi32> to vector<16x96xf32>
    %cst_243 = arith.constant dense<0.000000e+00> : vector<96xf32>
    %496 = vector.multi_reduction <add>, %469, %cst_243 [0] : vector<6x96xf32> to vector<96xf32>
    %497 = vector.shape_cast %496 : vector<96xf32> to vector<1x96xf32>
    %498 = arith.mulf %469, %469 : vector<6x96xf32>
    %cst_244 = arith.constant dense<0.000000e+00> : vector<96xf32>
    %499 = vector.multi_reduction <add>, %498, %cst_244 [0] : vector<6x96xf32> to vector<96xf32>
    %500 = vector.shape_cast %499 : vector<96xf32> to vector<1x96xf32>
    %cst_245 = arith.constant dense<0.000000e+00> : vector<1x16xf32>
    %501 = tpu.matmul %497, %482, %cst_245 {dimension_numbers = #tpu.dot_dimension_numbers<[1], [0], [0], [1], [0, 0, 1, 1], [], []>} : vector<1x96xf32>, vector<96x16xf32>, vector<1x16xf32> -> vector<1x16xf32>
    %cst_246 = arith.constant 0.027777778 : f32
    %502 = vector.broadcast %cst_246 : f32 to vector<1x16xf32>
    %503 = arith.mulf %501, %502 : vector<1x16xf32>
    %cst_247 = arith.constant dense<0.000000e+00> : vector<1x16xf32>
    %504 = tpu.matmul %500, %482, %cst_247 {dimension_numbers = #tpu.dot_dimension_numbers<[1], [0], [0], [1], [0, 0, 1, 1], [], []>} : vector<1x96xf32>, vector<96x16xf32>, vector<1x16xf32> -> vector<1x16xf32>
    %cst_248 = arith.constant 0.027777778 : f32
    %505 = vector.broadcast %cst_248 : f32 to vector<1x16xf32>
    %506 = arith.mulf %504, %505 : vector<1x16xf32>
    %507 = arith.mulf %503, %503 : vector<1x16xf32>
    %508 = arith.subf %506, %507 : vector<1x16xf32>
    %cst_249 = arith.constant 9.99999974E-6 : f32
    %509 = vector.broadcast %cst_249 : f32 to vector<1x16xf32>
    %510 = arith.addf %508, %509 : vector<1x16xf32>
    %511 = math.rsqrt %510 : vector<1x16xf32>
    %c5 = arith.constant 5 : index
    %c0_250 = arith.constant 0 : index
    %512 = vector.load %arg9[%c5, %c0_250] : memref<7x16xf32, #tpu.memory_space<vmem>>, vector<1x16xf32>
    %c5_251 = arith.constant 5 : index
    %c0_252 = arith.constant 0 : index
    %513 = vector.load %arg10[%c5_251, %c0_252] : memref<7x16xf32, #tpu.memory_space<vmem>>, vector<1x16xf32>
    %514 = arith.mulf %512, %511 : vector<1x16xf32>
    %515 = arith.mulf %503, %514 : vector<1x16xf32>
    %516 = arith.subf %513, %515 : vector<1x16xf32>
    %cst_253 = arith.constant dense<0.000000e+00> : vector<1x96xf32>
    %517 = tpu.matmul %514, %495, %cst_253 {dimension_numbers = #tpu.dot_dimension_numbers<[1], [0], [0], [1], [0, 0, 1, 1], [], []>} : vector<1x16xf32>, vector<16x96xf32>, vector<1x96xf32> -> vector<1x96xf32>
    %cst_254 = arith.constant dense<0.000000e+00> : vector<1x96xf32>
    %518 = tpu.matmul %516, %495, %cst_254 {dimension_numbers = #tpu.dot_dimension_numbers<[1], [0], [0], [1], [0, 0, 1, 1], [], []>} : vector<1x16xf32>, vector<16x96xf32>, vector<1x96xf32> -> vector<1x96xf32>
    %519 = vector.broadcast %517 : vector<1x96xf32> to vector<6x96xf32>
    %520 = arith.mulf %469, %519 : vector<6x96xf32>
    %521 = vector.broadcast %518 : vector<1x96xf32> to vector<6x96xf32>
    %522 = arith.addf %520, %521 : vector<6x96xf32>
    %cst_255 = arith.constant 0.000000e+00 : f32
    %523 = vector.broadcast %cst_255 : f32 to vector<6x96xf32>
    %524 = arith.maximumf %522, %523 : vector<6x96xf32>
    %c0_256 = arith.constant 0 : index
    %c0_257 = arith.constant 0 : index
    %c0_258 = arith.constant 0 : index
    %525 = vector.load %arg18[%c0_256, %c0_257, %c0_258] : memref<1x6x96xf32, #tpu.memory_space<vmem>>, vector<1x6x96xf32>
    %526 = vector.shape_cast %525 : vector<1x6x96xf32> to vector<6x96xf32>
    %527 = vector.shape_cast %524 : vector<6x96xf32> to vector<1x6x96xf32>
    tpu.vector_store %arg18[%c0_256, %c0_257, %c0_258], %527 {strides = array<i32>} : memref<1x6x96xf32, #tpu.memory_space<vmem>>, vector<1x6x96xf32>,
    %c0_259 = arith.constant 0 : index
    %c0_260 = arith.constant 0 : index
    %c0_261 = arith.constant 0 : index
    %528 = vector.load %arg8[%c0_259, %c0_260, %c0_261] : memref<3x96x64xbf16, #tpu.memory_space<vmem>>, vector<1x96x64xbf16>
    %529 = vector.shape_cast %528 : vector<1x96x64xbf16> to vector<96x64xbf16>
    %c1_262 = arith.constant 1 : index
    %c0_263 = arith.constant 0 : index
    %c0_264 = arith.constant 0 : index
    %530 = vector.load %arg8[%c1_262, %c0_263, %c0_264] : memref<3x96x64xbf16, #tpu.memory_space<vmem>>, vector<1x96x64xbf16>
    %531 = vector.shape_cast %530 : vector<1x96x64xbf16> to vector<96x64xbf16>
    %c2_265 = arith.constant 2 : index
    %c0_266 = arith.constant 0 : index
    %c0_267 = arith.constant 0 : index
    %532 = vector.load %arg8[%c2_265, %c0_266, %c0_267] : memref<3x96x64xbf16, #tpu.memory_space<vmem>>, vector<1x96x64xbf16>
    %533 = vector.shape_cast %532 : vector<1x96x64xbf16> to vector<96x64xbf16>
    %c0_268 = arith.constant 0 : index
    %c0_269 = arith.constant 0 : index
    %c0_270 = arith.constant 0 : index
    %534 = vector.load %arg18[%c0_268, %c0_269, %c0_270] : memref<1x6x96xf32, #tpu.memory_space<vmem>>, vector<1x4x96xf32>
    %535 = vector.shape_cast %534 : vector<1x4x96xf32> to vector<4x96xf32>
    %536 = arith.truncf %535 : vector<4x96xf32> to vector<4x96xbf16>
    %cst_271 = arith.constant dense<0.000000e+00> : vector<4x64xf32>
    %537 = tpu.matmul %536, %529, %cst_271 {dimension_numbers = #tpu.dot_dimension_numbers<[1], [0], [0], [1], [0, 0, 1, 1], [], []>} : vector<4x96xbf16>, vector<96x64xbf16>, vector<4x64xf32> -> vector<4x64xf32>
    %c0_272 = arith.constant 0 : index
    %c1_273 = arith.constant 1 : index
    %c0_274 = arith.constant 0 : index
    %538 = vector.load %arg18[%c0_272, %c1_273, %c0_274] : memref<1x6x96xf32, #tpu.memory_space<vmem>>, vector<1x4x96xf32>
    %539 = vector.shape_cast %538 : vector<1x4x96xf32> to vector<4x96xf32>
    %540 = arith.truncf %539 : vector<4x96xf32> to vector<4x96xbf16>
    %cst_275 = arith.constant dense<0.000000e+00> : vector<4x64xf32>
    %541 = tpu.matmul %540, %531, %cst_275 {dimension_numbers = #tpu.dot_dimension_numbers<[1], [0], [0], [1], [0, 0, 1, 1], [], []>} : vector<4x96xbf16>, vector<96x64xbf16>, vector<4x64xf32> -> vector<4x64xf32>
    %542 = arith.addf %537, %541 : vector<4x64xf32>
    %c0_276 = arith.constant 0 : index
    %c2_277 = arith.constant 2 : index
    %c0_278 = arith.constant 0 : index
    %543 = vector.load %arg18[%c0_276, %c2_277, %c0_278] : memref<1x6x96xf32, #tpu.memory_space<vmem>>, vector<1x4x96xf32>
    %544 = vector.shape_cast %543 : vector<1x4x96xf32> to vector<4x96xf32>
    %545 = arith.truncf %544 : vector<4x96xf32> to vector<4x96xbf16>
    %cst_279 = arith.constant dense<0.000000e+00> : vector<4x64xf32>
    %546 = tpu.matmul %545, %533, %cst_279 {dimension_numbers = #tpu.dot_dimension_numbers<[1], [0], [0], [1], [0, 0, 1, 1], [], []>} : vector<4x96xbf16>, vector<96x64xbf16>, vector<4x64xf32> -> vector<4x64xf32>
    %547 = arith.addf %542, %546 : vector<4x64xf32>
    %548 = tpu.iota {dimensions = array<i32: 0>} : vector<64x16xi32>
    %549 = arith.sitofp %548 : vector<64x16xi32> to vector<64x16xf32>
    %550 = tpu.iota {dimensions = array<i32: 1>} : vector<64x16xi32>
    %551 = arith.sitofp %550 : vector<64x16xi32> to vector<64x16xf32>
    %cst_280 = arith.constant 6.250000e-02 : f32
    %552 = vector.broadcast %cst_280 : f32 to vector<64x16xf32>
    %553 = arith.mulf %549, %552 : vector<64x16xf32>
    %554 = math.floor %553 : vector<64x16xf32>
    %cst_281 = arith.constant 1.600000e+01 : f32
    %555 = vector.broadcast %cst_281 : f32 to vector<64x16xf32>
    %556 = arith.mulf %555, %554 : vector<64x16xf32>
    %557 = arith.subf %549, %556 : vector<64x16xf32>
    %558 = arith.cmpf oeq, %557, %551 : vector<64x16xf32>
    %559 = arith.extui %558 : vector<64x16xi1> to vector<64x16xi32>
    %560 = arith.sitofp %559 : vector<64x16xi32> to vector<64x16xf32>
    %561 = tpu.iota {dimensions = array<i32: 0>} : vector<16x64xi32>
    %562 = arith.sitofp %561 : vector<16x64xi32> to vector<16x64xf32>
    %563 = tpu.iota {dimensions = array<i32: 1>} : vector<16x64xi32>
    %564 = arith.sitofp %563 : vector<16x64xi32> to vector<16x64xf32>
    %cst_282 = arith.constant 6.250000e-02 : f32
    %565 = vector.broadcast %cst_282 : f32 to vector<16x64xf32>
    %566 = arith.mulf %564, %565 : vector<16x64xf32>
    %567 = math.floor %566 : vector<16x64xf32>
    %cst_283 = arith.constant 1.600000e+01 : f32
    %568 = vector.broadcast %cst_283 : f32 to vector<16x64xf32>
    %569 = arith.mulf %568, %567 : vector<16x64xf32>
    %570 = arith.subf %564, %569 : vector<16x64xf32>
    %571 = arith.cmpf oeq, %570, %562 : vector<16x64xf32>
    %572 = arith.extui %571 : vector<16x64xi1> to vector<16x64xi32>
    %573 = arith.sitofp %572 : vector<16x64xi32> to vector<16x64xf32>
    %cst_284 = arith.constant dense<0.000000e+00> : vector<64xf32>
    %574 = vector.multi_reduction <add>, %547, %cst_284 [0] : vector<4x64xf32> to vector<64xf32>
    %575 = vector.shape_cast %574 : vector<64xf32> to vector<1x64xf32>
    %576 = arith.mulf %547, %547 : vector<4x64xf32>
    %cst_285 = arith.constant dense<0.000000e+00> : vector<64xf32>
    %577 = vector.multi_reduction <add>, %576, %cst_285 [0] : vector<4x64xf32> to vector<64xf32>
    %578 = vector.shape_cast %577 : vector<64xf32> to vector<1x64xf32>
    %cst_286 = arith.constant dense<0.000000e+00> : vector<1x16xf32>
    %579 = tpu.matmul %575, %560, %cst_286 {dimension_numbers = #tpu.dot_dimension_numbers<[1], [0], [0], [1], [0, 0, 1, 1], [], []>} : vector<1x64xf32>, vector<64x16xf32>, vector<1x16xf32> -> vector<1x16xf32>
    %cst_287 = arith.constant 6.250000e-02 : f32
    %580 = vector.broadcast %cst_287 : f32 to vector<1x16xf32>
    %581 = arith.mulf %579, %580 : vector<1x16xf32>
    %cst_288 = arith.constant dense<0.000000e+00> : vector<1x16xf32>
    %582 = tpu.matmul %578, %560, %cst_288 {dimension_numbers = #tpu.dot_dimension_numbers<[1], [0], [0], [1], [0, 0, 1, 1], [], []>} : vector<1x64xf32>, vector<64x16xf32>, vector<1x16xf32> -> vector<1x16xf32>
    %cst_289 = arith.constant 6.250000e-02 : f32
    %583 = vector.broadcast %cst_289 : f32 to vector<1x16xf32>
    %584 = arith.mulf %582, %583 : vector<1x16xf32>
    %585 = arith.mulf %581, %581 : vector<1x16xf32>
    %586 = arith.subf %584, %585 : vector<1x16xf32>
    %cst_290 = arith.constant 9.99999974E-6 : f32
    %587 = vector.broadcast %cst_290 : f32 to vector<1x16xf32>
    %588 = arith.addf %586, %587 : vector<1x16xf32>
    %589 = math.rsqrt %588 : vector<1x16xf32>
    %c6 = arith.constant 6 : index
    %c0_291 = arith.constant 0 : index
    %590 = vector.load %arg9[%c6, %c0_291] : memref<7x16xf32, #tpu.memory_space<vmem>>, vector<1x16xf32>
    %c6_292 = arith.constant 6 : index
    %c0_293 = arith.constant 0 : index
    %591 = vector.load %arg10[%c6_292, %c0_293] : memref<7x16xf32, #tpu.memory_space<vmem>>, vector<1x16xf32>
    %592 = arith.mulf %590, %589 : vector<1x16xf32>
    %593 = arith.mulf %581, %592 : vector<1x16xf32>
    %594 = arith.subf %591, %593 : vector<1x16xf32>
    %cst_294 = arith.constant dense<0.000000e+00> : vector<1x64xf32>
    %595 = tpu.matmul %592, %573, %cst_294 {dimension_numbers = #tpu.dot_dimension_numbers<[1], [0], [0], [1], [0, 0, 1, 1], [], []>} : vector<1x16xf32>, vector<16x64xf32>, vector<1x64xf32> -> vector<1x64xf32>
    %cst_295 = arith.constant dense<0.000000e+00> : vector<1x64xf32>
    %596 = tpu.matmul %594, %573, %cst_295 {dimension_numbers = #tpu.dot_dimension_numbers<[1], [0], [0], [1], [0, 0, 1, 1], [], []>} : vector<1x16xf32>, vector<16x64xf32>, vector<1x64xf32> -> vector<1x64xf32>
    %597 = vector.broadcast %595 : vector<1x64xf32> to vector<4x64xf32>
    %598 = arith.mulf %547, %597 : vector<4x64xf32>
    %599 = vector.broadcast %596 : vector<1x64xf32> to vector<4x64xf32>
    %600 = arith.addf %598, %599 : vector<4x64xf32>
    %cst_296 = arith.constant 0.000000e+00 : f32
    %601 = vector.broadcast %cst_296 : f32 to vector<4x64xf32>
    %602 = arith.maximumf %600, %601 : vector<4x64xf32>
    %603 = tpu.iota {dimensions = array<i32: 0>} : vector<64x16xi32>
    %604 = arith.sitofp %603 : vector<64x16xi32> to vector<64x16xf32>
    %605 = tpu.iota {dimensions = array<i32: 1>} : vector<64x16xi32>
    %606 = arith.sitofp %605 : vector<64x16xi32> to vector<64x16xf32>
    %cst_297 = arith.constant 6.250000e-02 : f32
    %607 = vector.broadcast %cst_297 : f32 to vector<64x16xf32>
    %608 = arith.mulf %604, %607 : vector<64x16xf32>
    %609 = math.floor %608 : vector<64x16xf32>
    %cst_298 = arith.constant 1.600000e+01 : f32
    %610 = vector.broadcast %cst_298 : f32 to vector<64x16xf32>
    %611 = arith.mulf %610, %609 : vector<64x16xf32>
    %612 = arith.subf %604, %611 : vector<64x16xf32>
    %613 = arith.cmpf oeq, %612, %606 : vector<64x16xf32>
    %614 = arith.extui %613 : vector<64x16xi1> to vector<64x16xi32>
    %615 = arith.sitofp %614 : vector<64x16xi32> to vector<64x16xf32>
    %c0_299 = arith.constant 0 : index
    %c0_300 = arith.constant 0 : index
    %616 = vector.load %arg11[%c0_299, %c0_300] : memref<16x10xf32, #tpu.memory_space<vmem>>, vector<16x10xf32>
    %cst_301 = arith.constant dense<0.000000e+00> : vector<64xf32>
    %617 = vector.multi_reduction <add>, %602, %cst_301 [0] : vector<4x64xf32> to vector<64xf32>
    %618 = vector.shape_cast %617 : vector<64xf32> to vector<1x64xf32>
    %cst_302 = arith.constant dense<0.000000e+00> : vector<1x16xf32>
    %619 = tpu.matmul %618, %615, %cst_302 {dimension_numbers = #tpu.dot_dimension_numbers<[1], [0], [0], [1], [0, 0, 1, 1], [], []>} : vector<1x64xf32>, vector<64x16xf32>, vector<1x16xf32> -> vector<1x16xf32>
    %cst_303 = arith.constant 6.250000e-02 : f32
    %620 = vector.broadcast %cst_303 : f32 to vector<1x16xf32>
    %621 = arith.mulf %619, %620 : vector<1x16xf32>
    %cst_304 = arith.constant dense<0.000000e+00> : vector<1x10xf32>
    %622 = tpu.matmul %621, %616, %cst_304 {dimension_numbers = #tpu.dot_dimension_numbers<[1], [0], [0], [1], [0, 0, 1, 1], [], []>} : vector<1x16xf32>, vector<16x10xf32>, vector<1x10xf32> -> vector<1x10xf32>
    %cst_305 = arith.constant dense<0xFF800000> : vector<1xf32>
    %623 = vector.multi_reduction <maximumf>, %622, %cst_305 [1] : vector<1x10xf32> to vector<1xf32>
    %624 = vector.shape_cast %623 : vector<1xf32> to vector<1x1xf32>
    %625 = vector.broadcast %624 : vector<1x1xf32> to vector<1x10xf32>
    %626 = arith.subf %622, %625 : vector<1x10xf32>
    %627 = math.exp %626 : vector<1x10xf32>
    %cst_306 = arith.constant dense<0.000000e+00> : vector<1xf32>
    %628 = vector.multi_reduction <add>, %627, %cst_306 [1] : vector<1x10xf32> to vector<1xf32>
    %629 = vector.shape_cast %628 : vector<1xf32> to vector<1x1xf32>
    %630 = math.log %629 : vector<1x1xf32>
    %631 = vector.broadcast %630 : vector<1x1xf32> to vector<1x10xf32>
    %632 = arith.subf %626, %631 : vector<1x10xf32>
    %c0_307 = arith.constant 0 : index
    %c0_308 = arith.constant 0 : index
    %c0_309 = arith.constant 0 : index
    %633 = vector.load %arg12[%c0_307, %c0_308, %c0_309] : memref<1x1x10xf32, #tpu.memory_space<vmem>>, vector<1x1x10xf32>
    %634 = vector.shape_cast %633 : vector<1x1x10xf32> to vector<1x10xf32>
    %635 = vector.shape_cast %632 : vector<1x10xf32> to vector<1x1x10xf32>
    tpu.vector_store %arg12[%c0_307, %c0_308, %c0_309], %635 {strides = array<i32>} : memref<1x1x10xf32, #tpu.memory_space<vmem>>, vector<1x1x10xf32>,
    return
  }
  func.func @transform_0(%arg0: i32) -> (i32, i32, i32) {
    %c0_i32 = arith.constant 0 : i32
    %c0_i32_0 = arith.constant 0 : i32
    %c0_i32_1 = arith.constant 0 : i32
    return %arg0, %c0_i32, %c0_i32_0 : i32, i32, i32
  }
  func.func @transform_1(%arg0: i32) -> (i32, i32, i32) {
    %c0_i32 = arith.constant 0 : i32
    %c0_i32_0 = arith.constant 0 : i32
    %c0_i32_1 = arith.constant 0 : i32
    %c0_i32_2 = arith.constant 0 : i32
    return %c0_i32, %c0_i32_0, %c0_i32_1 : i32, i32, i32
  }
  func.func @transform_2(%arg0: i32) -> (i32, i32, i32) {
    %c0_i32 = arith.constant 0 : i32
    %c0_i32_0 = arith.constant 0 : i32
    %c0_i32_1 = arith.constant 0 : i32
    %c0_i32_2 = arith.constant 0 : i32
    return %c0_i32, %c0_i32_0, %c0_i32_1 : i32, i32, i32
  }
  func.func @transform_3(%arg0: i32) -> (i32, i32, i32) {
    %c0_i32 = arith.constant 0 : i32
    %c0_i32_0 = arith.constant 0 : i32
    %c0_i32_1 = arith.constant 0 : i32
    %c0_i32_2 = arith.constant 0 : i32
    return %c0_i32, %c0_i32_0, %c0_i32_1 : i32, i32, i32
  }
  func.func @transform_4(%arg0: i32) -> (i32, i32, i32) {
    %c0_i32 = arith.constant 0 : i32
    %c0_i32_0 = arith.constant 0 : i32
    %c0_i32_1 = arith.constant 0 : i32
    %c0_i32_2 = arith.constant 0 : i32
    return %c0_i32, %c0_i32_0, %c0_i32_1 : i32, i32, i32
  }
  func.func @transform_5(%arg0: i32) -> (i32, i32, i32) {
    %c0_i32 = arith.constant 0 : i32
    %c0_i32_0 = arith.constant 0 : i32
    %c0_i32_1 = arith.constant 0 : i32
    %c0_i32_2 = arith.constant 0 : i32
    return %c0_i32, %c0_i32_0, %c0_i32_1 : i32, i32, i32
  }
  func.func @transform_6(%arg0: i32) -> (i32, i32, i32) {
    %c0_i32 = arith.constant 0 : i32
    %c0_i32_0 = arith.constant 0 : i32
    %c0_i32_1 = arith.constant 0 : i32
    %c0_i32_2 = arith.constant 0 : i32
    return %c0_i32, %c0_i32_0, %c0_i32_1 : i32, i32, i32
  }
  func.func @transform_7(%arg0: i32) -> (i32, i32, i32) {
    %c0_i32 = arith.constant 0 : i32
    %c0_i32_0 = arith.constant 0 : i32
    %c0_i32_1 = arith.constant 0 : i32
    %c0_i32_2 = arith.constant 0 : i32
    return %c0_i32, %c0_i32_0, %c0_i32_1 : i32, i32, i32
  }
  func.func @transform_8(%arg0: i32) -> (i32, i32) {
    %c0_i32 = arith.constant 0 : i32
    %c0_i32_0 = arith.constant 0 : i32
    %c0_i32_1 = arith.constant 0 : i32
    return %c0_i32, %c0_i32_0 : i32, i32
  }
  func.func @transform_9(%arg0: i32) -> (i32, i32) {
    %c0_i32 = arith.constant 0 : i32
    %c0_i32_0 = arith.constant 0 : i32
    %c0_i32_1 = arith.constant 0 : i32
    return %c0_i32, %c0_i32_0 : i32, i32
  }
  func.func @transform_10(%arg0: i32) -> (i32, i32) {
    %c0_i32 = arith.constant 0 : i32
    %c0_i32_0 = arith.constant 0 : i32
    %c0_i32_1 = arith.constant 0 : i32
    return %c0_i32, %c0_i32_0 : i32, i32
  }
  func.func @transform_11(%arg0: i32) -> (i32, i32, i32) {
    %c0_i32 = arith.constant 0 : i32
    %c0_i32_0 = arith.constant 0 : i32
    %c0_i32_1 = arith.constant 0 : i32
    return %arg0, %c0_i32, %c0_i32_0 : i32, i32, i32
  }
}

</mosaic_0001>

<bundles_post_ra>
// kernel: _lambda_.1
= control target key start
LH: loop header
LB: loop body
LE: loop exit
PB: predicated region body
PF: predicated region fallthrough
CT: control target
= control target key end

     0   :  { %s9577_s17 = smov 0   ;;  %s12873_s0 = inlined_call_operand.vmem [shape: f32[4,30,30], index: 0, kind: input, shape index: {}]   ;;  %s12874_s1 = inlined_call_operand.vmem [shape: bf16[3,30,224], index: 1, kind: input, shape index: {}]   ;;  %s12875_s2 = inlined_call_operand.vmem [shape: bf16[3,240,224], index: 2, kind: input, shape index: {}]   ;;  %s12876_s3 = inlined_call_operand.vmem [shape: bf16[3,112,144], index: 3, kind: input, shape index: {}]   ;;  %s12877_s4 = inlined_call_operand.vmem [shape: bf16[3,144,120], index: 4, kind: input, shape index: {}]   ;;  %s12878_s5 = inlined_call_operand.vmem [shape: bf16[3,120,96], index: 5, kind: input, shape index: {}]   ;;  %s12879_s6 = inlined_call_operand.vmem [shape: bf16[3,96,96], index: 6, kind: input, shape index: {}]   ;;  %s12880_s7 = inlined_call_operand.vmem [shape: bf16[3,96,64], index: 7, kind: input, shape index: {}]   ;;  %s12881_s8 = inlined_call_operand.vmem [shape: f32[7,16], index: 8, kind: input, shape index: {}]   ;;  %s12882_s9 = inlined_call_operand.vmem [shape: f32[7,16], index: 9, kind: input, shape index: {}]   ;;  %s12883_s10 = inlined_call_operand.vmem [shape: f32[16,10], index: 10, kind: input, shape index: {}]   ;;  %s12884_s11 = inlined_call_operand.vmem [shape: f32[4,1,10], index: 11, kind: output, shape index: {}]  }
   0x1 LB: > { %s7356_s18 = sadd.s32 4294967295, %s9511_s17   ;;  %p7360_p0 = scmp.ge.s32.totalorder %s9511_s17, 1  ;;  %s9511_s17 = sphi %s9577_s17, %s21_s17  }
   0x2   : > { %p337_p1 = scmp.lt.s32.totalorder %s9511_s17, 5 }
   0x4   : > { %p338_p2 = pnand %p7360_p0, %p337_p1 }
   0x6   : > { %341 = sbr.rel (%p338_p2) target bundleno = 6318 (0x18ae), region = 64 }
   0xb   : > { %v9184_v0 = vld [vmem:[%s12874_s1 + $0x34] ss:$8 sps:$4 sm:$0x7f]   ;;  %vm12885_vm0 = vcmask 1046528   ;;  %v9187_v2 = vld [vmem:[%s12874_s1 + $0x24] ss:$8 sps:$4 sm:$0xff]   ;;  %v675_v7 = vlaneseq }
   0xc   : > { %v9186_v1 = vld [vmem:[%s12874_s1 + $0x30] ss:$8 sps:$4 sm:$0x7f]   ;;  %7375 = vmatprep.subr.msk.bf16.mxu0 %vm12885_vm0, %v9184_v0  ;;  %9168 = vmatprep.subr.msk.bf16.mxu1 %vm12885_vm0, %v9184_v0  ;;  %v9189_v3 = vld [vmem:[%s12874_s1 + $0x20] ss:$8 sps:$4 sm:$0xff]   ;;  %p375_p3 = scmp.lt.s32.totalorder %s7356_s18, 3 }
   0xd   : > { %v437_v4 = vsel %vm12885_vm0, %v9186_v1, 0  ;;  %v12898_v5 = vmov 0   ;;  %v9190_v6 = vld [vmem:[%s12874_s1 + $0x14] ss:$8 sps:$4 sm:$0x7f]   ;;  %vm428_vm1 = vcmask 244736  }
   0xe   : > { %474 = vmatprep.mubr.bf16.mxu0 %v12898_v5  ;;  %484 = vmatprep.mubr.bf16.mxu1 %v12898_v5  ;;  %s13355_s18 = smov (!%p375_p3, %s7356_s18), 3  ;;  %v9192_v8 = vld [vmem:[%s12874_s1 + $0x54] ss:$8 sps:$4 sm:$0x7f]   ;;  %v9625_v14 = vshrl.u32 %v675_v7, 7  ;;  %v9656_v33 = vand.u32 127, %v675_v7 }
   0xf   : > { %455 = vmatpush1.bf16.msra.mxu0 %v437_v4  ;;  %9170 = vmatpush1.bf16.msra.mxu1 %v437_v4  ;;  %v9194_v9 = vld [vmem:[%s12874_s1 + $0x10] ss:$8 sps:$4 sm:$0x7f]   ;;  %s8476_s14 = sshll.u32 %s13355_s18, 5  ;;  %v9198_v20 = vld [vmem:[%s12874_s1 + $0x4] ss:$8 sps:$4 sm:$0xff]   ;;  %s382_s26 = scalar_lea.vmem %s12884_s11, %s13355_s18 }
  0x10   : > { %456 = vmatprep.subr.bf16.mxu0 %v9187_v2  ;;  %9169 = vmatprep.subr.bf16.mxu1 %v9187_v2  ;;  %v9195_v10 = vld [vmem:[%s12874_s1 + $0x50] ss:$8 sps:$4 sm:$0x7f]   ;;  %s9620_s21 = scalar_lea.vmem %s12873_s0, %s8476_s14  ;;  %v520_v19 = vsel %vm12885_vm0, %v9194_v9, 0  ;;  %v9201_v21 = vld [vmem:[%s12874_s1 + $0x44] ss:$8 sps:$4 sm:$0xff]   ;;  %v9677_v48 = vcvt.s32.f32 %v9656_v33 }
  0x11   : > { %v404_v11 = vld [vmem:[%s9620_s21 + $0x1] sm:$0xff]  ;;  %v405_v12 = vld [vmem:[%s9620_s21 + $0x9] sm:$0xff]  ;;  %v406_v13 = vld [vmem:[%s9620_s21 + $0x11] sm:$0xff]  ;;  %v609_v17 = vsel %vm12885_vm0, %v9195_v10, 0  ;;  %v691_v22 = vadd.s32 120, %v9625_v14  ;;  %v690_v26 = vadd.s32 112, %v9625_v14 }
  0x12   : > { %v408_v15 = vpack.c.bf16 %v405_v12, %v404_v11  ;;  %v407_v16 = vld [vmem:[%s9620_s21 + $0x19] sm:$0xf]  ;;  %v9196_v23 = vld [vmem:[%s12874_s1] ss:$8 sps:$4 sm:$0xff]   ;;  %v689_v27 = vadd.s32 104, %v9625_v14  ;;  %v688_v32 = vadd.s32 96, %v9625_v14 }
  0x13   : > { %457 = vmatpush1.bf16.msra.mxu0 %v9189_v3  ;;  %9171 = vmatpush1.bf16.msra.mxu1 %v9189_v3  ;;  %v409_v18 = vpack.c.bf16 %v407_v16, %v406_v13  ;;  %v9199_v24 = vld [vmem:[%s12874_s1 + $0x40] ss:$8 sps:$4 sm:$0xff]   ;;  %v9653_v31 = vcvt.s32.f32 %v691_v22  ;;  %v9658_v34 = vcvt.s32.f32 %v690_v26  ;;  %v687_v38 = vadd.s32 88, %v9625_v14  ;;  %v580_v52 = vld [vmem:[%s9620_s21 + $0x12] sm:$0xff]  ;;  %v581_v53 = vld [vmem:[%s9620_s21 + $0x1a] sm:$0xf] }
  0x14   : > { %7382 = vmatprep.subr.msk.bf16.mxu1 %vm12885_vm0, %v9190_v6  ;;  %7389 = vmatprep.subr.msk.bf16.mxu0 %vm12885_vm0, %v9192_v8  ;;  %v398_v25 = vld [vmem:[%s9620_s21] sm:$0xff]  ;;  %v399_v28 = vld [vmem:[%s9620_s21 + $0x8] sm:$0xff]  ;;  %v9660_v35 = vcvt.s32.f32 %v689_v27  ;;  %v9664_v37 = vcvt.s32.f32 %v688_v32  ;;  %v686_v39 = vadd.s32 80, %v9625_v14  ;;  %v12928_v49 = vmov 0.0   ;;  %v400_v58 = vld [vmem:[%s9620_s21 + $0x10] sm:$0xff] }
  0x15   : > { %v578_v29 = vld [vmem:[%s9620_s21 + $0x2] sm:$0xff]  ;;  %v579_v30 = vld [vmem:[%s9620_s21 + $0xa] sm:$0xff]  ;;  %v750_v36 = vmul.f32 0.125, %v9653_v31  ;;  %v402_v40 = vpack.c.bf16 %v399_v28, %v398_v25  ;;  %v749_v42 = vmul.f32 0.125, %v9658_v34  ;;  %v9672_v46 = vcvt.s32.f32 %v687_v38  ;;  %v401_v59 = vld [vmem:[%s9620_s21 + $0x18] sm:$0xf] }
  0x16   : > { %7376 = vmatmul.mubr.msk.bf16.vlgmr.msra.gmra.mxu0 %vm428_vm1, %v408_v15  ;;  %7377 = vmatmul.mubr.msk.bf16.vlgmr.msra.gmra.mxu1 %vm428_vm1, %v409_v18  ;;  %v582_v41 = vpack.c.bf16 %v579_v30, %v578_v29  ;;  %v748_v43 = vmul.f32 0.125, %v9660_v35  ;;  %v747_v45 = vmul.f32 0.125, %v9664_v37  ;;  %v9674_v47 = vcvt.s32.f32 %v686_v39 }
  0x17   : > { %627 = vmatpush1.bf16.msra.mxu0 %v609_v17  ;;  %538 = vmatpush1.bf16.msra.mxu1 %v520_v19  ;;  %v778_v44 = vfloor.f32 %v750_v36  ;;  %v777_v50 = vfloor.f32 %v749_v42  ;;  %v746_v56 = vmul.f32 0.125, %v9672_v46  ;;  %v13037_v4 = vmov 0 }
  0x18   : > { %628 = vmatprep.subr.bf16.mxu0 %v9201_v21  ;;  %539 = vmatprep.subr.bf16.mxu1 %v9198_v20  ;;  %v776_v51 = vfloor.f32 %v748_v43  ;;  %v775_v55 = vfloor.f32 %v747_v45  ;;  %v745_v57 = vmul.f32 0.125, %v9674_v47  ;;  %v583_v9 = vpack.c.bf16 %v581_v53, %v580_v52 }
  0x19   : > { %557 = vmatprep.mubr.bf16.mxu1 %v12898_v5  ;;  %646 = vmatprep.mubr.bf16.mxu0 %v12898_v5  ;;  %v806_v54 = vmul.f32 8.0, %v778_v44  ;;  %v805_v60 = vmul.f32 8.0, %v777_v50  ;;  %v774_v0 = vfloor.f32 %v746_v56  ;;  %v12944_v10 = vmov 1.0  }
  0x1a   : > { %v804_v61 = vmul.f32 8.0, %v776_v51  ;;  %v803_v63 = vmul.f32 8.0, %v775_v55  ;;  %v773_v1 = vfloor.f32 %v745_v57  ;;  %v13040_v11 = vmov 0 }
  0x1b   : > { %629 = vmatpush1.bf16.msra.mxu0 %v9199_v24  ;;  %540 = vmatpush1.bf16.msra.mxu1 %v9196_v23  ;;  %v834_v62 = vsub.f32 %v9653_v31, %v806_v54  ;;  %v833_v2 = vsub.f32 %v9658_v34, %v805_v60  ;;  %v802_v7 = vmul.f32 8.0, %v774_v0  ;;  %v403_v12 = vpack.c.bf16 %v401_v59, %v400_v58 }
  0x1c   : > { %1081 = vmatprep.subr.mxu0 %v12928_v49  ;;  %1007 = vmatprep.subr.mxu1 %v12928_v49  ;;  %v832_v3 = vsub.f32 %v9660_v35, %v804_v61  ;;  %v831_v6 = vsub.f32 %v9664_v37, %v803_v63  ;;  %v801_v8 = vmul.f32 8.0, %v773_v1  ;;  %v13043_v13 = vmov 0 }
  0x1d   : > { %vm9695_vm2 = vcmp.eq.f32.partialorder %v834_v62, %v9677_v48  ;;  %vm9704_vm3 = vcmp.eq.f32.partialorder %v833_v2, %v9677_v48  ;;  %v830_v15 = vsub.f32 %v9672_v46, %v802_v7  ;;  %v13046_v16 = vmov 0 }
  0x1e   : > { %7390 = vmatmul.mubr.msk.bf16.vlgmr.msra.gmra.mxu0 %vm428_vm1, %v582_v41  ;;  %7383 = vmatmul.mubr.msk.bf16.vlgmr.msra.gmra.mxu1 %vm428_vm1, %v402_v40  ;;  %v13038_v4 = vsel %vm9695_vm2, 4294967295, %v13037_v4  ;;  %v13041_v11 = vsel %vm9704_vm3, 4294967295, %v13040_v11  ;;  %vm9714_vm4 = vcmp.eq.f32.partialorder %v832_v3, %v9677_v48  ;;  %vm9728_vm5 = vcmp.eq.f32.partialorder %v831_v6, %v9677_v48 }
  0x1f   : > { %656 = vmatprep.mubr.bf16.mxu0 %v12898_v5  ;;  %567 = vmatprep.mubr.bf16.mxu1 %v12898_v5  ;;  %13039 = vst [vmem:[#allocation8_spill] sm:$0xff] %v13038_v4  ;;  %13042 = vst [vmem:[#allocation9_spill] sm:$0xff] %v13041_v11  ;;  %v13044_v13 = vsel %vm9714_vm4, 4294967295, %v13043_v13  ;;  %v13047_v16 = vsel %vm9728_vm5, 4294967295, %v13046_v16  ;;  %v829_v17 = vsub.f32 %v9674_v47, %v801_v8  ;;  %v13049_v18 = vmov 0 }
  0x20   : > { %7422 = vmatpush1.msk.msra.mxu1 %vm9695_vm2, %v12944_v10  ;;  %7451 = vmatpush1.msk.msra.mxu0 %vm9695_vm2, %v12944_v10  ;;  %13045 = vst [vmem:[#allocation10_spill] sm:$0xff] %v13044_v13  ;;  %13048 = vst [vmem:[#allocation11_spill] sm:$0xff] %v13047_v16  ;;  %vm9740_vm6 = vcmp.eq.f32.partialorder %v830_v15, %v9677_v48  ;;  %v13052_v19 = vmov 0  ;;  %v685_v20 = vadd.s32 72, %v9625_v14  ;;  %v684_v22 = vadd.s32 64, %v9625_v14 }
  0x21   : > { %1009 = vmatprep.subr.mxu1 %v12928_v49  ;;  %1083 = vmatprep.subr.mxu0 %v12928_v49  ;;  %v13050_v18 = vsel %vm9740_vm6, 4294967295, %v13049_v18  ;;  %vm9753_vm7 = vcmp.eq.f32.partialorder %v829_v17, %v9677_v48  ;;  %v683_v25 = vadd.s32 56, %v9625_v14  ;;  %v682_v29 = vadd.s32 48, %v9625_v14 }
  0x22   : > { %7423 = vmatpush1.msk.msra.mxu1 %vm9704_vm3, %v12944_v10  ;;  %7452 = vmatpush1.msk.msra.mxu0 %vm9704_vm3, %v12944_v10  ;;  %13051 = vst [vmem:[#allocation12_spill] sm:$0xff] %v13050_v18  ;;  %v13053_v19 = vsel %vm9753_vm7, 4294967295, %v13052_v19  ;;  %v9778_v21 = vcvt.s32.f32 %v685_v20  ;;  %v9782_v24 = vcvt.s32.f32 %v684_v22  ;;  %v681_v39 = vadd.s32 40, %v9625_v14 }
  0x23   : > { %1011 = vmatprep.subr.mxu1 %v12928_v49  ;;  %1085 = vmatprep.subr.mxu0 %v12928_v49  ;;  %13054 = vst [vmem:[#allocation13_spill] sm:$0xff] %v13053_v19  ;;  %v9786_v28 = vcvt.s32.f32 %v683_v25  ;;  %v9790_v38 = vcvt.s32.f32 %v682_v29  ;;  %v680_v45 = vadd.s32 32, %v9625_v14  ;;  %v13055_v50 = vmov 0 }
  0x24   : > { %7424 = vmatpush1.msk.msra.mxu1 %vm9714_vm4, %v12944_v10  ;;  %7453 = vmatpush1.msk.msra.mxu0 %vm9714_vm4, %v12944_v10  ;;  %v744_v23 = vmul.f32 0.125, %v9778_v21  ;;  %v743_v27 = vmul.f32 0.125, %v9782_v24  ;;  %v9795_v44 = vcvt.s32.f32 %v681_v39  ;;  %v679_v56 = vadd.s32 24, %v9625_v14 }
  0x25   : > { %1013 = vmatprep.subr.mxu1 %v12928_v49  ;;  %1087 = vmatprep.subr.mxu0 %v12928_v49  ;;  %v742_v36 = vmul.f32 0.125, %v9786_v28  ;;  %v741_v43 = vmul.f32 0.125, %v9790_v38  ;;  %v9811_v55 = vcvt.s32.f32 %v680_v45  ;;  %v13058_v57 = vmov 0 }
  0x26   : > { %7391 = vmatmul.mubr.msk.bf16.gmra.mxu0 %vm428_vm1, %v583_v9  ;;  %7384 = vmatmul.mubr.msk.bf16.gmra.mxu1 %vm428_vm1, %v403_v12  ;;  %v772_v26 = vfloor.f32 %v744_v23  ;;  %v771_v32 = vfloor.f32 %v743_v27  ;;  %v740_v54 = vmul.f32 0.125, %v9795_v44  ;;  %v678_v60 = vadd.s32 16, %v9625_v14 }
  0x27   : > { %7425 = vmatpush1.msk.msra.mxu1 %vm9728_vm5, %v12944_v10  ;;  %7454 = vmatpush1.msk.msra.mxu0 %vm9728_vm5, %v12944_v10  ;;  %v770_v42 = vfloor.f32 %v742_v36  ;;  %v769_v53 = vfloor.f32 %v741_v43  ;;  %v739_v62 = vmul.f32 0.125, %v9811_v55  ;;  %v9830_v63 = vcvt.s32.f32 %v679_v56 }
  0x28   : > { %1015 = vmatprep.subr.mxu1 %v12928_v49  ;;  %1089 = vmatprep.subr.mxu0 %v12928_v49  ;;  %v800_v30 = vmul.f32 8.0, %v772_v26  ;;  %v799_v41 = vmul.f32 8.0, %v771_v32  ;;  %v768_v61 = vfloor.f32 %v740_v54  ;;  %v13061_v0 = vmov 0 }
  0x29   : > { %7426 = vmatpush1.msk.msra.mxu1 %vm9740_vm6, %v12944_v10  ;;  %7455 = vmatpush1.msk.msra.mxu0 %vm9740_vm6, %v12944_v10  ;;  %v798_v52 = vmul.f32 8.0, %v770_v42  ;;  %v797_v59 = vmul.f32 8.0, %v769_v53  ;;  %v9840_v2 = vcvt.s32.f32 %v678_v60  ;;  %v767_v6 = vfloor.f32 %v739_v62 }
  0x2a   : > { %1017 = vmatprep.subr.mxu1 %v12928_v49  ;;  %1091 = vmatprep.subr.mxu0 %v12928_v49  ;;  %v828_v40 = vsub.f32 %v9778_v21, %v800_v30  ;;  %v827_v51 = vsub.f32 %v9782_v24, %v799_v41  ;;  %v796_v3 = vmul.f32 8.0, %v768_v61  ;;  %v738_v7 = vmul.f32 0.125, %v9830_v63 }
  0x2b   : > { %7427 = vmatpush1.msk.msra.mxu1 %vm9753_vm7, %v12944_v10  ;;  %7456 = vmatpush1.msk.msra.mxu0 %vm9753_vm7, %v12944_v10  ;;  %v826_v58 = vsub.f32 %v9786_v28, %v798_v52  ;;  %v825_v1 = vsub.f32 %v9790_v38, %v797_v59  ;;  %v677_v8 = vadd.s32 8, %v9625_v14  ;;  %v13064_v9 = vmov 0 }
  0x2c   : > { %1019 = vmatprep.subr.mxu1 %v12928_v49  ;;  %1093 = vmatprep.subr.mxu0 %v12928_v49  ;;  %vm9799_vm8 = vcmp.eq.f32.partialorder %v828_v40, %v9677_v48  ;;  %vm9816_vm9 = vcmp.eq.f32.partialorder %v827_v51, %v9677_v48  ;;  %v737_v12 = vmul.f32 0.125, %v9840_v2  ;;  %v824_v15 = vsub.f32 %v9795_v44, %v796_v3 }
  0x2d   : > { %v13056_v50 = vsel %vm9799_vm8, 4294967295, %v13055_v50  ;;  %7428 = vmatpush1.msk.msra.mxu1 %vm9799_vm8, %v12944_v10  ;;  %7457 = vmatpush1.msk.msra.mxu0 %vm9799_vm8, %v12944_v10  ;;  %v13059_v57 = vsel %vm9816_vm9, 4294967295, %v13058_v57  ;;  %vm9834_vm10 = vcmp.eq.f32.partialorder %v826_v58, %v9677_v48  ;;  %vm9852_vm11 = vcmp.eq.f32.partialorder %v825_v1, %v9677_v48 }
  0x2e   : > { %13057 = vst [vmem:[#allocation14_spill] sm:$0xff] %v13056_v50  ;;  %1021 = vmatprep.subr.mxu1 %v12928_v49  ;;  %13060 = vst [vmem:[#allocation15_spill] sm:$0xff] %v13059_v57  ;;  %1095 = vmatprep.subr.mxu0 %v12928_v49  ;;  %v13062_v0 = vsel %vm9834_vm10, 4294967295, %v13061_v0  ;;  %v13065_v9 = vsel %vm9852_vm11, 4294967295, %v13064_v9  ;;  %v795_v17 = vmul.f32 8.0, %v767_v6  ;;  %v766_v20 = vfloor.f32 %v738_v7 }
  0x2f   : > { %7429 = vmatpush1.msk.msra.mxu1 %vm9816_vm9, %v12944_v10  ;;  %7458 = vmatpush1.msk.msra.mxu0 %vm9816_vm9, %v12944_v10  ;;  %13063 = vst [vmem:[#allocation16_spill] sm:$0xff] %v13062_v0  ;;  %13066 = vst [vmem:[#allocation17_spill] sm:$0xff] %v13065_v9  ;;  %v9865_v22 = vcvt.s32.f32 %v677_v8  ;;  %v765_v23 = vfloor.f32 %v737_v12  ;;  %vm9870_vm12 = vcmp.eq.f32.partialorder %v824_v15, %v9677_v48  ;;  %v13067_v25 = vmov 0 }
  0x30   : > { %1023 = vmatprep.subr.mxu1 %v12928_v49  ;;  %1097 = vmatprep.subr.mxu0 %v12928_v49  ;;  %v13068_v25 = vsel %vm9870_vm12, 4294967295, %v13067_v25  ;;  %v823_v26 = vsub.f32 %v9811_v55, %v795_v17  ;;  %v794_v27 = vmul.f32 8.0, %v766_v20  ;;  %v9883_v32 = vcvt.s32.f32 %v9625_v14 }
  0x31   : > { %7430 = vmatpush1.msk.msra.mxu1 %vm9834_vm10, %v12944_v10  ;;  %7459 = vmatpush1.msk.msra.mxu0 %vm9834_vm10, %v12944_v10  ;;  %13069 = vst [vmem:[#allocation18_spill] sm:$0xff] %v13068_v25  ;;  %v736_v29 = vmul.f32 0.125, %v9865_v22  ;;  %v793_v30 = vmul.f32 8.0, %v765_v23  ;;  %v703_v36 = vadd.s32 216, %v9625_v14  ;;  %v13070_v39 = vmov 0 }
  0x32   : > { %1025 = vmatprep.subr.mxu1 %v12928_v49  ;;  %1099 = vmatprep.subr.mxu0 %v12928_v49  ;;  %vm9888_vm13 = vcmp.eq.f32.partialorder %v823_v26, %v9677_v48  ;;  %v822_v40 = vsub.f32 %v9830_v63, %v794_v27  ;;  %v702_v42 = vadd.s32 208, %v9625_v14  ;;  %v735_v45 = vmul.f32 0.125, %v9883_v32 }
  0x33   : > { %7431 = vmatpush1.msk.msra.mxu1 %vm9852_vm11, %v12944_v10  ;;  %7460 = vmatpush1.msk.msra.mxu0 %vm9852_vm11, %v12944_v10  ;;  %v13071_v39 = vsel %vm9888_vm13, 4294967295, %v13070_v39  ;;  %v764_v41 = vfloor.f32 %v736_v29  ;;  %v821_v43 = vsub.f32 %v9840_v2, %v793_v30  ;;  %v9903_v51 = vcvt.s32.f32 %v703_v36 }
  0x34   : > { %1027 = vmatprep.subr.mxu1 %v12928_v49  ;;  %1101 = vmatprep.subr.mxu0 %v12928_v49  ;;  %13072 = vst [vmem:[#allocation19_spill] sm:$0xff] %v13071_v39  ;;  %vm9907_vm14 = vcmp.eq.f32.partialorder %v822_v40, %v9677_v48  ;;  %v13073_v52 = vmov 0  ;;  %v9912_v54 = vcvt.s32.f32 %v702_v42  ;;  %v701_v56 = vadd.s32 200, %v9625_v14 }
  0x35   : > { %7432 = vmatpush1.msk.msra.mxu1 %vm9870_vm12, %v12944_v10  ;;  %7461 = vmatpush1.msk.msra.mxu0 %vm9870_vm12, %v12944_v10  ;;  %v13074_v52 = vsel %vm9907_vm14, 4294967295, %v13073_v52  ;;  %v792_v53 = vmul.f32 8.0, %v764_v41  ;;  %vm9919_vm15 = vcmp.eq.f32.partialorder %v821_v43, %v9677_v48  ;;  %v13076_v58 = vmov 0 }
  0x36   : > { %1029 = vmatprep.subr.mxu1 %v12928_v49  ;;  %1103 = vmatprep.subr.mxu0 %v12928_v49  ;;  %13075 = vst [vmem:[#allocation20_spill] sm:$0xff] %v13074_v52  ;;  %v13077_v58 = vsel %vm9919_vm15, 4294967295, %v13076_v58  ;;  %v763_v59 = vfloor.f32 %v735_v45  ;;  %v762_v60 = vmul.f32 0.125, %v9903_v51  ;;  %v761_v62 = vmul.f32 0.125, %v9912_v54 }
  0x37   : > { %7433 = vmatpush1.msk.msra.mxu1 %vm9888_vm13, %v12944_v10  ;;  %7462 = vmatpush1.msk.msra.mxu0 %vm9888_vm13, %v12944_v10  ;;  %13078 = vst [vmem:[#allocation21_spill] sm:$0xff] %v13077_v58  ;;  %v820_v61 = vsub.f32 %v9865_v22, %v792_v53  ;;  %v9931_v1 = vcvt.s32.f32 %v701_v56  ;;  %v700_v3 = vadd.s32 192, %v9625_v14  ;;  %v13079_v8 = vmov 0 }
  0x38   : > { %1031 = vmatprep.subr.mxu1 %v12928_v49  ;;  %1105 = vmatprep.subr.mxu0 %v12928_v49  ;;  %v791_v6 = vmul.f32 8.0, %v763_v59  ;;  %v790_v7 = vfloor.f32 %v762_v60  ;;  %v789_v12 = vfloor.f32 %v761_v62  ;;  %v699_v26 = vadd.s32 184, %v9625_v14 }
  0x39   : > { %7434 = vmatpush1.msk.msra.mxu1 %vm9907_vm14, %v12944_v10  ;;  %7463 = vmatpush1.msk.msra.mxu0 %vm9907_vm14, %v12944_v10  ;;  %vm9942_vm1 = vcmp.eq.f32.partialorder %v820_v61, %v9677_v48  ;;  %v760_v15 = vmul.f32 0.125, %v9931_v1  ;;  %v9948_v17 = vcvt.s32.f32 %v700_v3  ;;  %v698_v36 = vadd.s32 176, %v9625_v14 }
  0x3a   : > { %1033 = vmatprep.subr.mxu1 %v12928_v49  ;;  %1107 = vmatprep.subr.mxu0 %v12928_v49  ;;  %v13080_v8 = vsel %vm9942_vm1, 4294967295, %v13079_v8  ;;  %v819_v20 = vsub.f32 %v9883_v32, %v791_v6  ;;  %v818_v23 = vmul.f32 8.0, %v790_v7  ;;  %v817_v27 = vmul.f32 8.0, %v789_v12 }
  0x3b   : > { %7435 = vmatpush1.msk.msra.mxu1 %vm9919_vm15, %v12944_v10  ;;  %7464 = vmatpush1.msk.msra.mxu0 %vm9919_vm15, %v12944_v10  ;;  %13081 = vst [vmem:[#allocation22_spill] sm:$0xff] %v13080_v8  ;;  %v788_v29 = vfloor.f32 %v760_v15  ;;  %v759_v30 = vmul.f32 0.125, %v9948_v17  ;;  %v13082_v40 = vmov 0  ;;  %v9968_v42 = vcvt.s32.f32 %v699_v26 }
  0x3c   : > { %1035 = vmatprep.subr.mxu1 %v12928_v49  ;;  %1109 = vmatprep.subr.mxu0 %v12928_v49  ;;  %vm9963_vm0 = vcmp.eq.f32.partialorder %v819_v20, %v9677_v48  ;;  %v846_v41 = vsub.f32 %v9903_v51, %v818_v23  ;;  %v845_v43 = vsub.f32 %v9912_v54, %v817_v27  ;;  %v9977_v56 = vcvt.s32.f32 %v698_v36 }
  0x3d   : > { %7436 = vmatpush1.msk.msra.mxu1 %vm9942_vm1, %v12944_v10  ;;  %7465 = vmatpush1.msk.msra.mxu0 %vm9942_vm1, %v12944_v10  ;;  %v13083_v40 = vsel %vm9963_vm0, 4294967295, %v13082_v40  ;;  %v816_v45 = vmul.f32 8.0, %v788_v29  ;;  %v787_v53 = vfloor.f32 %v759_v30  ;;  %v13086_v59 = vmov 0 }
  0x3e   : > { %1037 = vmatprep.subr.mxu1 %v12928_v49  ;;  %1111 = vmatprep.subr.mxu0 %v12928_v49  ;;  %13084 = vst [vmem:[#allocation23_spill] sm:$0xff] %v13083_v40  ;;  %13085 = vst [vmem:[#allocation24_spill] sm:$0xff] %v9977_v56  ;;  %vm9981_vm1 = vcmp.eq.f32.partialorder %v846_v41, %v9677_v48  ;;  %v758_v60 = vmul.f32 0.125, %v9968_v42  ;;  %v697_v61 = vadd.s32 168, %v9625_v14  ;;  %v13089_v62 = vmov 0 }
  0x3f   : > { %7437 = vmatpush1.msk.msra.mxu1 %vm9963_vm0, %v12944_v10  ;;  %7466 = vmatpush1.msk.msra.mxu0 %vm9963_vm0, %v12944_v10  ;;  %v13087_v59 = vsel %vm9981_vm1, 4294967295, %v13086_v59  ;;  %vm9992_vm0 = vcmp.eq.f32.partialorder %v845_v43, %v9677_v48  ;;  %v844_v3 = vsub.f32 %v9931_v1, %v816_v45  ;;  %v815_v6 = vmul.f32 8.0, %v787_v53 }
  0x40   : > { %1047 = vmatprep.subr.mxu1 %v12928_v49  ;;  %13088 = vst [vmem:[#allocation25_spill] sm:$0xff] %v13087_v59  ;;  %1121 = vmatprep.subr.mxu0 %v12928_v49  ;;  %v13090_v62 = vsel %vm9992_vm0, 4294967295, %v13089_v62  ;;  %v757_v7 = vmul.f32 0.125, %v9977_v56  ;;  %v786_v12 = vfloor.f32 %v758_v60  ;;  %v10003_v15 = vcvt.s32.f32 %v697_v61 }
  0x41   : > { %7438 = vmatpush2.msk.msra.mxu1 %vm9981_vm1, %v12944_v10  ;;  %13091 = vst [vmem:[#allocation26_spill] sm:$0xff] %v13090_v62  ;;  %7467 = vmatpush2.msk.msra.mxu0 %vm9981_vm1, %v12944_v10  ;;  %v696_v20 = vadd.s32 160, %v9625_v14  ;;  %vm10010_vm1 = vcmp.eq.f32.partialorder %v844_v3, %v9677_v48  ;;  %v13093_v23 = vmov 0  ;;  %v843_v26 = vsub.f32 %v9948_v17, %v815_v6 }
  0x42   : > { %1049 = vmatprep.subr.mxu1 %v12928_v49  ;;  %1123 = vmatprep.subr.mxu0 %v12928_v49  ;;  %13092 = vst [vmem:[#allocation27_spill] sm:$0xff] %v10003_v15  ;;  %v13094_v23 = vsel %vm10010_vm1, 4294967295, %v13093_v23  ;;  %v785_v27 = vfloor.f32 %v757_v7  ;;  %v695_v29 = vadd.s32 152, %v9625_v14  ;;  %v814_v30 = vmul.f32 8.0, %v786_v12 }
  0x43   : > { %7439 = vmatpush2.msk.msra.mxu1 %vm9992_vm0, %v12944_v10  ;;  %13095 = vst [vmem:[#allocation28_spill] sm:$0xff] %v13094_v23  ;;  %7468 = vmatpush2.msk.msra.mxu0 %vm9992_vm0, %v12944_v10  ;;  %v756_v36 = vmul.f32 0.125, %v10003_v15  ;;  %v10022_v41 = vcvt.s32.f32 %v696_v20  ;;  %vm10028_vm0 = vcmp.eq.f32.partialorder %v843_v26, %v9677_v48  ;;  %v13097_v43 = vmov 0 }
  0x44   : > { %1051 = vmatprep.subr.mxu1 %v12928_v49  ;;  %1125 = vmatprep.subr.mxu0 %v12928_v49  ;;  %v13098_v43 = vsel %vm10028_vm0, 4294967295, %v13097_v43  ;;  %v813_v45 = vmul.f32 8.0, %v785_v27  ;;  %v10035_v53 = vcvt.s32.f32 %v695_v29  ;;  %v694_v60 = vadd.s32 144, %v9625_v14 }
  0x45   : > { %13096 = vst [vmem:[#allocation29_spill] sm:$0xff] %v10022_v41  ;;  %7440 = vmatpush2.msk.msra.mxu1 %vm10010_vm1, %v12944_v10  ;;  %13099 = vst [vmem:[#allocation30_spill] sm:$0xff] %v13098_v43  ;;  %7469 = vmatpush2.msk.msra.mxu0 %vm10010_vm1, %v12944_v10  ;;  %v842_v61 = vsub.f32 %v9968_v42, %v814_v30  ;;  %v784_v3 = vfloor.f32 %v756_v36  ;;  %v755_v6 = vmul.f32 0.125, %v10022_v41  ;;  %v693_v26 = vadd.s32 136, %v9625_v14 }
  0x46   : > { %13100 = vst [vmem:[#allocation31_spill] sm:$0xff] %v10035_v53  ;;  %1053 = vmatprep.subr.mxu1 %v12928_v49  ;;  %1127 = vmatprep.subr.mxu0 %v12928_v49  ;;  %v841_v7 = vsub.f32 %v9977_v56, %v813_v45  ;;  %v754_v12 = vmul.f32 0.125, %v10035_v53  ;;  %v10050_v20 = vcvt.s32.f32 %v694_v60  ;;  %v13102_v27 = vmov 0 }
  0x47   : > { %7441 = vmatpush2.msk.msra.mxu1 %vm10028_vm0, %v12944_v10  ;;  %7470 = vmatpush2.msk.msra.mxu0 %vm10028_vm0, %v12944_v10  ;;  %vm10055_vm1 = vcmp.eq.f32.partialorder %v842_v61, %v9677_v48  ;;  %v812_v29 = vmul.f32 8.0, %v784_v3  ;;  %v783_v30 = vfloor.f32 %v755_v6  ;;  %v13105_v36 = vmov 0 }
  0x48   : > { %13101 = vst [vmem:[#allocation32_spill] sm:$0xff] %v10050_v20  ;;  %1055 = vmatprep.subr.mxu1 %v12928_v49  ;;  %v13103_v27 = vsel %vm10055_vm1, 4294967295, %v13102_v27  ;;  %1129 = vmatprep.subr.mxu0 %v12928_v49  ;;  %vm10064_vm0 = vcmp.eq.f32.partialorder %v841_v7, %v9677_v48  ;;  %v782_v45 = vfloor.f32 %v754_v12  ;;  %v753_v60 = vmul.f32 0.125, %v10050_v20 }
  0x49   : > { %13104 = vst [vmem:[#allocation33_spill] sm:$0xff] %v13103_v27  ;;  %7442 = vmatpush2.msk.msra.mxu1 %vm10055_vm1, %v12944_v10  ;;  %v13106_v36 = vsel %vm10064_vm0, 4294967295, %v13105_v36  ;;  %7471 = vmatpush2.msk.msra.mxu0 %vm10055_vm1, %v12944_v10  ;;  %v10072_v61 = vcvt.s32.f32 %v693_v26  ;;  %v840_v3 = vsub.f32 %v10003_v15, %v812_v29  ;;  %v811_v6 = vmul.f32 8.0, %v783_v30 }
  0x4a   : > { %13107 = vst [vmem:[#allocation34_spill] sm:$0xff] %v13106_v36  ;;  %1057 = vmatprep.subr.mxu1 %v12928_v49  ;;  %1131 = vmatprep.subr.mxu0 %v12928_v49  ;;  %v692_v7 = vadd.s32 128, %v9625_v14  ;;  %v810_v12 = vmul.f32 8.0, %v782_v45  ;;  %v781_v26 = vfloor.f32 %v753_v60  ;;  %v13109_v29 = vmov 0 }
  0x4b   : > { %13108 = vst [vmem:[#allocation35_spill] sm:$0xff] %v10072_v61  ;;  %7443 = vmatpush2.msk.msra.mxu1 %vm10064_vm0, %v12944_v10  ;;  %7472 = vmatpush2.msk.msra.mxu0 %vm10064_vm0, %v12944_v10  ;;  %v752_v5 = vmul.f32 0.125, %v10072_v61  ;;  %vm10087_vm1 = vcmp.eq.f32.partialorder %v840_v3, %v9677_v48  ;;  %v839_v30 = vsub.f32 %v10022_v41, %v811_v6  ;;  %v13113_v36 = vmov 0 }
  0x4c   : > { %1059 = vmatprep.subr.mxu1 %v12928_v49  ;;  %v13110_v29 = vsel %vm10087_vm1, 4294967295, %v13109_v29  ;;  %1133 = vmatprep.subr.mxu0 %v12928_v49  ;;  %v10093_v27 = vcvt.s32.f32 %v692_v7  ;;  %v838_v45 = vsub.f32 %v10035_v53, %v810_v12  ;;  %v809_v60 = vmul.f32 8.0, %v781_v26 }
  0x4d   : > { %13111 = vst [vmem:[#allocation36_spill] sm:$0xff] %v13110_v29  ;;  %7444 = vmatpush2.msk.msra.mxu1 %vm10087_vm1, %v12944_v10  ;;  %7473 = vmatpush2.msk.msra.mxu0 %vm10087_vm1, %v12944_v10  ;;  %v780_v3 = vfloor.f32 %v752_v5  ;;  %vm10104_vm0 = vcmp.eq.f32.partialorder %v839_v30, %v9677_v48  ;;  %v13116_v7 = vmov 0  ;;  %v13119_v30 = vmov 0 }
  0x4e   : > { %13112 = vst [vmem:[#allocation37_spill] sm:$0xff] %v10093_v27  ;;  %1061 = vmatprep.subr.mxu1 %v12928_v49  ;;  %v13114_v36 = vsel %vm10104_vm0, 4294967295, %v13113_v36  ;;  %1135 = vmatprep.subr.mxu0 %v12928_v49  ;;  %v751_v6 = vmul.f32 0.125, %v10093_v27  ;;  %vm10114_vm1 = vcmp.eq.f32.partialorder %v838_v45, %v9677_v48  ;;  %v837_v5 = vsub.f32 %v10050_v20, %v809_v60 }
  0x4f   : > { %13115 = vst [vmem:[#allocation38_spill] sm:$0xff] %v13114_v36  ;;  %7445 = vmatpush2.msk.msra.mxu1 %vm10104_vm0, %v12944_v10  ;;  %v13117_v7 = vsel %vm10114_vm1, 4294967295, %v13116_v7  ;;  %7474 = vmatpush2.msk.msra.mxu0 %vm10104_vm0, %v12944_v10  ;;  %v808_v12 = vmul.f32 8.0, %v780_v3  ;;  %v13122_v3 = vmov 0 }
  0x50   : > { %13118 = vst [vmem:[#allocation39_spill] sm:$0xff] %v13117_v7  ;;  %1063 = vmatprep.subr.mxu1 %v12928_v49  ;;  %1137 = vmatprep.subr.mxu0 %v12928_v49  ;;  %v779_v26 = vfloor.f32 %v751_v6  ;;  %vm10128_vm15 = vcmp.eq.f32.partialorder %v837_v5, %v9677_v48  ;;  %v13125_v5 = vmov 0 }
  0x51   : > { %7446 = vmatpush2.msk.msra.mxu1 %vm10114_vm1, %v12944_v10  ;;  %v13120_v30 = vsel %vm10128_vm15, 4294967295, %v13119_v30  ;;  %7475 = vmatpush2.msk.msra.mxu0 %vm10114_vm1, %v12944_v10  ;;  %v836_v45 = vsub.f32 %v10072_v61, %v808_v12 }
  0x52   : > { %13121 = vst [vmem:[#allocation40_spill] sm:$0xff] %v13120_v30  ;;  %1065 = vmatprep.subr.mxu1 %v12928_v49  ;;  %1139 = vmatprep.subr.mxu0 %v12928_v49  ;;  %v807_v60 = vmul.f32 8.0, %v779_v26 }
  0x53   : > { %7447 = vmatpush2.msk.msra.mxu1 %vm10128_vm15, %v12944_v10  ;;  %vm10142_vm0 = vcmp.eq.f32.partialorder %v836_v45, %v9677_v48  ;;  %7476 = vmatpush2.msk.msra.mxu0 %vm10128_vm15, %v12944_v10  ;;  %vm12982_vm15 = vcmask 781312  }
  0x54   : > { %v13123_v3 = vsel %vm10142_vm0, 4294967295, %v13122_v3  ;;  %1067 = vmatprep.subr.mxu1 %v12928_v49  ;;  %1141 = vmatprep.subr.mxu0 %v12928_v49  ;;  %v835_v6 = vsub.f32 %v10093_v27, %v807_v60 }
  0x55   : > { %13124 = vst [vmem:[#allocation41_spill] sm:$0xff] %v13123_v3  ;;  %7448 = vmatpush2.msk.msra.mxu1 %vm10142_vm0, %v12944_v10  ;;  %7477 = vmatpush2.msk.msra.mxu0 %vm10142_vm0, %v12944_v10  ;;  %vm12984_vm0 = vcmask 1043456  }
  0x56   : > { %1069 = vmatprep.subr.mxu1 %v12928_v49  ;;  %vm10160_vm1 = vcmp.eq.f32.partialorder %v835_v6, %v9677_v48  ;;  %1143 = vmatprep.subr.mxu0 %v12928_v49 }
  0x57   : > { %v13126_v5 = vsel %vm10160_vm1, 4294967295, %v13125_v5  ;;  %7449 = vmatpush2.msk.msra.mxu1 %vm10160_vm1, %v12944_v10  ;;  %7478 = vmatpush2.msk.msra.mxu0 %vm10160_vm1, %v12944_v10  ;;  %vm12983_vm1 = vcmask 785408  }
  0x58   : > { %13127 = vst [vmem:[#allocation42_spill] sm:$0xff] %v13126_v5 }
  0xd6   : > { %v476_v12 = vpop.f32.mrf.mxu0  ;;  %v486_v26 = vpop.f32.mrf.mxu1 }
  0xd8   : > { %v478_v45 = vpop.f32.mrf.mxu0  ;;  %v488_v60 = vpop.f32.mrf.mxu1 }
  0xda   : > { %v480_v3 = vpop.f32.mrf.mxu0  ;;  %v490_v30 = vpop.f32.mrf.mxu1 }
  0xdc   : > { %v482_v6 = vpop.f32.mrf.mxu0  ;;  %v492_v7 = vpop.f32.mrf.mxu1 }
  0xde   : > { %v648_v36 = vpop.f32.mrf.mxu0  ;;  %v559_v29 = vpop.f32.mrf.mxu1 }
  0xdf   : > { %v560_v40 = vadd.f32 %v559_v29, %v476_v12 }
  0xe0   : > { %v650_v43 = vpop.f32.mrf.mxu0  ;;  %v561_v49 = vpop.f32.mrf.mxu1 }
  0xe1   : > { %v562_v62 = vadd.f32 %v561_v49, %v478_v45  ;;  %v10175_v0 = vadd.f32 %v648_v36, %v560_v40 }
  0xe2   : > { %v652_v23 = vpop.f32.mrf.mxu0  ;;  %v563_v59 = vpop.f32.mrf.mxu1 }
  0xe3   : > { %v564_v8 = vadd.f32 %v563_v59, %v480_v3  ;;  %v10171_v39 = vadd.f32 %v650_v43, %v562_v62 }
  0xe4   : > { %v654_v58 = vpop.f32.mrf.mxu0  ;;  %v565_v5 = vpop.f32.mrf.mxu1 }
  0xe5   : > { %v566_v10 = vadd.f32 %v565_v5, %v482_v6  ;;  %v10173_v25 = vadd.f32 %v652_v23, %v564_v8  ;;  %v974_v62 = vmul.f32 %v10171_v39, %v10171_v39  ;;  %v959_v36 = vsel %vm12983_vm1, %v10171_v39, 0.0 }
  0xe6   : > { %v658_v52 = vpop.f32.mrf.mxu0  ;;  %v569_v9 = vpop.f32.mrf.mxu1 }
  0xe7   : > { %v10177_v57 = vadd.f32 %v654_v58, %v566_v10  ;;  %v570_v19 = vadd.f32 %v569_v9, %v486_v26  ;;  %v975_v8 = vmul.f32 %v10173_v25, %v10173_v25  ;;  %v973_v9 = vmul.f32 %v10175_v0, %v10175_v0 }
  0xe8   : > { %v660_v50 = vpop.f32.mrf.mxu0  ;;  %v571_v18 = vpop.f32.mrf.mxu1  ;;  %v947_v29 = vadd.f32 %v10173_v25, %v10175_v0  ;;  %v991_v26 = vsel %vm12983_vm1, %v974_v62, 0.0 }
  0xe9   : > { %v976_v49 = vmul.f32 %v10177_v57, %v10177_v57  ;;  %v572_v59 = vadd.f32 %v571_v18, %v488_v60  ;;  %v10185_v23 = vadd.f32 %v658_v52, %v570_v19  ;;  %v960_v58 = vsel %vm12983_vm1, %v10177_v57, 0.0 }
  0xea   : > { %v573_v40 = vpop.f32.mrf.mxu1  ;;  %v662_v10 = vpop.f32.mrf.mxu0  ;;  %v981_v45 = vadd.f32 %v975_v8, %v973_v9  ;;  %v961_v60 = vadd.f32 %v960_v58, %v959_v36 }
  0xeb   : > { %v10191_v43 = vadd.f32 %v660_v50, %v572_v59  ;;  %v574_v18 = vadd.f32 %v573_v40, %v490_v30  ;;  %v992_v19 = vsel %vm12983_vm1, %v976_v49, 0.0  ;;  %v977_v52 = vmul.f32 %v10185_v23, %v10185_v23 }
  0xec   : > { %v575_v3 = vpop.f32.mrf.mxu1  ;;  %v948_v6 = vadd.f32 %v947_v29, %v10185_v23  ;;  %v664_v49 = vpop.f32.mrf.mxu0 }
  0xed   : > { %v962_v5 = vsel %vm12983_vm1, %v10191_v43, 0.0  ;;  %v978_v50 = vmul.f32 %v10191_v43, %v10191_v43  ;;  %v10204_v12 = vadd.f32 %v662_v10, %v574_v18  ;;  %v576_v30 = vadd.f32 %v575_v3, %v492_v7 }
  0xee   : > { %v993_v10 = vadd.f32 %v992_v19, %v991_v26  ;;  %v982_v18 = vadd.f32 %v981_v45, %v977_v52  ;;  %v963_v7 = vadd.f32 %v962_v5, %v961_v60 }
  0xef   : > { %v994_v59 = vsel %vm12983_vm1, %v978_v50, 0.0  ;;  %v950_v40 = vsel %vm12984_vm0, %v10204_v12, 0.0  ;;  %v979_v16 = vmul.f32 %v10204_v12, %v10204_v12  ;;  %v10213_v13 = vadd.f32 %v664_v49, %v576_v30 }
  0xf0   : > { %v951_v3 = vadd.f32 %v950_v40, %v948_v6  ;;  %v995_v58 = vadd.f32 %v994_v59, %v993_v10 }
  0xf1   : > { %v983_v62 = vsel %vm12984_vm0, %v979_v16, 0.0  ;;  %v965_v8 = vsel %vm12982_vm15, %v10213_v13, 0.0  ;;  %v980_v9 = vmul.f32 %v10213_v13, %v10213_v13  ;;  %vm12991_vm0 = vcmask 64512  }
  0xf2   : > { %v952_v36 = vrot.slane %v951_v3, 4  ;;  %v984_v29 = vadd.f32 %v983_v62, %v982_v18  ;;  %v966_v50 = vadd.f32 %v965_v8, %v963_v7 }
  0xf3   : > { %v996_v11 = vsel %vm12982_vm15, %v980_v9, 0.0 }
  0xf4   : > { %v953_v30 = vadd.f32 %v952_v36, %v951_v3  ;;  %v985_v49 = vrot.slane %v984_v29, 4  ;;  %v967_v19 = vrot.slane %v966_v50, 4  ;;  %v997_v52 = vadd.f32 %v996_v11, %v995_v58 }
  0xf5   : > { %v13128_v36 = vmov 0.0  }
  0xf6   : > { %v954_v5 = vrot.slane %v953_v30, 2  ;;  %v986_v26 = vadd.f32 %v985_v49, %v984_v29  ;;  %v968_v45 = vadd.f32 %v967_v19, %v966_v50  ;;  %v998_v16 = vrot.slane %v997_v52, 4 }
  0xf7   : > { %v931_v29 = vadd.s32 128, %v9656_v33  ;;  %v933_v50 = vmul.f32 0.125, %v9677_v48  ;;  %v13132_v33 = vmov 0 }
  0xf8   : > { %v955_v60 = vadd.f32 %v954_v5, %v953_v30  ;;  %v987_v6 = vrot.slane %v986_v26, 2  ;;  %v969_v40 = vrot.slane %v968_v45, 2  ;;  %v999_v4 = vadd.f32 %v998_v16, %v997_v52 }
  0xf9   : > { %v10226_v30 = vcvt.s32.f32 %v931_v29 }
  0xfa   : > { %v988_v27 = vadd.f32 %v987_v6, %v986_v26  ;;  %v970_v61 = vadd.f32 %v969_v40, %v968_v45  ;;  %v1000_v59 = vrot.slane %v999_v4, 2  ;;  %v956_v10 = vrot.slane %v955_v60, 1 }
  0xfb   : > { %13129 = vst [vmem:[#allocation43_spill] sm:$0xff] %v10226_v30  ;;  %v13130_v26 = vmov 0  ;;  %v13134_v45 = vmov 1.0  }
  0xfc   : > { %v971_v18 = vrot.slane %v970_v61, 1  ;;  %v1001_v7 = vadd.f32 %v1000_v59, %v999_v4  ;;  %v989_v62 = vrot.slane %v988_v27, 1  ;;  %v957_v9 = vadd.f32 %v956_v10, %v955_v60 }
  0xfd   : > { %v935_v4 = vfloor.f32 %v933_v50  ;;  %v10267_v50 = vadd.f32 -8.0, %v10226_v30 }
  0xfe   : > { %v972_v8 = vadd.f32 %v971_v18, %v970_v61  ;;  %v1002_v3 = vrot.slane %v1001_v7, 1  ;;  %v990_v58 = vadd.f32 %v989_v62, %v988_v27  ;;  %v934_v61 = vmul.f32 0.125, %v10226_v30 }
  0xff   : > { %v10229_v49 = vmul.f32 8.0, %v935_v4  ;;  %v10272_v4 = vadd.f32 -8.0, %v9677_v48  ;;  %vm1395_vm13 = vcmp.eq.f32.partialorder %v9660_v35, %v10267_v50 }
 0x100   : > { %7450 = vmatprep.mubr.msk.f32.mxu1 %vm12983_vm1, %v972_v8  ;;  %v1003_v11 = vadd.f32 %v1002_v3, %v1001_v7  ;;  %v936_v19 = vfloor.f32 %v934_v61  ;;  %v1156_v8 = vld [vmem:[%s12881_s8] sm:$0x1]  ;;  %v10429_v61 = vsub.s32 0, %v9625_v14 }
 0x101   : > { %1072 = vmatmul.mubr.f32.vlgmr.msra.gmra.mxu1 %v957_v9  ;;  %v939_v27 = vsub.f32 %v9677_v48, %v10229_v49  ;;  %vm1398_vm14 = vcmp.eq.f32.partialorder %v9653_v31, %v10272_v4  ;;  %vm1394_vm12 = vcmp.eq.f32.partialorder %v9660_v35, %v10272_v4  ;;  %vm1392_vm11 = vcmp.eq.f32.partialorder %v9664_v37, %v10272_v4 }
 0x102   : > { %7479 = vmatprep.mubr.msk.f32.mxu0 %vm12983_vm1, %v1003_v11  ;;  %1229 = vmatprep.mubr.f32.mxu1 %v13128_v36  ;;  %v938_v52 = vmul.f32 8.0, %v936_v19  ;;  %v1157_v11 = vld [vmem:[%s12882_s9] sm:$0x1]  ;;  %13135 = vst [vmem:[#allocation44_spill] sm:$0xff] %v10429_v61 }
 0x103   : > { %1146 = vmatmul.mubr.f32.vlgmr.msra.gmra.mxu0 %v990_v58  ;;  %vm10235_vm15 = vcmp.eq.f32.partialorder %v939_v27, %v9883_v32 }
 0x104   : > { %v940_v5 = vsub.f32 %v10226_v30, %v938_v52  ;;  %v13131_v26 = vsel %vm10235_vm15, 4294967295, %v13130_v26  ;;  %v13179_v30 = vld [vmem:[#allocation34_spill] sm:$0xff] }
 0x106   : > { %vm10240_vm1 = vcmp.eq.f32.partialorder %v940_v5, %v9883_v32 }
 0x107   : > { %v13133_v33 = vsel %vm10240_vm1, 4294967295, %v13132_v33  ;;  %7480 = vmatprep.subr.msk.mxu1 %vm10240_vm1, %v13134_v45 }
 0x108   : > { %7481 = vmatpush1.msk.msra.mxu1 %vm10235_vm15, %v13134_v45 }
 0x109   : > { %7483 = vmatprep.subr.msk.mxu1 %vm10240_vm1, %v13134_v45  ;;  %vm1399_vm1 = vcmp.eq.f32.partialorder %v9653_v31, %v10267_v50 }
 0x10a   : > { %7558 = vmatprep.subr.msk.mxu0 %vm1399_vm1, %v13134_v45  ;;  %vm1393_vm1 = vcmp.eq.f32.partialorder %v9664_v37, %v10267_v50 }
 0x10b   : > { %7559 = vmatpush1.msk.msra.mxu0 %vm1398_vm14, %v13134_v45  ;;  %vm1391_vm14 = vcmp.eq.f32.partialorder %v9672_v46, %v10267_v50 }
 0x1c1   : > { %v1073_v16 = vpop.f32.mrf.mxu1 }
 0x1c2   : > { %v1077_v60 = vmul.f32 0.0012755102, %v1073_v16 }
 0x1c3   : > { %v1075_v6 = vpop.f32.mrf.mxu1  ;;  %v1147_v40 = vpop.f32.mrf.mxu0 }
 0x1c4   : > { %v1152_v59 = vmul.f32 %v1077_v60, %v1077_v60  ;;  %v1151_v10 = vmul.f32 0.0012755102, %v1147_v40 }
 0x1c5   : > { %v1149_v18 = vpop.f32.mrf.mxu0 }
 0x1c6   : > { %v1153_v7 = vsub.f32 %v1151_v10, %v1152_v59 }
 0x1c8   : > { %v1154_v62 = vadd.f32 1e-05, %v1153_v7 }
 0x1ca   : > { %9487 = vrsqrt.f32 %v1154_v62 }
 0x1d7   : > { %v9488_v3 = vpop.eup %9487 }
 0x1d8   : > { %v1158_v9 = vmul.f32 %v9488_v3, %v1156_v8 }
 0x1da   : > { %7482 = vmatmul.mubr.msk.f32.vlgmr.msra.gmra.mxu1 %vm12991_vm0, %v1158_v9  ;;  %v1159_v58 = vmul.f32 %v1158_v9, %v1077_v60 }
 0x1db   : > { %7484 = vmatpush1.msk.msra.mxu1 %vm10235_vm15, %v13134_v45  ;;  %1303 = vmatprep.mubr.f32.mxu1 %v13128_v36  ;;  %vm1397_vm15 = vcmp.eq.f32.partialorder %v9658_v34, %v10267_v50 }
 0x1dc   : > { %v1160_v29 = vsub.f32 %v1157_v11, %v1159_v58  ;;  %7560 = vmatprep.subr.msk.mxu0 %vm1397_vm15, %v13134_v45  ;;  %vm1390_vm15 = vcmp.eq.f32.partialorder %v9672_v46, %v10272_v4 }
 0x1de   : > { %7485 = vmatmul.mubr.msk.f32.vlgmr.msra.gmra.mxu1 %vm12991_vm0, %v1160_v29  ;;  %vm1396_vm0 = vcmp.eq.f32.partialorder %v9658_v34, %v10272_v4 }
 0x1df   : > { %1619 = vmatprep.mubr.f32.mxu1 %v13128_v36  ;;  %7561 = vmatpush1.msk.msra.mxu0 %vm1396_vm0, %v13134_v45  ;;  %vm1389_vm0 = vcmp.eq.f32.partialorder %v9674_v47, %v10267_v50 }
 0x1e0   : > { %7562 = vmatprep.subr.msk.mxu0 %vm1395_vm13, %v13134_v45  ;;  %vm1388_vm13 = vcmp.eq.f32.partialorder %v9674_v47, %v10272_v4 }
 0x1e1   : > { %7563 = vmatpush1.msk.msra.mxu0 %vm1394_vm12, %v13134_v45  ;;  %vm1387_vm12 = vcmp.eq.f32.partialorder %v9778_v21, %v10267_v50 }
 0x1e2   : > { %7564 = vmatprep.subr.msk.mxu0 %vm1393_vm1, %v13134_v45  ;;  %vm1386_vm1 = vcmp.eq.f32.partialorder %v9778_v21, %v10272_v4 }
 0x1e3   : > { %7565 = vmatpush1.msk.msra.mxu0 %vm1392_vm11, %v13134_v45  ;;  %vm1385_vm11 = vcmp.eq.f32.partialorder %v9782_v24, %v10267_v50 }
 0x1e4   : > { %7566 = vmatprep.subr.msk.mxu0 %vm1391_vm14, %v13134_v45  ;;  %vm1384_vm14 = vcmp.eq.f32.partialorder %v9782_v24, %v10272_v4 }
 0x1e5   : > { %7567 = vmatpush1.msk.msra.mxu0 %vm1390_vm15, %v13134_v45  ;;  %vm1383_vm15 = vcmp.eq.f32.partialorder %v9786_v28, %v10267_v50 }
 0x1e6   : > { %7568 = vmatprep.subr.msk.mxu0 %vm1389_vm0, %v13134_v45  ;;  %vm1382_vm0 = vcmp.eq.f32.partialorder %v9786_v28, %v10272_v4 }
 0x1e7   : > { %7569 = vmatpush1.msk.msra.mxu0 %vm1388_vm13, %v13134_v45  ;;  %vm1381_vm13 = vcmp.eq.f32.partialorder %v9790_v38, %v10267_v50 }
 0x1e8   : > { %7570 = vmatprep.subr.msk.mxu0 %vm1387_vm12, %v13134_v45  ;;  %vm1380_vm12 = vcmp.eq.f32.partialorder %v9790_v38, %v10272_v4 }
 0x1e9   : > { %7571 = vmatpush1.msk.msra.mxu0 %vm1386_vm1, %v13134_v45  ;;  %vm1379_vm1 = vcmp.eq.f32.partialorder %v9795_v44, %v10267_v50 }
 0x1ea   : > { %7572 = vmatprep.subr.msk.mxu0 %vm1385_vm11, %v13134_v45  ;;  %vm1378_vm11 = vcmp.eq.f32.partialorder %v9795_v44, %v10272_v4 }
 0x1eb   : > { %7573 = vmatpush1.msk.msra.mxu0 %vm1384_vm14, %v13134_v45  ;;  %vm1377_vm14 = vcmp.eq.f32.partialorder %v9811_v55, %v10267_v50 }
 0x1ec   : > { %7574 = vmatprep.subr.msk.mxu0 %vm1383_vm15, %v13134_v45  ;;  %vm1376_vm15 = vcmp.eq.f32.partialorder %v9811_v55, %v10272_v4 }
 0x1ed   : > { %7575 = vmatpush1.msk.msra.mxu0 %vm1382_vm0, %v13134_v45  ;;  %vm1375_vm0 = vcmp.eq.f32.partialorder %v9830_v63, %v10267_v50 }
 0x1ee   : > { %7576 = vmatprep.subr.msk.mxu0 %vm1381_vm13, %v13134_v45  ;;  %vm1374_vm13 = vcmp.eq.f32.partialorder %v9830_v63, %v10272_v4 }
 0x1ef   : > { %7577 = vmatpush1.msk.msra.mxu0 %vm1380_vm12, %v13134_v45  ;;  %vm1373_vm12 = vcmp.eq.f32.partialorder %v9840_v2, %v10267_v50 }
 0x1f0   : > { %7578 = vmatprep.subr.msk.mxu0 %vm1379_vm1, %v13134_v45  ;;  %vm1372_vm1 = vcmp.eq.f32.partialorder %v9840_v2, %v10272_v4 }
 0x1f1   : > { %7579 = vmatpush1.msk.msra.mxu0 %vm1378_vm11, %v13134_v45  ;;  %vm1371_vm11 = vcmp.eq.f32.partialorder %v9865_v22, %v10267_v50 }
 0x1f2   : > { %7580 = vmatprep.subr.msk.mxu0 %vm1377_vm14, %v13134_v45  ;;  %vm1370_vm14 = vcmp.eq.f32.partialorder %v9865_v22, %v10272_v4 }
 0x1f3   : > { %7581 = vmatpush1.msk.msra.mxu0 %vm1376_vm15, %v13134_v45  ;;  %vm1369_vm15 = vcmp.eq.f32.partialorder %v9883_v32, %v10267_v50 }
 0x1f4   : > { %7582 = vmatprep.subr.msk.mxu0 %vm1375_vm0, %v13134_v45  ;;  %vm1368_vm0 = vcmp.eq.f32.partialorder %v9883_v32, %v10272_v4 }
 0x1f5   : > { %7583 = vmatpush1.msk.msra.mxu0 %vm1374_vm13, %v13134_v45  ;;  %vm1423_vm13 = vcmp.eq.f32.partialorder %v9903_v51, %v10267_v50 }
 0x1f6   : > { %7584 = vmatprep.subr.msk.mxu0 %vm1373_vm12, %v13134_v45  ;;  %vm1422_vm12 = vcmp.eq.f32.partialorder %v9903_v51, %v10272_v4 }
 0x1f7   : > { %7585 = vmatpush1.msk.msra.mxu0 %vm1372_vm1, %v13134_v45  ;;  %vm1421_vm1 = vcmp.eq.f32.partialorder %v9912_v54, %v10267_v50 }
 0x1f8   : > { %7586 = vmatprep.subr.msk.mxu0 %vm1371_vm11, %v13134_v45  ;;  %vm1420_vm11 = vcmp.eq.f32.partialorder %v9912_v54, %v10272_v4 }
 0x1f9   : > { %7587 = vmatpush1.msk.msra.mxu0 %vm1370_vm14, %v13134_v45  ;;  %vm1419_vm14 = vcmp.eq.f32.partialorder %v9931_v1, %v10267_v50 }
 0x1fa   : > { %7588 = vmatprep.subr.msk.mxu0 %vm1369_vm15, %v13134_v45  ;;  %vm1418_vm15 = vcmp.eq.f32.partialorder %v9931_v1, %v10272_v4 }
 0x1fb   : > { %7589 = vmatpush1.msk.msra.mxu0 %vm1368_vm0, %v13134_v45  ;;  %vm1417_vm0 = vcmp.eq.f32.partialorder %v9948_v17, %v10267_v50 }
 0x1fc   : > { %7590 = vmatprep.subr.msk.mxu0 %vm1423_vm13, %v13134_v45  ;;  %vm1416_vm13 = vcmp.eq.f32.partialorder %v9948_v17, %v10272_v4 }
 0x1fd   : > { %7591 = vmatpush2.msk.msra.mxu0 %vm1422_vm12, %v13134_v45  ;;  %vm1415_vm12 = vcmp.eq.f32.partialorder %v9968_v42, %v10267_v50 }
 0x1fe   : > { %7592 = vmatprep.subr.msk.mxu0 %vm1421_vm1, %v13134_v45  ;;  %vm1414_vm1 = vcmp.eq.f32.partialorder %v9968_v42, %v10272_v4 }
 0x1ff   : > { %7593 = vmatpush2.msk.msra.mxu0 %vm1420_vm11, %v13134_v45  ;;  %vm1413_vm11 = vcmp.eq.f32.partialorder %v9977_v56, %v10267_v50 }
 0x200   : > { %7594 = vmatprep.subr.msk.mxu0 %vm1419_vm14, %v13134_v45  ;;  %vm1412_vm14 = vcmp.eq.f32.partialorder %v9977_v56, %v10272_v4  ;;  %v9334_v56 = vld [vmem:[%s12875_s2 + $0x260] ss:$8 sps:$4 sm:$0xff]  }
 0x201   : > { %7595 = vmatpush2.msk.msra.mxu0 %vm1418_vm15, %v13134_v45  ;;  %vm1411_vm15 = vcmp.eq.f32.partialorder %v10003_v15, %v10267_v50 }
 0x202   : > { %7596 = vmatprep.subr.msk.mxu0 %vm1417_vm0, %v13134_v45  ;;  %vm1410_vm0 = vcmp.eq.f32.partialorder %v10003_v15, %v10272_v4  ;;  %v9331_v15 = vld [vmem:[%s12875_s2 + $0x270] ss:$8 sps:$4 sm:$0xff]  }
 0x203   : > { %7597 = vmatpush2.msk.msra.mxu0 %vm1416_vm13, %v13134_v45  ;;  %vm1409_vm13 = vcmp.eq.f32.partialorder %v10022_v41, %v10267_v50 }
 0x204   : > { %7598 = vmatprep.subr.msk.mxu0 %vm1415_vm12, %v13134_v45  ;;  %vm1408_vm12 = vcmp.eq.f32.partialorder %v10022_v41, %v10272_v4  ;;  %v13191_v41 = vld [vmem:[#allocation42_spill] sm:$0xff] }
 0x205   : > { %7599 = vmatpush2.msk.msra.mxu0 %vm1414_vm1, %v13134_v45  ;;  %vm1407_vm1 = vcmp.eq.f32.partialorder %v10035_v53, %v10267_v50 }
 0x206   : > { %7600 = vmatprep.subr.msk.mxu0 %vm1413_vm11, %v13134_v45  ;;  %vm1406_vm11 = vcmp.eq.f32.partialorder %v10035_v53, %v10272_v4  ;;  %v13189_v53 = vld [vmem:[#allocation41_spill] sm:$0xff] }
 0x207   : > { %7601 = vmatpush2.msk.msra.mxu0 %vm1412_vm14, %v13134_v45  ;;  %vm1405_vm14 = vcmp.eq.f32.partialorder %v10050_v20, %v10267_v50 }
 0x208   : > { %7602 = vmatprep.subr.msk.mxu0 %vm1411_vm15, %v13134_v45  ;;  %vm1404_vm15 = vcmp.eq.f32.partialorder %v10050_v20, %v10272_v4  ;;  %v13187_v20 = vld [vmem:[#allocation40_spill] sm:$0xff] }
 0x209   : > { %7603 = vmatpush2.msk.msra.mxu0 %vm1410_vm0, %v13134_v45  ;;  %vm13136_vm0 = vcmask 1043456  }
 0x20a   : > { %7604 = vmatprep.subr.msk.mxu0 %vm1409_vm13, %v13134_v45  ;;  %vm13137_vm13 = vmmov %vm13136_vm0 }
 0x20b   : > { %7605 = vmatpush2.msk.msra.mxu0 %vm1408_vm12, %v13134_v45 }
 0x20c   : > { %7606 = vmatprep.subr.msk.mxu0 %vm1407_vm1, %v13134_v45  ;;  %vm12999_vm1 = vcmask 228352  }
 0x20d   : > { %7607 = vmatpush2.msk.msra.mxu0 %vm1406_vm11, %v13134_v45 }
 0x20e   : > { %7608 = vmatprep.subr.msk.mxu0 %vm1405_vm14, %v13134_v45 }
 0x20f   : > { %7609 = vmatpush2.msk.msra.mxu0 %vm1404_vm15, %v13134_v45 }
 0x29a   : > { %v1231_v19 = vpop.f32.mrf.mxu1 }
 0x29b   : > { %v1313_v27 = vrot.slane %v1231_v19, %v10429_v61 }
 0x29c   : > { %v1233_v52 = vpop.f32.mrf.mxu1 }
 0x29d   : > { %v1317_v5 = vrot.slane %v1233_v52, %v10429_v61  ;;  %v1324_v6 = vmul.f32 %v1313_v27, %v10204_v12  ;;  %v1322_v14 = vmul.f32 %v1313_v27, %v10185_v23  ;;  %v1320_v9 = vmul.f32 %v1313_v27, %v10173_v25 }
 0x29e   : > { %v1305_v16 = vpop.f32.mrf.mxu1  ;;  %v1318_v19 = vmul.f32 %v1313_v27, %v10175_v0 }
 0x29f   : > { %v1329_v60 = vrot.slane %v1305_v16, %v10429_v61  ;;  %v1325_v59 = vmul.f32 %v1317_v5, %v10213_v13  ;;  %v1323_v18 = vmul.f32 %v1317_v5, %v10191_v43  ;;  %v1321_v3 = vmul.f32 %v1317_v5, %v10177_v57 }
 0x2a0   : > { %v1307_v40 = vpop.f32.mrf.mxu1  ;;  %v1319_v12 = vmul.f32 %v1317_v5, %v10171_v39  ;;  %v7486_v13 = vadd.f32 -1.0, %v9883_v32  ;;  %v7487_v39 = vadd.f32 -1.0, %v9865_v22 }
 0x2a1   : > { %v1333_v10 = vrot.slane %v1307_v40, %v10429_v61  ;;  %v1340_v7 = vadd.f32 %v1329_v60, %v1324_v6  ;;  %v1338_v11 = vadd.f32 %v1329_v60, %v1322_v14  ;;  %v1336_v43 = vadd.f32 %v1329_v60, %v1320_v9  ;;  %v9217_v9 = vld [vmem:[%s12875_s2 + $0x150] ss:$8 sps:$4 sm:$0xff]  }
 0x2a2   : > { %v1334_v6 = vadd.f32 %v1329_v60, %v1318_v19  ;;  %vm1354_vm12 = vcmp.eq.f32.partialorder %v9677_v48, %v7486_v13  ;;  %vm1355_vm11 = vcmp.eq.f32.partialorder %v9677_v48, %v7487_v39  ;;  %v7488_v60 = vadd.f32 -1.0, %v9840_v2  ;;  %v9237_v13 = vld [vmem:[%s12875_s2 + $0x124] ss:$8 sps:$4 sm:$0xff]   ;;  %v9235_v19 = vld [vmem:[%s12875_s2 + $0x120] ss:$8 sps:$4 sm:$0xff]   ;;  %v13181_v61 = vld [vmem:[#allocation36_spill] sm:$0xff] }
 0x2a3   : > { %v1341_v62 = vadd.f32 %v1333_v10, %v1325_v59  ;;  %v1339_v8 = vadd.f32 %v1333_v10, %v1323_v18  ;;  %v1337_v29 = vadd.f32 %v1333_v10, %v1321_v3  ;;  %v1348_v52 = vmax.f32 %v1340_v7, 0.0  ;;  %v13138_v7 = vld [vmem:[#allocation35_spill] sm:$0xff]  ;;  %v9202_v39 = vld [vmem:[%s12875_s2 + $0x70] ss:$8 sps:$4 sm:$0xff]  }
 0x2a4   : > { %v1335_v16 = vadd.f32 %v1333_v10, %v1319_v12  ;;  %v1346_v57 = vmax.f32 %v1338_v11, 0.0  ;;  %v1344_v5 = vmax.f32 %v1336_v43, 0.0  ;;  %v1342_v27 = vmax.f32 %v1334_v6, 0.0  ;;  %v9211_v3 = vld [vmem:[%s12875_s2 + $0x160] ss:$8 sps:$4 sm:$0xff]  }
 0x2a5   : > { %v1349_v58 = vmax.f32 %v1341_v62, 0.0  ;;  %v1347_v23 = vmax.f32 %v1339_v8, 0.0  ;;  %v1345_v25 = vmax.f32 %v1337_v29, 0.0  ;;  %v7490_v40 = vsel %vm1354_vm12, 1.0, %v13128_v36  ;;  %v13139_v62 = vld [vmem:[#allocation37_spill] sm:$0xff] }
 0x2a6   : > { %v1343_v0 = vmax.f32 %v1335_v16, 0.0  ;;  %v7491_v59 = vsel %vm1355_vm11, 1.0, %v13128_v36  ;;  %vm1356_vm14 = vcmp.eq.f32.partialorder %v9677_v48, %v7488_v60  ;;  %v7489_v10 = vadd.f32 -1.0, %v9830_v63  ;;  %v9204_v8 = vld [vmem:[%s12875_s2 + $0x74] ss:$8 sps:$4 sm:$0xff]  }
 0x2a7   : > { %7552 = vmatprep.subr.msk.mxu1 %vm13136_vm0, %v1349_v58  ;;  %v7492_v18 = vsel %vm1356_vm14, 1.0, %v13128_v36  ;;  %vm1403_vm0 = vcmp.eq.f32.partialorder %v13138_v7, %v10267_v50  ;;  %vm1401_vm12 = vcmp.eq.f32.partialorder %v13139_v62, %v10267_v50  ;;  %vm1400_vm11 = vcmp.eq.f32.partialorder %v13139_v62, %v10272_v4  ;;  %v9213_v50 = vld [vmem:[%s12875_s2 + $0x164] ss:$8 sps:$4 sm:$0xff]   ;;  %v9223_v58 = vld [vmem:[%s12875_s2 + $0x140] ss:$8 sps:$4 sm:$0xff]  }
 0x2a8   : > { %7553 = vmatpush1.msk.msra.mxu1 %vm13137_vm13, %v1348_v52  ;;  %vm1357_vm15 = vcmp.eq.f32.partialorder %v9677_v48, %v7489_v10  ;;  %vm1402_vm13 = vcmp.eq.f32.partialorder %v13138_v7, %v10272_v4  ;;  %7610 = vmatprep.subr.msk.mxu0 %vm1403_vm0, %v13134_v45  ;;  %v9219_v4 = vld [vmem:[%s12875_s2 + $0x154] ss:$8 sps:$4 sm:$0xff]   ;;  %v9225_v11 = vld [vmem:[%s12875_s2 + $0x144] ss:$8 sps:$4 sm:$0xff]   ;;  %v9229_v12 = vld [vmem:[%s12875_s2 + $0x130] ss:$8 sps:$4 sm:$0xff]  }
 0x2a9   : > { %1581 = vmatprep.subr.mxu1 %v1347_v23  ;;  %v7493_v14 = vsel %vm1357_vm15, 1.0, %v13128_v36  ;;  %7611 = vmatpush2.msk.msra.mxu0 %vm1402_vm13, %v13134_v45  ;;  %v9231_v29 = vld [vmem:[%s12875_s2 + $0x134] ss:$8 sps:$4 sm:$0xff]   ;;  %v9241_v43 = vld [vmem:[%s12875_s2 + $0x110] ss:$8 sps:$4 sm:$0xff]   ;;  %vm13140_vm14 = vcmask 785408  }
 0x2aa   : > { %1582 = vmatpush1.msra.mxu1 %v1346_v57  ;;  %7612 = vmatprep.subr.msk.mxu0 %vm1401_vm12, %v13134_v45  ;;  %v9243_v52 = vld [vmem:[%s12875_s2 + $0x114] ss:$8 sps:$4 sm:$0xff]   ;;  %v9249_v23 = vld [vmem:[%s12875_s2 + $0x104] ss:$8 sps:$4 sm:$0xff]   ;;  %v9247_v16 = vld [vmem:[%s12875_s2 + $0x100] ss:$8 sps:$4 sm:$0xff]  }
 0x2ab   : > { %1583 = vmatprep.subr.mxu1 %v1345_v25  ;;  %7613 = vmatpush2.msk.msra.mxu0 %vm1400_vm11, %v13134_v45  ;;  %v9255_v57 = vld [vmem:[%s12875_s2 + $0xf4] ss:$8 sps:$4 sm:$0xff]   ;;  %v9253_v6 = vld [vmem:[%s12875_s2 + $0xf0] ss:$8 sps:$4 sm:$0xff]   ;;  %vm13141_vm15 = vmmov %vm13140_vm14  ;;  %vm13000_vm12 = vcmask 916480   ;;  %vm12998_vm11 = vcmask 914432  }
 0x2ac   : > { %1584 = vmatpush1.msra.mxu1 %v1344_v5  ;;  %2265 = vmatprep.subr.bf16.mxu0 %v9204_v8  ;;  %v9216_v8 = vld [vmem:[%s12875_s2 + $0x44] ss:$8 sps:$4 sm:$0xff]   ;;  %vm13142_vm0 = vmmov %vm13140_vm14 }
 0x2ad   : > { %1585 = vmatprep.subr.mxu1 %v1343_v0  ;;  %v9207_v0 = vld [vmem:[%s12875_s2 + $0x64] ss:$8 sps:$4 sm:$0xff]   ;;  %vm13143_vm13 = vmmov %vm13142_vm0 }
 0x2ae   : > { %1586 = vmatpush1.msra.mxu1 %v1342_v27  ;;  %v13183_v62 = vld [vmem:[#allocation38_spill] sm:$0xff]  ;;  %v13185_v7 = vld [vmem:[#allocation39_spill] sm:$0xff] }
 0x2af   : > { %7554 = vmatmul.mubr.msk.f32.vlgmr.msra.gmra.mxu1 %vm12999_vm1, %v7490_v40  ;;  %2056 = vmatprep.subr.bf16.mxu1 %v9213_v50  ;;  %v9205_v40 = vld [vmem:[%s12875_s2 + $0x60] ss:$8 sps:$4 sm:$0xff]  }
 0x2b0   : > { %1625 = vmatprep.mubr.f32.mxu1 %v13128_v36  ;;  %2057 = vmatpush1.bf16.msra.mxu1 %v9211_v3  ;;  %v9214_v50 = vld [vmem:[%s12875_s2 + $0x40] ss:$8 sps:$4 sm:$0xff]  }
 0x2b1   : > { %2058 = vmatprep.subr.bf16.mxu1 %v9219_v4 }
 0x2b3   : > { %7555 = vmatmul.mubr.msk.f32.gmra.mxu1 %vm12999_vm1, %v7491_v59  ;;  %v9210_v59 = vld [vmem:[%s12875_s2 + $0x54] ss:$8 sps:$4 sm:$0xff]  }
 0x2b4   : > { %1631 = vmatprep.mubr.f32.mxu1 %v13128_v36  ;;  %2059 = vmatpush1.bf16.msra.mxu1 %v9217_v9  ;;  %v9222_v9 = vld [vmem:[%s12875_s2 + $0x34] ss:$8 sps:$4 sm:$0xff]  }
 0x2b5   : > { %2060 = vmatprep.subr.bf16.mxu1 %v9225_v11  ;;  %v9220_v11 = vld [vmem:[%s12875_s2 + $0x30] ss:$8 sps:$4 sm:$0xff]  }
 0x2b7   : > { %7556 = vmatmul.mubr.msk.f32.gmra.mxu1 %vm12999_vm1, %v7492_v18  ;;  %v9208_v18 = vld [vmem:[%s12875_s2 + $0x50] ss:$8 sps:$4 sm:$0xff]  }
 0x2b8   : > { %1637 = vmatprep.mubr.f32.mxu1 %v13128_v36  ;;  %2061 = vmatpush1.bf16.msra.mxu1 %v9223_v58  ;;  %v9228_v58 = vld [vmem:[%s12875_s2 + $0x24] ss:$8 sps:$4 sm:$0xff]  }
 0x2b9   : > { %2062 = vmatprep.subr.bf16.mxu1 %v9231_v29  ;;  %v9226_v29 = vld [vmem:[%s12875_s2 + $0x20] ss:$8 sps:$4 sm:$0xff]  }
 0x2bb   : > { %7557 = vmatmul.mubr.msk.f32.gmra.mxu1 %vm12999_vm1, %v7493_v14 }
 0x2bc   : > { %2063 = vmatpush1.bf16.msra.mxu1 %v9229_v12  ;;  %v9234_v12 = vld [vmem:[%s12875_s2 + $0x14] ss:$8 sps:$4 sm:$0xff]  }
 0x2bd   : > { %2064 = vmatprep.subr.bf16.mxu1 %v9237_v13  ;;  %v9232_v13 = vld [vmem:[%s12875_s2 + $0x10] ss:$8 sps:$4 sm:$0xff]  }
 0x2c0   : > { %2065 = vmatpush1.bf16.msra.mxu1 %v9235_v19  ;;  %v9240_v19 = vld [vmem:[%s12875_s2 + $0x4] ss:$8 sps:$4 sm:$0xff]  }
 0x2c1   : > { %2066 = vmatprep.subr.bf16.mxu1 %v9243_v52  ;;  %v9238_v52 = vld [vmem:[%s12875_s2] ss:$8 sps:$4 sm:$0xff]  }
 0x2c4   : > { %2067 = vmatpush1.bf16.msra.mxu1 %v9241_v43  ;;  %v9246_v43 = vld [vmem:[%s12875_s2 + $0xe4] ss:$8 sps:$4 sm:$0xff]  }
 0x2c5   : > { %2068 = vmatprep.subr.bf16.mxu1 %v9249_v23  ;;  %v9244_v23 = vld [vmem:[%s12875_s2 + $0xe0] ss:$8 sps:$4 sm:$0xff]  }
 0x2c8   : > { %2069 = vmatpush1.bf16.msra.mxu1 %v9247_v16  ;;  %v9252_v16 = vld [vmem:[%s12875_s2 + $0xd4] ss:$8 sps:$4 sm:$0xff]  }
 0x2c9   : > { %2070 = vmatprep.subr.bf16.mxu1 %v9255_v57  ;;  %v9250_v57 = vld [vmem:[%s12875_s2 + $0xd0] ss:$8 sps:$4 sm:$0xff]  }
 0x2cc   : > { %2071 = vmatpush1.bf16.msra.mxu1 %v9253_v6  ;;  %v9258_v6 = vld [vmem:[%s12875_s2 + $0xc4] ss:$8 sps:$4 sm:$0xff]  }
 0x36f   : > { %v1621_v25 = vpop.f32.mrf.mxu1 }
 0x371   : > { %v1623_v5 = vpop.f32.mrf.mxu1 }
 0x372   : > { %7614 = vmatprep.mubr.msk.f32.mxu0 %vm13140_vm14, %v1623_v5  ;;  %v9264_v5 = vld [vmem:[%s12875_s2 + $0xb4] ss:$8 sps:$4 sm:$0xff]   ;;  %vm13147_vm14 = vcmask 1046528  }
 0x373   : > { %v1627_v27 = vpop.f32.mrf.mxu1  ;;  %1721 = vmatmul.mubr.f32.vlgmr.msra.gmra.mxu0 %v1621_v25  ;;  %v9256_v25 = vld [vmem:[%s12875_s2 + $0xc0] ss:$8 sps:$4 sm:$0xff]  }
 0x374   : > { %2266 = vmatpush1.bf16.msra.mxu0 %v9202_v39  ;;  %v9261_v39 = vld [vmem:[%s12875_s2 + $0x1d4] ss:$8 sps:$4 sm:$0xff]  }
 0x375   : > { %v1629_v60 = vpop.f32.mrf.mxu1  ;;  %2267 = vmatprep.subr.bf16.mxu0 %v9207_v0  ;;  %v9259_v0 = vld [vmem:[%s12875_s2 + $0x1d0] ss:$8 sps:$4 sm:$0xff]   ;;  %2074 = vmatprep.subr.bf16.mxu1 %v9261_v39 }
 0x376   : > { %7615 = vmatprep.mubr.msk.f32.mxu0 %vm13141_vm15, %v1629_v60  ;;  %2075 = vmatpush2.bf16.msra.mxu1 %v9259_v0  ;;  %v9270_v60 = vld [vmem:[%s12875_s2 + $0xa4] ss:$8 sps:$4 sm:$0xff]   ;;  %vm1867_vm15 = vsmask.f32 7424 }
 0x377   : > { %v1633_v10 = vpop.f32.mrf.mxu1  ;;  %1727 = vmatmul.mubr.f32.gmra.mxu0 %v1627_v27  ;;  %v9262_v27 = vld [vmem:[%s12875_s2 + $0xb0] ss:$8 sps:$4 sm:$0xff]  }
 0x378   : > { %2268 = vmatpush1.bf16.msra.mxu0 %v9205_v40  ;;  %v9267_v40 = vld [vmem:[%s12875_s2 + $0x1c4] ss:$8 sps:$4 sm:$0xff]  }
 0x379   : > { %v1635_v14 = vpop.f32.mrf.mxu1  ;;  %2269 = vmatprep.subr.bf16.mxu0 %v9210_v59  ;;  %v9265_v59 = vld [vmem:[%s12875_s2 + $0x1c0] ss:$8 sps:$4 sm:$0xff]   ;;  %2076 = vmatprep.subr.bf16.mxu1 %v9267_v40 }
 0x37a   : > { %7616 = vmatprep.mubr.msk.f32.mxu0 %vm13142_vm0, %v1635_v14  ;;  %2077 = vmatpush2.bf16.msra.mxu1 %v9265_v59  ;;  %v9276_v14 = vld [vmem:[%s12875_s2 + $0x94] ss:$8 sps:$4 sm:$0xff]  }
 0x37b   : > { %v1639_v3 = vpop.f32.mrf.mxu1  ;;  %1733 = vmatmul.mubr.f32.gmra.mxu0 %v1633_v10  ;;  %v9268_v10 = vld [vmem:[%s12875_s2 + $0xa0] ss:$8 sps:$4 sm:$0xff]  }
 0x37c   : > { %2270 = vmatpush1.bf16.msra.mxu0 %v9208_v18  ;;  %v9273_v18 = vld [vmem:[%s12875_s2 + $0x1b4] ss:$8 sps:$4 sm:$0xff]  }
 0x37d   : > { %v1641_v4 = vpop.f32.mrf.mxu1  ;;  %2271 = vmatprep.subr.bf16.mxu0 %v9216_v8  ;;  %v9271_v8 = vld [vmem:[%s12875_s2 + $0x1b0] ss:$8 sps:$4 sm:$0xff]   ;;  %2078 = vmatprep.subr.bf16.mxu1 %v9273_v18 }
 0x37e   : > { %7617 = vmatprep.mubr.msk.f32.mxu0 %vm13143_vm13, %v1641_v4  ;;  %2079 = vmatpush2.bf16.msra.mxu1 %v9271_v8  ;;  %v9282_v4 = vld [vmem:[%s12875_s2 + $0x84] ss:$8 sps:$4 sm:$0xff]   ;;  %vm13156_vm13 = vmmov %vm13147_vm14 }
 0x37f   : > { %1739 = vmatmul.mubr.f32.gmra.mxu0 %v1639_v3  ;;  %v9274_v3 = vld [vmem:[%s12875_s2 + $0x90] ss:$8 sps:$4 sm:$0xff]  }
 0x380   : > { %2272 = vmatpush1.bf16.msra.mxu0 %v9214_v50  ;;  %v9279_v50 = vld [vmem:[%s12875_s2 + $0x1a4] ss:$8 sps:$4 sm:$0xff]  }
 0x381   : > { %2273 = vmatprep.subr.bf16.mxu0 %v9222_v9  ;;  %v9277_v9 = vld [vmem:[%s12875_s2 + $0x1a0] ss:$8 sps:$4 sm:$0xff]   ;;  %2080 = vmatprep.subr.bf16.mxu1 %v9279_v50 }
 0x382   : > { %2081 = vmatpush2.bf16.msra.mxu1 %v9277_v9 }
 0x384   : > { %2274 = vmatpush1.bf16.msra.mxu0 %v9220_v11  ;;  %v9280_v11 = vld [vmem:[%s12875_s2 + $0x80] ss:$8 sps:$4 sm:$0xff]  }
 0x385   : > { %2275 = vmatprep.subr.bf16.mxu0 %v9228_v58  ;;  %v9283_v58 = vld [vmem:[%s12875_s2 + $0x190] ss:$8 sps:$4 sm:$0xff]  }
 0x388   : > { %2276 = vmatpush1.bf16.msra.mxu0 %v9226_v29  ;;  %v9285_v29 = vld [vmem:[%s12875_s2 + $0x194] ss:$8 sps:$4 sm:$0xff]  }
 0x389   : > { %2277 = vmatprep.subr.bf16.mxu0 %v9234_v12  ;;  %v9288_v12 = vld [vmem:[%s12875_s2 + $0x184] ss:$8 sps:$4 sm:$0xff]   ;;  %2082 = vmatprep.subr.bf16.mxu1 %v9285_v29 }
 0x38a   : > { %2083 = vmatpush2.bf16.msra.mxu1 %v9283_v58 }
 0x38b   : > { %2084 = vmatprep.subr.bf16.mxu1 %v9288_v12 }
 0x38c   : > { %2278 = vmatpush1.bf16.msra.mxu0 %v9232_v13  ;;  %v9286_v13 = vld [vmem:[%s12875_s2 + $0x180] ss:$8 sps:$4 sm:$0xff]  }
 0x38d   : > { %2279 = vmatprep.subr.bf16.mxu0 %v9240_v19  ;;  %v9289_v19 = vld [vmem:[%s12875_s2 + $0x170] ss:$8 sps:$4 sm:$0xff]  }
 0x38e   : > { %2085 = vmatpush2.bf16.msra.mxu1 %v9286_v13 }
 0x390   : > { %2280 = vmatpush1.bf16.msra.mxu0 %v9238_v52  ;;  %v9291_v52 = vld [vmem:[%s12875_s2 + $0x174] ss:$8 sps:$4 sm:$0xff]  }
 0x391   : > { %2283 = vmatprep.subr.bf16.mxu0 %v9246_v43  ;;  %2086 = vmatprep.subr.bf16.mxu1 %v9291_v52  ;;  %v9294_v43 = vld [vmem:[%s12875_s2 + $0x254] ss:$8 sps:$4 sm:$0xff]  }
 0x392   : > { %2087 = vmatpush2.bf16.msra.mxu1 %v9289_v19 }
 0x393   : > { %2495 = vmatprep.subr.bf16.mxu1 %v9294_v43 }
 0x394   : > { %2284 = vmatpush2.bf16.msra.mxu0 %v9244_v23 }
 0x395   : > { %2285 = vmatprep.subr.bf16.mxu0 %v9252_v16 }
 0x398   : > { %2286 = vmatpush2.bf16.msra.mxu0 %v9250_v57 }
 0x399   : > { %2287 = vmatprep.subr.bf16.mxu0 %v9258_v6 }
 0x39c   : > { %2288 = vmatpush2.bf16.msra.mxu0 %v9256_v25 }
 0x39d   : > { %2289 = vmatprep.subr.bf16.mxu0 %v9264_v5 }
 0x3a0   : > { %2290 = vmatpush2.bf16.msra.mxu0 %v9262_v27 }
 0x3a1   : > { %2291 = vmatprep.subr.bf16.mxu0 %v9270_v60 }
 0x3a4   : > { %2292 = vmatpush2.bf16.msra.mxu0 %v9268_v10 }
 0x3a5   : > { %2293 = vmatprep.subr.bf16.mxu0 %v9276_v14 }
 0x3a8   : > { %2294 = vmatpush2.bf16.msra.mxu0 %v9274_v3 }
 0x3a9   : > { %2295 = vmatprep.subr.bf16.mxu0 %v9282_v4 }
 0x3ac   : > { %2296 = vmatpush2.bf16.msra.mxu0 %v9280_v11 }
 0x3ad   : > { %2613 = vmatprep.subr.mxu0 %v13128_v36 }
 0x433   : > { %v1722_v23 = vpop.f32.mrf.mxu0 }
 0x434   : > { %1745 = vst [vmem:[#allocation2] sm:$0xff] %v1722_v23 }
 0x435   : > { %v1724_v16 = vpop.f32.mrf.mxu0 }
 0x436   : > { %1747 = vst.msk [vmem:[#allocation2 + $0x8] sm:$0xff] %vm13000_vm12, %v1724_v16 }
 0x437   : > { %v1728_v57 = vpop.f32.mrf.mxu0 }
 0x438   : > { %v1855_v8 = vpack.c.bf16 %v1728_v57, %v1722_v23 }
 0x439   : > { %v1730_v6 = vpop.f32.mrf.mxu0 }
 0x43a   : > { %1749 = vst.msk [vmem:[#allocation2 + $0x18] sm:$0xff] %vm13000_vm12, %v1730_v6 }
 0x43b   : > { %v1734_v25 = vpop.f32.mrf.mxu0  ;;  %v1859_v0 = vld [vmem:[#allocation2] sm:$0xfe] }
 0x43c   : > { %v2318_v27 = vld [vmem:[#allocation2] sm:$0xfc]  ;;  %v1863_v3 = vpack.c.bf16 %v1728_v57, %v1859_v0 }
 0x43d   : > { %v1736_v39 = vpop.f32.mrf.mxu0  ;;  %v1848_v60 = vld [vmem:[#allocation2 + $0x8] sm:$0xff]  ;;  %v2322_v50 = vpack.c.bf16 %v1728_v57, %v2318_v27 }
 0x43e   : > { %1751 = vst.msk [vmem:[#allocation2 + $0x28] sm:$0xff] %vm13000_vm12, %v1736_v39  ;;  %v1860_v10 = vld [vmem:[#allocation2 + $0x8] sm:$0xfe]  ;;  %v1871_v29 = vshll.u32 %v1863_v3, 16 }
 0x43f   : > { %v1740_v5 = vpop.f32.mrf.mxu0  ;;  %v2331_v52 = vrot.slane %v2322_v50, 1 }
 0x440   : > { %1752 = vst [vmem:[#allocation2 + $0x30] sm:$0x3f] %v1740_v5 }
 0x441   : > { %v1742_v40 = vpop.f32.mrf.mxu0  ;;  %v10667_v59 = vld [vmem:[#allocation2 + $0x18] sm:$0xff] }
 0x442   : > { %1754 = vst.msk [vmem:[#allocation2 + $0x38] sm:$0x3f] %vm12998_vm11, %v1742_v40  ;;  %v1856_v18 = vpack.c.bf16 %v10667_v59, %v1848_v60  ;;  %v1864_v14 = vpack.c.bf16 %v10667_v59, %v1860_v10  ;;  %v1873_v10 = vrot.slane %v1871_v29, 1 }
 0x444   : > { %7740 = vmatprep.mubr.msk.bf16.mxu0 %vm13000_vm12, %v1856_v18  ;;  %v1883_v4 = vshll.u32 %v1864_v14, 16  ;;  %v1881_v18 = vshrl.u32 %v1864_v14, 16 }
 0x445   : > { %2298 = vmatmul.mubr.bf16.vlgmr.msra.gmra.mxu0 %v1855_v8  ;;  %v1852_v23 = vld [vmem:[#allocation2 + $0x28] sm:$0xff] }
 0x446   : > { %7774 = vmatpush1.msk.msra.mxu0 %vm9695_vm2, %v13134_v45  ;;  %v1885_v6 = vrot.slane %v1883_v4, 1 }
 0x447   : > { %v1861_v11 = vld [vmem:[#allocation2 + $0x30] sm:$0x1f]  ;;  %2615 = vmatprep.subr.mxu0 %v13128_v36 }
 0x448   : > { %v2320_v58 = vld [vmem:[#allocation2 + $0x30] sm:$0x3f]  ;;  %v1865_v13 = vpack.c.bf16 %v1861_v11, %v1734_v25  ;;  %7775 = vmatpush1.msk.msra.mxu0 %vm9704_vm3, %v13134_v45  ;;  %v1869_v11 = vshrl.u32 %v1863_v3, 16 }
 0x449   : > { %v1853_v12 = vld [vmem:[#allocation2 + $0x30] sm:$0xf]  ;;  %v2324_v19 = vpack.c.bf16 %v2320_v58, %v1734_v25  ;;  %v1854_v16 = vld [vmem:[#allocation2 + $0x38] sm:$0xf]  ;;  %2617 = vmatprep.subr.mxu0 %v13128_v36 }
 0x44a   : > { %v1862_v57 = vld [vmem:[#allocation2 + $0x38] sm:$0x1f]  ;;  %v1858_v39 = vpack.c.bf16 %v1854_v16, %v1852_v23  ;;  %v1876_v5 = vshll.u32 %v1865_v13, 16  ;;  %7776 = vmatpush1.msk.msra.mxu0 %vm9714_vm4, %v13134_v45  ;;  %v1857_v60 = vpack.c.bf16 %v1853_v12, %v1734_v25  ;;  %v1886_v25 = vor.u32 %v1885_v6, %v1881_v18  ;;  %v9297_v6 = vld [vmem:[%s12875_s2 + $0x244] ss:$8 sps:$4 sm:$0xff]  }
 0x44b   : > { %v10681_v0 = vrot.slane %v2324_v19, 1  ;;  %v1866_v27 = vpack.c.bf16 %v1862_v57, %v1852_v23  ;;  %2619 = vmatprep.subr.mxu0 %v13128_v36  ;;  %v9292_v19 = vld [vmem:[%s12875_s2 + $0x250] ss:$8 sps:$4 sm:$0xff]   ;;  %v2319_v18 = vld [vmem:[#allocation2 + $0x8] sm:$0xfc] }
 0x44c   : > { %7741 = vmatprep.mubr.msk.bf16.mxu0 %vm13000_vm12, %v1858_v39  ;;  %7777 = vmatpush1.msk.msra.mxu0 %vm9728_vm5, %v13134_v45  ;;  %v1878_v58 = vrot.slane %v1876_v5, 1  ;;  %v2321_v16 = vld [vmem:[#allocation2 + $0x38] sm:$0x3f] }
 0x44d   : > { %v1888_v8 = vshll.u32 %v1866_v27, 16  ;;  %v10690_v50 = vsel %vm13147_vm14, %v2331_v52, %v10681_v0  ;;  %2308 = vmatmul.mubr.bf16.gmra.mxu0 %v1857_v60  ;;  %2621 = vmatprep.subr.mxu0 %v13128_v36  ;;  %v1895_v12 = vshrl.u32 %v1866_v27, 16  ;;  %v1874_v52 = vor.u32 %v1873_v10, %v1869_v11  ;;  %v9295_v10 = vld [vmem:[%s12875_s2 + $0x240] ss:$8 sps:$4 sm:$0xff]  }
 0x44e   : > { %7778 = vmatpush1.msk.msra.mxu0 %vm9740_vm6, %v13134_v45  ;;  %v2325_v27 = vpack.c.bf16 %v2321_v16, %v1852_v23  ;;  %v2323_v11 = vpack.c.bf16 %v10667_v59, %v2319_v18  ;;  %v13154_v16 = vld [vmem:[#allocation17_spill] sm:$0xff]  ;;  %v13161_v18 = vld [vmem:[#allocation20_spill] sm:$0xff] }
 0x44f   : > { %v1890_v29 = vrot.slane %v1888_v8, 1  ;;  %2623 = vmatprep.subr.mxu0 %v13128_v36  ;;  %v1879_v5 = vsel %vm1867_vm15, %v1874_v52, %v1878_v58  ;;  %v9300_v8 = vld [vmem:[%s12875_s2 + $0x234] ss:$8 sps:$4 sm:$0xff]   ;;  %vm13155_vm0 = vnez %v13154_v16 }
 0x450   : > { %7779 = vmatpush1.msk.msra.mxu0 %vm9753_vm7, %v13134_v45  ;;  %v2334_v52 = vrot.slane %v2323_v11, 1  ;;  %v9307_v11 = vld [vmem:[%s12875_s2 + $0x200] ss:$8 sps:$4 sm:$0xff]  }
 0x451   : > { %v1891_v3 = vsel %vm1867_vm15, %v1886_v25, %v1890_v29  ;;  %v1897_v57 = vor.u32 %v1895_v12, %v1890_v29  ;;  %2625 = vmatprep.subr.mxu0 %v13128_v36  ;;  %v1892_v25 = vshrl.u32 %v1865_v13, 16  ;;  %v10726_v29 = vrot.slane %v2325_v27, 1  ;;  %v9298_v12 = vld [vmem:[%s12875_s2 + $0x230] ss:$8 sps:$4 sm:$0xff]   ;;  %v9303_v13 = vld [vmem:[%s12875_s2 + $0x224] ss:$8 sps:$4 sm:$0xff]  }
 0x452   : > { %7708 = vmatprep.mubr.msk.bf16.mxu1 %vm13000_vm12, %v1891_v3  ;;  %7780 = vmatpush1.msk.msra.mxu0 %vm9799_vm8, %v13134_v45  ;;  %v9304_v27 = vld [vmem:[%s12875_s2 + $0x210] ss:$8 sps:$4 sm:$0xff]  }
 0x453   : > { %2089 = vmatmul.mubr.bf16.vlgmr.msra.gmra.mxu1 %v1879_v5  ;;  %2627 = vmatprep.subr.mxu0 %v13128_v36  ;;  %v1894_v59 = vor.u32 %v1892_v25, %v1878_v58  ;;  %v2336_v3 = vsel %vm13156_vm13, %v2334_v52, %v10726_v29  ;;  %v9301_v58 = vld [vmem:[%s12875_s2 + $0x220] ss:$8 sps:$4 sm:$0xff]   ;;  %vm13162_vm13 = vnez %v13161_v18  ;;  %v9312_v25 = vld [vmem:[%s12875_s2 + $0x1f4] ss:$8 sps:$4 sm:$0xff]   ;;  %v9310_v52 = vld [vmem:[%s12875_s2 + $0x1f0] ss:$8 sps:$4 sm:$0xff]  }
 0x454   : > { %2496 = vmatpush1.bf16.msra.mxu1 %v9292_v19  ;;  %7709 = vmatprep.mubr.msk.bf16.mxu1 %vm13000_vm12, %v1897_v57  ;;  %v9306_v57 = vld [vmem:[%s12875_s2 + $0x214] ss:$8 sps:$4 sm:$0xff]   ;;  %v13159_v5 = vld [vmem:[#allocation19_spill] sm:$0xff] }
 0x455   : > { %2497 = vmatprep.subr.bf16.mxu1 %v9297_v6  ;;  %7781 = vmatpush1.msk.msra.mxu0 %vm9816_vm9, %v13134_v45  ;;  %v13157_v6 = vld [vmem:[#allocation18_spill] sm:$0xff]  ;;  %vm13160_vm15 = vnez %v13159_v5 }
 0x456   : > { %2629 = vmatprep.subr.mxu0 %v13128_v36  ;;  %vm13158_vm14 = vnez %v13157_v6 }
 0x457   : > { %7782 = vmatpush1.msk.msra.mxu0 %vm9834_vm10, %v13134_v45 }
 0x458   : > { %2498 = vmatpush1.bf16.msra.mxu1 %v9295_v10  ;;  %2631 = vmatprep.subr.mxu0 %v13128_v36  ;;  %v9309_v10 = vld [vmem:[%s12875_s2 + $0x204] ss:$8 sps:$4 sm:$0xff]  }
 0x459   : > { %2499 = vmatprep.subr.bf16.mxu1 %v9300_v8  ;;  %7783 = vmatpush1.msk.msra.mxu0 %vm13155_vm0, %v13134_v45  ;;  %v13163_v8 = vld [vmem:[#allocation21_spill] sm:$0xff] }
 0x45a   : > { %2633 = vmatprep.subr.mxu0 %v13128_v36  ;;  %vm13164_vm11 = vnez %v13163_v8 }
 0x45b   : > { %2099 = vmatmul.mubr.bf16.gmra.mxu1 %v1894_v59  ;;  %7784 = vmatpush1.msk.msra.mxu0 %vm13158_vm14, %v13134_v45  ;;  %v13167_v59 = vld [vmem:[#allocation23_spill] sm:$0xff] }
 0x45c   : > { %2500 = vmatpush1.bf16.msra.mxu1 %v9298_v12  ;;  %7772 = vmatprep.mubr.msk.bf16.mxu1 %vm13000_vm12, %v2336_v3  ;;  %v13165_v12 = vld [vmem:[#allocation22_spill] sm:$0xff]  ;;  %vm13168_vm12 = vnez %v13167_v59  ;;  %v13169_v3 = vld [vmem:[#allocation25_spill] sm:$0xff] }
 0x45d   : > { %2501 = vmatprep.subr.bf16.mxu1 %v9303_v13  ;;  %2635 = vmatprep.subr.mxu0 %v13128_v36  ;;  %vm13166_vm1 = vnez %v13165_v12  ;;  %v9315_v13 = vld [vmem:[%s12875_s2 + $0x1e4] ss:$8 sps:$4 sm:$0xff]  }
 0x45e   : > { %7785 = vmatpush1.msk.msra.mxu0 %vm13160_vm15, %v13134_v45 }
 0x45f   : > { %2637 = vmatprep.subr.mxu0 %v13128_v36 }
 0x460   : > { %2502 = vmatpush1.bf16.msra.mxu1 %v9301_v58  ;;  %7786 = vmatpush1.msk.msra.mxu0 %vm13162_vm13, %v13134_v45  ;;  %v13171_v58 = vld [vmem:[#allocation26_spill] sm:$0xff] }
 0x461   : > { %2503 = vmatprep.subr.bf16.mxu1 %v9306_v57  ;;  %2639 = vmatprep.subr.mxu0 %v13128_v36  ;;  %v9313_v57 = vld [vmem:[%s12875_s2 + $0x1e0] ss:$8 sps:$4 sm:$0xff]  }
 0x462   : > { %7787 = vmatpush1.msk.msra.mxu0 %vm13164_vm11, %v13134_v45  ;;  %vm13193_vm11 = vnez %v13133_v33 }
 0x463   : > { %2641 = vmatprep.subr.mxu0 %v13128_v36 }
 0x464   : > { %2504 = vmatpush1.bf16.msra.mxu1 %v9304_v27  ;;  %7788 = vmatpush1.msk.msra.mxu0 %vm13166_vm1, %v13134_v45  ;;  %vm13170_vm1 = vnez %v13169_v3  ;;  %v9318_v27 = vld [vmem:[%s12875_s2 + $0x2c4] ss:$8 sps:$4 sm:$0xff]  }
 0x465   : > { %2505 = vmatprep.subr.bf16.mxu1 %v9309_v10  ;;  %2643 = vmatprep.subr.mxu0 %v13128_v36  ;;  %v13173_v10 = vld [vmem:[#allocation28_spill] sm:$0xff] }
 0x466   : > { %7789 = vmatpush1.msk.msra.mxu0 %vm13168_vm12, %v13134_v45  ;;  %vm13172_vm12 = vnez %v13171_v58 }
 0x467   : > { %2653 = vmatprep.subr.mxu0 %v13128_v36 }
 0x468   : > { %2506 = vmatpush1.bf16.msra.mxu1 %v9307_v11  ;;  %7790 = vmatpush2.msk.msra.mxu0 %vm13170_vm1, %v13134_v45  ;;  %vm13174_vm1 = vnez %v13173_v10  ;;  %v13175_v11 = vld [vmem:[#allocation30_spill] sm:$0xff] }
 0x469   : > { %2507 = vmatprep.subr.bf16.mxu1 %v9312_v25  ;;  %2655 = vmatprep.subr.mxu0 %v13128_v36  ;;  %v9316_v25 = vld [vmem:[%s12875_s2 + $0x2c0] ss:$8 sps:$4 sm:$0xff]  }
 0x46a   : > { %7791 = vmatpush2.msk.msra.mxu0 %vm13172_vm12, %v13134_v45  ;;  %vm13176_vm12 = vnez %v13175_v11 }
 0x46b   : > { %2657 = vmatprep.subr.mxu0 %v13128_v36 }
 0x46c   : > { %2508 = vmatpush1.bf16.msra.mxu1 %v9310_v52  ;;  %7792 = vmatpush2.msk.msra.mxu0 %vm13174_vm1, %v13134_v45  ;;  %v9321_v52 = vld [vmem:[%s12875_s2 + $0x2b4] ss:$8 sps:$4 sm:$0xff]  }
 0x46d   : > { %2509 = vmatprep.subr.bf16.mxu1 %v9315_v13  ;;  %2659 = vmatprep.subr.mxu0 %v13128_v36  ;;  %v13177_v13 = vld [vmem:[#allocation33_spill] sm:$0xff] }
 0x46e   : > { %7793 = vmatpush2.msk.msra.mxu0 %vm13176_vm12, %v13134_v45  ;;  %vm13178_vm1 = vnez %v13177_v13  ;;  %vm13180_vm12 = vnez %v13179_v30 }
 0x46f   : > { %2661 = vmatprep.subr.mxu0 %v13128_v36 }
 0x470   : > { %2510 = vmatpush1.bf16.msra.mxu1 %v9313_v57  ;;  %7794 = vmatpush2.msk.msra.mxu0 %vm13178_vm1, %v13134_v45  ;;  %v9319_v57 = vld [vmem:[%s12875_s2 + $0x2b0] ss:$8 sps:$4 sm:$0xff]   ;;  %vm13182_vm1 = vnez %v13181_v61 }
 0x471   : > { %2513 = vmatprep.subr.bf16.mxu1 %v9318_v27  ;;  %2663 = vmatprep.subr.mxu0 %v13128_v36  ;;  %v9324_v27 = vld [vmem:[%s12875_s2 + $0x2a4] ss:$8 sps:$4 sm:$0xff]  }
 0x472   : > { %7795 = vmatpush2.msk.msra.mxu0 %vm13180_vm12, %v13134_v45  ;;  %vm13184_vm12 = vnez %v13183_v62 }
 0x473   : > { %2665 = vmatprep.subr.mxu0 %v13128_v36 }
 0x474   : > { %2514 = vmatpush2.bf16.msra.mxu1 %v9316_v25  ;;  %7796 = vmatpush2.msk.msra.mxu0 %vm13182_vm1, %v13134_v45  ;;  %v9322_v25 = vld [vmem:[%s12875_s2 + $0x2a0] ss:$8 sps:$4 sm:$0xff]   ;;  %vm13186_vm1 = vnez %v13185_v7 }
 0x475   : > { %2515 = vmatprep.subr.bf16.mxu1 %v9321_v52  ;;  %2667 = vmatprep.subr.mxu0 %v13128_v36  ;;  %v9327_v52 = vld [vmem:[%s12875_s2 + $0x294] ss:$8 sps:$4 sm:$0xff]  }
 0x476   : > { %7797 = vmatpush2.msk.msra.mxu0 %vm13184_vm12, %v13134_v45  ;;  %vm13188_vm12 = vnez %v13187_v20 }
 0x477   : > { %2669 = vmatprep.subr.mxu0 %v13128_v36 }
 0x478   : > { %2516 = vmatpush2.bf16.msra.mxu1 %v9319_v57  ;;  %7798 = vmatpush2.msk.msra.mxu0 %vm13186_vm1, %v13134_v45  ;;  %v9325_v57 = vld [vmem:[%s12875_s2 + $0x290] ss:$8 sps:$4 sm:$0xff]   ;;  %vm13190_vm1 = vnez %v13189_v53 }
 0x479   : > { %2517 = vmatprep.subr.bf16.mxu1 %v9324_v27  ;;  %2671 = vmatprep.subr.mxu0 %v13128_v36  ;;  %v9330_v27 = vld [vmem:[%s12875_s2 + $0x284] ss:$8 sps:$4 sm:$0xff]  }
 0x47a   : > { %7799 = vmatpush2.msk.msra.mxu0 %vm13188_vm12, %v13134_v45  ;;  %vm13192_vm12 = vnez %v13191_v41 }
 0x47b   : > { %2673 = vmatprep.subr.mxu0 %v13128_v36 }
 0x47c   : > { %2518 = vmatpush2.bf16.msra.mxu1 %v9322_v25  ;;  %7800 = vmatpush2.msk.msra.mxu0 %vm13190_vm1, %v13134_v45  ;;  %v9328_v25 = vld [vmem:[%s12875_s2 + $0x280] ss:$8 sps:$4 sm:$0xff]  }
 0x47d   : > { %2519 = vmatprep.subr.bf16.mxu1 %v9327_v52  ;;  %2675 = vmatprep.subr.mxu0 %v13128_v36  ;;  %v9333_v52 = vld [vmem:[%s12875_s2 + $0x274] ss:$8 sps:$4 sm:$0xff]  }
 0x47e   : > { %7801 = vmatpush2.msk.msra.mxu0 %vm13192_vm12, %v13134_v45 }
 0x47f   : > { %7832 = vmatprep.subr.msk.mxu0 %vm13193_vm11, %v13134_v45  ;;  %vm13194_vm11 = vcmask 916480  }
 0x480   : > { %2520 = vmatpush2.bf16.msra.mxu1 %v9325_v57  ;;  %v9336_v57 = vld [vmem:[%s12875_s2 + $0x264] ss:$8 sps:$4 sm:$0xff]  }
 0x481   : > { %2521 = vmatprep.subr.bf16.mxu1 %v9330_v27 }
 0x484   : > { %2522 = vmatpush2.bf16.msra.mxu1 %v9328_v25 }
 0x485   : > { %2523 = vmatprep.subr.bf16.mxu1 %v9333_v52 }
 0x488   : > { %2524 = vmatpush2.bf16.msra.mxu1 %v9331_v15 }
 0x489   : > { %2525 = vmatprep.subr.bf16.mxu1 %v9336_v57 }
 0x48c   : > { %2526 = vmatpush2.bf16.msra.mxu1 %v9334_v56 }
 0x48d   : > { %2687 = vmatprep.subr.mxu1 %v13128_v36 }
 0x48f   : > { %2528 = vmatmul.mubr.bf16.vlgmr.msra.gmra.mxu1 %v10690_v50 }
 0x490   : > { %7773 = vmatprep.mubr.msk.bf16.mxu1 %vm13194_vm11, %v10726_v29  ;;  %7803 = vmatpush1.msk.msra.mxu1 %vm9695_vm2, %v13134_v45  ;;  %vm13195_vm2 = vnez %v13163_v8  ;;  %vm13204_vm11 = vnez %v13181_v61 }
 0x491   : > { %2689 = vmatprep.subr.mxu1 %v13128_v36 }
 0x492   : > { %7804 = vmatpush1.msk.msra.mxu1 %vm9704_vm3, %v13134_v45  ;;  %vm13196_vm3 = vnez %v13165_v12 }
 0x493   : > { %2691 = vmatprep.subr.mxu1 %v13128_v36 }
 0x494   : > { %7805 = vmatpush1.msk.msra.mxu1 %vm9714_vm4, %v13134_v45  ;;  %vm13197_vm4 = vnez %v13167_v59 }
 0x495   : > { %2693 = vmatprep.subr.mxu1 %v13128_v36 }
 0x496   : > { %7806 = vmatpush1.msk.msra.mxu1 %vm9728_vm5, %v13134_v45  ;;  %vm13198_vm5 = vnez %v13169_v3 }
 0x497   : > { %2538 = vmatmul.mubr.bf16.gmra.mxu1 %v10681_v0  ;;  %2695 = vmatprep.subr.mxu1 %v13128_v36 }
 0x498   : > { %7807 = vmatpush1.msk.msra.mxu1 %vm9740_vm6, %v13134_v45  ;;  %vm13199_vm6 = vnez %v13171_v58 }
 0x499   : > { %2697 = vmatprep.subr.mxu1 %v13128_v36 }
 0x49a   : > { %7808 = vmatpush1.msk.msra.mxu1 %vm9753_vm7, %v13134_v45  ;;  %vm13200_vm7 = vnez %v13173_v10 }
 0x49b   : > { %2699 = vmatprep.subr.mxu1 %v13128_v36 }
 0x49c   : > { %7809 = vmatpush1.msk.msra.mxu1 %vm9799_vm8, %v13134_v45  ;;  %vm13201_vm8 = vnez %v13175_v11 }
 0x49d   : > { %2701 = vmatprep.subr.mxu1 %v13128_v36 }
 0x49e   : > { %7810 = vmatpush1.msk.msra.mxu1 %vm9816_vm9, %v13134_v45  ;;  %vm13202_vm9 = vnez %v13177_v13 }
 0x49f   : > { %2703 = vmatprep.subr.mxu1 %v13128_v36 }
 0x4a0   : > { %7811 = vmatpush1.msk.msra.mxu1 %vm9834_vm10, %v13134_v45  ;;  %vm13203_vm10 = vnez %v13179_v30 }
 0x4a1   : > { %2705 = vmatprep.subr.mxu1 %v13128_v36 }
 0x4a2   : > { %7812 = vmatpush1.msk.msra.mxu1 %vm13155_vm0, %v13134_v45  ;;  %vm13205_vm0 = vnez %v13183_v62 }
 0x4a3   : > { %2707 = vmatprep.subr.mxu1 %v13128_v36 }
 0x4a4   : > { %7813 = vmatpush1.msk.msra.mxu1 %vm13158_vm14, %v13134_v45  ;;  %vm13206_vm14 = vnez %v13185_v7 }
 0x4a5   : > { %2709 = vmatprep.subr.mxu1 %v13128_v36 }
 0x4a6   : > { %7814 = vmatpush1.msk.msra.mxu1 %vm13160_vm15, %v13134_v45  ;;  %vm13207_vm15 = vnez %v13187_v20 }
 0x4a7   : > { %2711 = vmatprep.subr.mxu1 %v13128_v36 }
 0x4a8   : > { %7815 = vmatpush1.msk.msra.mxu1 %vm13162_vm13, %v13134_v45 }
 0x4a9   : > { %2713 = vmatprep.subr.mxu1 %v13128_v36 }
 0x4aa   : > { %7816 = vmatpush1.msk.msra.mxu1 %vm13195_vm2, %v13134_v45 }
 0x4ab   : > { %2715 = vmatprep.subr.mxu1 %v13128_v36 }
 0x4ac   : > { %7817 = vmatpush1.msk.msra.mxu1 %vm13196_vm3, %v13134_v45 }
 0x4ad   : > { %2717 = vmatprep.subr.mxu1 %v13128_v36 }
 0x4ae   : > { %7818 = vmatpush1.msk.msra.mxu1 %vm13197_vm4, %v13134_v45 }
 0x4af   : > { %2727 = vmatprep.subr.mxu1 %v13128_v36 }
 0x4b0   : > { %7819 = vmatpush2.msk.msra.mxu1 %vm13198_vm5, %v13134_v45  ;;  %vm13214_vm5 = vcmask 1043456  }
 0x4b1   : > { %2729 = vmatprep.subr.mxu1 %v13128_v36 }
 0x4b2   : > { %7820 = vmatpush2.msk.msra.mxu1 %vm13199_vm6, %v13134_v45  ;;  %vm13215_vm6 = vmmov %vm13214_vm5 }
 0x4b3   : > { %2731 = vmatprep.subr.mxu1 %v13128_v36 }
 0x4b4   : > { %7821 = vmatpush2.msk.msra.mxu1 %vm13200_vm7, %v13134_v45  ;;  %vm13216_vm7 = vcmask 781312  }
 0x4b5   : > { %2733 = vmatprep.subr.mxu1 %v13128_v36 }
 0x4b6   : > { %7822 = vmatpush2.msk.msra.mxu1 %vm13201_vm8, %v13134_v45  ;;  %vm13217_vm8 = vmmov %vm13216_vm7 }
 0x4b7   : > { %2735 = vmatprep.subr.mxu1 %v13128_v36 }
 0x4b8   : > { %7823 = vmatpush2.msk.msra.mxu1 %vm13202_vm9, %v13134_v45 }
 0x4b9   : > { %2737 = vmatprep.subr.mxu1 %v13128_v36 }
 0x4ba   : > { %7824 = vmatpush2.msk.msra.mxu1 %vm13203_vm10, %v13134_v45 }
 0x4bb   : > { %2739 = vmatprep.subr.mxu1 %v13128_v36 }
 0x4bc   : > { %7825 = vmatpush2.msk.msra.mxu1 %vm13204_vm11, %v13134_v45  ;;  %vm13220_vm11 = vnez %v13131_v26  ;;  %v13229_v26 = vld [vmem:[#allocation35_spill] sm:$0xff] }
 0x4bd   : > { %2741 = vmatprep.subr.mxu1 %v13128_v36 }
 0x4be   : > { %7826 = vmatpush2.msk.msra.mxu1 %vm13205_vm0, %v13134_v45  ;;  %vm13221_vm0 = vnez %v13133_v33 }
 0x4bf   : > { %2743 = vmatprep.subr.mxu1 %v13128_v36 }
 0x4c0   : > { %7827 = vmatpush2.msk.msra.mxu1 %vm13206_vm14, %v13134_v45 }
 0x4c1   : > { %2745 = vmatprep.subr.mxu1 %v13128_v36 }
 0x4c2   : > { %7828 = vmatpush2.msk.msra.mxu1 %vm13207_vm15, %v13134_v45 }
 0x4c3   : > { %2747 = vmatprep.subr.mxu1 %v13128_v36 }
 0x4c4   : > { %7829 = vmatpush2.msk.msra.mxu1 %vm13190_vm1, %v13134_v45  ;;  %vm13208_vm1 = vcmask 785408  }
 0x4c5   : > { %2749 = vmatprep.subr.mxu1 %v13128_v36  ;;  %vm13210_vm13 = vmmov %vm13208_vm1 }
 0x4c6   : > { %7830 = vmatpush2.msk.msra.mxu1 %vm13192_vm12, %v13134_v45  ;;  %vm13209_vm12 = vmmov %vm13208_vm1 }
 0x4c7   : > { %3153 = vmatprep.subr.mxu1 %v13128_v36  ;;  %vm13211_vm2 = vmmov %vm13208_vm1 }
 0x4c8   : > { %vm13212_vm3 = vmmov %vm13208_vm1 }
 0x4c9   : > { %vm13213_vm4 = vmmov %vm13208_vm1 }
 0x4ca   : > { %vm13218_vm9 = vmmov %vm13208_vm1 }
 0x4cb   : > { %vm13219_vm10 = vmmov %vm13208_vm1 }
 0x505   : > { %v2299_v61 = vpop.f32.mrf.mxu0 }
 0x507   : > { %v2301_v7 = vpop.f32.mrf.mxu0 }
 0x509   : > { %v2303_v9 = vpop.f32.mrf.mxu0 }
 0x50b   : > { %v2305_v0 = vpop.f32.mrf.mxu0 }
 0x50d   : > { %v2309_v40 = vpop.f32.mrf.mxu0 }
 0x50f   : > { %v2311_v14 = vpop.f32.mrf.mxu0 }
 0x511   : > { %v2313_v19 = vpop.f32.mrf.mxu0 }
 0x513   : > { %v2090_v56 = vpop.f32.mrf.mxu1  ;;  %v2315_v13 = vpop.f32.mrf.mxu0 }
 0x514   : > { %v2300_v16 = vadd.f32 %v2299_v61, %v2090_v56 }
 0x515   : > { %v2092_v15 = vpop.f32.mrf.mxu1 }
 0x516   : > { %v2302_v41 = vadd.f32 %v2301_v7, %v2092_v15 }
 0x517   : > { %v2094_v30 = vpop.f32.mrf.mxu1 }
 0x518   : > { %v2304_v60 = vadd.f32 %v2303_v9, %v2094_v30 }
 0x519   : > { %v2096_v20 = vpop.f32.mrf.mxu1 }
 0x51a   : > { %v2306_v29 = vadd.f32 %v2305_v0, %v2096_v20 }
 0x51b   : > { %v2100_v62 = vpop.f32.mrf.mxu1 }
 0x51c   : > { %v2310_v8 = vadd.f32 %v2309_v40, %v2100_v62 }
 0x51d   : > { %v2102_v43 = vpop.f32.mrf.mxu1 }
 0x51e   : > { %v2312_v58 = vadd.f32 %v2311_v14, %v2102_v43 }
 0x51f   : > { %v2104_v53 = vpop.f32.mrf.mxu1 }
 0x520   : > { %v2314_v57 = vadd.f32 %v2313_v19, %v2104_v53 }
 0x521   : > { %v2106_v50 = vpop.f32.mrf.mxu1 }
 0x522   : > { %v2316_v56 = vadd.f32 %v2315_v13, %v2106_v50 }
 0x54f   : > { %v2529_v4 = vpop.f32.mrf.mxu1 }
 0x550   : > { %v11012_v59 = vadd.f32 %v2529_v4, %v2300_v16 }
 0x551   : > { %v2531_v39 = vpop.f32.mrf.mxu1 }
 0x552   : > { %v11006_v6 = vadd.f32 %v2531_v39, %v2302_v41  ;;  %v2579_v61 = vmul.f32 %v11012_v59, %v11012_v59 }
 0x553   : > { %v2533_v23 = vpop.f32.mrf.mxu1 }
 0x554   : > { %v11008_v5 = vadd.f32 %v2533_v23, %v2304_v60  ;;  %v2580_v27 = vmul.f32 %v11006_v6, %v11006_v6  ;;  %v2566_v20 = vsel %vm13209_vm12, %v11006_v6, 0.0 }
 0x555   : > { %v2535_v18 = vpop.f32.mrf.mxu1 }
 0x556   : > { %v11010_v12 = vadd.f32 %v2535_v18, %v2306_v29  ;;  %v2581_v25 = vmul.f32 %v11008_v5, %v11008_v5  ;;  %v2556_v7 = vadd.f32 %v11008_v5, %v11012_v59  ;;  %v2597_v50 = vsel %vm13212_vm3, %v2580_v27, 0.0 }
 0x557   : > { %v2539_v3 = vpop.f32.mrf.mxu1 }
 0x558   : > { %v2582_v10 = vmul.f32 %v11010_v12, %v11010_v12  ;;  %v11016_v11 = vadd.f32 %v2539_v3, %v2310_v8  ;;  %v2567_v15 = vsel %vm13208_vm1, %v11010_v12, 0.0  ;;  %v2587_v4 = vadd.f32 %v2581_v25, %v2579_v61 }
 0x559   : > { %v2541_v52 = vpop.f32.mrf.mxu1  ;;  %v2568_v14 = vadd.f32 %v2567_v15, %v2566_v20 }
 0x55a   : > { %v11024_v30 = vadd.f32 %v2541_v52, %v2312_v58  ;;  %v2583_v62 = vmul.f32 %v11016_v11, %v11016_v11  ;;  %v2598_v43 = vsel %vm13210_vm13, %v2582_v10, 0.0  ;;  %v2557_v39 = vadd.f32 %v2556_v7, %v11016_v11 }
 0x55b   : > { %v2543_v9 = vpop.f32.mrf.mxu1  ;;  %v2599_v16 = vadd.f32 %v2598_v43, %v2597_v50 }
 0x55c   : > { %v2569_v0 = vsel %vm13211_vm2, %v11024_v30, 0.0  ;;  %v2584_v53 = vmul.f32 %v11024_v30, %v11024_v30  ;;  %v11039_v40 = vadd.f32 %v2543_v9, %v2314_v57  ;;  %v2588_v18 = vadd.f32 %v2587_v4, %v2583_v62 }
 0x55d   : > { %v2545_v41 = vpop.f32.mrf.mxu1  ;;  %v2570_v8 = vadd.f32 %v2569_v0, %v2568_v14 }
 0x55e   : > { %v2600_v60 = vsel %vm13213_vm4, %v2584_v53, 0.0  ;;  %v2558_v23 = vsel %vm13214_vm5, %v11039_v40, 0.0  ;;  %v2585_v29 = vmul.f32 %v11039_v40, %v11039_v40  ;;  %v11048_v19 = vadd.f32 %v2545_v41, %v2316_v56 }
 0x55f   : > { %v2559_v3 = vadd.f32 %v2558_v23, %v2557_v39  ;;  %v2601_v27 = vadd.f32 %v2600_v60, %v2599_v16 }
 0x560   : > { %v2589_v58 = vsel %vm13215_vm6, %v2585_v29, 0.0  ;;  %v2571_v10 = vsel %vm13216_vm7, %v11048_v19, 0.0  ;;  %v2586_v13 = vmul.f32 %v11048_v19, %v11048_v19 }
 0x561   : > { %v2560_v25 = vrot.slane %v2559_v3, 4  ;;  %v2590_v52 = vadd.f32 %v2589_v58, %v2588_v18  ;;  %v2572_v57 = vadd.f32 %v2571_v10, %v2570_v8 }
 0x562   : > { %v2602_v15 = vsel %vm13217_vm8, %v2586_v13, 0.0 }
 0x563   : > { %v2561_v56 = vadd.f32 %v2560_v25, %v2559_v3  ;;  %v2591_v61 = vrot.slane %v2590_v52, 4  ;;  %v2573_v20 = vrot.slane %v2572_v57, 4  ;;  %v2603_v7 = vadd.f32 %v2602_v15, %v2601_v27 }
 0x564   : > { %v11067_v27 = vadd.f32 %v10229_v49, %v9677_v48 }
 0x565   : > { %v2562_v62 = vrot.slane %v2561_v56, 2  ;;  %v2592_v9 = vadd.f32 %v2591_v61, %v2590_v52  ;;  %v2574_v43 = vadd.f32 %v2573_v20, %v2572_v57  ;;  %v2604_v0 = vrot.slane %v2603_v7, 4 }
 0x566   : > { %vm2971_vm14 = vcmp.eq.f32.partialorder %v9653_v31, %v11067_v27  ;;  %vm2970_vm15 = vcmp.eq.f32.partialorder %v9658_v34, %v11067_v27  ;;  %vm2969_vm1 = vcmp.eq.f32.partialorder %v9660_v35, %v11067_v27  ;;  %vm2968_vm12 = vcmp.eq.f32.partialorder %v9664_v37, %v11067_v27 }
 0x567   : > { %v2563_v53 = vadd.f32 %v2562_v62, %v2561_v56  ;;  %v2593_v50 = vrot.slane %v2592_v9, 2  ;;  %v2575_v4 = vrot.slane %v2574_v43, 2  ;;  %v2605_v14 = vadd.f32 %v2604_v0, %v2603_v7  ;;  %v2762_v7 = vld [vmem:[%s12881_s8 + $0x1] sm:$0x1] }
 0x568   : > { %vm2967_vm13 = vcmp.eq.f32.partialorder %v9672_v46, %v11067_v27  ;;  %vm2966_vm2 = vcmp.eq.f32.partialorder %v9674_v47, %v11067_v27  ;;  %vm2965_vm3 = vcmp.eq.f32.partialorder %v9778_v21, %v11067_v27  ;;  %vm2964_vm4 = vcmp.eq.f32.partialorder %v9782_v24, %v11067_v27  ;;  %v2763_v0 = vld [vmem:[%s12882_s9 + $0x1] sm:$0x1] }
 0x569   : > { %v2594_v39 = vadd.f32 %v2593_v50, %v2592_v9  ;;  %v2576_v41 = vadd.f32 %v2575_v4, %v2574_v43  ;;  %v2606_v60 = vrot.slane %v2605_v14, 2  ;;  %v2564_v23 = vrot.slane %v2563_v53, 1  ;;  %v13230_v4 = vld [vmem:[#allocation37_spill] sm:$0xff] }
 0x56a   : > { %vm2963_vm5 = vcmp.eq.f32.partialorder %v9786_v28, %v11067_v27  ;;  %vm2962_vm6 = vcmp.eq.f32.partialorder %v9790_v38, %v11067_v27  ;;  %vm2961_vm7 = vcmp.eq.f32.partialorder %v9795_v44, %v11067_v27  ;;  %vm2960_vm8 = vcmp.eq.f32.partialorder %v9811_v55, %v11067_v27 }
 0x56b   : > { %v2577_v29 = vrot.slane %v2576_v41, 1  ;;  %v2607_v16 = vadd.f32 %v2606_v60, %v2605_v14  ;;  %v2595_v18 = vrot.slane %v2594_v39, 1  ;;  %v2565_v58 = vadd.f32 %v2564_v23, %v2563_v53 }
 0x56c   : > { %v11157_v43 = vadd.f32 8.0, %v11067_v27 }
 0x56d   : > { %v2578_v8 = vadd.f32 %v2577_v29, %v2576_v41  ;;  %v2608_v3 = vrot.slane %v2607_v16, 1  ;;  %v2596_v13 = vadd.f32 %v2595_v18, %v2594_v39  ;;  %v13231_v39 = vld [vmem:[#allocation44_spill] sm:$0xff] }
 0x56f   : > { %7802 = vmatprep.mubr.msk.f32.mxu0 %vm13218_vm9, %v2578_v8  ;;  %v2609_v10 = vadd.f32 %v2608_v3, %v2607_v16  ;;  %vm2959_vm9 = vcmp.eq.f32.partialorder %v9830_v63, %v11067_v27 }
 0x570   : > { %2678 = vmatmul.mubr.f32.vlgmr.msra.gmra.mxu0 %v2565_v58 }
 0x571   : > { %7831 = vmatprep.mubr.msk.f32.mxu1 %vm13219_vm10, %v2609_v10  ;;  %7833 = vmatpush1.msk.msra.mxu0 %vm13220_vm11, %v13134_v45  ;;  %vm2958_vm10 = vcmp.eq.f32.partialorder %v9840_v2, %v11067_v27 }
 0x572   : > { %2752 = vmatmul.mubr.f32.vlgmr.msra.gmra.mxu1 %v2596_v13  ;;  %2834 = vmatprep.mubr.f32.mxu0 %v13128_v36 }
 0x573   : > { %7835 = vmatprep.subr.msk.mxu0 %vm13221_vm0, %v13134_v45  ;;  %7898 = vmatpush1.msk.msra.mxu1 %vm2971_vm14, %v13134_v45  ;;  %vm2957_vm0 = vcmp.eq.f32.partialorder %v9865_v22, %v11067_v27  ;;  %vm2956_vm14 = vcmp.eq.f32.partialorder %v9883_v32, %v11067_v27 }
 0x574   : > { %3155 = vmatprep.subr.mxu1 %v13128_v36 }
 0x575   : > { %7899 = vmatpush1.msk.msra.mxu1 %vm2970_vm15, %v13134_v45  ;;  %vm2983_vm15 = vcmp.eq.f32.partialorder %v9903_v51, %v11067_v27 }
 0x576   : > { %3157 = vmatprep.subr.mxu1 %v13128_v36 }
 0x577   : > { %7900 = vmatpush1.msk.msra.mxu1 %vm2969_vm1, %v13134_v45  ;;  %vm2982_vm1 = vcmp.eq.f32.partialorder %v9912_v54, %v11067_v27 }
 0x578   : > { %3159 = vmatprep.subr.mxu1 %v13128_v36 }
 0x579   : > { %7901 = vmatpush1.msk.msra.mxu1 %vm2968_vm12, %v13134_v45  ;;  %vm2981_vm12 = vcmp.eq.f32.partialorder %v9931_v1, %v11067_v27 }
 0x57a   : > { %3161 = vmatprep.subr.mxu1 %v13128_v36 }
 0x57b   : > { %7902 = vmatpush1.msk.msra.mxu1 %vm2967_vm13, %v13134_v45  ;;  %vm2980_vm13 = vcmp.eq.f32.partialorder %v9948_v17, %v11067_v27 }
 0x57c   : > { %3163 = vmatprep.subr.mxu1 %v13128_v36 }
 0x57d   : > { %7903 = vmatpush1.msk.msra.mxu1 %vm2966_vm2, %v13134_v45  ;;  %vm2979_vm2 = vcmp.eq.f32.partialorder %v9968_v42, %v11067_v27 }
 0x57e   : > { %3165 = vmatprep.subr.mxu1 %v13128_v36 }
 0x57f   : > { %7904 = vmatpush1.msk.msra.mxu1 %vm2965_vm3, %v13134_v45  ;;  %vm13222_vm3 = vcmask 64512  }
 0x580   : > { %3167 = vmatprep.subr.mxu1 %v13128_v36 }
 0x581   : > { %7905 = vmatpush1.msk.msra.mxu1 %vm2964_vm4, %v13134_v45  ;;  %vm3056_vm4 = vcmp.eq.f32.partialorder %v9653_v31, %v11157_v43 }
 0x582   : > { %3169 = vmatprep.subr.mxu1 %v13128_v36 }
 0x583   : > { %7906 = vmatpush1.msk.msra.mxu1 %vm2963_vm5, %v13134_v45  ;;  %vm13223_vm5 = vmmov %vm13222_vm3 }
 0x584   : > { %3171 = vmatprep.subr.mxu1 %v13128_v36 }
 0x585   : > { %7907 = vmatpush1.msk.msra.mxu1 %vm2962_vm6, %v13134_v45  ;;  %vm3055_vm6 = vcmp.eq.f32.partialorder %v9658_v34, %v11157_v43 }
 0x586   : > { %3173 = vmatprep.subr.mxu1 %v13128_v36 }
 0x587   : > { %7908 = vmatpush1.msk.msra.mxu1 %vm2961_vm7, %v13134_v45  ;;  %vm3053_vm7 = vcmp.eq.f32.partialorder %v9664_v37, %v11157_v43 }
 0x588   : > { %3175 = vmatprep.subr.mxu1 %v13128_v36 }
 0x589   : > { %7909 = vmatpush1.msk.msra.mxu1 %vm2960_vm8, %v13134_v45  ;;  %vm3052_vm8 = vcmp.eq.f32.partialorder %v9672_v46, %v11157_v43 }
 0x58a   : > { %3177 = vmatprep.subr.mxu1 %v13128_v36 }
 0x58b   : > { %7910 = vmatpush1.msk.msra.mxu1 %vm2959_vm9, %v13134_v45  ;;  %vm3051_vm9 = vcmp.eq.f32.partialorder %v9674_v47, %v11157_v43 }
 0x58c   : > { %3179 = vmatprep.subr.mxu1 %v13128_v36 }
 0x58d   : > { %7911 = vmatpush1.msk.msra.mxu1 %vm2958_vm10, %v13134_v45  ;;  %vm3050_vm10 = vcmp.eq.f32.partialorder %v9778_v21, %v11157_v43 }
 0x58e   : > { %3181 = vmatprep.subr.mxu1 %v13128_v36 }
 0x58f   : > { %7912 = vmatpush1.msk.msra.mxu1 %vm2957_vm0, %v13134_v45  ;;  %vm3049_vm0 = vcmp.eq.f32.partialorder %v9782_v24, %v11157_v43 }
 0x590   : > { %3183 = vmatprep.subr.mxu1 %v13128_v36 }
 0x591   : > { %7913 = vmatpush1.msk.msra.mxu1 %vm2956_vm14, %v13134_v45  ;;  %vm3048_vm14 = vcmp.eq.f32.partialorder %v9786_v28, %v11157_v43 }
 0x592   : > { %3193 = vmatprep.subr.mxu1 %v13128_v36 }
 0x593   : > { %7914 = vmatpush2.msk.msra.mxu1 %vm2983_vm15, %v13134_v45  ;;  %vm3047_vm15 = vcmp.eq.f32.partialorder %v9790_v38, %v11157_v43 }
 0x594   : > { %3195 = vmatprep.subr.mxu1 %v13128_v36 }
 0x595   : > { %7915 = vmatpush2.msk.msra.mxu1 %vm2982_vm1, %v13134_v45  ;;  %vm3046_vm1 = vcmp.eq.f32.partialorder %v9795_v44, %v11157_v43 }
 0x596   : > { %3197 = vmatprep.subr.mxu1 %v13128_v36 }
 0x597   : > { %7916 = vmatpush2.msk.msra.mxu1 %vm2981_vm12, %v13134_v45  ;;  %vm3045_vm12 = vcmp.eq.f32.partialorder %v9811_v55, %v11157_v43 }
 0x598   : > { %3199 = vmatprep.subr.mxu1 %v13128_v36 }
 0x599   : > { %7917 = vmatpush2.msk.msra.mxu1 %vm2980_vm13, %v13134_v45  ;;  %vm3044_vm13 = vcmp.eq.f32.partialorder %v9830_v63, %v11157_v43 }
 0x59a   : > { %3201 = vmatprep.subr.mxu1 %v13128_v36 }
 0x59b   : > { %7918 = vmatpush2.msk.msra.mxu1 %vm2979_vm2, %v13134_v45  ;;  %vm3043_vm2 = vcmp.eq.f32.partialorder %v9840_v2, %v11157_v43 }
 0x59c   : > { %3203 = vmatprep.subr.mxu1 %v13128_v36 }
 0x630   : > { %v2679_v49 = vpop.f32.mrf.mxu0 }
 0x631   : > { %v2683_v33 = vmul.f32 0.0012755102, %v2679_v49 }
 0x632   : > { %v2681_v25 = vpop.f32.mrf.mxu0  ;;  %v2753_v52 = vpop.f32.mrf.mxu1 }
 0x633   : > { %v2758_v57 = vmul.f32 %v2683_v33, %v2683_v33  ;;  %v2757_v15 = vmul.f32 0.0012755102, %v2753_v52 }
 0x634   : > { %v2755_v56 = vpop.f32.mrf.mxu1 }
 0x635   : > { %v2759_v61 = vsub.f32 %v2757_v15, %v2758_v57 }
 0x637   : > { %v2760_v20 = vadd.f32 1e-05, %v2759_v61 }
 0x639   : > { %9489 = vrsqrt.f32 %v2760_v20 }
 0x646   : > { %v9490_v62 = vpop.eup %9489 }
 0x647   : > { %v2764_v9 = vmul.f32 %v9490_v62, %v2762_v7 }
 0x649   : > { %7834 = vmatmul.mubr.msk.f32.vlgmr.msra.gmra.mxu0 %vm13222_vm3, %v2764_v9  ;;  %v2765_v53 = vmul.f32 %v2764_v9, %v2683_v33  ;;  %vm3042_vm3 = vcmp.eq.f32.partialorder %v9865_v22, %v11157_v43 }
 0x64a   : > { %7836 = vmatpush1.msk.msra.mxu0 %vm13220_vm11, %v13134_v45  ;;  %2908 = vmatprep.mubr.f32.mxu0 %v13128_v36  ;;  %vm3054_vm11 = vcmp.eq.f32.partialorder %v9660_v35, %v11157_v43 }
 0x64b   : > { %v2766_v50 = vsub.f32 %v2763_v0, %v2765_v53  ;;  %3238 = vmatprep.subr.mxu0 %v13128_v36 }
 0x64d   : > { %7837 = vmatmul.mubr.msk.f32.vlgmr.msra.gmra.mxu0 %vm13223_vm5, %v2766_v50  ;;  %vm3068_vm5 = vcmp.eq.f32.partialorder %v9903_v51, %v11157_v43  ;;  %v13224_v51 = vld [vmem:[#allocation24_spill] sm:$0xff] }
 0x64e   : > { %7930 = vmatpush1.msk.msra.mxu0 %vm3056_vm4, %v13134_v45  ;;  %vm3041_vm4 = vcmp.eq.f32.partialorder %v9883_v32, %v11157_v43 }
 0x64f   : > { %3240 = vmatprep.subr.mxu0 %v13128_v36 }
 0x650   : > { %7931 = vmatpush1.msk.msra.mxu0 %vm3055_vm6, %v13134_v45  ;;  %vm3067_vm6 = vcmp.eq.f32.partialorder %v9912_v54, %v11157_v43  ;;  %v13225_v54 = vld [vmem:[#allocation27_spill] sm:$0xff] }
 0x651   : > { %3242 = vmatprep.subr.mxu0 %v13128_v36 }
 0x652   : > { %7932 = vmatpush1.msk.msra.mxu0 %vm3054_vm11, %v13134_v45  ;;  %vm3066_vm11 = vcmp.eq.f32.partialorder %v9931_v1, %v11157_v43  ;;  %v13226_v1 = vld [vmem:[#allocation29_spill] sm:$0xff] }
 0x653   : > { %3244 = vmatprep.subr.mxu0 %v13128_v36 }
 0x654   : > { %7933 = vmatpush1.msk.msra.mxu0 %vm3053_vm7, %v13134_v45  ;;  %vm3065_vm7 = vcmp.eq.f32.partialorder %v9948_v17, %v11157_v43  ;;  %v13227_v17 = vld [vmem:[#allocation31_spill] sm:$0xff] }
 0x655   : > { %3246 = vmatprep.subr.mxu0 %v13128_v36 }
 0x656   : > { %7934 = vmatpush1.msk.msra.mxu0 %vm3052_vm8, %v13134_v45  ;;  %vm3064_vm8 = vcmp.eq.f32.partialorder %v9968_v42, %v11157_v43  ;;  %v13228_v42 = vld [vmem:[#allocation32_spill] sm:$0xff] }
 0x657   : > { %3248 = vmatprep.subr.mxu0 %v13128_v36 }
 0x658   : > { %7935 = vmatpush1.msk.msra.mxu0 %vm3051_vm9, %v13134_v45  ;;  %vm2978_vm9 = vcmp.eq.f32.partialorder %v13224_v51, %v11067_v27 }
 0x659   : > { %3250 = vmatprep.subr.mxu0 %v13128_v36  ;;  %7919 = vmatpush2.msk.msra.mxu1 %vm2978_vm9, %v13134_v45 }
 0x65a   : > { %7936 = vmatpush1.msk.msra.mxu0 %vm3050_vm10, %v13134_v45  ;;  %vm3063_vm10 = vcmp.eq.f32.partialorder %v13224_v51, %v11157_v43  ;;  %3205 = vmatprep.subr.mxu1 %v13128_v36 }
 0x65b   : > { %3252 = vmatprep.subr.mxu0 %v13128_v36 }
 0x65c   : > { %7937 = vmatpush1.msk.msra.mxu0 %vm3049_vm0, %v13134_v45  ;;  %vm2977_vm0 = vcmp.eq.f32.partialorder %v13225_v54, %v11067_v27 }
 0x65d   : > { %3254 = vmatprep.subr.mxu0 %v13128_v36  ;;  %7920 = vmatpush2.msk.msra.mxu1 %vm2977_vm0, %v13134_v45 }
 0x65e   : > { %7938 = vmatpush1.msk.msra.mxu0 %vm3048_vm14, %v13134_v45  ;;  %vm3062_vm14 = vcmp.eq.f32.partialorder %v13225_v54, %v11157_v43  ;;  %3207 = vmatprep.subr.mxu1 %v13128_v36 }
 0x65f   : > { %3256 = vmatprep.subr.mxu0 %v13128_v36 }
 0x660   : > { %7939 = vmatpush1.msk.msra.mxu0 %vm3047_vm15, %v13134_v45  ;;  %vm2976_vm15 = vcmp.eq.f32.partialorder %v13226_v1, %v11067_v27 }
 0x661   : > { %3258 = vmatprep.subr.mxu0 %v13128_v36  ;;  %7921 = vmatpush2.msk.msra.mxu1 %vm2976_vm15, %v13134_v45 }
 0x662   : > { %7940 = vmatpush1.msk.msra.mxu0 %vm3046_vm1, %v13134_v45  ;;  %vm3061_vm1 = vcmp.eq.f32.partialorder %v13226_v1, %v11157_v43  ;;  %3209 = vmatprep.subr.mxu1 %v13128_v36 }
 0x663   : > { %3260 = vmatprep.subr.mxu0 %v13128_v36 }
 0x664   : > { %7941 = vmatpush1.msk.msra.mxu0 %vm3045_vm12, %v13134_v45  ;;  %vm2975_vm12 = vcmp.eq.f32.partialorder %v13227_v17, %v11067_v27 }
 0x665   : > { %3262 = vmatprep.subr.mxu0 %v13128_v36  ;;  %7922 = vmatpush2.msk.msra.mxu1 %vm2975_vm12, %v13134_v45 }
 0x666   : > { %7942 = vmatpush1.msk.msra.mxu0 %vm3044_vm13, %v13134_v45  ;;  %vm3060_vm13 = vcmp.eq.f32.partialorder %v13227_v17, %v11157_v43  ;;  %3211 = vmatprep.subr.mxu1 %v13128_v36 }
 0x667   : > { %3264 = vmatprep.subr.mxu0 %v13128_v36 }
 0x668   : > { %7943 = vmatpush1.msk.msra.mxu0 %vm3043_vm2, %v13134_v45  ;;  %vm2974_vm2 = vcmp.eq.f32.partialorder %v13228_v42, %v11067_v27 }
 0x669   : > { %3266 = vmatprep.subr.mxu0 %v13128_v36  ;;  %7923 = vmatpush2.msk.msra.mxu1 %vm2974_vm2, %v13134_v45  ;;  %vm13240_vm2 = vcmask 228352  }
 0x66a   : > { %7944 = vmatpush1.msk.msra.mxu0 %vm3042_vm3, %v13134_v45  ;;  %vm3059_vm3 = vcmp.eq.f32.partialorder %v13228_v42, %v11157_v43  ;;  %3213 = vmatprep.subr.mxu1 %v13128_v36 }
 0x66b   : > { %3268 = vmatprep.subr.mxu0 %v13128_v36 }
 0x66c   : > { %7945 = vmatpush1.msk.msra.mxu0 %vm3041_vm4, %v13134_v45  ;;  %vm2973_vm4 = vcmp.eq.f32.partialorder %v13229_v26, %v11067_v27 }
 0x66d   : > { %3278 = vmatprep.subr.mxu0 %v13128_v36  ;;  %7924 = vmatpush2.msk.msra.mxu1 %vm2973_vm4, %v13134_v45  ;;  %vm13242_vm4 = vcmask 1043456  }
 0x66e   : > { %7946 = vmatpush2.msk.msra.mxu0 %vm3068_vm5, %v13134_v45  ;;  %vm3058_vm5 = vcmp.eq.f32.partialorder %v13229_v26, %v11157_v43  ;;  %3215 = vmatprep.subr.mxu1 %v13128_v36 }
 0x66f   : > { %3280 = vmatprep.subr.mxu0 %v13128_v36 }
 0x670   : > { %7947 = vmatpush2.msk.msra.mxu0 %vm3067_vm6, %v13134_v45  ;;  %vm2972_vm6 = vcmp.eq.f32.partialorder %v13230_v4, %v11067_v27 }
 0x671   : > { %3282 = vmatprep.subr.mxu0 %v13128_v36  ;;  %7925 = vmatpush2.msk.msra.mxu1 %vm2972_vm6, %v13134_v45  ;;  %vm13244_vm6 = vmmov %vm13242_vm4 }
 0x672   : > { %7948 = vmatpush2.msk.msra.mxu0 %vm3066_vm11, %v13134_v45  ;;  %vm3057_vm11 = vcmp.eq.f32.partialorder %v13230_v4, %v11157_v43  ;;  %v3125_v43 = vmul.f32 2.0, %v9883_v32 }
 0x673   : > { %3284 = vmatprep.subr.mxu0 %v13128_v36 }
 0x674   : > { %7949 = vmatpush2.msk.msra.mxu0 %vm3065_vm7, %v13134_v45  ;;  %vm13232_vm7 = vcmask 785408   ;;  %v3133_v0 = vadd.f32 1.0, %v3125_v43  ;;  %vm3127_vm12 = vcmp.eq.f32.partialorder %v9677_v48, %v3125_v43  ;;  %v9355_v43 = vld [vmem:[%s12876_s3 + $0xa0] ss:$8 sps:$4 sm:$0xff]  }
 0x675   : > { %3286 = vmatprep.subr.mxu0 %v13128_v36  ;;  %vm13234_vm9 = vmmov %vm13232_vm7 }
 0x676   : > { %7950 = vmatpush2.msk.msra.mxu0 %vm3064_vm8, %v13134_v45  ;;  %vm13233_vm8 = vmmov %vm13232_vm7 }
 0x677   : > { %3288 = vmatprep.subr.mxu0 %v13128_v36  ;;  %vm13236_vm0 = vmmov %vm13232_vm7 }
 0x678   : > { %7951 = vmatpush2.msk.msra.mxu0 %vm3063_vm10, %v13134_v45  ;;  %vm13235_vm10 = vmmov %vm13232_vm7 }
 0x679   : > { %3290 = vmatprep.subr.mxu0 %v13128_v36  ;;  %vm13238_vm15 = vmmov %vm13236_vm0 }
 0x67a   : > { %7952 = vmatpush2.msk.msra.mxu0 %vm3062_vm14, %v13134_v45  ;;  %vm13237_vm14 = vmmov %vm13236_vm0 }
 0x67b   : > { %3292 = vmatprep.subr.mxu0 %v13128_v36 }
 0x67c   : > { %7953 = vmatpush2.msk.msra.mxu0 %vm3061_vm1, %v13134_v45  ;;  %vm13239_vm1 = vmmov %vm13236_vm0 }
 0x67d   : > { %3294 = vmatprep.subr.mxu0 %v13128_v36 }
 0x67e   : > { %7954 = vmatpush2.msk.msra.mxu0 %vm3060_vm13, %v13134_v45  ;;  %vm3135_vm13 = vcmp.eq.f32.partialorder %v9677_v48, %v3133_v0  ;;  %v9360_v0 = vld [vmem:[%s12876_s3 + $0x34] ss:$8 sps:$4 sm:$0xff]  }
 0x67f   : > { %3296 = vmatprep.subr.mxu0 %v13128_v36  ;;  %v7896_v53 = vsel %vm3135_vm13, 1.0, %v13128_v36 }
 0x680   : > { %7955 = vmatpush2.msk.msra.mxu0 %vm3059_vm3, %v13134_v45  ;;  %vm13241_vm3 = vmmov %vm13240_vm2 }
 0x681   : > { %3298 = vmatprep.subr.mxu0 %v13128_v36 }
 0x682   : > { %7956 = vmatpush2.msk.msra.mxu0 %vm3058_vm5, %v13134_v45  ;;  %vm13243_vm5 = vmmov %vm13242_vm4 }
 0x683   : > { %3300 = vmatprep.subr.mxu0 %v13128_v36 }
 0x684   : > { %7957 = vmatpush2.msk.msra.mxu0 %vm3057_vm11, %v13134_v45  ;;  %vm13245_vm11 = vmmov %vm13242_vm4 }
 0x709   : > { %v2836_v14 = vpop.f32.mrf.mxu0 }
 0x70a   : > { %v2918_v41 = vrot.slane %v2836_v14, %v13231_v39 }
 0x70b   : > { %v2838_v60 = vpop.f32.mrf.mxu0 }
 0x70c   : > { %v2922_v23 = vrot.slane %v2838_v60, %v13231_v39  ;;  %v2923_v16 = vmul.f32 %v2918_v41, %v11012_v59  ;;  %v2925_v33 = vmul.f32 %v2918_v41, %v11008_v5  ;;  %v2929_v7 = vmul.f32 %v2918_v41, %v11039_v40 }
 0x70d   : > { %v2910_v29 = vpop.f32.mrf.mxu0  ;;  %v7894_v40 = vsel %vm3127_vm12, 1.0, %v13128_v36 }
 0x70e   : > { %v2934_v18 = vrot.slane %v2910_v29, %v13231_v39  ;;  %v2924_v3 = vmul.f32 %v2922_v23, %v11006_v6  ;;  %v2926_v58 = vmul.f32 %v2922_v23, %v11010_v12  ;;  %v2928_v25 = vmul.f32 %v2922_v23, %v11024_v30 }
 0x70f   : > { %v2912_v8 = vpop.f32.mrf.mxu0  ;;  %v2927_v12 = vmul.f32 %v2918_v41, %v11016_v11  ;;  %v2930_v56 = vmul.f32 %v2922_v23, %v11048_v19  ;;  %v3126_v29 = vmul.f32 2.0, %v9865_v22 }
 0x710   : > { %v2938_v10 = vrot.slane %v2912_v8, %v13231_v39  ;;  %v2939_v13 = vadd.f32 %v2934_v18, %v2923_v16  ;;  %v2941_v15 = vadd.f32 %v2934_v18, %v2925_v33  ;;  %v2945_v11 = vadd.f32 %v2934_v18, %v2929_v7  ;;  %v9354_v7 = vld [vmem:[%s12876_s3 + $0x44] ss:$8 sps:$4 sm:$0xff]  }
 0x711   : > { %v2943_v30 = vadd.f32 %v2934_v18, %v2927_v12  ;;  %v9340_v12 = vld [vmem:[%s12876_s3 + $0x60] ss:$8 sps:$4 sm:$0xff]  }
 0x712   : > { %v2940_v27 = vadd.f32 %v2938_v10, %v2924_v3  ;;  %v2942_v49 = vadd.f32 %v2938_v10, %v2926_v58  ;;  %v2947_v57 = vmax.f32 %v2939_v13, 0.0  ;;  %v2944_v6 = vadd.f32 %v2938_v10, %v2928_v25 }
 0x713   : > { %v2949_v5 = vmax.f32 %v2941_v15, 0.0  ;;  %v2946_v20 = vadd.f32 %v2938_v10, %v2930_v56  ;;  %v2951_v62 = vmax.f32 %v2943_v30, 0.0  ;;  %v2953_v19 = vmax.f32 %v2945_v11, 0.0  ;;  %v9339_v15 = vld [vmem:[%s12876_s3 + $0xd4] ss:$8 sps:$4 sm:$0xff]  }
 0x714   : > { %v2948_v52 = vmax.f32 %v2940_v27, 0.0  ;;  %v2950_v59 = vmax.f32 %v2942_v49, 0.0  ;;  %v2952_v61 = vmax.f32 %v2944_v6, 0.0  ;;  %v3134_v10 = vadd.f32 1.0, %v3126_v29  ;;  %v9337_v6 = vld [vmem:[%s12876_s3 + $0xd0] ss:$8 sps:$4 sm:$0xff]  }
 0x715   : > { %v2954_v9 = vmax.f32 %v2946_v20, 0.0  ;;  %v9345_v56 = vld [vmem:[%s12876_s3 + $0xc4] ss:$8 sps:$4 sm:$0xff]   ;;  %v9343_v30 = vld [vmem:[%s12876_s3 + $0xc0] ss:$8 sps:$4 sm:$0xff]  }
 0x716   : > { %7926 = vmatprep.mubr.msk.f32.mxu1 %vm13232_vm7, %v2948_v52  ;;  %7958 = vmatprep.mubr.msk.f32.mxu0 %vm13233_vm8, %v2948_v52  ;;  %vm3128_vm7 = vcmp.eq.f32.partialorder %v9677_v48, %v3126_v29  ;;  %vm3136_vm8 = vcmp.eq.f32.partialorder %v9677_v48, %v3134_v10  ;;  %v9351_v20 = vld [vmem:[%s12876_s3 + $0xb4] ss:$8 sps:$4 sm:$0xff]   ;;  %v9349_v11 = vld [vmem:[%s12876_s3 + $0xb0] ss:$8 sps:$4 sm:$0xff]   ;;  %v9376_v29 = vld [vmem:[%s12876_s3] ss:$8 sps:$4 sm:$0xff]  }
 0x717   : > { %3218 = vmatmul.mubr.f32.vlgmr.msra.gmra.mxu1 %v2947_v57  ;;  %3303 = vmatmul.mubr.f32.vlgmr.msra.gmra.mxu0 %v2947_v57  ;;  %v7895_v52 = vsel %vm3128_vm7, 1.0, %v13128_v36  ;;  %v7897_v57 = vsel %vm3136_vm8, 1.0, %v13128_v36 }
 0x718   : > { %7927 = vmatprep.mubr.msk.f32.mxu1 %vm13234_vm9, %v2950_v59  ;;  %7959 = vmatprep.mubr.msk.f32.mxu0 %vm13235_vm10, %v2950_v59  ;;  %v9342_v59 = vld [vmem:[%s12876_s3 + $0x64] ss:$8 sps:$4 sm:$0xff]   ;;  %vm13246_vm9 = vmmov %vm13240_vm2 }
 0x719   : > { %vm13247_vm10 = vmmov %vm13240_vm2 }
 0x71b   : > { %3223 = vmatmul.mubr.f32.gmra.mxu1 %v2949_v5  ;;  %3308 = vmatmul.mubr.f32.gmra.mxu0 %v2949_v5  ;;  %v9348_v5 = vld [vmem:[%s12876_s3 + $0x54] ss:$8 sps:$4 sm:$0xff]  }
 0x71c   : > { %7928 = vmatprep.mubr.msk.f32.mxu1 %vm13236_vm0, %v2952_v61  ;;  %7960 = vmatprep.mubr.msk.f32.mxu0 %vm13237_vm14, %v2952_v61  ;;  %v9346_v61 = vld [vmem:[%s12876_s3 + $0x50] ss:$8 sps:$4 sm:$0xff]   ;;  %vm13249_vm0 = vcmask 914432   ;;  %vm13250_vm14 = vcmask 916480  }
 0x71f   : > { %3228 = vmatmul.mubr.f32.gmra.mxu1 %v2951_v62  ;;  %3313 = vmatmul.mubr.f32.gmra.mxu0 %v2951_v62  ;;  %v13248_v62 = vmov 0  }
 0x720   : > { %7929 = vmatprep.mubr.msk.f32.mxu1 %vm13238_vm15, %v2954_v9  ;;  %7961 = vmatprep.mubr.msk.f32.mxu0 %vm13239_vm1, %v2954_v9  ;;  %v9352_v9 = vld [vmem:[%s12876_s3 + $0x40] ss:$8 sps:$4 sm:$0xff]   ;;  %vm13251_vm15 = vmmov %vm13250_vm14 }
 0x721   : > { %vm13252_vm1 = vmmov %vm13250_vm14 }
 0x722   : > { %vm13253_vm12 = vmmov %vm13252_vm1 }
 0x723   : > { %3233 = vmatmul.mubr.f32.gmra.mxu1 %v2953_v19  ;;  %3318 = vmatmul.mubr.f32.gmra.mxu0 %v2953_v19  ;;  %v9357_v19 = vld [vmem:[%s12876_s3 + $0xa4] ss:$8 sps:$4 sm:$0xff]  }
 0x724   : > { %8704 = vmatprep.mubr.msk.f32.mxu1 %vm13240_vm2, %v7894_v40  ;;  %8715 = vmatprep.mubr.msk.f32.mxu0 %vm13241_vm3, %v7896_v53  ;;  %v9358_v40 = vld [vmem:[%s12876_s3 + $0x30] ss:$8 sps:$4 sm:$0xff]   ;;  %v9363_v53 = vld [vmem:[%s12876_s3 + $0x94] ss:$8 sps:$4 sm:$0xff]  }
 0x7d7   : > { %v3219_v50 = vpop.f32.mrf.mxu1  ;;  %v3304_v51 = vpop.f32.mrf.mxu0 }
 0x7d8   : > { %v3323_v25 = vmax.f32 %v3219_v50, %v3304_v51  ;;  %v9361_v50 = vld [vmem:[%s12876_s3 + $0x90] ss:$8 sps:$4 sm:$0xff]   ;;  %v9366_v51 = vld [vmem:[%s12876_s3 + $0x24] ss:$8 sps:$4 sm:$0xff]  }
 0x7d9   : > { %v3221_v54 = vpop.f32.mrf.mxu1  ;;  %v3306_v1 = vpop.f32.mrf.mxu0 }
 0x7da   : > { %v9364_v54 = vld [vmem:[%s12876_s3 + $0x20] ss:$8 sps:$4 sm:$0xff]  }
 0x7db   : > { %v3224_v17 = vpop.f32.mrf.mxu1  ;;  %v3309_v42 = vpop.f32.mrf.mxu0  ;;  %v9367_v1 = vld [vmem:[%s12876_s3 + $0x80] ss:$8 sps:$4 sm:$0xff]  }
 0x7dc   : > { %v3324_v33 = vmax.f32 %v3224_v17, %v3309_v42  ;;  %v9369_v17 = vld [vmem:[%s12876_s3 + $0x84] ss:$8 sps:$4 sm:$0xff]   ;;  %v9370_v42 = vld [vmem:[%s12876_s3 + $0x10] ss:$8 sps:$4 sm:$0xff]  }
 0x7dd   : > { %v3226_v14 = vpop.f32.mrf.mxu1  ;;  %v3311_v41 = vpop.f32.mrf.mxu0 }
 0x7de   : > { %v9372_v14 = vld [vmem:[%s12876_s3 + $0x14] ss:$8 sps:$4 sm:$0xff]  }
 0x7df   : > { %v3229_v60 = vpop.f32.mrf.mxu1  ;;  %v3314_v23 = vpop.f32.mrf.mxu0  ;;  %v9375_v41 = vld [vmem:[%s12876_s3 + $0x74] ss:$8 sps:$4 sm:$0xff]  }
 0x7e0   : > { %v3325_v49 = vmax.f32 %v3229_v60, %v3314_v23  ;;  %v9378_v60 = vld [vmem:[%s12876_s3 + $0x4] ss:$8 sps:$4 sm:$0xff]   ;;  %v9373_v23 = vld [vmem:[%s12876_s3 + $0x70] ss:$8 sps:$4 sm:$0xff]  }
 0x7e1   : > { %v3231_v16 = vpop.f32.mrf.mxu1  ;;  %v3316_v18 = vpop.f32.mrf.mxu0 }
 0x7e2   : > { %v9381_v16 = vld [vmem:[%s12876_s3 + $0x144] ss:$8 sps:$4 sm:$0xff]  }
 0x7e3   : > { %v3234_v8 = vpop.f32.mrf.mxu1  ;;  %v3319_v3 = vpop.f32.mrf.mxu0 }
 0x7e4   : > { %v3326_v58 = vmax.f32 %v3234_v8, %v3319_v3 }
 0x7e5   : > { %v3236_v13 = vpop.f32.mrf.mxu1  ;;  %v3321_v27 = vpop.f32.mrf.mxu0 }
 0x7e6   : > { %8696 = vmatprep.subr.msk.mxu1 %vm13242_vm4, %v3326_v58  ;;  %8707 = vmatprep.subr.msk.mxu0 %vm13243_vm5, %v3326_v58  ;;  %v9379_v27 = vld [vmem:[%s12876_s3 + $0x140] ss:$8 sps:$4 sm:$0xff]  }
 0x7e7   : > { %8697 = vmatpush3.msk.msra.mxu1 %vm13244_vm6, %v3326_v58  ;;  %8708 = vmatpush3.msk.msra.mxu0 %vm13245_vm11, %v3326_v58 }
 0x7e8   : > { %8698 = vmatprep.subr.mxu1 %v3325_v49  ;;  %8709 = vmatprep.subr.mxu0 %v3325_v49 }
 0x7e9   : > { %8699 = vmatpush3.msra.mxu1 %v3325_v49  ;;  %8710 = vmatpush3.msra.mxu0 %v3325_v49 }
 0x7ea   : > { %8700 = vmatprep.subr.mxu1 %v3324_v33  ;;  %8711 = vmatprep.subr.mxu0 %v3324_v33 }
 0x7eb   : > { %8701 = vmatpush3.msra.mxu1 %v3324_v33  ;;  %8712 = vmatpush3.msra.mxu0 %v3324_v33 }
 0x7ec   : > { %8702 = vmatprep.subr.mxu1 %v3323_v25  ;;  %8713 = vmatprep.subr.mxu0 %v3323_v25 }
 0x7ed   : > { %8703 = vmatpush3.msra.mxu1 %v3323_v25  ;;  %8714 = vmatpush3.msra.mxu0 %v3323_v25 }
 0x7ee   : > { %8705 = vmatmul.mubr.msk.f32.vlgmr.msra.gmra.mxu1 %vm13246_vm9, %v7895_v52  ;;  %8716 = vmatmul.mubr.msk.f32.vlgmr.msra.gmra.mxu0 %vm13247_vm10, %v7897_v57 }
 0x7ef   : > { %3621 = vmatprep.subr.bf16.mxu1 %v9339_v15  ;;  %3737 = vmatprep.subr.bf16.mxu0 %v9342_v59  ;;  %v9384_v59 = vld [vmem:[%s12876_s3 + $0x134] ss:$8 sps:$4 sm:$0xff]  }
 0x7f0   : > { %3622 = vmatpush1.bf16.msra.mxu1 %v9337_v6  ;;  %3738 = vmatpush1.bf16.msra.mxu0 %v9340_v12  ;;  %v9382_v6 = vld [vmem:[%s12876_s3 + $0x130] ss:$8 sps:$4 sm:$0xff]   ;;  %v9387_v12 = vld [vmem:[%s12876_s3 + $0x124] ss:$8 sps:$4 sm:$0xff]  }
 0x7f1   : > { %3623 = vmatprep.subr.bf16.mxu1 %v9345_v56  ;;  %3739 = vmatprep.subr.bf16.mxu0 %v9348_v5  ;;  %v9385_v56 = vld [vmem:[%s12876_s3 + $0x120] ss:$8 sps:$4 sm:$0xff]   ;;  %v9390_v5 = vld [vmem:[%s12876_s3 + $0x114] ss:$8 sps:$4 sm:$0xff]  }
 0x7f2   : > { %3651 = vmatprep.mubr.bf16.mxu1 %v13248_v62  ;;  %3767 = vmatprep.mubr.bf16.mxu0 %v13248_v62 }
 0x7f4   : > { %3624 = vmatpush1.bf16.msra.mxu1 %v9343_v30  ;;  %3740 = vmatpush1.bf16.msra.mxu0 %v9346_v61  ;;  %v9388_v30 = vld [vmem:[%s12876_s3 + $0x110] ss:$8 sps:$4 sm:$0xff]   ;;  %v9393_v61 = vld [vmem:[%s12876_s3 + $0x104] ss:$8 sps:$4 sm:$0xff]  }
 0x7f5   : > { %3625 = vmatprep.subr.bf16.mxu1 %v9351_v20  ;;  %3741 = vmatprep.subr.bf16.mxu0 %v9354_v7  ;;  %v9391_v20 = vld [vmem:[%s12876_s3 + $0x100] ss:$8 sps:$4 sm:$0xff]   ;;  %v9396_v7 = vld [vmem:[%s12876_s3 + $0xf4] ss:$8 sps:$4 sm:$0xff]  }
 0x7f8   : > { %3626 = vmatpush1.bf16.msra.mxu1 %v9349_v11  ;;  %3742 = vmatpush1.bf16.msra.mxu0 %v9352_v9  ;;  %v9394_v11 = vld [vmem:[%s12876_s3 + $0xf0] ss:$8 sps:$4 sm:$0xff]   ;;  %v9399_v9 = vld [vmem:[%s12876_s3 + $0xe4] ss:$8 sps:$4 sm:$0xff]  }
 0x7f9   : > { %3627 = vmatprep.subr.bf16.mxu1 %v9357_v19  ;;  %3743 = vmatprep.subr.bf16.mxu0 %v9360_v0  ;;  %v9397_v19 = vld [vmem:[%s12876_s3 + $0xe0] ss:$8 sps:$4 sm:$0xff]  }
 0x7fc   : > { %3628 = vmatpush1.bf16.msra.mxu1 %v9355_v43  ;;  %3744 = vmatpush1.bf16.msra.mxu0 %v9358_v40 }
 0x7fd   : > { %3629 = vmatprep.subr.bf16.mxu1 %v9363_v53  ;;  %3745 = vmatprep.subr.bf16.mxu0 %v9366_v51  ;;  %v3916_v53 = vmul.f32 0.083333336, %v9653_v31  ;;  %v3914_v51 = vmul.f32 0.083333336, %v9660_v35 }
 0x800   : > { %3630 = vmatpush1.bf16.msra.mxu1 %v9361_v50  ;;  %3746 = vmatpush1.bf16.msra.mxu0 %v9364_v54  ;;  %v3915_v50 = vmul.f32 0.083333336, %v9658_v34  ;;  %v3913_v54 = vmul.f32 0.083333336, %v9664_v37 }
 0x801   : > { %3631 = vmatprep.subr.bf16.mxu1 %v9369_v17  ;;  %3747 = vmatprep.subr.bf16.mxu0 %v9372_v14  ;;  %v3934_v17 = vfloor.f32 %v3916_v53  ;;  %v3932_v14 = vfloor.f32 %v3914_v51 }
 0x804   : > { %3632 = vmatpush1.bf16.msra.mxu1 %v9367_v1  ;;  %3748 = vmatpush1.bf16.msra.mxu0 %v9370_v42  ;;  %v3912_v1 = vmul.f32 0.083333336, %v9672_v46  ;;  %v3933_v42 = vfloor.f32 %v3915_v50 }
 0x805   : > { %3633 = vmatprep.subr.bf16.mxu1 %v9375_v41  ;;  %3749 = vmatprep.subr.bf16.mxu0 %v9378_v60  ;;  %v3931_v41 = vfloor.f32 %v3913_v54  ;;  %v3905_v54 = vmul.f32 0.083333336, %v9811_v55 }
 0x806   : > { %v3930_v60 = vfloor.f32 %v3912_v1 }
 0x808   : > { %3634 = vmatpush1.bf16.msra.mxu1 %v9373_v23  ;;  %3750 = vmatpush1.bf16.msra.mxu0 %v9376_v29  ;;  %v3952_v23 = vmul.f32 12.0, %v3934_v17  ;;  %v3951_v29 = vmul.f32 12.0, %v3933_v42  ;;  %v3904_v42 = vmul.f32 0.083333336, %v9830_v63 }
 0x809   : > { %3856 = vmatprep.subr.bf16.mxu1 %v9381_v16  ;;  %4090 = vmatprep.subr.mxu0 %v13128_v36  ;;  %v3950_v16 = vmul.f32 12.0, %v3932_v14 }
 0x8ae   : > { %v8706_v18 = vpop.f32.mrf.mxu1  ;;  %v8717_v8 = vpop.f32.mrf.mxu0 }
 0x8af   : > { %v3493_v3 = vmax.f32 %v8706_v18, %v8717_v8  ;;  %v3949_v18 = vmul.f32 12.0, %v3931_v41  ;;  %v3970_v8 = vsub.f32 %v9653_v31, %v3952_v23  ;;  %v3923_v41 = vfloor.f32 %v3905_v54 }
 0x8b0   : > { %v3402_v58 = vpop.f32.mrf.mxu1  ;;  %v3483_v10 = vpop.f32.mrf.mxu0  ;;  %v3922_v23 = vfloor.f32 %v3904_v42 }
 0x8b1   : > { %3495 = vst.msk [vmem:[#allocation3 + $0x8] sm:$0x3f] %vm13249_vm0, %v3493_v3  ;;  %v3492_v13 = vmax.f32 %v3402_v58, %v3483_v10  ;;  %v3969_v3 = vsub.f32 %v9658_v34, %v3951_v29  ;;  %v3968_v58 = vsub.f32 %v9660_v35, %v3950_v16  ;;  %v3948_v10 = vmul.f32 12.0, %v3930_v60 }
 0x8b2   : > { %vm3988_vm13 = vcmp.eq.f32.partialorder %v3970_v8, %v9677_v48  ;;  %v3903_v29 = vmul.f32 0.083333336, %v9840_v2 }
 0x8b3   : > { %3494 = vst.msk [vmem:[#allocation3] sm:$0xff] %vm13250_vm14, %v3492_v13  ;;  %vm11491_vm2 = vcmp.eq.f32.partialorder %v3969_v3, %v9677_v48  ;;  %vm11501_vm3 = vcmp.eq.f32.partialorder %v3968_v58, %v9677_v48  ;;  %v3966_v34 = vsub.f32 %v9672_v46, %v3948_v10  ;;  %v3940_v3 = vmul.f32 12.0, %v3922_v23 }
 0x8b4   : > { %v3921_v58 = vfloor.f32 %v3903_v29  ;;  %v3902_v10 = vmul.f32 0.083333336, %v9865_v22 }
 0x8b5   : > { %vm11529_vm5 = vcmp.eq.f32.partialorder %v3966_v34, %v9677_v48  ;;  %v3958_v34 = vsub.f32 %v9830_v63, %v3940_v3 }
 0x8b7   : > { %vm11654_vm14 = vcmp.eq.f32.partialorder %v3958_v34, %v9677_v48 }
 0x8b8   : > { %v3544_v49 = vld [vmem:[#allocation3 + $0x9] sm:$0xf] }
 0x8b9   : > { %v3541_v52 = vld [vmem:[#allocation3 + $0x8] sm:$0xf] }
 0x8ba   : > { %v3543_v33 = vld [vmem:[#allocation3 + $0x1] sm:$0xff]  ;;  %v3779_v0 = vld [vmem:[#allocation3 + $0xa] sm:$0xf] }
 0x8bb   : > { %v3540_v25 = vld [vmem:[#allocation3] sm:$0xff]  ;;  %v3545_v57 = vpack.c.bf16 %v3544_v49, %v3543_v33 }
 0x8bc   : > { %v3542_v15 = vpack.c.bf16 %v3541_v52, %v3540_v25  ;;  %v3778_v43 = vld [vmem:[#allocation3 + $0x2] sm:$0xff]  ;;  %v3910_v25 = vmul.f32 0.083333336, %v9778_v21 }
 0x8bd   : > { %8010 = vmatmul.mubr.msk.bf16.vlgmr.msra.gmra.mxu1 %vm13251_vm15, %v3545_v57  ;;  %v3780_v40 = vpack.c.bf16 %v3779_v0, %v3778_v43  ;;  %v3906_v43 = vmul.f32 0.083333336, %v9795_v44 }
 0x8be   : > { %8025 = vmatmul.mubr.msk.bf16.vlgmr.msra.gmra.mxu0 %vm13252_vm1, %v3542_v15  ;;  %3857 = vmatpush1.bf16.msra.mxu1 %v9379_v27  ;;  %v3967_v27 = vsub.f32 %v9664_v37, %v3949_v18  ;;  %v3911_v37 = vmul.f32 0.083333336, %v9674_v47  ;;  %v3928_v57 = vfloor.f32 %v3910_v25  ;;  %v3909_v15 = vmul.f32 0.083333336, %v9782_v24 }
 0x8bf   : > { %3886 = vmatprep.mubr.bf16.mxu1 %v13248_v62  ;;  %3858 = vmatprep.subr.bf16.mxu1 %v9384_v59  ;;  %v3924_v50 = vfloor.f32 %v3906_v43  ;;  %v3941_v18 = vmul.f32 12.0, %v3923_v41  ;;  %v3901_v25 = vmul.f32 0.083333336, %v9883_v32 }
 0x8c0   : > { %8063 = vmatpush1.msk.msra.mxu0 %vm3988_vm13, %v13134_v45  ;;  %vm11515_vm4 = vcmp.eq.f32.partialorder %v3967_v27, %v9677_v48  ;;  %v3929_v33 = vfloor.f32 %v3911_v37  ;;  %v3939_v37 = vmul.f32 12.0, %v3921_v58 }
 0x8c1   : > { %4092 = vmatprep.subr.mxu0 %v13128_v36  ;;  %v3942_v17 = vmul.f32 12.0, %v3924_v50  ;;  %v3959_v27 = vsub.f32 %v9811_v55, %v3941_v18 }
 0x8c2   : > { %3859 = vmatpush1.bf16.msra.mxu1 %v9382_v6  ;;  %8064 = vmatpush1.msk.msra.mxu0 %vm11491_vm2, %v13134_v45  ;;  %v3947_v52 = vmul.f32 12.0, %v3929_v33  ;;  %v3946_v6 = vmul.f32 12.0, %v3928_v57  ;;  %v3920_v33 = vfloor.f32 %v3902_v10  ;;  %v13276_v57 = vmov 0 }
 0x8c3   : > { %3860 = vmatprep.subr.bf16.mxu1 %v9387_v12  ;;  %4094 = vmatprep.subr.mxu0 %v13128_v36  ;;  %v3927_v12 = vfloor.f32 %v3909_v15  ;;  %v3960_v60 = vsub.f32 %v9795_v44, %v3942_v17  ;;  %vm11645_vm0 = vcmp.eq.f32.partialorder %v3959_v27, %v9677_v48  ;;  %v13277_v57 = vsel %vm11654_vm14, 4294967295, %v13276_v57 }
 0x8c4   : > { %8065 = vmatpush1.msk.msra.mxu0 %vm11501_vm3, %v13134_v45  ;;  %v3965_v59 = vsub.f32 %v9674_v47, %v3947_v52  ;;  %v13274_v52 = vmov 0  ;;  %v3957_v15 = vsub.f32 %v9840_v2, %v3939_v37 }
 0x8c5   : > { %4096 = vmatprep.subr.mxu0 %v13128_v36  ;;  %vm11624_vm10 = vcmp.eq.f32.partialorder %v3960_v60, %v9677_v48  ;;  %v13275_v52 = vsel %vm11645_vm0, 4294967295, %v13274_v52 }
 0x8c6   : > { %3861 = vmatpush1.bf16.msra.mxu1 %v9385_v56  ;;  %8066 = vmatpush1.msk.msra.mxu0 %vm11515_vm4, %v13134_v45  ;;  %v3908_v56 = vmul.f32 0.083333336, %v9786_v28  ;;  %vm11554_vm6 = vcmp.eq.f32.partialorder %v3965_v59, %v9677_v48  ;;  %v3938_v59 = vmul.f32 12.0, %v3920_v33  ;;  %vm11669_vm15 = vcmp.eq.f32.partialorder %v3957_v15, %v9677_v48 }
 0x8c7   : > { %3862 = vmatprep.subr.bf16.mxu1 %v9390_v5  ;;  %4098 = vmatprep.subr.mxu0 %v13128_v36 }
 0x8c8   : > { %8067 = vmatpush1.msk.msra.mxu0 %vm11529_vm5, %v13134_v45 }
 0x8c9   : > { %4100 = vmatprep.subr.mxu0 %v13128_v36 }
 0x8ca   : > { %3863 = vmatpush1.bf16.msra.mxu1 %v9388_v30  ;;  %v3964_v30 = vsub.f32 %v9778_v21, %v3946_v6  ;;  %8068 = vmatpush1.msk.msra.mxu0 %vm11554_vm6, %v13134_v45  ;;  %v3919_v6 = vfloor.f32 %v3901_v25 }
 0x8cb   : > { %3864 = vmatprep.subr.bf16.mxu1 %v9393_v61  ;;  %v3945_v61 = vmul.f32 12.0, %v3927_v12  ;;  %4102 = vmatprep.subr.mxu0 %v13128_v36  ;;  %v3918_v12 = vmul.f32 0.083333336, %v13229_v26 }
 0x8cc   : > { %vm11568_vm11 = vcmp.eq.f32.partialorder %v3964_v30, %v9677_v48  ;;  %v3956_v30 = vsub.f32 %v9865_v22, %v3938_v59 }
 0x8cd   : > { %8069 = vmatpush1.msk.msra.mxu0 %vm11568_vm11, %v13134_v45 }
 0x8ce   : > { %3865 = vmatpush1.bf16.msra.mxu1 %v9391_v20  ;;  %v3926_v20 = vfloor.f32 %v3908_v56  ;;  %4104 = vmatprep.subr.mxu0 %v13128_v36  ;;  %v13278_v56 = vmov 0  ;;  %vm11684_vm1 = vcmp.eq.f32.partialorder %v3956_v30, %v9677_v48 }
 0x8cf   : > { %3866 = vmatprep.subr.bf16.mxu1 %v9396_v7  ;;  %v3907_v7 = vmul.f32 0.083333336, %v9790_v38  ;;  %v13279_v56 = vsel %vm11669_vm15, 4294967295, %v13278_v56 }
 0x8d1   : > { %v3925_v0 = vfloor.f32 %v3907_v7  ;;  %v3936_v7 = vfloor.f32 %v3918_v12 }
 0x8d2   : > { %3867 = vmatpush1.bf16.msra.mxu1 %v9394_v11 }
 0x8d3   : > { %3868 = vmatprep.subr.bf16.mxu1 %v9399_v9  ;;  %v3963_v9 = vsub.f32 %v9782_v24, %v3945_v61  ;;  %v3943_v51 = vmul.f32 12.0, %v3925_v0  ;;  %v3937_v61 = vmul.f32 12.0, %v3919_v6  ;;  %v3954_v0 = vmul.f32 12.0, %v3936_v7 }
 0x8d5   : > { %vm11583_vm7 = vcmp.eq.f32.partialorder %v3963_v9, %v9677_v48  ;;  %v3961_v14 = vsub.f32 %v9790_v38, %v3943_v51  ;;  %v13280_v9 = vmov 0  ;;  %v3972_v51 = vsub.f32 %v13229_v26, %v3954_v0 }
 0x8d6   : > { %3869 = vmatpush1.bf16.msra.mxu1 %v9397_v19  ;;  %v3944_v19 = vmul.f32 12.0, %v3926_v20  ;;  %8070 = vmatpush1.msk.msra.mxu0 %vm11583_vm7, %v13134_v45  ;;  %v3917_v20 = vmul.f32 0.083333336, %v13230_v4  ;;  %v13281_v9 = vsel %vm11684_vm1, 4294967295, %v13280_v9 }
 0x8d7   : > { %4164 = vmatprep.subr.mxu1 %v13128_v36  ;;  %4106 = vmatprep.subr.mxu0 %v13128_v36  ;;  %vm11616_vm9 = vcmp.eq.f32.partialorder %v3961_v14, %v9677_v48 }
 0x8d8   : > { %v3962_v53 = vsub.f32 %v9786_v28, %v3944_v19  ;;  %v3955_v19 = vsub.f32 %v9883_v32, %v3937_v61  ;;  %v3935_v43 = vfloor.f32 %v3917_v20 }
 0x8d9   : > { %8040 = vmatmul.mubr.msk.bf16.vlgmr.msra.gmra.mxu1 %vm13253_vm12, %v3780_v40 }
 0x8da   : > { %8082 = vmatpush1.msk.msra.mxu1 %vm3988_vm13, %v13134_v45  ;;  %vm11598_vm8 = vcmp.eq.f32.partialorder %v3962_v53, %v9677_v48  ;;  %vm11698_vm12 = vcmp.eq.f32.partialorder %v3955_v19, %v9677_v48  ;;  %v13282_v53 = vmov 0  ;;  %v3953_v50 = vmul.f32 12.0, %v3935_v43 }
 0x8db   : > { %4166 = vmatprep.subr.mxu1 %v13128_v36  ;;  %8071 = vmatpush1.msk.msra.mxu0 %vm11598_vm8, %v13134_v45  ;;  %v13283_v53 = vsel %vm11698_vm12, 4294967295, %v13282_v53  ;;  %vm3990_vm13 = vcmp.eq.f32.partialorder %v3972_v51, %v9677_v48 }
 0x8dc   : > { %8083 = vmatpush1.msk.msra.mxu1 %vm11491_vm2, %v13134_v45  ;;  %4108 = vmatprep.subr.mxu0 %v13128_v36  ;;  %v3971_v54 = vsub.f32 %v13230_v4, %v3953_v50 }
 0x8dd   : > { %4168 = vmatprep.subr.mxu1 %v13128_v36  ;;  %8072 = vmatpush1.msk.msra.mxu0 %vm11616_vm9, %v13134_v45 }
 0x8de   : > { %8084 = vmatpush1.msk.msra.mxu1 %vm11501_vm3, %v13134_v45  ;;  %4110 = vmatprep.subr.mxu0 %v13128_v36 }
 0x8df   : > { %4170 = vmatprep.subr.mxu1 %v13128_v36  ;;  %8073 = vmatpush1.msk.msra.mxu0 %vm11624_vm10, %v13134_v45 }
 0x8e0   : > { %8085 = vmatpush1.msk.msra.mxu1 %vm11515_vm4, %v13134_v45  ;;  %4112 = vmatprep.subr.mxu0 %v13128_v36 }
 0x8e1   : > { %4172 = vmatprep.subr.mxu1 %v13128_v36  ;;  %8074 = vmatpush1.msk.msra.mxu0 %vm11645_vm0, %v13134_v45 }
 0x8e2   : > { %8086 = vmatpush1.msk.msra.mxu1 %vm11529_vm5, %v13134_v45  ;;  %4114 = vmatprep.subr.mxu0 %v13128_v36 }
 0x8e3   : > { %4174 = vmatprep.subr.mxu1 %v13128_v36  ;;  %8075 = vmatpush1.msk.msra.mxu0 %vm11654_vm14, %v13134_v45 }
 0x8e4   : > { %8087 = vmatpush1.msk.msra.mxu1 %vm11554_vm6, %v13134_v45  ;;  %4116 = vmatprep.subr.mxu0 %v13128_v36 }
 0x8e5   : > { %4176 = vmatprep.subr.mxu1 %v13128_v36  ;;  %8076 = vmatpush1.msk.msra.mxu0 %vm11669_vm15, %v13134_v45 }
 0x8e6   : > { %8088 = vmatpush1.msk.msra.mxu1 %vm11568_vm11, %v13134_v45  ;;  %4118 = vmatprep.subr.mxu0 %v13128_v36 }
 0x8e7   : > { %4178 = vmatprep.subr.mxu1 %v13128_v36  ;;  %8077 = vmatpush1.msk.msra.mxu0 %vm11684_vm1, %v13134_v45 }
 0x8e8   : > { %8089 = vmatpush1.msk.msra.mxu1 %vm11583_vm7, %v13134_v45  ;;  %4120 = vmatprep.subr.mxu0 %v13128_v36 }
 0x8e9   : > { %4180 = vmatprep.subr.mxu1 %v13128_v36  ;;  %8078 = vmatpush1.msk.msra.mxu0 %vm11698_vm12, %v13134_v45 }
 0x8ea   : > { %8090 = vmatpush1.msk.msra.mxu1 %vm11598_vm8, %v13134_v45  ;;  %4150 = vmatprep.subr.mxu0 %v13128_v36 }
 0x8eb   : > { %4182 = vmatprep.subr.mxu1 %v13128_v36  ;;  %8079 = vmatpush2.msk.msra.mxu0 %vm3990_vm13, %v13134_v45 }
 0x8ec   : > { %8091 = vmatpush1.msk.msra.mxu1 %vm11616_vm9, %v13134_v45  ;;  %4152 = vmatprep.subr.mxu0 %v13128_v36 }
 0x8ed   : > { %4184 = vmatprep.subr.mxu1 %v13128_v36 }
 0x8ee   : > { %8092 = vmatpush1.msk.msra.mxu1 %vm11624_vm10, %v13134_v45 }
 0x8ef   : > { %4186 = vmatprep.subr.mxu1 %v13128_v36 }
 0x8f0   : > { %8093 = vmatpush1.msk.msra.mxu1 %vm11645_vm0, %v13134_v45 }
 0x8f1   : > { %4188 = vmatprep.subr.mxu1 %v13128_v36 }
 0x8f2   : > { %8094 = vmatpush1.msk.msra.mxu1 %vm11654_vm14, %v13134_v45 }
 0x8f3   : > { %4190 = vmatprep.subr.mxu1 %v13128_v36 }
 0x8f4   : > { %8095 = vmatpush1.msk.msra.mxu1 %vm11669_vm15, %v13134_v45  ;;  %vm13286_vm15 = vcmask 125952  }
 0x8f5   : > { %4192 = vmatprep.subr.mxu1 %v13128_v36 }
 0x8f6   : > { %8096 = vmatpush1.msk.msra.mxu1 %vm11684_vm1, %v13134_v45  ;;  %vm3989_vm1 = vcmp.eq.f32.partialorder %v3971_v54, %v9677_v48 }
 0x8f7   : > { %4194 = vmatprep.subr.mxu1 %v13128_v36  ;;  %8080 = vmatpush2.msk.msra.mxu0 %vm3989_vm1, %v13134_v45 }
 0x8f8   : > { %8097 = vmatpush1.msk.msra.mxu1 %vm11698_vm12, %v13134_v45  ;;  %vm13284_vm12 = vcmask 1043456  }
 0x8f9   : > { %4224 = vmatprep.subr.mxu1 %v13128_v36 }
 0x8fa   : > { %8098 = vmatpush2.msk.msra.mxu1 %vm3990_vm13, %v13134_v45  ;;  %vm13285_vm13 = vmmov %vm13284_vm12 }
 0x8fb   : > { %4226 = vmatprep.subr.mxu1 %v13128_v36 }
 0x8fc   : > { %8099 = vmatpush2.msk.msra.mxu1 %vm3989_vm1, %v13134_v45  ;;  %vm13023_vm1 = vcmask 130048  }
 0x8fd   : > { %4669 = vmatprep.subr.bf16.mxu1 %v13248_v62 }
 0x97d   : > { %v3653_v26 = vpop.f32.mrf.mxu1 }
 0x97e   : > { %v3769_v4 = vpop.f32.mrf.mxu0 }
 0x97f   : > { %v3655_v17 = vpop.f32.mrf.mxu1  ;;  %v3770_v18 = vadd.f32 %v3769_v4, %v3653_v26 }
 0x980   : > { %v3771_v42 = vpop.f32.mrf.mxu0 }
 0x981   : > { %v3657_v14 = vpop.f32.mrf.mxu1  ;;  %v3772_v29 = vadd.f32 %v3771_v42, %v3655_v17 }
 0x982   : > { %v3773_v41 = vpop.f32.mrf.mxu0 }
 0x983   : > { %v3659_v60 = vpop.f32.mrf.mxu1  ;;  %v3774_v10 = vadd.f32 %v3773_v41, %v3657_v14 }
 0x984   : > { %v3775_v3 = vpop.f32.mrf.mxu0 }
 0x985   : > { %v3776_v33 = vadd.f32 %v3775_v3, %v3659_v60 }
 0x999   : > { %v3888_v23 = vpop.f32.mrf.mxu1 }
 0x99a   : > { %v11728_v34 = vadd.f32 %v3888_v23, %v3770_v18 }
 0x99b   : > { %v3890_v58 = vpop.f32.mrf.mxu1 }
 0x99c   : > { %v11726_v27 = vadd.f32 %v3890_v58, %v3772_v29  ;;  %v4066_v61 = vmul.f32 %v11728_v34, %v11728_v34 }
 0x99d   : > { %v3892_v37 = vpop.f32.mrf.mxu1 }
 0x99e   : > { %v11730_v25 = vadd.f32 %v3892_v37, %v3774_v10  ;;  %v4067_v59 = vmul.f32 %v11726_v27, %v11726_v27  ;;  %v4056_v7 = vsel %vm13023_vm1, %v11726_v27, 0.0 }
 0x99f   : > { %v3894_v15 = vpop.f32.mrf.mxu1 }
 0x9a0   : > { %v4047_v6 = vsel %vm13284_vm12, %v11730_v25, 0.0  ;;  %v4068_v12 = vmul.f32 %v11730_v25, %v11730_v25  ;;  %v11738_v30 = vadd.f32 %v3894_v15, %v3776_v33  ;;  %v4078_v26 = vsel %vm13023_vm1, %v4067_v59, 0.0  ;;  %vm13287_vm12 = vmmov %vm13286_vm15 }
 0x9a1   : > { %v4048_v20 = vadd.f32 %v4047_v6, %v11728_v34 }
 0x9a2   : > { %v4070_v19 = vsel %vm13285_vm13, %v4068_v12, 0.0  ;;  %v4058_v43 = vsel %vm13286_vm15, %v11738_v30, 0.0  ;;  %v4069_v0 = vmul.f32 %v11738_v30, %v11738_v30 }
 0x9a3   : > { %v4049_v50 = vrot.slane %v4048_v20, 4  ;;  %v4071_v51 = vadd.f32 %v4070_v19, %v4066_v61  ;;  %v4059_v54 = vadd.f32 %v4058_v43, %v4056_v7 }
 0x9a4   : > { %v4079_v4 = vsel %vm13287_vm12, %v4069_v0, 0.0 }
 0x9a5   : > { %v4050_v17 = vadd.f32 %v4049_v50, %v4048_v20  ;;  %v4072_v42 = vrot.slane %v4071_v51, 4  ;;  %v4060_v14 = vrot.slane %v4059_v54, 4  ;;  %v4080_v41 = vadd.f32 %v4079_v4, %v4078_v26 }
 0x9a6   : > { %v4027_v26 = vmul.f32 0.083333336, %v9677_v48 }
 0x9a7   : > { %v4051_v60 = vrot.slane %v4050_v17, 2  ;;  %v4073_v23 = vadd.f32 %v4072_v42, %v4071_v51  ;;  %v4061_v29 = vadd.f32 %v4060_v14, %v4059_v54  ;;  %v4081_v18 = vrot.slane %v4080_v41, 4  ;;  %v13288_v51 = vld [vmem:[#allocation43_spill] sm:$0xff] }
 0x9a8   : > { %v4028_v54 = vmul.f32 0.083333336, %v13288_v51 }
 0x9a9   : > { %v4062_v3 = vrot.slane %v4061_v29, 2  ;;  %v4082_v58 = vadd.f32 %v4081_v18, %v4080_v41  ;;  %v4052_v10 = vadd.f32 %v4051_v60, %v4050_v17  ;;  %v4074_v37 = vrot.slane %v4073_v23, 2 }
 0x9aa   : > { %v4030_v4 = vfloor.f32 %v4028_v54  ;;  %v4029_v17 = vfloor.f32 %v4027_v26  ;;  %v13290_v18 = vmov 0  ;;  %v9402_v54 = vld [vmem:[%s12877_s4 + $0x80] sm:$0xff]  }
 0x9ab   : > { %v4063_v33 = vadd.f32 %v4062_v3, %v4061_v29  ;;  %v4083_v15 = vrot.slane %v4082_v58, 2  ;;  %v4075_v6 = vadd.f32 %v4074_v37, %v4073_v23  ;;  %v4053_v12 = vrot.slane %v4052_v10, 1  ;;  %v9400_v3 = vld [vmem:[%s12877_s4 + $0x38] sm:$0xff]  }
 0x9ac   : > { %v4032_v42 = vmul.f32 12.0, %v4030_v4  ;;  %v4031_v14 = vmul.f32 12.0, %v4029_v17  ;;  %v9404_v4 = vld [vmem:[%s12877_s4 + $0x78] sm:$0xff]   ;;  %v9405_v17 = vld [vmem:[%s12877_s4 + $0x20] sm:$0xff]  }
 0x9ad   : > { %v4064_v61 = vrot.slane %v4063_v33, 1  ;;  %v4084_v59 = vadd.f32 %v4083_v15, %v4082_v58  ;;  %v4076_v7 = vrot.slane %v4075_v6, 1  ;;  %v4054_v43 = vadd.f32 %v4053_v12, %v4052_v10  ;;  %v9401_v58 = vld [vmem:[%s12877_s4 + $0x30] sm:$0xff]   ;;  %v9403_v10 = vld [vmem:[%s12877_s4 + $0x28] sm:$0xff]  }
 0x9ae   : > { %v4034_v41 = vsub.f32 %v13288_v51, %v4032_v42  ;;  %v4033_v60 = vsub.f32 %v9677_v48, %v4031_v14  ;;  %v9406_v42 = vld [vmem:[%s12877_s4 + $0x70] sm:$0xff]   ;;  %v9407_v14 = vld [vmem:[%s12877_s4 + $0x18] sm:$0xff]  }
 0x9af   : > { %v4065_v19 = vadd.f32 %v4064_v61, %v4063_v33  ;;  %v4085_v20 = vrot.slane %v4084_v59, 1  ;;  %v4077_v50 = vadd.f32 %v4076_v7, %v4075_v6 }
 0x9b0   : > { %vm4038_vm15 = vcmp.eq.f32.partialorder %v4034_v41, %v9865_v22  ;;  %vm4037_vm13 = vcmp.eq.f32.partialorder %v4033_v60, %v9865_v22  ;;  %vm4036_vm12 = vcmp.eq.f32.partialorder %v4034_v41, %v9883_v32  ;;  %vm11768_vm14 = vcmp.eq.f32.partialorder %v4033_v60, %v9883_v32  ;;  %v9408_v41 = vld [vmem:[%s12877_s4 + $0x68] sm:$0xff]   ;;  %v9409_v60 = vld [vmem:[%s12877_s4 + $0x10] sm:$0xff]  }
 0x9b1   : > { %8081 = vmatprep.mubr.msk.f32.mxu0 %vm13023_vm1, %v4065_v19  ;;  %v4086_v0 = vadd.f32 %v4085_v20, %v4084_v59  ;;  %v8062_v23 = vsel %vm4038_vm15, 1.0, %v13128_v36  ;;  %v11763_v29 = vsel %vm4037_vm13, 1.0, %v13128_v36  ;;  %v13291_v18 = vsel %vm11768_vm14, 4294967295, %v13290_v18  ;;  %v4239_v20 = vld [vmem:[%s12881_s8 + $0x2] sm:$0x1] }
 0x9b2   : > { %4155 = vmatmul.mubr.f32.vlgmr.msra.gmra.mxu0 %v4054_v43  ;;  %vm13294_vm13 = vcmask 130048  }
 0x9b3   : > { %8100 = vmatprep.mubr.msk.f32.mxu1 %vm13023_vm1, %v4086_v0  ;;  %4318 = vmatprep.mubr.f32.mxu0 %v13128_v36  ;;  %vm13289_vm1 = vcmask 1043456  }
 0x9b4   : > { %4229 = vmatmul.mubr.f32.vlgmr.msra.gmra.mxu1 %v4077_v50  ;;  %8101 = vmatprep.subr.msk.mxu0 %vm13289_vm1, %v8062_v23  ;;  %vm13292_vm0 = vmmov %vm13289_vm1  ;;  %v4240_v50 = vld [vmem:[%s12882_s9 + $0x2] sm:$0x1] }
 0x9b5   : > { %8102 = vmatpush1.msk.msra.mxu0 %vm13292_vm0, %v11763_v29  ;;  %vm13293_vm15 = vmmov %vm13292_vm0  ;;  %4670 = vmatpush1.bf16.msra.mxu1 %v9400_v3  ;;  %vm13028_vm0 = vcmask 97280   ;;  %v9411_v3 = vld [vmem:[%s12877_s4 + $0x8] sm:$0xff]  }
 0x9b6   : > { %8103 = vmatprep.subr.msk.mxu0 %vm4036_vm12, %v13134_v45  ;;  %4671 = vmatprep.subr.bf16.mxu1 %v13248_v62 }
 0x9b7   : > { %8104 = vmatpush1.msk.msra.mxu0 %vm11768_vm14, %v13134_v45 }
 0x9b8   : > { %8106 = vmatprep.subr.msk.mxu0 %vm13293_vm15, %v8062_v23  ;;  %v9410_v23 = vld [vmem:[%s12877_s4 + $0x60] sm:$0xff]   ;;  %vm13296_vm15 = vmmov %vm13294_vm13 }
 0x9b9   : > { %4672 = vmatpush1.bf16.msra.mxu1 %v9401_v58  ;;  %v9412_v58 = vld [vmem:[%s12877_s4 + $0x58] sm:$0xff]  }
 0x9ba   : > { %4673 = vmatprep.subr.bf16.mxu1 %v13248_v62 }
 0x9bd   : > { %4674 = vmatpush1.bf16.msra.mxu1 %v9403_v10  ;;  %v9413_v10 = vld [vmem:[%s12877_s4] sm:$0xff]  }
 0x9be   : > { %4675 = vmatprep.subr.bf16.mxu1 %v13248_v62 }
 0x9c1   : > { %4676 = vmatpush1.bf16.msra.mxu1 %v9405_v17 }
 0x9c2   : > { %4677 = vmatprep.subr.bf16.mxu1 %v13248_v62 }
 0x9c5   : > { %4678 = vmatpush1.bf16.msra.mxu1 %v9407_v14 }
 0x9c6   : > { %4679 = vmatprep.subr.bf16.mxu1 %v13248_v62 }
 0x9c9   : > { %4680 = vmatpush1.bf16.msra.mxu1 %v9409_v60 }
 0x9ca   : > { %4681 = vmatprep.subr.bf16.mxu1 %v13248_v62 }
 0x9cd   : > { %4682 = vmatpush1.bf16.msra.mxu1 %v9411_v3 }
 0x9ce   : > { %4683 = vmatprep.subr.bf16.mxu1 %v13248_v62 }
 0x9d1   : > { %4684 = vmatpush1.bf16.msra.mxu1 %v9413_v10 }
 0x9d2   : > { %4699 = vmatprep.subr.bf16.mxu1 %v13248_v62 }
 0xa72   : > { %v4156_v37 = vpop.f32.mrf.mxu0 }
 0xa73   : > { %v4160_v33 = vmul.f32 0.0069444445, %v4156_v37  ;;  %v9414_v37 = vld [vmem:[%s12877_s4 + $0x50] sm:$0xff]  }
 0xa74   : > { %v4158_v15 = vpop.f32.mrf.mxu0  ;;  %v4230_v6 = vpop.f32.mrf.mxu1 }
 0xa75   : > { %v4235_v12 = vmul.f32 %v4160_v33, %v4160_v33  ;;  %v4234_v61 = vmul.f32 0.0069444445, %v4230_v6  ;;  %v9416_v15 = vld [vmem:[%s12877_s4 + $0x48] sm:$0xff]  }
 0xa76   : > { %v4232_v59 = vpop.f32.mrf.mxu1  ;;  %v9417_v6 = vld [vmem:[%s12877_s4 + $0x88] sm:$0xff]  }
 0xa77   : > { %v4236_v7 = vsub.f32 %v4234_v61, %v4235_v12 }
 0xa79   : > { %v4237_v19 = vadd.f32 1e-05, %v4236_v7 }
 0xa7b   : > { %9491 = vrsqrt.f32 %v4237_v19 }
 0xa88   : > { %v9492_v43 = vpop.eup %9491 }
 0xa89   : > { %v4241_v0 = vmul.f32 %v9492_v43, %v4239_v20 }
 0xa8b   : > { %8105 = vmatmul.mubr.msk.f32.vlgmr.msra.gmra.mxu0 %vm13028_vm0, %v4241_v0  ;;  %v4242_v51 = vmul.f32 %v4241_v0, %v4160_v33  ;;  %v9415_v33 = vld [vmem:[%s12877_s4 + $0x40] sm:$0xff]  }
 0xa8c   : > { %8107 = vmatpush1.msk.msra.mxu0 %vm13289_vm1, %v11763_v29  ;;  %4392 = vmatprep.mubr.f32.mxu0 %v13128_v36  ;;  %vm13297_vm1 = vmmov %vm13294_vm13 }
 0xa8d   : > { %8108 = vmatprep.subr.msk.mxu0 %vm4036_vm12, %v13134_v45  ;;  %v4243_v26 = vsub.f32 %v4240_v50, %v4242_v51  ;;  %4700 = vmatpush2.bf16.msra.mxu1 %v9415_v33  ;;  %vm13295_vm12 = vcmask 125952  }
 0xa8e   : > { %8109 = vmatpush1.msk.msra.mxu0 %vm11768_vm14, %v13134_v45  ;;  %8718 = vmatprep.subr.mxu1 %v13128_v36 }
 0xa8f   : > { %8110 = vmatmul.mubr.msk.f32.vlgmr.msra.gmra.mxu0 %vm13028_vm0, %v4243_v26  ;;  %4571 = vmatprep.subr.bf16.mxu0 %v13248_v62  ;;  %vm13303_vm0 = vnez %v13283_v53 }
 0xa90   : > { %4572 = vmatpush1.bf16.msra.mxu0 %v9402_v54 }
 0xa91   : > { %4573 = vmatprep.subr.bf16.mxu0 %v13248_v62 }
 0xa94   : > { %4574 = vmatpush1.bf16.msra.mxu0 %v9404_v4 }
 0xa95   : > { %4575 = vmatprep.subr.bf16.mxu0 %v13248_v62 }
 0xa98   : > { %4576 = vmatpush1.bf16.msra.mxu0 %v9406_v42 }
 0xa99   : > { %4577 = vmatprep.subr.bf16.mxu0 %v13248_v62 }
 0xa9c   : > { %4578 = vmatpush1.bf16.msra.mxu0 %v9408_v41 }
 0xa9d   : > { %4579 = vmatprep.subr.bf16.mxu0 %v13248_v62 }
 0xaa0   : > { %4580 = vmatpush1.bf16.msra.mxu0 %v9410_v23 }
 0xaa1   : > { %4581 = vmatprep.subr.bf16.mxu0 %v13248_v62 }
 0xaa4   : > { %4582 = vmatpush1.bf16.msra.mxu0 %v9412_v58 }
 0xaa5   : > { %4583 = vmatprep.subr.bf16.mxu0 %v13248_v62 }
 0xaa8   : > { %4584 = vmatpush1.bf16.msra.mxu0 %v9414_v37 }
 0xaa9   : > { %4585 = vmatprep.subr.bf16.mxu0 %v13248_v62 }
 0xaac   : > { %4586 = vmatpush1.bf16.msra.mxu0 %v9416_v15 }
 0xaad   : > { %4601 = vmatprep.subr.bf16.mxu0 %v13248_v62 }
 0xab0   : > { %4602 = vmatpush2.bf16.msra.mxu0 %v9417_v6 }
 0xab1   : > { %4778 = vmatprep.subr.bf16.mxu0 %v13248_v62 }
 0xb4b   : > { %v4320_v12 = vpop.f32.mrf.mxu0 }
 0xb4c   : > { %v4402_v61 = vrot.slane %v4320_v12, %v13231_v39 }
 0xb4d   : > { %v4322_v59 = vpop.f32.mrf.mxu0 }
 0xb4e   : > { %v4406_v7 = vrot.slane %v4322_v59, %v13231_v39  ;;  %v4407_v20 = vmul.f32 %v4402_v61, %v11728_v34  ;;  %v4409_v43 = vmul.f32 %v4402_v61, %v11730_v25 }
 0xb4f   : > { %v4394_v19 = vpop.f32.mrf.mxu0 }
 0xb50   : > { %v4414_v0 = vrot.slane %v4394_v19, %v13231_v39  ;;  %v4408_v50 = vmul.f32 %v4406_v7, %v11726_v27  ;;  %v4410_v54 = vmul.f32 %v4406_v7, %v11738_v30 }
 0xb51   : > { %v4396_v51 = vpop.f32.mrf.mxu0 }
 0xb52   : > { %v4419_v26 = vadd.f32 %v4414_v0, %v4407_v20  ;;  %v4421_v4 = vadd.f32 %v4414_v0, %v4409_v43  ;;  %v4418_v17 = vrot.slane %v4396_v51, %v13231_v39 }
 0xb54   : > { %v4423_v42 = vmax.f32 %v4419_v26, 0.0  ;;  %v4425_v14 = vmax.f32 %v4421_v4, 0.0  ;;  %v4420_v41 = vadd.f32 %v4418_v17, %v4408_v50  ;;  %v4422_v60 = vadd.f32 %v4418_v17, %v4410_v54  ;;  %v9418_v26 = vld [vmem:[%s12877_s4 + $0xc8] sm:$0xff]  }
 0xb56   : > { %4427 = vst [vmem:[#allocation4] sm:$0xff] %v4423_v42  ;;  %4429 = vst [vmem:[#allocation4 + $0x10] sm:$0xf] %v4425_v14  ;;  %v4424_v34 = vmax.f32 %v4420_v41, 0.0  ;;  %v4426_v23 = vmax.f32 %v4422_v60, 0.0  ;;  %v9420_v14 = vld [vmem:[%s12877_s4 + $0xb8] sm:$0xff]  }
 0xb57   : > { %v9421_v41 = vld [vmem:[%s12877_s4 + $0xb0] sm:$0xff]   ;;  %v9422_v60 = vld [vmem:[%s12877_s4 + $0xa8] sm:$0xff]  }
 0xb58   : > { %4428 = vst.msk [vmem:[#allocation4 + $0x8] sm:$0xff] %vm13294_vm13, %v4424_v34  ;;  %vm13298_vm13 = vmmov %vm13297_vm1  ;;  %v9423_v34 = vld [vmem:[%s12877_s4 + $0xa0] sm:$0xff]  }
 0xb59   : > { %4430 = vst.msk [vmem:[#allocation4 + $0x18] sm:$0xf] %vm13295_vm12, %v4426_v23  ;;  %vm13299_vm12 = vnez %v13275_v52  ;;  %v9424_v23 = vld [vmem:[%s12877_s4 + $0x98] sm:$0xff]  }
 0xb5d   : > { %v4493_v27 = vld [vmem:[#allocation4] sm:$0xfe]  ;;  %v4495_v25 = vld [vmem:[#allocation4 + $0x10] sm:$0x7] }
 0xb5e   : > { %v4489_v3 = vld [vmem:[#allocation4 + $0x10] sm:$0x3]  ;;  %v4497_v30 = vpack.c.bf16 %v4495_v25, %v4493_v27  ;;  %v9425_v27 = vld [vmem:[%s12877_s4 + $0x90] sm:$0xff]  }
 0xb5f   : > { %v4488_v58 = vld [vmem:[#allocation4 + $0x8] sm:$0xff]  ;;  %v4491_v12 = vpack.c.bf16 %v4489_v3, %v4423_v42  ;;  %v9419_v42 = vld [vmem:[%s12877_s4 + $0xc0] sm:$0xff]   ;;  %v4710_v25 = vld [vmem:[#allocation4] sm:$0xfc] }
 0xb60   : > { %v4490_v10 = vld [vmem:[#allocation4 + $0x18] sm:$0x3]  ;;  %v4494_v37 = vld [vmem:[#allocation4 + $0x8] sm:$0xfe]  ;;  %v4502_v6 = vshll.u32 %v4497_v30, 16  ;;  %v4500_v51 = vshrl.u32 %v4497_v30, 16 }
 0xb61   : > { %v4492_v33 = vpack.c.bf16 %v4490_v10, %v4488_v58  ;;  %v4496_v15 = vld [vmem:[#allocation4 + $0x18] sm:$0x7]  ;;  %v4711_v59 = vld [vmem:[#allocation4 + $0x8] sm:$0xfc]  ;;  %v4712_v3 = vld [vmem:[#allocation4 + $0x10] sm:$0xf] }
 0xb62   : > { %v4498_v61 = vpack.c.bf16 %v4496_v15, %v4494_v37  ;;  %v4713_v7 = vld [vmem:[#allocation4 + $0x18] sm:$0xf]  ;;  %v4504_v20 = vrot.slane %v4502_v6, 1  ;;  %v9426_v30 = vld [vmem:[%s12877_s4 + $0xd0] sm:$0xff]   ;;  %v4714_v58 = vpack.c.bf16 %v4712_v3, %v4710_v25 }
 0xb63   : > { %8166 = vmatprep.mubr.msk.bf16.mxu1 %vm13296_vm15, %v4492_v33  ;;  %v4715_v50 = vpack.c.bf16 %v4713_v7, %v4711_v59  ;;  %vm13300_vm15 = vnez %v13277_v57 }
 0xb64   : > { %4702 = vmatmul.mubr.bf16.vlgmr.msra.gmra.mxu1 %v4491_v12  ;;  %v4509_v19 = vshll.u32 %v4498_v61, 16  ;;  %v4507_v43 = vshrl.u32 %v4498_v61, 16  ;;  %v4505_v4 = vor.u32 %v4504_v20, %v4500_v51  ;;  %v4718_v10 = vrot.slane %v4714_v58, 1 }
 0xb65   : > { %8719 = vmatpush3.msk.msra.mxu1 %vm11491_vm2, %v13134_v45  ;;  %v4719_v17 = vrot.slane %v4715_v50, 1 }
 0xb66   : > { %v4511_v0 = vrot.slane %v4509_v19, 1  ;;  %8720 = vmatprep.subr.mxu1 %v13128_v36 }
 0xb67   : > { %8721 = vmatpush3.msk.msra.mxu1 %vm11501_vm3, %v13134_v45 }
 0xb68   : > { %v4512_v54 = vor.u32 %v4511_v0, %v4507_v43  ;;  %8722 = vmatprep.subr.mxu1 %v13128_v36 }
 0xb69   : > { %8723 = vmatpush3.msk.msra.mxu1 %vm11515_vm4, %v13134_v45 }
 0xb6a   : > { %8156 = vmatprep.mubr.msk.bf16.mxu0 %vm13297_vm1, %v4512_v54  ;;  %8724 = vmatprep.subr.mxu1 %v13128_v36  ;;  %vm13301_vm1 = vnez %v13279_v56 }
 0xb6b   : > { %4604 = vmatmul.mubr.bf16.vlgmr.msra.gmra.mxu0 %v4505_v4  ;;  %8725 = vmatpush3.msk.msra.mxu1 %vm11529_vm5, %v13134_v45 }
 0xb6c   : > { %4779 = vmatpush1.bf16.msra.mxu0 %v9418_v26  ;;  %8176 = vmatprep.mubr.msk.bf16.mxu0 %vm13298_vm13, %v4719_v17  ;;  %vm13302_vm13 = vnez %v13281_v9 }
 0xb6d   : > { %4780 = vmatprep.subr.bf16.mxu0 %v13248_v62  ;;  %8726 = vmatprep.subr.mxu1 %v13128_v36 }
 0xb6e   : > { %8727 = vmatpush3.msk.msra.mxu1 %vm11554_vm6, %v13134_v45 }
 0xb6f   : > { %8728 = vmatprep.subr.mxu1 %v13128_v36 }
 0xb70   : > { %4781 = vmatpush1.bf16.msra.mxu0 %v9419_v42  ;;  %8729 = vmatpush3.msk.msra.mxu1 %vm11568_vm11, %v13134_v45 }
 0xb71   : > { %4782 = vmatprep.subr.bf16.mxu0 %v13248_v62  ;;  %8730 = vmatprep.subr.mxu1 %v13128_v36 }
 0xb72   : > { %8731 = vmatpush3.msk.msra.mxu1 %vm11583_vm7, %v13134_v45 }
 0xb73   : > { %8732 = vmatprep.subr.mxu1 %v13128_v36 }
 0xb74   : > { %4783 = vmatpush1.bf16.msra.mxu0 %v9420_v14  ;;  %8733 = vmatpush3.msk.msra.mxu1 %vm11598_vm8, %v13134_v45 }
 0xb75   : > { %4784 = vmatprep.subr.bf16.mxu0 %v13248_v62  ;;  %8734 = vmatprep.subr.mxu1 %v13128_v36 }
 0xb76   : > { %8735 = vmatpush3.msk.msra.mxu1 %vm11616_vm9, %v13134_v45 }
 0xb77   : > { %8736 = vmatprep.subr.mxu1 %v13128_v36 }
 0xb78   : > { %4785 = vmatpush1.bf16.msra.mxu0 %v9421_v41  ;;  %8737 = vmatpush3.msk.msra.mxu1 %vm11624_vm10, %v13134_v45 }
 0xb79   : > { %4786 = vmatprep.subr.bf16.mxu0 %v13248_v62  ;;  %8738 = vmatprep.subr.mxu1 %v13128_v36 }
 0xb7a   : > { %8739 = vmatpush3.msk.msra.mxu1 %vm13299_vm12, %v13134_v45 }
 0xb7b   : > { %8740 = vmatprep.subr.mxu1 %v13128_v36 }
 0xb7c   : > { %4787 = vmatpush1.bf16.msra.mxu0 %v9422_v60  ;;  %8741 = vmatpush3.msk.msra.mxu1 %vm13300_vm15, %v13134_v45 }
 0xb7d   : > { %4788 = vmatprep.subr.bf16.mxu0 %v13248_v62  ;;  %8742 = vmatprep.subr.mxu1 %v13128_v36 }
 0xb7e   : > { %8743 = vmatpush3.msk.msra.mxu1 %vm13301_vm1, %v13134_v45 }
 0xb7f   : > { %8744 = vmatprep.subr.mxu1 %v13128_v36 }
 0xb80   : > { %4789 = vmatpush1.bf16.msra.mxu0 %v9423_v34  ;;  %8745 = vmatpush3.msk.msra.mxu1 %vm13302_vm13, %v13134_v45 }
 0xb81   : > { %4790 = vmatprep.subr.bf16.mxu0 %v13248_v62  ;;  %8746 = vmatprep.subr.mxu1 %v13128_v36 }
 0xb82   : > { %8747 = vmatpush3.msk.msra.mxu1 %vm13303_vm0, %v13134_v45 }
 0xb83   : > { %8784 = vmatprep.subr.mxu1 %v13128_v36 }
 0xb84   : > { %4791 = vmatpush1.bf16.msra.mxu0 %v9424_v23 }
 0xb85   : > { %4792 = vmatprep.subr.bf16.mxu0 %v13248_v62 }
 0xb88   : > { %4793 = vmatpush1.bf16.msra.mxu0 %v9425_v27 }
 0xb89   : > { %4808 = vmatprep.subr.bf16.mxu0 %v13248_v62 }
 0xb8c   : > { %4809 = vmatpush2.bf16.msra.mxu0 %v9426_v30 }
 0xb8d   : > { %8751 = vmatprep.subr.mxu0 %v13128_v36 }
 0xb8f   : > { %4811 = vmatmul.mubr.bf16.vlgmr.msra.gmra.mxu0 %v4718_v10 }
 0xb90   : > { %8752 = vmatpush3.msk.msra.mxu0 %vm11491_vm2, %v13134_v45  ;;  %vm13029_vm2 = vmmov 0  }
 0xb91   : > { %8753 = vmatprep.subr.mxu0 %v13128_v36  ;;  %8748 = vmatprep.mubr.msk.f32.mxu1 %vm13029_vm2, %v13128_v36 }
 0xb92   : > { %8754 = vmatpush3.msk.msra.mxu0 %vm11501_vm3, %v13134_v45  ;;  %8781 = vmatprep.mubr.msk.f32.mxu0 %vm13029_vm2, %v13128_v36  ;;  %vm13032_vm3 = vcmask 982016   ;;  %vm13304_vm2 = vcmask 1043456  }
 0xb93   : > { %8755 = vmatprep.subr.mxu0 %v13128_v36 }
 0xb94   : > { %8756 = vmatpush3.msk.msra.mxu0 %vm11515_vm4, %v13134_v45  ;;  %vm13031_vm4 = vcmask 975872  }
 0xb95   : > { %8757 = vmatprep.subr.mxu0 %v13128_v36 }
 0xb96   : > { %8758 = vmatpush3.msk.msra.mxu0 %vm11529_vm5, %v13134_v45 }
 0xb97   : > { %8759 = vmatprep.subr.mxu0 %v13128_v36 }
 0xb98   : > { %8760 = vmatpush3.msk.msra.mxu0 %vm11554_vm6, %v13134_v45 }
 0xb99   : > { %8761 = vmatprep.subr.mxu0 %v13128_v36 }
 0xb9a   : > { %8762 = vmatpush3.msk.msra.mxu0 %vm11568_vm11, %v13134_v45 }
 0xb9b   : > { %8763 = vmatprep.subr.mxu0 %v13128_v36 }
 0xb9c   : > { %8764 = vmatpush3.msk.msra.mxu0 %vm11583_vm7, %v13134_v45 }
 0xb9d   : > { %8765 = vmatprep.subr.mxu0 %v13128_v36 }
 0xb9e   : > { %8766 = vmatpush3.msk.msra.mxu0 %vm11598_vm8, %v13134_v45 }
 0xb9f   : > { %8767 = vmatprep.subr.mxu0 %v13128_v36 }
 0xba0   : > { %8768 = vmatpush3.msk.msra.mxu0 %vm11616_vm9, %v13134_v45 }
 0xba1   : > { %8769 = vmatprep.subr.mxu0 %v13128_v36 }
 0xba2   : > { %8770 = vmatpush3.msk.msra.mxu0 %vm11624_vm10, %v13134_v45 }
 0xba3   : > { %8771 = vmatprep.subr.mxu0 %v13128_v36 }
 0xba4   : > { %8772 = vmatpush3.msk.msra.mxu0 %vm13299_vm12, %v13134_v45 }
 0xba5   : > { %8773 = vmatprep.subr.mxu0 %v13128_v36 }
 0xba6   : > { %8774 = vmatpush3.msk.msra.mxu0 %vm13300_vm15, %v13134_v45 }
 0xba7   : > { %8775 = vmatprep.subr.mxu0 %v13128_v36 }
 0xba8   : > { %8776 = vmatpush3.msk.msra.mxu0 %vm13301_vm1, %v13134_v45 }
 0xba9   : > { %8777 = vmatprep.subr.mxu0 %v13128_v36 }
 0xbaa   : > { %8778 = vmatpush3.msk.msra.mxu0 %vm13302_vm13, %v13134_v45 }
 0xbab   : > { %8779 = vmatprep.subr.mxu0 %v13128_v36 }
 0xbac   : > { %8780 = vmatpush3.msk.msra.mxu0 %vm13303_vm0, %v13134_v45 }
 0xbad   : > { %8818 = vmatprep.subr.bf16.mxu0 %v13128_v36 }
 0xc24   : > { %v4703_v62 = vpop.f32.mrf.mxu1 }
 0xc26   : > { %v4705_v13 = vpop.f32.mrf.mxu1 }
 0xc28   : > { %v4706_v31 = vpop.f32.mrf.mxu1 }
 0xc2a   : > { %v4708_v35 = vpop.f32.mrf.mxu1 }
 0xc2b   : > { %v4605_v37 = vpop.f32.mrf.mxu0 }
 0xc2c   : > { %v4704_v12 = vadd.f32 %v4703_v62, %v4605_v37  ;;  %v9430_v37 = vld [vmem:[%s12878_s5 + $0x30] sm:$0xff]  }
 0xc2d   : > { %v4607_v33 = vpop.f32.mrf.mxu0 }
 0xc2e   : > { %v9432_v33 = vld [vmem:[%s12878_s5 + $0x28] sm:$0xff]  }
 0xc2f   : > { %v4608_v15 = vpop.f32.mrf.mxu0 }
 0xc30   : > { %v4707_v19 = vadd.f32 %v4706_v31, %v4608_v15  ;;  %v9428_v31 = vld [vmem:[%s12878_s5 + $0x38] ss:$0 sps:$4 sm:$0xff]  }
 0xc31   : > { %v4610_v6 = vpop.f32.mrf.mxu0  ;;  %v5353_v35 = vsel %vm13304_vm2, %v9428_v31, 0  ;;  %v9442_v31 = vld [vmem:[%s12878_s5] sm:$0xff]  }
 0xc4f   : > { %v4812_v61 = vpop.f32.mrf.mxu0 }
 0xc50   : > { %v12044_v59 = vadd.f32 %v4812_v61, %v4704_v12 }
 0xc51   : > { %v4814_v7 = vpop.f32.mrf.mxu0 }
 0xc52   : > { %v4832_v43 = vmul.f32 %v12044_v59, %v12044_v59  ;;  %v4822_v51 = vsel %vm13032_vm3, %v12044_v59, 0.0 }
 0xc53   : > { %v4815_v20 = vpop.f32.mrf.mxu0 }
 0xc54   : > { %v12048_v0 = vadd.f32 %v4815_v20, %v4707_v19  ;;  %v4834_v17 = vsel %vm13032_vm3, %v4832_v43, 0.0 }
 0xc55   : > { %v4817_v50 = vpop.f32.mrf.mxu0 }
 0xc56   : > { %v4824_v54 = vsel %vm13031_vm4, %v12048_v0, 0.0  ;;  %v4833_v26 = vmul.f32 %v12048_v0, %v12048_v0 }
 0xc57   : > { %v4825_v4 = vadd.f32 %v4824_v54, %v4822_v51  ;;  %v4995_v51 = vld [vmem:[%s12881_s8 + $0x3] sm:$0x1] }
 0xc58   : > { %v4835_v42 = vsel %vm13031_vm4, %v4833_v26, 0.0  ;;  %vm13305_vm4 = vmmov 0  }
 0xc59   : > { %v4826_v14 = vrot.slane %v4825_v4, 4  ;;  %v4836_v41 = vadd.f32 %v4835_v42, %v4834_v17  ;;  %v4996_v17 = vld [vmem:[%s12882_s9 + $0x3] sm:$0x1] }
 0xc5b   : > { %v4827_v60 = vadd.f32 %v4826_v14, %v4825_v4  ;;  %v4837_v34 = vrot.slane %v4836_v41, 4  ;;  %v9427_v4 = vld [vmem:[%s12878_s5 + $0x74] ss:$0 sps:$4 sm:$0xff]  }
 0xc5d   : > { %v4828_v23 = vrot.slane %v4827_v60, 2  ;;  %v4838_v27 = vadd.f32 %v4837_v34, %v4836_v41  ;;  %v9431_v34 = vld [vmem:[%s12878_s5 + $0x64] sm:$0xff]  }
 0xc5f   : > { %v4829_v25 = vadd.f32 %v4828_v23, %v4827_v60  ;;  %v4839_v3 = vrot.slane %v4838_v27, 2  ;;  %v9429_v60 = vld [vmem:[%s12878_s5 + $0x6c] sm:$0xff]   ;;  %v9433_v23 = vld [vmem:[%s12878_s5 + $0x5c] sm:$0xff]  }
 0xc61   : > { %v4830_v30 = vrot.slane %v4829_v25, 1  ;;  %v4840_v58 = vadd.f32 %v4839_v3, %v4838_v27  ;;  %v9434_v27 = vld [vmem:[%s12878_s5 + $0x20] sm:$0xff]   ;;  %v9436_v3 = vld [vmem:[%s12878_s5 + $0x18] sm:$0xff]  }
 0xc63   : > { %v4831_v10 = vadd.f32 %v4830_v30, %v4829_v25  ;;  %v4841_v62 = vrot.slane %v4840_v58, 1  ;;  %v9435_v25 = vld [vmem:[%s12878_s5 + $0x54] sm:$0xff]   ;;  %v9437_v30 = vld [vmem:[%s12878_s5 + $0x4c] sm:$0xff]  }
 0xc65   : > { %8749 = vmatmul.mubr.msk.f32.vlgmr.msra.gmra.mxu1 %vm13032_vm3, %v4831_v10  ;;  %v4842_v13 = vadd.f32 %v4841_v62, %v4840_v58  ;;  %v9438_v58 = vld [vmem:[%s12878_s5 + $0x10] sm:$0xff]   ;;  %v9439_v10 = vld [vmem:[%s12878_s5 + $0x44] sm:$0xff]  }
 0xc66   : > { %8785 = vmatpush3.msk.msra.mxu1 %vm13304_vm2, %v11763_v29  ;;  %8788 = vmatprep.mubr.msk.f32.mxu1 %vm13305_vm4, %v13128_v36  ;;  %vm13306_vm2 = vcmask 97280   ;;  %v9440_v62 = vld [vmem:[%s12878_s5 + $0x8] sm:$0xff]  }
 0xc67   : > { %8782 = vmatmul.mubr.msk.f32.vlgmr.msra.gmra.mxu0 %vm13032_vm3, %v4842_v13  ;;  %8786 = vmatprep.subr.mxu1 %v13128_v36  ;;  %vm13307_vm3 = vcmask 1043456   ;;  %vm13309_vm13 = vmmov %vm13306_vm2  ;;  %v9441_v13 = vld [vmem:[%s12878_s5 + $0x3c] sm:$0xff]  }
 0xc68   : > { %8787 = vmatpush3.msk.msra.mxu1 %vm11768_vm14, %v13134_v45  ;;  %8834 = vmatprep.mubr.msk.bf16.mxu0 %vm13305_vm4, %v13128_v36  ;;  %vm13308_vm0 = vmmov %vm13307_vm3 }
 0xc69   : > { %8791 = vmatprep.subr.mxu1 %v13128_v36  ;;  %8819 = vmatpush3.bf16.msra.mxu0 %v5353_v35  ;;  %v5262_v41 = vsel %vm13308_vm0, %v9427_v4, 0  ;;  %vm13310_vm0 = vcmask 982016  }
 0xc6a   : > { %8820 = vmatprep.subr.bf16.mxu0 %v13128_v36 }
 0xc6d   : > { %8821 = vmatpush3.bf16.msra.mxu0 %v9430_v37 }
 0xc6e   : > { %8822 = vmatprep.subr.bf16.mxu0 %v13128_v36 }
 0xc71   : > { %8823 = vmatpush3.bf16.msra.mxu0 %v9432_v33 }
 0xc72   : > { %8824 = vmatprep.subr.bf16.mxu0 %v13128_v36 }
 0xc75   : > { %8825 = vmatpush3.bf16.msra.mxu0 %v9434_v27 }
 0xc76   : > { %8826 = vmatprep.subr.bf16.mxu0 %v13128_v36 }
 0xc79   : > { %8827 = vmatpush3.bf16.msra.mxu0 %v9436_v3 }
 0xc7a   : > { %8828 = vmatprep.subr.bf16.mxu0 %v13128_v36 }
 0xc7d   : > { %8829 = vmatpush3.bf16.msra.mxu0 %v9438_v58 }
 0xc7e   : > { %8830 = vmatprep.subr.bf16.mxu0 %v13128_v36 }
 0xc81   : > { %8831 = vmatpush3.bf16.msra.mxu0 %v9440_v62 }
 0xc82   : > { %8832 = vmatprep.subr.bf16.mxu0 %v13128_v36 }
 0xc85   : > { %8833 = vmatpush3.bf16.msra.mxu0 %v9442_v31 }
 0xc86   : > { %8858 = vmatprep.subr.mxu0 %v13128_v36 }
 0xd25   : > { %v4912_v15 = vpop.f32.mrf.mxu1 }
 0xd26   : > { %v4916_v6 = vmul.f32 0.01, %v4912_v15 }
 0xd27   : > { %v8750_v12 = vpop.f32.mrf.mxu1  ;;  %v4986_v61 = vpop.f32.mrf.mxu0 }
 0xd28   : > { %v4991_v7 = vmul.f32 %v4916_v6, %v4916_v6  ;;  %v4990_v19 = vmul.f32 0.01, %v4986_v61 }
 0xd29   : > { %v8783_v20 = vpop.f32.mrf.mxu0 }
 0xd2a   : > { %v4992_v43 = vsub.f32 %v4990_v19, %v4991_v7 }
 0xd2c   : > { %v4993_v50 = vadd.f32 1e-05, %v4992_v43 }
 0xd2e   : > { %9493 = vrsqrt.f32 %v4993_v50 }
 0xd3b   : > { %v9494_v54 = vpop.eup %9493 }
 0xd3c   : > { %v4997_v26 = vmul.f32 %v9494_v54, %v4995_v51  ;;  %v9443_v51 = vld [vmem:[%s12878_s5 + $0xb0] ss:$0 sps:$4 sm:$0xff]  }
 0xd3e   : > { %8789 = vmatmul.mubr.msk.f32.vlgmr.msra.gmra.mxu1 %vm13306_vm2, %v4997_v26  ;;  %v4998_v42 = vmul.f32 %v4997_v26, %v4916_v6  ;;  %vm13312_vm2 = vmmov %vm13310_vm0 }
 0xd3f   : > { %8792 = vmatpush3.msk.msra.mxu1 %vm13307_vm3, %v11763_v29  ;;  %8795 = vmatprep.mubr.msk.f32.mxu1 %vm13305_vm4, %v13128_v36 }
 0xd40   : > { %8793 = vmatprep.subr.mxu1 %v13128_v36  ;;  %v4999_v14 = vsub.f32 %v4996_v17, %v4998_v42  ;;  %v9444_v17 = vld [vmem:[%s12878_s5 + $0xa8] sm:$0xff]   ;;  %v9445_v42 = vld [vmem:[%s12878_s5 + $0xa0] sm:$0xff]  }
 0xd41   : > { %8794 = vmatpush3.msk.msra.mxu1 %vm11768_vm14, %v13134_v45  ;;  %vm13313_vm14 = vmmov %vm13310_vm0 }
 0xd42   : > { %8796 = vmatmul.mubr.msk.f32.vlgmr.msra.gmra.mxu1 %vm13309_vm13, %v4999_v14  ;;  %8798 = vmatprep.subr.bf16.mxu1 %v13128_v36  ;;  %vm13311_vm13 = vcmask 975872   ;;  %v9446_v14 = vld [vmem:[%s12878_s5 + $0x98] sm:$0xff]  }
 0xd43   : > { %8799 = vmatpush3.bf16.msra.mxu1 %v5262_v41  ;;  %8814 = vmatprep.mubr.msk.bf16.mxu1 %vm13305_vm4, %v13128_v36  ;;  %v9447_v41 = vld [vmem:[%s12878_s5 + $0x90] sm:$0xff]  }
 0xd44   : > { %8800 = vmatprep.subr.bf16.mxu1 %v13128_v36 }
 0xd47   : > { %8801 = vmatpush3.bf16.msra.mxu1 %v9429_v60  ;;  %v9448_v60 = vld [vmem:[%s12878_s5 + $0x88] sm:$0xff]  }
 0xd48   : > { %8802 = vmatprep.subr.bf16.mxu1 %v13128_v36 }
 0xd4b   : > { %8803 = vmatpush3.bf16.msra.mxu1 %v9431_v34  ;;  %v9449_v34 = vld [vmem:[%s12878_s5 + $0x80] sm:$0xff]  }
 0xd4c   : > { %8804 = vmatprep.subr.bf16.mxu1 %v13128_v36 }
 0xd4f   : > { %8805 = vmatpush3.bf16.msra.mxu1 %v9433_v23  ;;  %v9450_v23 = vld [vmem:[%s12878_s5 + $0x78] sm:$0xff]  }
 0xd50   : > { %8806 = vmatprep.subr.bf16.mxu1 %v13128_v36 }
 0xd53   : > { %8807 = vmatpush3.bf16.msra.mxu1 %v9435_v25 }
 0xd54   : > { %8808 = vmatprep.subr.bf16.mxu1 %v13128_v36 }
 0xd57   : > { %8809 = vmatpush3.bf16.msra.mxu1 %v9437_v30 }
 0xd58   : > { %8810 = vmatprep.subr.bf16.mxu1 %v13128_v36 }
 0xd5b   : > { %8811 = vmatpush3.bf16.msra.mxu1 %v9439_v10 }
 0xd5c   : > { %8812 = vmatprep.subr.bf16.mxu1 %v13128_v36 }
 0xd5f   : > { %8813 = vmatpush3.bf16.msra.mxu1 %v9441_v13 }
 0xd60   : > { %8838 = vmatprep.subr.bf16.mxu1 %v13128_v36 }
 0xdfe   : > { %v5069_v35 = vpop.f32.mrf.mxu1 }
 0xdff   : > { %v5149_v37 = vrot.slane %v5069_v35, %v13231_v39 }
 0xe00   : > { %v8790_v33 = vpop.f32.mrf.mxu1 }
 0xe01   : > { %v5150_v6 = vmul.f32 %v5149_v37, %v12044_v59  ;;  %v5151_v12 = vmul.f32 %v5149_v37, %v12048_v0  ;;  %v5446_v0 = vsel %vm13307_vm3, %v9443_v51, 0 }
 0xe02   : > { %v5142_v15 = vpop.f32.mrf.mxu1 }
 0xe03   : > { %v5155_v61 = vrot.slane %v5142_v15, %v13231_v39 }
 0xe04   : > { %v8797_v7 = vpop.f32.mrf.mxu1 }
 0xe05   : > { %v5156_v19 = vadd.f32 %v5155_v61, %v5150_v6  ;;  %v5157_v20 = vadd.f32 %v5155_v61, %v5151_v12 }
 0xe07   : > { %v5158_v43 = vmax.f32 %v5156_v19, 0.0  ;;  %v5159_v50 = vmax.f32 %v5157_v20, 0.0 }
 0xe09   : > { %5160 = vst.msk [vmem:[#allocation5] sm:$0xff] %vm13310_vm0, %v5158_v43  ;;  %vm13315_vm0 = vnez %v13283_v53  ;;  %v9452_v43 = vld [vmem:[%s12879_s6 + $0x28] sm:$0xff]  }
 0xe0a   : > { %5161 = vst.msk [vmem:[#allocation5 + $0x8] sm:$0x3] %vm13311_vm13, %v5159_v50  ;;  %vm13316_vm13 = vmmov %vm13312_vm2 }
 0xe10   : > { %v5209_v26 = vld [vmem:[#allocation5] sm:$0xff] }
 0xe11   : > { %v5211_v54 = vld [vmem:[#allocation5 + $0x1] sm:$0xff]  ;;  %v5210_v4 = vpack.c.bf16 %v5209_v26, %v5209_v26 }
 0xe12   : > { %v5212_v59 = vpack.c.bf16 %v5211_v54, %v5211_v54  ;;  %v5395_v27 = vld [vmem:[#allocation5 + $0x2] sm:$0xff] }
 0xe13   : > { %8835 = vmatmul.mubr.msk.bf16.vlgmr.msra.gmra.mxu0 %vm13313_vm14, %v5210_v4  ;;  %vm13314_vm14 = vnez %v13281_v9  ;;  %v5396_v25 = vpack.c.bf16 %v5395_v27, %v5395_v27  ;;  %v9451_v27 = vld [vmem:[%s12879_s6 + $0x58] sm:$0xff]  }
 0xe14   : > { %8815 = vmatmul.mubr.msk.bf16.vlgmr.msra.gmra.mxu1 %vm13312_vm2, %v5212_v59  ;;  %8859 = vmatpush3.msk.msra.mxu0 %vm11529_vm5, %v13134_v45 }
 0xe15   : > { %8839 = vmatpush3.bf16.msra.mxu1 %v5446_v0  ;;  %8854 = vmatprep.mubr.msk.bf16.mxu1 %vm13305_vm4, %v13128_v36 }
 0xe16   : > { %8840 = vmatprep.subr.bf16.mxu1 %v13128_v36  ;;  %8860 = vmatprep.subr.mxu0 %v13128_v36 }
 0xe17   : > { %8882 = vmatprep.mubr.msk.f32.mxu0 %vm13305_vm4, %v13128_v36  ;;  %8861 = vmatpush3.msk.msra.mxu0 %vm11554_vm6, %v13134_v45 }
 0xe18   : > { %8862 = vmatprep.subr.mxu0 %v13128_v36 }
 0xe19   : > { %8841 = vmatpush3.bf16.msra.mxu1 %v9444_v17  ;;  %8863 = vmatpush3.msk.msra.mxu0 %vm11568_vm11, %v13134_v45 }
 0xe1a   : > { %8842 = vmatprep.subr.bf16.mxu1 %v13128_v36  ;;  %8864 = vmatprep.subr.mxu0 %v13128_v36 }
 0xe1b   : > { %8865 = vmatpush3.msk.msra.mxu0 %vm11583_vm7, %v13134_v45 }
 0xe1c   : > { %8866 = vmatprep.subr.mxu0 %v13128_v36 }
 0xe1d   : > { %8843 = vmatpush3.bf16.msra.mxu1 %v9445_v42  ;;  %8867 = vmatpush3.msk.msra.mxu0 %vm11598_vm8, %v13134_v45 }
 0xe1e   : > { %8844 = vmatprep.subr.bf16.mxu1 %v13128_v36  ;;  %8868 = vmatprep.subr.mxu0 %v13128_v36 }
 0xe1f   : > { %8869 = vmatpush3.msk.msra.mxu0 %vm11616_vm9, %v13134_v45 }
 0xe20   : > { %8870 = vmatprep.subr.mxu0 %v13128_v36 }
 0xe21   : > { %8845 = vmatpush3.bf16.msra.mxu1 %v9446_v14  ;;  %8871 = vmatpush3.msk.msra.mxu0 %vm11624_vm10, %v13134_v45  ;;  %v5656_v14 = vld [vmem:[%s12881_s8 + $0x4] sm:$0x1] }
 0xe22   : > { %8846 = vmatprep.subr.bf16.mxu1 %v13128_v36  ;;  %8872 = vmatprep.subr.mxu0 %v13128_v36 }
 0xe23   : > { %8873 = vmatpush3.msk.msra.mxu0 %vm13299_vm12, %v13134_v45 }
 0xe24   : > { %8874 = vmatprep.subr.mxu0 %v13128_v36 }
 0xe25   : > { %8847 = vmatpush3.bf16.msra.mxu1 %v9447_v41  ;;  %8875 = vmatpush3.msk.msra.mxu0 %vm13300_vm15, %v13134_v45 }
 0xe26   : > { %8848 = vmatprep.subr.bf16.mxu1 %v13128_v36  ;;  %8876 = vmatprep.subr.mxu0 %v13128_v36 }
 0xe27   : > { %8877 = vmatpush3.msk.msra.mxu0 %vm13301_vm1, %v13134_v45 }
 0xe28   : > { %8878 = vmatprep.subr.mxu0 %v13128_v36 }
 0xe29   : > { %8849 = vmatpush3.bf16.msra.mxu1 %v9448_v60  ;;  %8879 = vmatpush3.msk.msra.mxu0 %vm13314_vm14, %v13134_v45 }
 0xe2a   : > { %8850 = vmatprep.subr.bf16.mxu1 %v13128_v36  ;;  %8880 = vmatprep.subr.mxu0 %v13128_v36 }
 0xe2b   : > { %8881 = vmatpush3.msk.msra.mxu0 %vm13315_vm0, %v13134_v45 }
 0xe2c   : > { %8912 = vmatprep.subr.mxu0 %v13128_v36 }
 0xe2d   : > { %8851 = vmatpush3.bf16.msra.mxu1 %v9449_v34  ;;  %v5657_v34 = vld [vmem:[%s12882_s9 + $0x4] sm:$0x1] }
 0xe2e   : > { %8852 = vmatprep.subr.bf16.mxu1 %v13128_v36 }
 0xe31   : > { %8853 = vmatpush3.bf16.msra.mxu1 %v9450_v23 }
 0xe32   : > { %8885 = vmatprep.subr.mxu1 %v13128_v36 }
 0xe34   : > { %8855 = vmatmul.mubr.msk.bf16.vlgmr.msra.gmra.mxu1 %vm13316_vm13, %v5396_v25 }
 0xe35   : > { %8886 = vmatpush3.msk.msra.mxu1 %vm11529_vm5, %v13134_v45  ;;  %8909 = vmatprep.mubr.msk.f32.mxu1 %vm13305_vm4, %v13128_v36  ;;  %vm13317_vm5 = vcmask 785408  }
 0xe36   : > { %8887 = vmatprep.subr.mxu1 %v13128_v36 }
 0xe37   : > { %8888 = vmatpush3.msk.msra.mxu1 %vm11554_vm6, %v13134_v45  ;;  %vm13318_vm6 = vmmov %vm13317_vm5 }
 0xe38   : > { %8889 = vmatprep.subr.mxu1 %v13128_v36 }
 0xe39   : > { %8890 = vmatpush3.msk.msra.mxu1 %vm11568_vm11, %v13134_v45  ;;  %vm13319_vm11 = vmmov %vm13317_vm5 }
 0xe3a   : > { %8891 = vmatprep.subr.mxu1 %v13128_v36 }
 0xe3b   : > { %8892 = vmatpush3.msk.msra.mxu1 %vm11583_vm7, %v13134_v45  ;;  %vm13320_vm7 = vmmov %vm13307_vm3 }
 0xe3c   : > { %8893 = vmatprep.subr.mxu1 %v13128_v36 }
 0xe3d   : > { %8894 = vmatpush3.msk.msra.mxu1 %vm11598_vm8, %v13134_v45  ;;  %vm13321_vm8 = vmmov %vm13317_vm5 }
 0xe3e   : > { %8895 = vmatprep.subr.mxu1 %v13128_v36 }
 0xe3f   : > { %8896 = vmatpush3.msk.msra.mxu1 %vm11616_vm9, %v13134_v45  ;;  %vm13322_vm9 = vnez %v13291_v18  ;;  %v9455_v18 = vld [vmem:[%s12879_s6 + $0x48] sm:$0xff]  }
 0xe40   : > { %8897 = vmatprep.subr.mxu1 %v13128_v36 }
 0xe41   : > { %8898 = vmatpush3.msk.msra.mxu1 %vm11624_vm10, %v13134_v45  ;;  %vm13323_vm10 = vcmask 97280  }
 0xe42   : > { %8899 = vmatprep.subr.mxu1 %v13128_v36 }
 0xe43   : > { %8900 = vmatpush3.msk.msra.mxu1 %vm13299_vm12, %v13134_v45  ;;  %vm13324_vm12 = vmmov %vm13307_vm3 }
 0xe44   : > { %8901 = vmatprep.subr.mxu1 %v13128_v36 }
 0xe45   : > { %8902 = vmatpush3.msk.msra.mxu1 %vm13300_vm15, %v13134_v45  ;;  %vm13325_vm15 = vmmov %vm13323_vm10 }
 0xe46   : > { %8903 = vmatprep.subr.mxu1 %v13128_v36 }
 0xe47   : > { %8904 = vmatpush3.msk.msra.mxu1 %vm13301_vm1, %v13134_v45  ;;  %vm13326_vm1 = vmmov %vm13317_vm5 }
 0xe48   : > { %8905 = vmatprep.subr.mxu1 %v13128_v36  ;;  %vm13327_vm3 = vmmov %vm13326_vm1 }
 0xe49   : > { %8906 = vmatpush3.msk.msra.mxu1 %vm13314_vm14, %v13134_v45  ;;  %vm13328_vm2 = vmmov %vm13326_vm1 }
 0xe4a   : > { %8907 = vmatprep.subr.mxu1 %v13128_v36  ;;  %vm13329_vm14 = vmmov %vm13326_vm1 }
 0xe4b   : > { %8908 = vmatpush3.msk.msra.mxu1 %vm13315_vm0, %v13134_v45 }
 0xe4c   : > { %8942 = vmatprep.subr.bf16.mxu1 %v13128_v36 }
 0xed3   : > { %v5389_v5 = vpop.f32.mrf.mxu0 }
 0xed4   : > { %v5298_v49 = vpop.f32.mrf.mxu1 }
 0xed5   : > { %v8836_v40 = vpop.f32.mrf.mxu0  ;;  %v5390_v57 = vadd.f32 %v5389_v5, %v5298_v49  ;;  %v9454_v49 = vld [vmem:[%s12879_s6 + $0x20] sm:$0xff]   ;;  %v9456_v5 = vld [vmem:[%s12879_s6 + $0x18] sm:$0xff]  }
 0xed6   : > { %v8816_v11 = vpop.f32.mrf.mxu1  ;;  %v9458_v40 = vld [vmem:[%s12879_s6 + $0x10] sm:$0xff]  }
 0xed7   : > { %v5392_v16 = vpop.f32.mrf.mxu0  ;;  %v9457_v11 = vld [vmem:[%s12879_s6 + $0x40] sm:$0xff]  }
 0xed8   : > { %v5301_v1 = vpop.f32.mrf.mxu1  ;;  %v9460_v16 = vld [vmem:[%s12879_s6 + $0x8] sm:$0xff]  }
 0xed9   : > { %v8837_v52 = vpop.f32.mrf.mxu0  ;;  %v9459_v1 = vld [vmem:[%s12879_s6 + $0x38] sm:$0xff]  }
 0xeda   : > { %v8817_v8 = vpop.f32.mrf.mxu1  ;;  %v9462_v52 = vld [vmem:[%s12879_s6] sm:$0xff]  }
 0xedb   : > { %v9461_v8 = vld [vmem:[%s12879_s6 + $0x30] sm:$0xff]  }
 0xef4   : > { %v5482_v56 = vpop.f32.mrf.mxu1 }
 0xef5   : > { %v12300_v9 = vadd.f32 %v5482_v56, %v5390_v57 }
 0xef6   : > { %v8856_v3 = vpop.f32.mrf.mxu1 }
 0xef7   : > { %v5489_v30 = vsel %vm13317_vm5, %v12300_v9, 0.0  ;;  %v5496_v53 = vmul.f32 %v12300_v9, %v12300_v9 }
 0xef8   : > { %v5490_v58 = vrot.slane %v5489_v30, 4  ;;  %v5485_v10 = vpop.f32.mrf.mxu1 }
 0xef9   : > { %v5497_v62 = vsel %vm13318_vm6, %v5496_v53, 0.0 }
 0xefa   : > { %v5491_v13 = vadd.f32 %v5490_v58, %v5489_v30  ;;  %v5498_v31 = vrot.slane %v5497_v62, 4  ;;  %v8857_v35 = vpop.f32.mrf.mxu1 }
 0xefc   : > { %v5492_v37 = vrot.slane %v5491_v13, 2  ;;  %v5499_v33 = vadd.f32 %v5498_v31, %v5497_v62 }
 0xefe   : > { %v5493_v15 = vadd.f32 %v5492_v37, %v5491_v13  ;;  %v5500_v6 = vrot.slane %v5499_v33, 2  ;;  %v9463_v37 = vld [vmem:[%s12879_s6 + $0x88] sm:$0xff]  }
 0xf00   : > { %v5494_v12 = vrot.slane %v5493_v15, 1  ;;  %v5501_v61 = vadd.f32 %v5500_v6, %v5499_v33  ;;  %v9465_v6 = vld [vmem:[%s12879_s6 + $0x78] sm:$0xff]  }
 0xf02   : > { %v5495_v7 = vadd.f32 %v5494_v12, %v5493_v15  ;;  %v5502_v19 = vrot.slane %v5501_v61, 1  ;;  %v9466_v12 = vld [vmem:[%s12879_s6 + $0x70] sm:$0xff]  }
 0xf04   : > { %8883 = vmatmul.mubr.msk.f32.vlgmr.msra.gmra.mxu0 %vm13319_vm11, %v5495_v7  ;;  %v5503_v20 = vadd.f32 %v5502_v19, %v5501_v61  ;;  %v9467_v61 = vld [vmem:[%s12879_s6 + $0x68] sm:$0xff]   ;;  %v9468_v7 = vld [vmem:[%s12879_s6 + $0x60] sm:$0xff]  }
 0xf05   : > { %8913 = vmatpush3.msk.msra.mxu0 %vm13320_vm7, %v11763_v29  ;;  %8916 = vmatprep.mubr.msk.f32.mxu0 %vm13305_vm4, %v13128_v36 }
 0xf06   : > { %8910 = vmatmul.mubr.msk.f32.vlgmr.msra.gmra.mxu1 %vm13321_vm8, %v5503_v20  ;;  %8914 = vmatprep.subr.mxu0 %v13128_v36 }
 0xf07   : > { %8915 = vmatpush3.msk.msra.mxu0 %vm13322_vm9, %v13134_v45  ;;  %8954 = vmatprep.mubr.msk.bf16.mxu1 %vm13305_vm4, %v13128_v36 }
 0xf08   : > { %8919 = vmatprep.subr.mxu0 %v13128_v36  ;;  %8943 = vmatpush3.bf16.msra.mxu1 %v9452_v43  ;;  %v6112_v43 = vmul.f32 0.0625, %v9672_v46 }
 0xf09   : > { %8944 = vmatprep.subr.bf16.mxu1 %v13128_v36 }
 0xf0c   : > { %8945 = vmatpush3.bf16.msra.mxu1 %v9454_v49 }
 0xf0d   : > { %8946 = vmatprep.subr.bf16.mxu1 %v13128_v36 }
 0xf10   : > { %8947 = vmatpush3.bf16.msra.mxu1 %v9456_v5 }
 0xf11   : > { %8948 = vmatprep.subr.bf16.mxu1 %v13128_v36 }
 0xf14   : > { %8949 = vmatpush3.bf16.msra.mxu1 %v9458_v40 }
 0xf15   : > { %8950 = vmatprep.subr.bf16.mxu1 %v13128_v36 }
 0xf18   : > { %8951 = vmatpush3.bf16.msra.mxu1 %v9460_v16 }
 0xf19   : > { %8952 = vmatprep.subr.bf16.mxu1 %v13128_v36 }
 0xf1c   : > { %8953 = vmatpush3.bf16.msra.mxu1 %v9462_v52 }
 0xf1d   : > { %8974 = vmatprep.subr.mxu1 %v13128_v36 }
 0xfc4   : > { %v5573_v50 = vpop.f32.mrf.mxu0 }
 0xfc5   : > { %v5577_v51 = vmul.f32 0.015625, %v5573_v50  ;;  %v6111_v50 = vmul.f32 0.0625, %v9674_v47 }
 0xfc6   : > { %v8884_v54 = vpop.f32.mrf.mxu0  ;;  %v5647_v26 = vpop.f32.mrf.mxu1 }
 0xfc7   : > { %v5652_v59 = vmul.f32 %v5577_v51, %v5577_v51  ;;  %v5651_v4 = vmul.f32 0.015625, %v5647_v26  ;;  %v6109_v54 = vmul.f32 0.0625, %v9782_v24  ;;  %v6124_v26 = vfloor.f32 %v6112_v43 }
 0xfc8   : > { %v8911_v0 = vpop.f32.mrf.mxu1 }
 0xfc9   : > { %v5653_v17 = vsub.f32 %v5651_v4, %v5652_v59  ;;  %v6123_v59 = vfloor.f32 %v6111_v50  ;;  %v6121_v0 = vfloor.f32 %v6109_v54 }
 0xfcb   : > { %v5654_v42 = vadd.f32 1e-05, %v5653_v17  ;;  %v6136_v17 = vmul.f32 16.0, %v6124_v26 }
 0xfcd   : > { %9495 = vrsqrt.f32 %v5654_v42  ;;  %v6135_v42 = vmul.f32 16.0, %v6123_v59 }
 0xfda   : > { %v9496_v41 = vpop.eup %9495 }
 0xfdb   : > { %v5658_v60 = vmul.f32 %v9496_v41, %v5656_v14  ;;  %v6133_v41 = vmul.f32 16.0, %v6121_v0 }
 0xfdd   : > { %8917 = vmatmul.mubr.msk.f32.vlgmr.msra.gmra.mxu0 %vm13323_vm10, %v5658_v60  ;;  %v5659_v23 = vmul.f32 %v5658_v60, %v5577_v51  ;;  %v6110_v51 = vmul.f32 0.0625, %v9778_v21  ;;  %v6148_v60 = vsub.f32 %v9672_v46, %v6136_v17  ;;  %v6108_v46 = vmul.f32 0.0625, %v9786_v28 }
 0xfde   : > { %8920 = vmatpush3.msk.msra.mxu0 %vm13324_vm12, %v11763_v29  ;;  %8923 = vmatprep.mubr.msk.f32.mxu0 %vm13305_vm4, %v13128_v36  ;;  %v9453_v29 = vld [vmem:[%s12879_s6 + $0x50] sm:$0xff]  }
 0xfdf   : > { %8921 = vmatprep.subr.mxu0 %v13128_v36  ;;  %v5660_v25 = vsub.f32 %v5657_v34, %v5659_v23  ;;  %v6122_v4 = vfloor.f32 %v6110_v51  ;;  %v6147_v34 = vsub.f32 %v9674_v47, %v6135_v42  ;;  %vm6160_vm0 = vcmp.eq.f32.partialorder %v6148_v60, %v9677_v48 }
 0xfe0   : > { %8922 = vmatpush3.msk.msra.mxu0 %vm13322_vm9, %v13134_v45  ;;  %v6120_v47 = vfloor.f32 %v6108_v46 }
 0xfe1   : > { %8924 = vmatmul.mubr.msk.f32.vlgmr.msra.gmra.mxu0 %vm13325_vm15, %v5660_v25  ;;  %8926 = vmatprep.subr.bf16.mxu0 %v13128_v36  ;;  %v6134_v14 = vmul.f32 16.0, %v6122_v4  ;;  %vm6159_vm13 = vcmp.eq.f32.partialorder %v6147_v34, %v9677_v48 }
 0xfe2   : > { %8927 = vmatpush3.bf16.msra.mxu0 %v9451_v27  ;;  %8938 = vmatprep.mubr.msk.bf16.mxu0 %vm13305_vm4, %v13128_v36  ;;  %v6145_v27 = vsub.f32 %v9782_v24, %v6133_v41  ;;  %v6132_v24 = vmul.f32 16.0, %v6120_v47 }
 0xfe3   : > { %8928 = vmatprep.subr.bf16.mxu0 %v13128_v36  ;;  %v6146_v23 = vsub.f32 %v9778_v21, %v6134_v14  ;;  %v6107_v21 = vmul.f32 0.0625, %v9790_v38 }
 0xfe4   : > { %vm6157_vm6 = vcmp.eq.f32.partialorder %v6145_v27, %v9677_v48  ;;  %v6144_v49 = vsub.f32 %v9786_v28, %v6132_v24  ;;  %v6104_v28 = vmul.f32 0.0625, %v9830_v63 }
 0xfe5   : > { %vm6158_vm5 = vcmp.eq.f32.partialorder %v6146_v23, %v9677_v48  ;;  %v6119_v25 = vfloor.f32 %v6107_v21 }
 0xfe6   : > { %8929 = vmatpush3.bf16.msra.mxu0 %v9453_v29  ;;  %v6106_v29 = vmul.f32 0.0625, %v9795_v44  ;;  %vm12458_vm11 = vcmp.eq.f32.partialorder %v6144_v49, %v9677_v48 }
 0xfe7   : > { %8930 = vmatprep.subr.bf16.mxu0 %v13128_v36 }
 0xfe8   : > { %v6118_v5 = vfloor.f32 %v6106_v29 }
 0xfea   : > { %8931 = vmatpush3.bf16.msra.mxu0 %v9455_v18  ;;  %v6131_v18 = vmul.f32 16.0, %v6119_v25  ;;  %v6130_v16 = vmul.f32 16.0, %v6118_v5 }
 0xfeb   : > { %8932 = vmatprep.subr.bf16.mxu0 %v13128_v36 }
 0xfee   : > { %8933 = vmatpush3.bf16.msra.mxu0 %v9457_v11  ;;  %v6105_v11 = vmul.f32 0.0625, %v9811_v55 }
 0xfef   : > { %8934 = vmatprep.subr.bf16.mxu0 %v13128_v36 }
 0xff2   : > { %8935 = vmatpush3.bf16.msra.mxu0 %v9459_v1  ;;  %v6143_v1 = vsub.f32 %v9790_v38, %v6131_v18  ;;  %v6142_v38 = vsub.f32 %v9795_v44, %v6130_v16  ;;  %v6185_v16 = vmul.f32 0.0625, %v9677_v48 }
 0xff3   : > { %8936 = vmatprep.subr.bf16.mxu0 %v13128_v36 }
 0xff4   : > { %vm12472_vm7 = vcmp.eq.f32.partialorder %v6143_v1, %v9677_v48  ;;  %vm12487_vm8 = vcmp.eq.f32.partialorder %v6142_v38, %v9677_v48 }
 0xff6   : > { %8937 = vmatpush3.bf16.msra.mxu0 %v9461_v8  ;;  %v6117_v8 = vfloor.f32 %v6105_v11 }
 0xff7   : > { %8958 = vmatprep.subr.bf16.mxu0 %v13128_v36 }
0x109d   : > { %v5730_v57 = vpop.f32.mrf.mxu0 }
0x109e   : > { %v5810_v56 = vrot.slane %v5730_v57, %v13231_v39  ;;  %v6129_v57 = vmul.f32 16.0, %v6117_v8  ;;  %v6186_v8 = vfloor.f32 %v6185_v16 }
0x109f   : > { %v8918_v3 = vpop.f32.mrf.mxu0 }
0x10a0   : > { %v5811_v53 = vmul.f32 %v5810_v56, %v12300_v9  ;;  %v9464_v9 = vld [vmem:[%s12879_s6 + $0x80] sm:$0xff]   ;;  %v6103_v56 = vmul.f32 0.0625, %v9840_v2  ;;  %v6116_v3 = vfloor.f32 %v6104_v28  ;;  %v6141_v44 = vsub.f32 %v9811_v55, %v6129_v57 }
0x10a1   : > { %v5803_v30 = vpop.f32.mrf.mxu0  ;;  %v6187_v28 = vmul.f32 16.0, %v6186_v8 }
0x10a2   : > { %v5815_v58 = vrot.slane %v5803_v30, %v13231_v39  ;;  %vm12502_vm9 = vcmp.eq.f32.partialorder %v6141_v44, %v9677_v48 }
0x10a3   : > { %v8925_v10 = vpop.f32.mrf.mxu0  ;;  %v12587_v38 = vsub.f32 %v9677_v48, %v6187_v28 }
0x10a4   : > { %v5816_v62 = vadd.f32 %v5815_v58, %v5811_v53  ;;  %v6115_v53 = vfloor.f32 %v6103_v56  ;;  %v6102_v58 = vmul.f32 0.0625, %v9865_v22  ;;  %v6128_v10 = vmul.f32 16.0, %v6116_v3 }
0x10a6   : > { %v5817_v13 = vmax.f32 %v5816_v62, 0.0  ;;  %v6127_v55 = vmul.f32 16.0, %v6115_v53 }
0x10a8   : > { %5818 = vst.msk [vmem:[#allocation6] sm:$0xff] %vm13326_vm1, %v5817_v13  ;;  %v6114_v13 = vfloor.f32 %v6102_v58 }
0x10af   : > { %v5859_v31 = vld [vmem:[#allocation6 + $0x1] sm:$0x3f] }
0x10b0   : > { %v5857_v35 = vld [vmem:[#allocation6] sm:$0x3f]  ;;  %v5860_v33 = vpack.c.bf16 %v5859_v31, %v5859_v31  ;;  %v6101_v31 = vmul.f32 0.0625, %v9883_v32 }
0x10b1   : > { %v5858_v15 = vpack.c.bf16 %v5857_v35, %v5857_v35  ;;  %v6019_v19 = vld [vmem:[#allocation6 + $0x2] sm:$0x3f]  ;;  %v6140_v35 = vsub.f32 %v9830_v63, %v6128_v10 }
0x10b2   : > { %8939 = vmatmul.mubr.msk.bf16.vlgmr.msra.gmra.mxu0 %vm13327_vm3, %v5860_v33  ;;  %v6020_v20 = vpack.c.bf16 %v6019_v19, %v6019_v19  ;;  %v6126_v33 = vmul.f32 16.0, %v6114_v13  ;;  %vm6195_vm3 = vcmask 783360  }
0x10b3   : > { %8955 = vmatmul.mubr.msk.bf16.vlgmr.msra.gmra.mxu1 %vm13328_vm2, %v5858_v15  ;;  %8959 = vmatpush3.bf16.msra.mxu0 %v9463_v37  ;;  %v6139_v37 = vsub.f32 %v9840_v2, %v6127_v55  ;;  %v6113_v15 = vfloor.f32 %v6101_v31  ;;  %vm12519_vm10 = vcmp.eq.f32.partialorder %v6140_v35, %v9677_v48  ;;  %v6363_v31 = vld [vmem:[%s12881_s8 + $0x5] sm:$0x1] }
0x10b4   : > { %8970 = vmatprep.mubr.msk.bf16.mxu0 %vm13305_vm4, %v13128_v36  ;;  %8960 = vmatprep.subr.bf16.mxu0 %v13128_v36  ;;  %v6138_v2 = vsub.f32 %v9865_v22, %v6126_v33  ;;  %v6364_v33 = vld [vmem:[%s12882_s9 + $0x5] sm:$0x1] }
0x10b5   : > { %8998 = vmatprep.mubr.msk.f32.mxu1 %vm13305_vm4, %v13128_v36  ;;  %8975 = vmatpush3.msk.msra.mxu1 %vm6160_vm0, %v13134_v45  ;;  %vm12527_vm12 = vcmp.eq.f32.partialorder %v6139_v37, %v9677_v48 }
0x10b6   : > { %8976 = vmatprep.subr.mxu1 %v13128_v36  ;;  %vm12541_vm15 = vcmp.eq.f32.partialorder %v6138_v2, %v9677_v48  ;;  %v9469_v2 = vld [vmem:[%s12880_s7 + $0x58] sm:$0xff]  }
0x10b7   : > { %8961 = vmatpush3.bf16.msra.mxu0 %v9464_v9  ;;  %8977 = vmatpush3.msk.msra.mxu1 %vm6159_vm13, %v13134_v45 }
0x10b8   : > { %8962 = vmatprep.subr.bf16.mxu0 %v13128_v36  ;;  %8978 = vmatprep.subr.mxu1 %v13128_v36 }
0x10b9   : > { %8979 = vmatpush3.msk.msra.mxu1 %vm6158_vm5, %v13134_v45 }
0x10ba   : > { %8980 = vmatprep.subr.mxu1 %v13128_v36 }
0x10bb   : > { %8963 = vmatpush3.bf16.msra.mxu0 %v9465_v6  ;;  %8981 = vmatpush3.msk.msra.mxu1 %vm6157_vm6, %v13134_v45  ;;  %v6125_v6 = vmul.f32 16.0, %v6113_v15 }
0x10bc   : > { %8964 = vmatprep.subr.bf16.mxu0 %v13128_v36  ;;  %8982 = vmatprep.subr.mxu1 %v13128_v36 }
0x10bd   : > { %8983 = vmatpush3.msk.msra.mxu1 %vm12458_vm11, %v13134_v45 }
0x10be   : > { %8984 = vmatprep.subr.mxu1 %v13128_v36 }
0x10bf   : > { %8965 = vmatpush3.bf16.msra.mxu0 %v9466_v12  ;;  %8985 = vmatpush3.msk.msra.mxu1 %vm12472_vm7, %v13134_v45  ;;  %v6977_v12 = vld [vmem:[%s12881_s8 + $0x6] sm:$0x1] }
0x10c0   : > { %8966 = vmatprep.subr.bf16.mxu0 %v13128_v36  ;;  %8986 = vmatprep.subr.mxu1 %v13128_v36 }
0x10c1   : > { %8987 = vmatpush3.msk.msra.mxu1 %vm12487_vm8, %v13134_v45 }
0x10c2   : > { %8988 = vmatprep.subr.mxu1 %v13128_v36 }
0x10c3   : > { %8967 = vmatpush3.bf16.msra.mxu0 %v9467_v61  ;;  %8989 = vmatpush3.msk.msra.mxu1 %vm12502_vm9, %v13134_v45  ;;  %v6137_v61 = vsub.f32 %v9883_v32, %v6125_v6 }
0x10c4   : > { %8968 = vmatprep.subr.bf16.mxu0 %v13128_v36  ;;  %8990 = vmatprep.subr.mxu1 %v13128_v36 }
0x10c5   : > { %8991 = vmatpush3.msk.msra.mxu1 %vm12519_vm10, %v13134_v45  ;;  %vm12555_vm1 = vcmp.eq.f32.partialorder %v6137_v61, %v9677_v48  ;;  %v9470_v48 = vld [vmem:[%s12880_s7 + $0x28] sm:$0xff]   ;;  %v9471_v61 = vld [vmem:[%s12880_s7 + $0x50] sm:$0xff]  }
0x10c6   : > { %8992 = vmatprep.subr.mxu1 %v13128_v36 }
0x10c7   : > { %8969 = vmatpush3.bf16.msra.mxu0 %v9468_v7  ;;  %8993 = vmatpush3.msk.msra.mxu1 %vm12527_vm12, %v13134_v45  ;;  %v6978_v7 = vld [vmem:[%s12882_s9 + $0x6] sm:$0x1] }
0x10c8   : > { %9001 = vmatprep.subr.mxu0 %v13128_v36  ;;  %8994 = vmatprep.subr.mxu1 %v13128_v36 }
0x10c9   : > { %8995 = vmatpush3.msk.msra.mxu1 %vm12541_vm15, %v13134_v45 }
0x10ca   : > { %8971 = vmatmul.mubr.msk.bf16.vlgmr.msra.gmra.mxu0 %vm13329_vm14, %v6020_v20  ;;  %8996 = vmatprep.subr.mxu1 %v13128_v36  ;;  %vm13346_vm14 = vmmov %vm13328_vm2 }
0x10cb   : > { %9025 = vmatprep.mubr.msk.f32.mxu0 %vm13305_vm4, %v13128_v36  ;;  %9002 = vmatpush3.msk.msra.mxu0 %vm6160_vm0, %v13134_v45  ;;  %vm6190_vm0 = vcmp.eq.f32.partialorder %v12587_v38, %v9865_v22 }
0x10cc   : > { %9003 = vmatprep.subr.mxu0 %v13128_v36  ;;  %8997 = vmatpush3.msk.msra.mxu1 %vm12555_vm1, %v13134_v45 }
0x10cd   : > { %9004 = vmatpush3.msk.msra.mxu0 %vm6159_vm13, %v13134_v45  ;;  %9028 = vmatprep.subr.mxu1 %v13128_v36  ;;  %vm6189_vm13 = vcmp.eq.f32.partialorder %v12587_v38, %v9883_v32 }
0x10ce   : > { %9005 = vmatprep.subr.mxu0 %v13128_v36 }
0x10cf   : > { %9006 = vmatpush3.msk.msra.mxu0 %vm6158_vm5, %v13134_v45  ;;  %vm13347_vm5 = vcmask 130048  }
0x10d0   : > { %9007 = vmatprep.subr.mxu0 %v13128_v36 }
0x10d1   : > { %9008 = vmatpush3.msk.msra.mxu0 %vm6157_vm6, %v13134_v45  ;;  %vm13348_vm6 = vmmov %vm13347_vm5 }
0x10d2   : > { %9009 = vmatprep.subr.mxu0 %v13128_v36 }
0x10d3   : > { %9010 = vmatpush3.msk.msra.mxu0 %vm12458_vm11, %v13134_v45 }
0x10d4   : > { %9011 = vmatprep.subr.mxu0 %v13128_v36 }
0x10d5   : > { %9012 = vmatpush3.msk.msra.mxu0 %vm12472_vm7, %v13134_v45 }
0x10d6   : > { %9013 = vmatprep.subr.mxu0 %v13128_v36 }
0x10d7   : > { %9014 = vmatpush3.msk.msra.mxu0 %vm12487_vm8, %v13134_v45 }
0x10d8   : > { %9015 = vmatprep.subr.mxu0 %v13128_v36 }
0x10d9   : > { %9016 = vmatpush3.msk.msra.mxu0 %vm12502_vm9, %v13134_v45 }
0x10da   : > { %9017 = vmatprep.subr.mxu0 %v13128_v36 }
0x10db   : > { %9018 = vmatpush3.msk.msra.mxu0 %vm12519_vm10, %v13134_v45 }
0x10dc   : > { %9019 = vmatprep.subr.mxu0 %v13128_v36 }
0x10dd   : > { %9020 = vmatpush3.msk.msra.mxu0 %vm12527_vm12, %v13134_v45 }
0x10de   : > { %9021 = vmatprep.subr.mxu0 %v13128_v36 }
0x10df   : > { %9022 = vmatpush3.msk.msra.mxu0 %vm12541_vm15, %v13134_v45 }
0x10e0   : > { %9023 = vmatprep.subr.mxu0 %v13128_v36 }
0x10e1   : > { %9024 = vmatpush3.msk.msra.mxu0 %vm12555_vm1, %v13134_v45 }
0x10e2   : > { %9058 = vmatprep.subr.bf16.mxu0 %v13128_v36 }
0x1172   : > { %v5934_v19 = vpop.f32.mrf.mxu0 }
0x1173   : > { %v6013_v20 = vpop.f32.mrf.mxu1 }
0x1174   : > { %v8940_v43 = vpop.f32.mrf.mxu0  ;;  %v6014_v4 = vadd.f32 %v6013_v20, %v5934_v19  ;;  %v9472_v19 = vld [vmem:[%s12880_s7 + $0x20] sm:$0xff]   ;;  %v9473_v20 = vld [vmem:[%s12880_s7 + $0x48] sm:$0xff]  }
0x1175   : > { %v8956_v50 = vpop.f32.mrf.mxu1  ;;  %v9474_v43 = vld [vmem:[%s12880_s7 + $0x18] sm:$0xff]  }
0x1176   : > { %v5937_v51 = vpop.f32.mrf.mxu0  ;;  %v9475_v50 = vld [vmem:[%s12880_s7 + $0x40] sm:$0xff]  }
0x1177   : > { %v6016_v54 = vpop.f32.mrf.mxu1  ;;  %v9476_v51 = vld [vmem:[%s12880_s7 + $0x10] sm:$0xff]  }
0x1178   : > { %v8941_v26 = vpop.f32.mrf.mxu0  ;;  %v9477_v54 = vld [vmem:[%s12880_s7 + $0x38] sm:$0xff]  }
0x1179   : > { %v8957_v59 = vpop.f32.mrf.mxu1  ;;  %v9478_v26 = vld [vmem:[%s12880_s7 + $0x8] sm:$0xff]  }
0x117a   : > { %v9479_v59 = vld [vmem:[%s12880_s7 + $0x30] sm:$0xff]  }
0x118a   : > { %v6094_v0 = vpop.f32.mrf.mxu0 }
0x118b   : > { %v12572_v17 = vadd.f32 %v6094_v0, %v6014_v4  ;;  %v9480_v4 = vld [vmem:[%s12880_s7] sm:$0xff]  }
0x118c   : > { %v8972_v42 = vpop.f32.mrf.mxu0 }
0x118d   : > { %v6196_v14 = vsel %vm6195_vm3, %v12572_v17, 0.0  ;;  %v6203_v41 = vmul.f32 %v12572_v17, %v12572_v17 }
0x118e   : > { %v6197_v60 = vrot.slane %v6196_v14, 4  ;;  %v6097_v34 = vpop.f32.mrf.mxu0 }
0x118f   : > { %v6204_v23 = vsel %vm6195_vm3, %v6203_v41, 0.0 }
0x1190   : > { %v6198_v27 = vadd.f32 %v6197_v60, %v6196_v14  ;;  %v6205_v46 = vrot.slane %v6204_v23, 4  ;;  %v8973_v47 = vpop.f32.mrf.mxu0 }
0x1192   : > { %v6199_v21 = vrot.slane %v6198_v27, 2  ;;  %v6206_v24 = vadd.f32 %v6205_v46, %v6204_v23 }
0x1194   : > { %v6200_v25 = vadd.f32 %v6199_v21, %v6198_v27  ;;  %v6207_v29 = vrot.slane %v6206_v24, 2 }
0x1196   : > { %v6201_v49 = vrot.slane %v6200_v25, 1  ;;  %v6208_v18 = vadd.f32 %v6207_v29, %v6206_v24  ;;  %v9481_v24 = vld [vmem:[%s12880_s7 + $0x88] sm:$0xff]  }
0x1198   : > { %v6202_v5 = vadd.f32 %v6201_v49, %v6200_v25  ;;  %v6209_v11 = vrot.slane %v6208_v18, 1  ;;  %v9483_v49 = vld [vmem:[%s12880_s7 + $0x78] sm:$0xff]  }
0x119a   : > { %8999 = vmatmul.mubr.msk.f32.vlgmr.msra.gmra.mxu1 %vm13328_vm2, %v6202_v5  ;;  %v6210_v1 = vadd.f32 %v6209_v11, %v6208_v18  ;;  %v9484_v18 = vld [vmem:[%s12880_s7 + $0x70] sm:$0xff]   ;;  %v9485_v5 = vld [vmem:[%s12880_s7 + $0x68] sm:$0xff]   ;;  %v9486_v11 = vld [vmem:[%s12880_s7 + $0x60] sm:$0xff]  }
0x119b   : > { %9032 = vmatprep.mubr.msk.f32.mxu1 %vm13305_vm4, %v13128_v36  ;;  %9029 = vmatpush3.msk.msra.mxu1 %vm6190_vm0, %v13134_v45 }
0x119c   : > { %9026 = vmatmul.mubr.msk.f32.vlgmr.msra.gmra.mxu0 %vm13346_vm14, %v6210_v1  ;;  %9030 = vmatprep.subr.mxu1 %v13128_v36  ;;  %vm13349_vm14 = vmmov %vm13328_vm2 }
0x119d   : > { %9070 = vmatprep.mubr.msk.bf16.mxu0 %vm13305_vm4, %v13128_v36  ;;  %9031 = vmatpush3.msk.msra.mxu1 %vm6189_vm13, %v13134_v45 }
0x119e   : > { %9035 = vmatprep.subr.mxu1 %v13128_v36  ;;  %9059 = vmatpush3.bf16.msra.mxu0 %v9470_v48 }
0x119f   : > { %9060 = vmatprep.subr.bf16.mxu0 %v13128_v36 }
0x11a2   : > { %9061 = vmatpush3.bf16.msra.mxu0 %v9472_v19 }
0x11a3   : > { %9062 = vmatprep.subr.bf16.mxu0 %v13128_v36 }
0x11a6   : > { %9063 = vmatpush3.bf16.msra.mxu0 %v9474_v43 }
0x11a7   : > { %9064 = vmatprep.subr.bf16.mxu0 %v13128_v36 }
0x11aa   : > { %9065 = vmatpush3.bf16.msra.mxu0 %v9476_v51 }
0x11ab   : > { %9066 = vmatprep.subr.bf16.mxu0 %v13128_v36 }
0x11ae   : > { %9067 = vmatpush3.bf16.msra.mxu0 %v9478_v26 }
0x11af   : > { %9068 = vmatprep.subr.bf16.mxu0 %v13128_v36 }
0x11b2   : > { %9069 = vmatpush3.bf16.msra.mxu0 %v9480_v4 }
0x11b3   : > { %9090 = vmatprep.subr.mxu0 %v13128_v36 }
0x125a   : > { %v6280_v57 = vpop.f32.mrf.mxu1 }
0x125b   : > { %v6284_v56 = vmul.f32 0.027777778, %v6280_v57 }
0x125c   : > { %v9000_v3 = vpop.f32.mrf.mxu1  ;;  %v6354_v44 = vpop.f32.mrf.mxu0 }
0x125d   : > { %v6359_v53 = vmul.f32 %v6284_v56, %v6284_v56  ;;  %v6358_v58 = vmul.f32 0.027777778, %v6354_v44 }
0x125e   : > { %v9027_v10 = vpop.f32.mrf.mxu0 }
0x125f   : > { %v6360_v55 = vsub.f32 %v6358_v58, %v6359_v53 }
0x1261   : > { %v6361_v13 = vadd.f32 1e-05, %v6360_v55 }
0x1263   : > { %9497 = vrsqrt.f32 %v6361_v13 }
0x1270   : > { %v9498_v35 = vpop.eup %9497 }
0x1271   : > { %v6365_v37 = vmul.f32 %v9498_v35, %v6363_v31 }
0x1273   : > { %9033 = vmatmul.mubr.msk.f32.vlgmr.msra.gmra.mxu1 %vm13347_vm5, %v6365_v37  ;;  %v6366_v15 = vmul.f32 %v6365_v37, %v6284_v56  ;;  %vm6808_vm5 = vcmask 519168  }
0x1274   : > { %9036 = vmatpush3.msk.msra.mxu1 %vm6190_vm0, %v13134_v45  ;;  %9039 = vmatprep.mubr.msk.f32.mxu1 %vm13305_vm4, %v13128_v36 }
0x1275   : > { %9037 = vmatprep.subr.mxu1 %v13128_v36  ;;  %v6367_v6 = vsub.f32 %v6364_v33, %v6366_v15 }
0x1276   : > { %9038 = vmatpush3.msk.msra.mxu1 %vm6189_vm13, %v13134_v45 }
0x1277   : > { %9040 = vmatmul.mubr.msk.f32.vlgmr.msra.gmra.mxu1 %vm13348_vm6, %v6367_v6  ;;  %9042 = vmatprep.subr.bf16.mxu1 %v13128_v36  ;;  %vm6824_vm6 = vcmask 523264  }
0x1278   : > { %9043 = vmatpush3.bf16.msra.mxu1 %v9469_v2  ;;  %9054 = vmatprep.mubr.msk.bf16.mxu1 %vm13305_vm4, %v13128_v36 }
0x1279   : > { %9044 = vmatprep.subr.bf16.mxu1 %v13128_v36 }
0x127c   : > { %9045 = vmatpush3.bf16.msra.mxu1 %v9471_v61 }
0x127d   : > { %9046 = vmatprep.subr.bf16.mxu1 %v13128_v36 }
0x1280   : > { %9047 = vmatpush3.bf16.msra.mxu1 %v9473_v20 }
0x1281   : > { %9048 = vmatprep.subr.bf16.mxu1 %v13128_v36 }
0x1284   : > { %9049 = vmatpush3.bf16.msra.mxu1 %v9475_v50 }
0x1285   : > { %9050 = vmatprep.subr.bf16.mxu1 %v13128_v36 }
0x1288   : > { %9051 = vmatpush3.bf16.msra.mxu1 %v9477_v54 }
0x1289   : > { %9052 = vmatprep.subr.bf16.mxu1 %v13128_v36 }
0x128c   : > { %9053 = vmatpush3.bf16.msra.mxu1 %v9479_v59 }
0x128d   : > { %9074 = vmatprep.subr.bf16.mxu1 %v13128_v36 }
0x1333   : > { %v6437_v0 = vpop.f32.mrf.mxu1 }
0x1334   : > { %v6517_v42 = vrot.slane %v6437_v0, %v13231_v39 }
0x1335   : > { %v9034_v14 = vpop.f32.mrf.mxu1 }
0x1336   : > { %v6518_v60 = vmul.f32 %v6517_v42, %v12572_v17  ;;  %v9482_v17 = vld [vmem:[%s12880_s7 + $0x80] sm:$0xff]  }
0x1337   : > { %v6510_v41 = vpop.f32.mrf.mxu1 }
0x1338   : > { %v6522_v34 = vrot.slane %v6510_v41, %v13231_v39 }
0x1339   : > { %v9041_v23 = vpop.f32.mrf.mxu1 }
0x133a   : > { %v6523_v27 = vadd.f32 %v6522_v34, %v6518_v60 }
0x133c   : > { %v6524_v46 = vmax.f32 %v6523_v27, 0.0 }
0x133e   : > { %6525 = vst.msk [vmem:[#allocation7] sm:$0x3f] %vm6195_vm3, %v6524_v46  ;;  %vm13350_vm3 = vmmov %vm13328_vm2 }
0x1345   : > { %v6566_v47 = vld [vmem:[#allocation7 + $0x1] sm:$0xf] }
0x1346   : > { %v6564_v21 = vld [vmem:[#allocation7] sm:$0xf]  ;;  %v6567_v25 = vpack.c.bf16 %v6566_v47, %v6566_v47 }
0x1347   : > { %v6565_v29 = vpack.c.bf16 %v6564_v21, %v6564_v21  ;;  %v6726_v1 = vld [vmem:[#allocation7 + $0x2] sm:$0xf] }
0x1348   : > { %9055 = vmatmul.mubr.msk.bf16.vlgmr.msra.gmra.mxu1 %vm13328_vm2, %v6567_v25  ;;  %v6727_v16 = vpack.c.bf16 %v6726_v1, %v6726_v1  ;;  %v7140_v1 = vld [vmem:[%s12883_s10 + $0x8] sm:$0xff] }
0x1349   : > { %9071 = vmatmul.mubr.msk.bf16.vlgmr.msra.gmra.mxu0 %vm13349_vm14, %v6565_v29  ;;  %9075 = vmatpush3.bf16.msra.mxu1 %v9481_v24 }
0x134a   : > { %9086 = vmatprep.mubr.msk.bf16.mxu1 %vm13305_vm4, %v13128_v36  ;;  %9076 = vmatprep.subr.bf16.mxu1 %v13128_v36 }
0x134b   : > { %9091 = vmatpush3.msk.msra.mxu0 %vm12458_vm11, %v13134_v45  ;;  %9106 = vmatprep.mubr.msk.f32.mxu0 %vm13305_vm4, %v13128_v36 }
0x134c   : > { %9092 = vmatprep.subr.mxu0 %v13128_v36 }
0x134d   : > { %9093 = vmatpush3.msk.msra.mxu0 %vm12472_vm7, %v13134_v45  ;;  %9077 = vmatpush3.bf16.msra.mxu1 %v9482_v17 }
0x134e   : > { %9094 = vmatprep.subr.mxu0 %v13128_v36  ;;  %9078 = vmatprep.subr.bf16.mxu1 %v13128_v36 }
0x134f   : > { %9095 = vmatpush3.msk.msra.mxu0 %vm12487_vm8, %v13134_v45 }
0x1350   : > { %9096 = vmatprep.subr.mxu0 %v13128_v36 }
0x1351   : > { %9097 = vmatpush3.msk.msra.mxu0 %vm12502_vm9, %v13134_v45  ;;  %9079 = vmatpush3.bf16.msra.mxu1 %v9483_v49 }
0x1352   : > { %9098 = vmatprep.subr.mxu0 %v13128_v36  ;;  %9080 = vmatprep.subr.bf16.mxu1 %v13128_v36 }
0x1353   : > { %9099 = vmatpush3.msk.msra.mxu0 %vm12519_vm10, %v13134_v45 }
0x1354   : > { %9100 = vmatprep.subr.mxu0 %v13128_v36 }
0x1355   : > { %9101 = vmatpush3.msk.msra.mxu0 %vm12527_vm12, %v13134_v45  ;;  %9081 = vmatpush3.bf16.msra.mxu1 %v9484_v18 }
0x1356   : > { %9102 = vmatprep.subr.mxu0 %v13128_v36  ;;  %9082 = vmatprep.subr.bf16.mxu1 %v13128_v36 }
0x1357   : > { %9103 = vmatpush3.msk.msra.mxu0 %vm12541_vm15, %v13134_v45 }
0x1358   : > { %9104 = vmatprep.subr.mxu0 %v13128_v36 }
0x1359   : > { %9105 = vmatpush3.msk.msra.mxu0 %vm12555_vm1, %v13134_v45  ;;  %9083 = vmatpush3.bf16.msra.mxu1 %v9485_v5 }
0x135a   : > { %9109 = vmatprep.subr.mxu0 %v13128_v36  ;;  %9084 = vmatprep.subr.bf16.mxu1 %v13128_v36 }
0x135d   : > { %9085 = vmatpush3.bf16.msra.mxu1 %v9486_v11 }
0x135e   : > { %9128 = vmatprep.subr.mxu1 %v13128_v36 }
0x1360   : > { %9087 = vmatmul.mubr.msk.bf16.vlgmr.msra.gmra.mxu1 %vm13350_vm3, %v6727_v16 }
0x1361   : > { %9129 = vmatpush3.msk.msra.mxu1 %vm6190_vm0, %v13134_v45  ;;  %9132 = vmatprep.mubr.msk.f32.mxu1 %vm13305_vm4, %v13128_v36 }
0x1362   : > { %9130 = vmatprep.subr.mxu1 %v13128_v36 }
0x1363   : > { %9131 = vmatpush3.msk.msra.mxu1 %vm6189_vm13, %v13134_v45 }
0x1364   : > { %9135 = vmatprep.subr.mxu1 %v13128_v36 }
0x1408   : > { %v6641_v8 = vpop.f32.mrf.mxu1 }
0x1409   : > { %v6720_v28 = vpop.f32.mrf.mxu0 }
0x140a   : > { %v9056_v48 = vpop.f32.mrf.mxu1  ;;  %v6721_v58 = vadd.f32 %v6720_v28, %v6641_v8 }
0x140b   : > { %v9072_v57 = vpop.f32.mrf.mxu0 }
0x140c   : > { %v6644_v56 = vpop.f32.mrf.mxu1 }
0x140d   : > { %v6723_v3 = vpop.f32.mrf.mxu0 }
0x140e   : > { %v9057_v44 = vpop.f32.mrf.mxu1 }
0x140f   : > { %v9073_v53 = vpop.f32.mrf.mxu0 }
0x1420   : > { %v6801_v10 = vpop.f32.mrf.mxu1 }
0x1421   : > { %v12752_v55 = vadd.f32 %v6801_v10, %v6721_v58 }
0x1422   : > { %v9088_v13 = vpop.f32.mrf.mxu1 }
0x1423   : > { %v6809_v31 = vsel %vm6808_vm5, %v12752_v55, 0.0  ;;  %v6816_v35 = vmul.f32 %v12752_v55, %v12752_v55 }
0x1424   : > { %v6810_v37 = vrot.slane %v6809_v31, 4  ;;  %v6804_v33 = vpop.f32.mrf.mxu1 }
0x1425   : > { %v6817_v6 = vsel %vm6808_vm5, %v6816_v35, 0.0 }
0x1426   : > { %v6811_v15 = vadd.f32 %v6810_v37, %v6809_v31  ;;  %v9089_v2 = vpop.f32.mrf.mxu1  ;;  %v6818_v20 = vrot.slane %v6817_v6, 4 }
0x1428   : > { %v6812_v61 = vrot.slane %v6811_v15, 2  ;;  %v6819_v51 = vadd.f32 %v6818_v20, %v6817_v6 }
0x142a   : > { %v6813_v19 = vadd.f32 %v6812_v61, %v6811_v15  ;;  %v6820_v54 = vrot.slane %v6819_v51, 2 }
0x142c   : > { %v6814_v43 = vrot.slane %v6813_v19, 1  ;;  %v6821_v26 = vadd.f32 %v6820_v54, %v6819_v51 }
0x142e   : > { %v6815_v50 = vadd.f32 %v6814_v43, %v6813_v19  ;;  %v6822_v59 = vrot.slane %v6821_v26, 1 }
0x1430   : > { %9107 = vmatmul.mubr.msk.f32.vlgmr.msra.gmra.mxu0 %vm6824_vm6, %v6815_v50  ;;  %v6823_v4 = vadd.f32 %v6822_v59, %v6821_v26 }
0x1431   : > { %9110 = vmatpush3.msk.msra.mxu0 %vm12458_vm11, %v13134_v45  ;;  %9125 = vmatprep.mubr.msk.f32.mxu0 %vm13305_vm4, %v13128_v36 }
0x1432   : > { %9111 = vmatprep.subr.mxu0 %v13128_v36 }
0x1433   : > { %9112 = vmatpush3.msk.msra.mxu0 %vm12472_vm7, %v13134_v45 }
0x1434   : > { %9113 = vmatprep.subr.mxu0 %v13128_v36 }
0x1435   : > { %9114 = vmatpush3.msk.msra.mxu0 %vm12487_vm8, %v13134_v45 }
0x1436   : > { %9115 = vmatprep.subr.mxu0 %v13128_v36 }
0x1437   : > { %9116 = vmatpush3.msk.msra.mxu0 %vm12502_vm9, %v13134_v45 }
0x1438   : > { %9117 = vmatprep.subr.mxu0 %v13128_v36 }
0x1439   : > { %9118 = vmatpush3.msk.msra.mxu0 %vm12519_vm10, %v13134_v45 }
0x143a   : > { %9119 = vmatprep.subr.mxu0 %v13128_v36 }
0x143b   : > { %9120 = vmatpush3.msk.msra.mxu0 %vm12527_vm12, %v13134_v45 }
0x143c   : > { %9121 = vmatprep.subr.mxu0 %v13128_v36 }
0x143d   : > { %9122 = vmatpush3.msk.msra.mxu0 %vm12541_vm15, %v13134_v45 }
0x143e   : > { %9123 = vmatprep.subr.mxu0 %v13128_v36 }
0x143f   : > { %9124 = vmatpush3.msk.msra.mxu0 %vm12555_vm1, %v13134_v45 }
0x1440   : > { %9126 = vmatmul.mubr.msk.f32.vlgmr.msra.gmra.mxu0 %vm6824_vm6, %v6823_v4  ;;  %9142 = vmatprep.subr.mxu0 %v13128_v36 }
0x1441   : > { %9143 = vmatpush3.msk.msra.mxu0 %vm12458_vm11, %v13134_v45  ;;  %9158 = vmatprep.mubr.msk.f32.mxu0 %vm13305_vm4, %v13128_v36  ;;  %vm13351_vm11 = vcmask 130048  }
0x1442   : > { %9144 = vmatprep.subr.mxu0 %v13128_v36 }
0x1443   : > { %9145 = vmatpush3.msk.msra.mxu0 %vm12472_vm7, %v13134_v45  ;;  %vm13352_vm7 = vmmov %vm13351_vm11 }
0x1444   : > { %9146 = vmatprep.subr.mxu0 %v13128_v36 }
0x1445   : > { %9147 = vmatpush3.msk.msra.mxu0 %vm12487_vm8, %v13134_v45  ;;  %vm7295_vm8 = vcmask 73728  }
0x1446   : > { %9148 = vmatprep.subr.mxu0 %v13128_v36 }
0x1447   : > { %9149 = vmatpush3.msk.msra.mxu0 %vm12502_vm9, %v13134_v45 }
0x1448   : > { %9150 = vmatprep.subr.mxu0 %v13128_v36 }
0x1449   : > { %9151 = vmatpush3.msk.msra.mxu0 %vm12519_vm10, %v13134_v45 }
0x144a   : > { %9152 = vmatprep.subr.mxu0 %v13128_v36 }
0x144b   : > { %9153 = vmatpush3.msk.msra.mxu0 %vm12527_vm12, %v13134_v45 }
0x144c   : > { %9154 = vmatprep.subr.mxu0 %v13128_v36 }
0x144d   : > { %9155 = vmatpush3.msk.msra.mxu0 %vm12541_vm15, %v13134_v45 }
0x144e   : > { %9156 = vmatprep.subr.mxu0 %v13128_v36 }
0x144f   : > { %9157 = vmatpush3.msk.msra.mxu0 %vm12555_vm1, %v13134_v45 }
0x14f0   : > { %v6894_v40 = vpop.f32.mrf.mxu0 }
0x14f1   : > { %v6898_v30 = vmul.f32 0.0625, %v6894_v40 }
0x14f2   : > { %v9108_v52 = vpop.f32.mrf.mxu0 }
0x14f3   : > { %v6973_v9 = vmul.f32 %v6898_v30, %v6898_v30 }
0x1500   : > { %v6968_v62 = vpop.f32.mrf.mxu0 }
0x1501   : > { %v6972_v0 = vmul.f32 0.0625, %v6968_v62 }
0x1502   : > { %v9127_v63 = vpop.f32.mrf.mxu0 }
0x1503   : > { %v6974_v42 = vsub.f32 %v6972_v0, %v6973_v9 }
0x1505   : > { %v6975_v14 = vadd.f32 1e-05, %v6974_v42 }
0x1507   : > { %9499 = vrsqrt.f32 %v6975_v14 }
0x1514   : > { %v9500_v41 = vpop.eup %9499 }
0x1515   : > { %v6979_v60 = vmul.f32 %v9500_v41, %v6977_v12 }
0x1517   : > { %9133 = vmatmul.mubr.msk.f32.vlgmr.msra.gmra.mxu1 %vm13351_vm11, %v6979_v60  ;;  %v6980_v34 = vmul.f32 %v6979_v60, %v6898_v30 }
0x1518   : > { %9136 = vmatpush3.msk.msra.mxu1 %vm6190_vm0, %v13134_v45  ;;  %9139 = vmatprep.mubr.msk.f32.mxu1 %vm13305_vm4, %v13128_v36 }
0x1519   : > { %9137 = vmatprep.subr.mxu1 %v13128_v36  ;;  %v6981_v23 = vsub.f32 %v6978_v7, %v6980_v34 }
0x151a   : > { %9138 = vmatpush3.msk.msra.mxu1 %vm6189_vm13, %v13134_v45 }
0x151b   : > { %9140 = vmatmul.mubr.msk.f32.vlgmr.msra.gmra.mxu1 %vm13352_vm7, %v6981_v23  ;;  %9161 = vmatprep.subr.mxu1 %v13128_v36 }
0x151c   : > { %9165 = vmatprep.mubr.msk.f32.mxu1 %vm13305_vm4, %v13128_v36  ;;  %9162 = vmatpush3.msra.mxu1 %v7140_v1  ;;  %vm13353_vm4 = vmmov %vm13352_vm7 }
0x151d   : > { %9163 = vmatprep.subr.mxu1 %v13128_v36 }
0x15d7   : > { %v7051_v22 = vpop.f32.mrf.mxu1 }
0x15d8   : > { %v7131_v27 = vrot.slane %v7051_v22, %v13231_v39 }
0x15d9   : > { %v9134_v46 = vpop.f32.mrf.mxu1 }
0x15da   : > { %v7132_v21 = vmul.f32 %v7131_v27, %v12752_v55 }
0x15db   : > { %v7124_v47 = vpop.f32.mrf.mxu1 }
0x15dc   : > { %v7136_v24 = vrot.slane %v7124_v47, %v13231_v39  ;;  %v7139_v39 = vld [vmem:[%s12883_s10] sm:$0xff] }
0x15dd   : > { %v9141_v25 = vpop.f32.mrf.mxu1  ;;  %9164 = vmatpush3.msra.mxu1 %v7139_v39 }
0x15de   : > { %v7137_v29 = vadd.f32 %v7136_v24, %v7132_v21 }
0x15e0   : > { %v7138_v32 = vmax.f32 %v7137_v29, 0.0 }
0x15e2   : > { %v7141_v45 = vsel %vm6808_vm5, %v7138_v32, 0.0 }
0x15e3   : > { %v7142_v38 = vrot.slane %v7141_v45, 4 }
0x15e5   : > { %v7143_v17 = vadd.f32 %v7142_v38, %v7141_v45 }
0x15e7   : > { %v7144_v49 = vrot.slane %v7143_v17, 2 }
0x15e9   : > { %v7145_v18 = vadd.f32 %v7144_v49, %v7143_v17 }
0x15eb   : > { %v7146_v5 = vrot.slane %v7145_v18, 1 }
0x15ed   : > { %v7147_v11 = vadd.f32 %v7146_v5, %v7145_v18 }
0x15ef   : > { %9159 = vmatmul.mubr.msk.f32.vlgmr.msra.gmra.mxu0 %vm6824_vm6, %v7147_v11 }
0x16af   : > { %v7217_v16 = vpop.f32.mrf.mxu0 }
0x16b0   : > { %v7221_v8 = vmul.f32 0.0625, %v7217_v16 }
0x16b1   : > { %v9160_v28 = vpop.f32.mrf.mxu0 }
0x16b2   : > { %9166 = vmatmul.mubr.msk.f32.vlgmr.msra.gmra.mxu1 %vm13353_vm4, %v7221_v8 }
0x1772   : > { %v7291_v48 = vpop.f32.mrf.mxu1 }
0x1773   : > { %v7296_v57 = vsel %vm7295_vm8, %v7291_v48, -inf }
0x1774   : > { %7297 = vmax.xlane.f32.xlu0 %v7296_v57  ;;  %v9167_v56 = vpop.f32.mrf.mxu1 }
0x17fd   : > { %v7298_v3 = vpop.xlane.xlu0 %7297 }
0x17fe   : > { %v7299_v44 = vsub.f32 %v7291_v48, %v7298_v3 }
0x1800   : > { %v7300_v36 = vmul.f32 1.442695, %v7299_v44 }
0x1802   : > { %9501 = vpow2.f32 %v7300_v36 }
0x180f   : > { %v9502_v53 = vpop.eup %9501 }
0x1810   : > { %v7302_v58 = vsel %vm7295_vm8, %v9502_v53, 0.0 }
0x1811   : > { %7303 = vadd.xlane.f32.xlu0 %v7302_v58 }
0x189a   : > { %v7304_v10 = vpop.xlane.xlu0 %7303 }
0x189b   : > { %9503 = vlog2.f32 %v7304_v10 }
0x18a8   : > { %v9504_v55 = vpop.eup %9503 }
0x18a9   : > { %v7306_v13 = vmul.f32 0.6931472, %v9504_v55 }
0x18ab   : > { %v7307_v31 = vsub.f32 %v7299_v44, %v7306_v13 }
0x18ad   : > { %7308 = vst.msk [vmem:[%s382_s26] sm:$0x1] %vm7295_vm8, %v7307_v31 }
0x18ae PF: > { %s21_s17 = sadd.s32 1, %s9511_s17  }
0x18af   : > { %p18_p4 = scmp.ge.s32.totalorder %s21_s17, 6  }
0x18b1   :  { %20 = sbr.rel (!%p18_p4) target bundleno = 1 (0x1), region = 108 }

</bundles_post_ra>
